<compile_context>
chip_gen: v5e
topology: v5e:2x2
jax: 0.10.0
libtpu: 0.0.40
codegen_flags: <defaults>
</compile_context>

<pallas_src>
import math
import functools

import jax
import jax.numpy as jnp
import numpy as np
from jax.experimental import pallas as pl
from jax.experimental.pallas import tpu as pltpu


# ----------------------------- model dimensions ------------------------------
IN_CHANNELS = 16
MODEL_CHANNELS = 64
OUT_CHANNELS = 32
Z_CHANNELS = 24
NUM_RES_BLOCKS = 2
FREQ_EMB = 256          # timestep frequency embedding size (half = 128 lanes)
LN_EPS = 1e-6

BATCH_TILE = 256        # default rows per grid step; sweep per generation


# --------------------------------- helpers -----------------------------------
def _silu(x):
    return x * jax.nn.sigmoid(x)


def _layernorm(h, w=None, b=None, eps=LN_EPS):
    mu = jnp.mean(h, axis=-1, keepdims=True)
    var = jnp.mean((h - mu) ** 2, axis=-1, keepdims=True)
    hn = (h - mu) * jax.lax.rsqrt(var + eps)
    if w is not None:
        hn = hn * w + b
    return hn


def timestep_embedding(t, dim=FREQ_EMB, max_period=10000):
    """Sinusoidal embedding (reference-side only; kernel builds it inline)."""
    half = dim // 2
    freqs = jnp.exp(
        -math.log(max_period) * jnp.arange(half, dtype=jnp.float32) / half
    )
    args = t[:, None].astype(jnp.float32) * freqs[None, :]
    return jnp.concatenate([jnp.cos(args), jnp.sin(args)], axis=-1)


# --------------------------------- kernel ------------------------------------
def simple_mlp_adaln_kernel(
    # batch-tiled inputs
    xc_ref, t_ref,
    # frequency table for the in-kernel sinusoidal embedding
    freqs_ref,
    # fused input_proj + cond_embed (block-structured), and its fused bias
    xcW_ref, xcB_ref,
    # time_embed.mlp[0] split into cos / sin halves, then mlp[2]
    tW1c_ref, tW1s_ref, tB1_ref, tW2_ref, tB2_ref,
    # res blocks (stacked along leading axis R)
    lnW_ref, lnB_ref, rW1_ref, rB1_ref, rW2_ref, rB2_ref,
    # compact fused adaLN heads (all res blocks + final layer), 64-wide chunks
    adaW_ref, adaB_ref,
    # final linear (true OUT_CHANNELS columns)
    flW_ref, flB_ref,
    # output (true OUT_CHANNELS width)
    out_ref,
    *, num_res_blocks, model_channels,
):
    f32 = jnp.float32
    bf16 = jnp.bfloat16
    C = model_channels

    def mm(a, w):
        # bf16 MXU inputs (weights arrive pre-cast to bf16), f32 accumulate.
        return jnp.dot(a.astype(bf16), w, preferred_element_type=f32)

    def half(v, hi):
        # Extract a 64-wide half of a 128-lane slab. The high half is brought
        # to lane 0 with an XLU rotate so the slice itself is lane-aligned.
        if hi:
            v = pltpu.roll(v, shift=C, axis=1)
        return v[:, :C]

    # Fused input_proj + cond_embed: one (40, 128) matmul; cols 0:64 -> x,
    # cols 64:128 -> cond_embed(c). Biases fused the same way.
    xcp = mm(xc_ref[...], xcW_ref[...]) + xcB_ref[...]    # (bt, 2C)
    x = half(xcp, False)                                   # input_proj(x)
    c_emb = half(xcp, True)                                # cond_embed(c)

    # t = time_embed(t): sinusoidal embedding built in-kernel (VPU mul + EUP).
    args = t_ref[...] * freqs_ref[...]                     # (bt,1)*(1,128)->(bt,128)
    t_h = (mm(jnp.cos(args), tW1c_ref[...])
           + mm(jnp.sin(args), tW1s_ref[...])) + tB1_ref[...]
    t_h = _silu(t_h)
    t_h = mm(t_h, tW2_ref[...]) + tB2_ref[...]

    # y = t + cond_embed(c); SiLU(y) is shared by every adaLN head.
    y = t_h + c_emb
    sy = _silu(y)

    # One compact MXU pass for all adaLN heads: (bt, 64) @ (64, (3R+2)*64).
    ada = mm(sy, adaW_ref[...]) + adaB_ref[...]

    def chunk(j):
        # chunk j of width C; pairs of chunks share a 128-lane slot.
        s = (j // 2) * 2 * C
        return half(ada[:, s:s + 2 * C], j % 2 == 1)

    # res blocks
    for r in range(num_res_blocks):
        shift = chunk(3 * r)
        scale = chunk(3 * r + 1)
        gate = chunk(3 * r + 2)

        h = _layernorm(x, lnW_ref[r], lnB_ref[r])          # in_ln (affine)
        h = h * (1.0 + scale) + shift                      # modulate
        h = mm(h, rW1_ref[r]) + rB1_ref[r]
        h = _silu(h)
        h = mm(h, rW2_ref[r]) + rB2_ref[r]
        x = x + gate * h

    # final layer
    shift = chunk(3 * num_res_blocks)
    scale = chunk(3 * num_res_blocks + 1)
    h = _layernorm(x)                                      # norm_final (no affine)
    h = h * (1.0 + scale) + shift
    out = mm(h, flW_ref[...]) + flB_ref[...]               # (bt, OUT_CHANNELS)
    out_ref[...] = out.astype(out_ref.dtype)


# ------------------------------ param packing ---------------------------------
def prepare_params(params):
    """One-time conversion of natural (PyTorch-layout, f32) params into the
    fused / compact / bf16 layout consumed by the kernel.  Call ONCE at init
    and reuse the result -- this is intentionally out of the forward path."""
    C, R = MODEL_CHANNELS, NUM_RES_BLOCKS
    bf16 = jnp.bfloat16
    half = FREQ_EMB // 2

    freqs = jnp.exp(
        -math.log(10000.0) * jnp.arange(half, dtype=jnp.float32) / half
    )[None, :]                                             # (1, 128)

    tW1 = params["tW1"]                                    # (FREQ_EMB, C)
    tW1c, tW1s = tW1[:half], tW1[half:]

    # Fused input_proj + cond_embed: block-structured (IN+Z, 2C) weight so a
    # single matmul on the concatenated [x | c] stream yields both projections.
    XC = IN_CHANNELS + Z_CHANNELS
    xcW = jnp.zeros((XC, 2 * C), jnp.float32)
    xcW = xcW.at[:IN_CHANNELS, :C].set(params["inW"])
    xcW = xcW.at[IN_CHANNELS:, C:].set(params["cW"])
    xcB = jnp.concatenate([params["inB"], params["cB"]], axis=1)   # (1, 2C)

    # Compact fused adaLN head: dense concat of every head's columns
    # (block0 shift|scale|gate, block1 ..., final shift|scale) -> (C, (3R+2)C).
    adaW = jnp.concatenate(
        [params["aW"][r] for r in range(R)] + [params["fW"]], axis=1)
    adaB = jnp.concatenate(
        [params["aB"][r] for r in range(R)] + [params["fB"]], axis=1)
    n_chunks = adaW.shape[1] // C
    if n_chunks % 2:   # keep chunk-pairs 128-lane aligned
        adaW = jnp.pad(adaW, ((0, 0), (0, C)))
        adaB = jnp.pad(adaB, ((0, 0), (0, C)))

    return (
        freqs,
        xcW.astype(bf16), xcB,
        tW1c.astype(bf16), tW1s.astype(bf16), params["tB1"],
        params["tW2"].astype(bf16), params["tB2"],
        params["lnW"], params["lnB"],
        params["rW1"].astype(bf16), params["rB1"],
        params["rW2"].astype(bf16), params["rB2"],
        adaW.astype(bf16), adaB,
        params["flW"].astype(bf16), params["flB"],
    )


# --------------------------------- wrapper -----------------------------------
@functools.partial(jax.jit, static_argnames=("batch_tile",))
def simple_mlp_adaln(x, t, c, prep, batch_tile=BATCH_TILE):
    """Forward pass. `prep` is the output of prepare_params (computed once).

    batch_tile notes:
      * v7x: 2 TensorCores share the "parallel" grid axis -> keep >= 2 (ideally
        4+) grid steps per core; re-check VMEM (64 MiB) before bt >= 4096.
      * v6e/v5e: single TC; pick the largest bt that still yields ~4-8 steps.
      * If N % bt != 0 the last block reads past the end (rows computed on
        garbage, dropped on store) -- fine for this purely row-wise kernel.
    """
    N = x.shape[0]
    bt = min(batch_tile, N)
    assert bt == N or bt % 16 == 0, "batch tile must be a multiple of 16 rows"

    # One combined bf16 [x | c] stream (halves input HBM bytes, 1 DMA not 2);
    # t stays f32 so the sinusoidal embedding keeps full precision.
    xc = jnp.concatenate([x, c], axis=1).astype(jnp.bfloat16)
    t2 = t.reshape(N, 1).astype(jnp.float32)

    def full_spec(a):
        zeros = (0,) * a.ndim
        return pl.BlockSpec(a.shape, lambda i, _z=zeros: _z)

    in_specs = [
        pl.BlockSpec((bt, xc.shape[1]), lambda i: (i, 0)),
        pl.BlockSpec((bt, 1), lambda i: (i, 0)),
    ] + [full_spec(p) for p in prep]

    kernel = functools.partial(
        simple_mlp_adaln_kernel,
        num_res_blocks=NUM_RES_BLOCKS,
        model_channels=MODEL_CHANNELS,
    )

    return pl.pallas_call(
        kernel,
        out_shape=jax.ShapeDtypeStruct((N, OUT_CHANNELS), jnp.float32),
        grid=(pl.cdiv(N, bt),),
        in_specs=in_specs,
        out_specs=pl.BlockSpec((bt, OUT_CHANNELS), lambda i: (i, 0)),
        compiler_params=pltpu.CompilerParams(
            dimension_semantics=("parallel",)),
    )(xc, t2, *prep)


# ----------------------------- reference (pure JAX) ---------------------------
def simple_mlp_adaln_ref(x, t, c, params, mxu_dtype=jnp.float32):
    """Pure-JAX reference. mxu_dtype=bfloat16 mirrors the kernel's bf16 MXU
    inputs (f32 accumulate) for a tight-tolerance comparison."""
    C = MODEL_CHANNELS

    def mm(a, w):
        return jnp.dot(a.astype(mxu_dtype), w.astype(mxu_dtype),
                       preferred_element_type=jnp.float32)

    tf = timestep_embedding(t)
    x = mm(x, params["inW"]) + params["inB"]
    th = _silu(mm(tf, params["tW1"]) + params["tB1"])
    th = mm(th, params["tW2"]) + params["tB2"]
    y = th + mm(c, params["cW"]) + params["cB"]
    sy = _silu(y)
    for r in range(NUM_RES_BLOCKS):
        ada = mm(sy, params["aW"][r]) + params["aB"][r]
        shift, scale, gate = ada[:, :C], ada[:, C:2 * C], ada[:, 2 * C:]
        h = _layernorm(x, params["lnW"][r], params["lnB"][r])
        h = h * (1.0 + scale) + shift
        h = _silu(mm(h, params["rW1"][r]) + params["rB1"][r])
        h = mm(h, params["rW2"][r]) + params["rB2"][r]
        x = x + gate * h
    ada = mm(sy, params["fW"]) + params["fB"]
    shift, scale = ada[:, :C], ada[:, C:]
    h = _layernorm(x) * (1.0 + scale) + shift
    return mm(h, params["flW"]) + params["flB"]


# ------------------------------- param init ----------------------------------
def init_params(key):
    """Deterministic synthetic weights (shapes from SimpleMLPAdaLN.__init__).

    Note: the PyTorch init zeroes adaLN/final weights (output would be all
    zeros); here we use small random values so the kernel is exercised
    non-trivially. Weights are stored as [in, out]; biases as [1, out]
    (or [R, 1, out] for stacked res-block params).
    """
    C, R = MODEL_CHANNELS, NUM_RES_BLOCKS
    ks = jax.random.split(key, 16)

    def w(k, shape, scale=0.05):
        return (scale * jax.random.normal(k, shape)).astype(jnp.float32)

    return {
        "inW": w(ks[0], (IN_CHANNELS, C)),
        "inB": w(ks[1], (1, C)),
        "tW1": w(ks[2], (FREQ_EMB, C), 0.02),
        "tB1": jnp.zeros((1, C), jnp.float32),
        "tW2": w(ks[3], (C, C), 0.02),
        "tB2": jnp.zeros((1, C), jnp.float32),
        "cW": w(ks[4], (Z_CHANNELS, C)),
        "cB": w(ks[5], (1, C)),
        "lnW": jnp.ones((R, 1, C), jnp.float32),
        "lnB": jnp.zeros((R, 1, C), jnp.float32),
        "rW1": w(ks[6], (R, C, C)),
        "rB1": w(ks[7], (R, 1, C)),
        "rW2": w(ks[8], (R, C, C)),
        "rB2": w(ks[9], (R, 1, C)),
        "aW": w(ks[10], (R, C, 3 * C)),
        "aB": w(ks[11], (R, 1, 3 * C)),
        "fW": w(ks[12], (C, 2 * C)),
        "fB": w(ks[13], (1, 2 * C)),
        "flW": w(ks[14], (C, OUT_CHANNELS)),
        "flB": w(ks[15], (1, OUT_CHANNELS)),
    }


# ----------------------------------- main -------------------------------------
if __name__ == "__main__":
    key = jax.random.PRNGKey(0)
    kx, kt, kc, kp = jax.random.split(key, 4)

    N = 512   # small smoke-test batch; bt=128 -> 4 grid steps (>=2 per v7x TC)
    x = jax.random.normal(kx, (N, IN_CHANNELS), dtype=jnp.float32)
    t = jax.random.uniform(kt, (N,), dtype=jnp.float32)   # flow-matching t in [0,1)
    c = jax.random.normal(kc, (N, Z_CHANNELS), dtype=jnp.float32)

    params = init_params(kp)
    prep = prepare_params(params)    # hoisted out of the forward path (run once)

    out = jax.block_until_ready(simple_mlp_adaln(x, t, c, prep, batch_tile=128))

    # Tight check vs a reference using the same bf16 MXU inputs / f32 accumulate.
    ref_bf16 = jax.block_until_ready(
        simple_mlp_adaln_ref(x, t, c, params, mxu_dtype=jnp.bfloat16))
    np.testing.assert_allclose(np.asarray(out), np.asarray(ref_bf16),
                               rtol=5e-3, atol=5e-3)

    # Loose check vs the full-f32 reference (bounds the bf16-input approximation).
    ref_f32 = jax.block_until_ready(simple_mlp_adaln_ref(x, t, c, params))
    np.testing.assert_allclose(np.asarray(out), np.asarray(ref_f32),
                               rtol=5e-2, atol=5e-2)

    print("KERNEL_OK")
</pallas_src>

<mosaic_0001>
module attributes {stable_mosaic.version = 11 : i64} {
  func.func @simple_mlp_adaln_kernel(%arg0: i32, %arg1: memref<128x40xbf16, #tpu.memory_space<vmem>>, %arg2: memref<128x1xf32, #tpu.memory_space<vmem>>, %arg3: memref<1x128xf32, #tpu.memory_space<vmem>>, %arg4: memref<40x128xbf16, #tpu.memory_space<vmem>>, %arg5: memref<1x128xf32, #tpu.memory_space<vmem>>, %arg6: memref<128x64xbf16, #tpu.memory_space<vmem>>, %arg7: memref<128x64xbf16, #tpu.memory_space<vmem>>, %arg8: memref<1x64xf32, #tpu.memory_space<vmem>>, %arg9: memref<64x64xbf16, #tpu.memory_space<vmem>>, %arg10: memref<1x64xf32, #tpu.memory_space<vmem>>, %arg11: memref<2x1x64xf32, #tpu.memory_space<vmem>>, %arg12: memref<2x1x64xf32, #tpu.memory_space<vmem>>, %arg13: memref<2x64x64xbf16, #tpu.memory_space<vmem>>, %arg14: memref<2x1x64xf32, #tpu.memory_space<vmem>>, %arg15: memref<2x64x64xbf16, #tpu.memory_space<vmem>>, %arg16: memref<2x1x64xf32, #tpu.memory_space<vmem>>, %arg17: memref<64x512xbf16, #tpu.memory_space<vmem>>, %arg18: memref<1x512xf32, #tpu.memory_space<vmem>>, %arg19: memref<64x32xbf16, #tpu.memory_space<vmem>>, %arg20: memref<1x32xf32, #tpu.memory_space<vmem>>, %arg21: memref<128x32xf32, #tpu.memory_space<vmem>>) attributes {dimension_semantics = [#tpu.dimension_semantics<parallel>], iteration_bounds = array<i64: 4>, scalar_prefetch = 0 : i64, scratch_operands = 0 : i64, tpu.core_type = #tpu.core_type<tc>, window_params = [{transform_indices = @transform_0, window_bounds = array<i64: 128, 40>}, {transform_indices = @transform_1, window_bounds = array<i64: 128, 1>}, {pipeline_mode = #tpu.pipeline_mode<synchronous>, transform_indices = @transform_2, window_bounds = array<i64: 1, 128>}, {pipeline_mode = #tpu.pipeline_mode<synchronous>, transform_indices = @transform_3, window_bounds = array<i64: 40, 128>}, {pipeline_mode = #tpu.pipeline_mode<synchronous>, transform_indices = @transform_4, window_bounds = array<i64: 1, 128>}, {pipeline_mode = #tpu.pipeline_mode<synchronous>, transform_indices = @transform_5, window_bounds = array<i64: 128, 64>}, {pipeline_mode = #tpu.pipeline_mode<synchronous>, transform_indices = @transform_6, window_bounds = array<i64: 128, 64>}, {pipeline_mode = #tpu.pipeline_mode<synchronous>, transform_indices = @transform_7, window_bounds = array<i64: 1, 64>}, {pipeline_mode = #tpu.pipeline_mode<synchronous>, transform_indices = @transform_8, window_bounds = array<i64: 64, 64>}, {pipeline_mode = #tpu.pipeline_mode<synchronous>, transform_indices = @transform_9, window_bounds = array<i64: 1, 64>}, {pipeline_mode = #tpu.pipeline_mode<synchronous>, transform_indices = @transform_10, window_bounds = array<i64: 2, 1, 64>}, {pipeline_mode = #tpu.pipeline_mode<synchronous>, transform_indices = @transform_11, window_bounds = array<i64: 2, 1, 64>}, {pipeline_mode = #tpu.pipeline_mode<synchronous>, transform_indices = @transform_12, window_bounds = array<i64: 2, 64, 64>}, {pipeline_mode = #tpu.pipeline_mode<synchronous>, transform_indices = @transform_13, window_bounds = array<i64: 2, 1, 64>}, {pipeline_mode = #tpu.pipeline_mode<synchronous>, transform_indices = @transform_14, window_bounds = array<i64: 2, 64, 64>}, {pipeline_mode = #tpu.pipeline_mode<synchronous>, transform_indices = @transform_15, window_bounds = array<i64: 2, 1, 64>}, {pipeline_mode = #tpu.pipeline_mode<synchronous>, transform_indices = @transform_16, window_bounds = array<i64: 64, 512>}, {pipeline_mode = #tpu.pipeline_mode<synchronous>, transform_indices = @transform_17, window_bounds = array<i64: 1, 512>}, {pipeline_mode = #tpu.pipeline_mode<synchronous>, transform_indices = @transform_18, window_bounds = array<i64: 64, 32>}, {pipeline_mode = #tpu.pipeline_mode<synchronous>, transform_indices = @transform_19, window_bounds = array<i64: 1, 32>}, {transform_indices = @transform_20, window_bounds = array<i64: 128, 32>}]} {
    %c0 = arith.constant 0 : index
    %c0_0 = arith.constant 0 : index
    %0 = vector.load %arg1[%c0, %c0_0] : memref<128x40xbf16, #tpu.memory_space<vmem>>, vector<128x40xbf16>
    %c0_1 = arith.constant 0 : index
    %c0_2 = arith.constant 0 : index
    %1 = vector.load %arg4[%c0_1, %c0_2] : memref<40x128xbf16, #tpu.memory_space<vmem>>, vector<40x128xbf16>
    %cst = arith.constant dense<0.000000e+00> : vector<128x128xf32>
    %2 = tpu.matmul %0, %1, %cst {dimension_numbers = #tpu.dot_dimension_numbers<[1], [0], [0], [1], [0, 0, 1, 1], [], []>} : vector<128x40xbf16>, vector<40x128xbf16>, vector<128x128xf32> -> vector<128x128xf32>
    %c0_3 = arith.constant 0 : index
    %c0_4 = arith.constant 0 : index
    %3 = vector.load %arg5[%c0_3, %c0_4] : memref<1x128xf32, #tpu.memory_space<vmem>>, vector<1x128xf32>
    %4 = vector.broadcast %3 : vector<1x128xf32> to vector<128x128xf32>
    %5 = arith.addf %2, %4 : vector<128x128xf32>
    %6 = vector.extract_strided_slice %5 {offsets = [0, 0], sizes = [128, 64], strides = [1, 1]} : vector<128x128xf32> to vector<128x64xf32>
    %c64_i32 = arith.constant 64 : i32
    %7 = tpu.dynamic_rotate %5 by %c64_i32 dim 1 : vector<128x128xf32>, i32 -> vector<128x128xf32>
    %8 = vector.extract_strided_slice %7 {offsets = [0, 0], sizes = [128, 64], strides = [1, 1]} : vector<128x128xf32> to vector<128x64xf32>
    %c0_5 = arith.constant 0 : index
    %c0_6 = arith.constant 0 : index
    %9 = vector.load %arg2[%c0_5, %c0_6] : memref<128x1xf32, #tpu.memory_space<vmem>>, vector<128x1xf32>
    %c0_7 = arith.constant 0 : index
    %c0_8 = arith.constant 0 : index
    %10 = vector.load %arg3[%c0_7, %c0_8] : memref<1x128xf32, #tpu.memory_space<vmem>>, vector<1x128xf32>
    %11 = vector.broadcast %9 : vector<128x1xf32> to vector<128x128xf32>
    %12 = vector.broadcast %10 : vector<1x128xf32> to vector<128x128xf32>
    %13 = arith.mulf %11, %12 : vector<128x128xf32>
    %14 = math.cos %13 : vector<128x128xf32>
    %c0_9 = arith.constant 0 : index
    %c0_10 = arith.constant 0 : index
    %15 = vector.load %arg6[%c0_9, %c0_10] : memref<128x64xbf16, #tpu.memory_space<vmem>>, vector<128x64xbf16>
    %16 = arith.truncf %14 : vector<128x128xf32> to vector<128x128xbf16>
    %cst_11 = arith.constant dense<0.000000e+00> : vector<128x64xf32>
    %17 = tpu.matmul %16, %15, %cst_11 {dimension_numbers = #tpu.dot_dimension_numbers<[1], [0], [0], [1], [0, 0, 1, 1], [], []>} : vector<128x128xbf16>, vector<128x64xbf16>, vector<128x64xf32> -> vector<128x64xf32>
    %18 = math.sin %13 : vector<128x128xf32>
    %c0_12 = arith.constant 0 : index
    %c0_13 = arith.constant 0 : index
    %19 = vector.load %arg7[%c0_12, %c0_13] : memref<128x64xbf16, #tpu.memory_space<vmem>>, vector<128x64xbf16>
    %20 = arith.truncf %18 : vector<128x128xf32> to vector<128x128xbf16>
    %cst_14 = arith.constant dense<0.000000e+00> : vector<128x64xf32>
    %21 = tpu.matmul %20, %19, %cst_14 {dimension_numbers = #tpu.dot_dimension_numbers<[1], [0], [0], [1], [0, 0, 1, 1], [], []>} : vector<128x128xbf16>, vector<128x64xbf16>, vector<128x64xf32> -> vector<128x64xf32>
    %22 = arith.addf %17, %21 : vector<128x64xf32>
    %c0_15 = arith.constant 0 : index
    %c0_16 = arith.constant 0 : index
    %23 = vector.load %arg8[%c0_15, %c0_16] : memref<1x64xf32, #tpu.memory_space<vmem>>, vector<1x64xf32>
    %24 = vector.broadcast %23 : vector<1x64xf32> to vector<128x64xf32>
    %25 = arith.addf %22, %24 : vector<128x64xf32>
    %26 = arith.negf %25 : vector<128x64xf32>
    %27 = math.exp %26 : vector<128x64xf32>
    %cst_17 = arith.constant 1.000000e+00 : f32
    %28 = vector.broadcast %cst_17 : f32 to vector<128x64xf32>
    %29 = arith.addf %28, %27 : vector<128x64xf32>
    %30 = arith.divf %28, %29 : vector<128x64xf32>
    %31 = arith.mulf %25, %30 : vector<128x64xf32>
    %c0_18 = arith.constant 0 : index
    %c0_19 = arith.constant 0 : index
    %32 = vector.load %arg9[%c0_18, %c0_19] : memref<64x64xbf16, #tpu.memory_space<vmem>>, vector<64x64xbf16>
    %33 = arith.truncf %31 : vector<128x64xf32> to vector<128x64xbf16>
    %cst_20 = arith.constant dense<0.000000e+00> : vector<128x64xf32>
    %34 = tpu.matmul %33, %32, %cst_20 {dimension_numbers = #tpu.dot_dimension_numbers<[1], [0], [0], [1], [0, 0, 1, 1], [], []>} : vector<128x64xbf16>, vector<64x64xbf16>, vector<128x64xf32> -> vector<128x64xf32>
    %c0_21 = arith.constant 0 : index
    %c0_22 = arith.constant 0 : index
    %35 = vector.load %arg10[%c0_21, %c0_22] : memref<1x64xf32, #tpu.memory_space<vmem>>, vector<1x64xf32>
    %36 = vector.broadcast %35 : vector<1x64xf32> to vector<128x64xf32>
    %37 = arith.addf %34, %36 : vector<128x64xf32>
    %38 = arith.addf %37, %8 : vector<128x64xf32>
    %39 = arith.negf %38 : vector<128x64xf32>
    %40 = math.exp %39 : vector<128x64xf32>
    %cst_23 = arith.constant 1.000000e+00 : f32
    %41 = vector.broadcast %cst_23 : f32 to vector<128x64xf32>
    %42 = arith.addf %41, %40 : vector<128x64xf32>
    %43 = arith.divf %41, %42 : vector<128x64xf32>
    %44 = arith.mulf %38, %43 : vector<128x64xf32>
    %c0_24 = arith.constant 0 : index
    %c0_25 = arith.constant 0 : index
    %45 = vector.load %arg17[%c0_24, %c0_25] : memref<64x512xbf16, #tpu.memory_space<vmem>>, vector<64x512xbf16>
    %46 = arith.truncf %44 : vector<128x64xf32> to vector<128x64xbf16>
    %cst_26 = arith.constant dense<0.000000e+00> : vector<128x512xf32>
    %47 = tpu.matmul %46, %45, %cst_26 {dimension_numbers = #tpu.dot_dimension_numbers<[1], [0], [0], [1], [0, 0, 1, 1], [], []>} : vector<128x64xbf16>, vector<64x512xbf16>, vector<128x512xf32> -> vector<128x512xf32>
    %c0_27 = arith.constant 0 : index
    %c0_28 = arith.constant 0 : index
    %48 = vector.load %arg18[%c0_27, %c0_28] : memref<1x512xf32, #tpu.memory_space<vmem>>, vector<1x512xf32>
    %49 = vector.broadcast %48 : vector<1x512xf32> to vector<128x512xf32>
    %50 = arith.addf %47, %49 : vector<128x512xf32>
    %51 = vector.extract_strided_slice %50 {offsets = [0, 0], sizes = [128, 128], strides = [1, 1]} : vector<128x512xf32> to vector<128x128xf32>
    %52 = vector.extract_strided_slice %51 {offsets = [0, 0], sizes = [128, 64], strides = [1, 1]} : vector<128x128xf32> to vector<128x64xf32>
    %53 = vector.extract_strided_slice %50 {offsets = [0, 0], sizes = [128, 128], strides = [1, 1]} : vector<128x512xf32> to vector<128x128xf32>
    %c64_i32_29 = arith.constant 64 : i32
    %54 = tpu.dynamic_rotate %53 by %c64_i32_29 dim 1 : vector<128x128xf32>, i32 -> vector<128x128xf32>
    %55 = vector.extract_strided_slice %54 {offsets = [0, 0], sizes = [128, 64], strides = [1, 1]} : vector<128x128xf32> to vector<128x64xf32>
    %56 = vector.extract_strided_slice %50 {offsets = [0, 128], sizes = [128, 128], strides = [1, 1]} : vector<128x512xf32> to vector<128x128xf32>
    %57 = vector.extract_strided_slice %56 {offsets = [0, 0], sizes = [128, 64], strides = [1, 1]} : vector<128x128xf32> to vector<128x64xf32>
    %c0_30 = arith.constant 0 : index
    %c0_31 = arith.constant 0 : index
    %c0_32 = arith.constant 0 : index
    %58 = vector.load %arg11[%c0_30, %c0_31, %c0_32] : memref<2x1x64xf32, #tpu.memory_space<vmem>>, vector<1x1x64xf32>
    %59 = vector.shape_cast %58 : vector<1x1x64xf32> to vector<1x64xf32>
    %c0_33 = arith.constant 0 : index
    %c0_34 = arith.constant 0 : index
    %c0_35 = arith.constant 0 : index
    %60 = vector.load %arg12[%c0_33, %c0_34, %c0_35] : memref<2x1x64xf32, #tpu.memory_space<vmem>>, vector<1x1x64xf32>
    %61 = vector.shape_cast %60 : vector<1x1x64xf32> to vector<1x64xf32>
    %cst_36 = arith.constant dense<0.000000e+00> : vector<128xf32>
    %62 = vector.multi_reduction <add>, %6, %cst_36 [1] : vector<128x64xf32> to vector<128xf32>
    %63 = vector.shape_cast %62 : vector<128xf32> to vector<128x1xf32>
    %cst_37 = arith.constant 6.400000e+01 : f32
    %64 = vector.broadcast %cst_37 : f32 to vector<128x1xf32>
    %65 = arith.divf %63, %64 : vector<128x1xf32>
    %66 = vector.broadcast %65 : vector<128x1xf32> to vector<128x64xf32>
    %67 = arith.subf %6, %66 : vector<128x64xf32>
    %68 = arith.mulf %67, %67 : vector<128x64xf32>
    %cst_38 = arith.constant dense<0.000000e+00> : vector<128xf32>
    %69 = vector.multi_reduction <add>, %68, %cst_38 [1] : vector<128x64xf32> to vector<128xf32>
    %70 = vector.shape_cast %69 : vector<128xf32> to vector<128x1xf32>
    %cst_39 = arith.constant 6.400000e+01 : f32
    %71 = vector.broadcast %cst_39 : f32 to vector<128x1xf32>
    %72 = arith.divf %70, %71 : vector<128x1xf32>
    %73 = vector.broadcast %65 : vector<128x1xf32> to vector<128x64xf32>
    %74 = arith.subf %6, %73 : vector<128x64xf32>
    %cst_40 = arith.constant 9.99999997E-7 : f32
    %75 = vector.broadcast %cst_40 : f32 to vector<128x1xf32>
    %76 = arith.addf %72, %75 : vector<128x1xf32>
    %77 = math.rsqrt %76 : vector<128x1xf32>
    %78 = vector.broadcast %77 : vector<128x1xf32> to vector<128x64xf32>
    %79 = arith.mulf %74, %78 : vector<128x64xf32>
    %80 = vector.broadcast %59 : vector<1x64xf32> to vector<128x64xf32>
    %81 = arith.mulf %79, %80 : vector<128x64xf32>
    %82 = vector.broadcast %61 : vector<1x64xf32> to vector<128x64xf32>
    %83 = arith.addf %81, %82 : vector<128x64xf32>
    %cst_41 = arith.constant 1.000000e+00 : f32
    %84 = vector.broadcast %cst_41 : f32 to vector<128x64xf32>
    %85 = arith.addf %84, %55 : vector<128x64xf32>
    %86 = arith.mulf %83, %85 : vector<128x64xf32>
    %87 = arith.addf %86, %52 : vector<128x64xf32>
    %c0_42 = arith.constant 0 : index
    %c0_43 = arith.constant 0 : index
    %c0_44 = arith.constant 0 : index
    %88 = vector.load %arg13[%c0_42, %c0_43, %c0_44] : memref<2x64x64xbf16, #tpu.memory_space<vmem>>, vector<1x64x64xbf16>
    %89 = vector.shape_cast %88 : vector<1x64x64xbf16> to vector<64x64xbf16>
    %90 = arith.truncf %87 : vector<128x64xf32> to vector<128x64xbf16>
    %cst_45 = arith.constant dense<0.000000e+00> : vector<128x64xf32>
    %91 = tpu.matmul %90, %89, %cst_45 {dimension_numbers = #tpu.dot_dimension_numbers<[1], [0], [0], [1], [0, 0, 1, 1], [], []>} : vector<128x64xbf16>, vector<64x64xbf16>, vector<128x64xf32> -> vector<128x64xf32>
    %c0_46 = arith.constant 0 : index
    %c0_47 = arith.constant 0 : index
    %c0_48 = arith.constant 0 : index
    %92 = vector.load %arg14[%c0_46, %c0_47, %c0_48] : memref<2x1x64xf32, #tpu.memory_space<vmem>>, vector<1x1x64xf32>
    %93 = vector.shape_cast %92 : vector<1x1x64xf32> to vector<1x64xf32>
    %94 = vector.broadcast %93 : vector<1x64xf32> to vector<128x64xf32>
    %95 = arith.addf %91, %94 : vector<128x64xf32>
    %96 = arith.negf %95 : vector<128x64xf32>
    %97 = math.exp %96 : vector<128x64xf32>
    %cst_49 = arith.constant 1.000000e+00 : f32
    %98 = vector.broadcast %cst_49 : f32 to vector<128x64xf32>
    %99 = arith.addf %98, %97 : vector<128x64xf32>
    %100 = arith.divf %98, %99 : vector<128x64xf32>
    %101 = arith.mulf %95, %100 : vector<128x64xf32>
    %c0_50 = arith.constant 0 : index
    %c0_51 = arith.constant 0 : index
    %c0_52 = arith.constant 0 : index
    %102 = vector.load %arg15[%c0_50, %c0_51, %c0_52] : memref<2x64x64xbf16, #tpu.memory_space<vmem>>, vector<1x64x64xbf16>
    %103 = vector.shape_cast %102 : vector<1x64x64xbf16> to vector<64x64xbf16>
    %104 = arith.truncf %101 : vector<128x64xf32> to vector<128x64xbf16>
    %cst_53 = arith.constant dense<0.000000e+00> : vector<128x64xf32>
    %105 = tpu.matmul %104, %103, %cst_53 {dimension_numbers = #tpu.dot_dimension_numbers<[1], [0], [0], [1], [0, 0, 1, 1], [], []>} : vector<128x64xbf16>, vector<64x64xbf16>, vector<128x64xf32> -> vector<128x64xf32>
    %c0_54 = arith.constant 0 : index
    %c0_55 = arith.constant 0 : index
    %c0_56 = arith.constant 0 : index
    %106 = vector.load %arg16[%c0_54, %c0_55, %c0_56] : memref<2x1x64xf32, #tpu.memory_space<vmem>>, vector<1x1x64xf32>
    %107 = vector.shape_cast %106 : vector<1x1x64xf32> to vector<1x64xf32>
    %108 = vector.broadcast %107 : vector<1x64xf32> to vector<128x64xf32>
    %109 = arith.addf %105, %108 : vector<128x64xf32>
    %110 = arith.mulf %57, %109 : vector<128x64xf32>
    %111 = arith.addf %6, %110 : vector<128x64xf32>
    %112 = vector.extract_strided_slice %50 {offsets = [0, 128], sizes = [128, 128], strides = [1, 1]} : vector<128x512xf32> to vector<128x128xf32>
    %c64_i32_57 = arith.constant 64 : i32
    %113 = tpu.dynamic_rotate %112 by %c64_i32_57 dim 1 : vector<128x128xf32>, i32 -> vector<128x128xf32>
    %114 = vector.extract_strided_slice %113 {offsets = [0, 0], sizes = [128, 64], strides = [1, 1]} : vector<128x128xf32> to vector<128x64xf32>
    %115 = vector.extract_strided_slice %50 {offsets = [0, 256], sizes = [128, 128], strides = [1, 1]} : vector<128x512xf32> to vector<128x128xf32>
    %116 = vector.extract_strided_slice %115 {offsets = [0, 0], sizes = [128, 64], strides = [1, 1]} : vector<128x128xf32> to vector<128x64xf32>
    %117 = vector.extract_strided_slice %50 {offsets = [0, 256], sizes = [128, 128], strides = [1, 1]} : vector<128x512xf32> to vector<128x128xf32>
    %c64_i32_58 = arith.constant 64 : i32
    %118 = tpu.dynamic_rotate %117 by %c64_i32_58 dim 1 : vector<128x128xf32>, i32 -> vector<128x128xf32>
    %119 = vector.extract_strided_slice %118 {offsets = [0, 0], sizes = [128, 64], strides = [1, 1]} : vector<128x128xf32> to vector<128x64xf32>
    %c1 = arith.constant 1 : index
    %c0_59 = arith.constant 0 : index
    %c0_60 = arith.constant 0 : index
    %120 = vector.load %arg11[%c1, %c0_59, %c0_60] : memref<2x1x64xf32, #tpu.memory_space<vmem>>, vector<1x1x64xf32>
    %121 = vector.shape_cast %120 : vector<1x1x64xf32> to vector<1x64xf32>
    %c1_61 = arith.constant 1 : index
    %c0_62 = arith.constant 0 : index
    %c0_63 = arith.constant 0 : index
    %122 = vector.load %arg12[%c1_61, %c0_62, %c0_63] : memref<2x1x64xf32, #tpu.memory_space<vmem>>, vector<1x1x64xf32>
    %123 = vector.shape_cast %122 : vector<1x1x64xf32> to vector<1x64xf32>
    %cst_64 = arith.constant dense<0.000000e+00> : vector<128xf32>
    %124 = vector.multi_reduction <add>, %111, %cst_64 [1] : vector<128x64xf32> to vector<128xf32>
    %125 = vector.shape_cast %124 : vector<128xf32> to vector<128x1xf32>
    %cst_65 = arith.constant 6.400000e+01 : f32
    %126 = vector.broadcast %cst_65 : f32 to vector<128x1xf32>
    %127 = arith.divf %125, %126 : vector<128x1xf32>
    %128 = vector.broadcast %127 : vector<128x1xf32> to vector<128x64xf32>
    %129 = arith.subf %111, %128 : vector<128x64xf32>
    %130 = arith.mulf %129, %129 : vector<128x64xf32>
    %cst_66 = arith.constant dense<0.000000e+00> : vector<128xf32>
    %131 = vector.multi_reduction <add>, %130, %cst_66 [1] : vector<128x64xf32> to vector<128xf32>
    %132 = vector.shape_cast %131 : vector<128xf32> to vector<128x1xf32>
    %cst_67 = arith.constant 6.400000e+01 : f32
    %133 = vector.broadcast %cst_67 : f32 to vector<128x1xf32>
    %134 = arith.divf %132, %133 : vector<128x1xf32>
    %135 = vector.broadcast %127 : vector<128x1xf32> to vector<128x64xf32>
    %136 = arith.subf %111, %135 : vector<128x64xf32>
    %cst_68 = arith.constant 9.99999997E-7 : f32
    %137 = vector.broadcast %cst_68 : f32 to vector<128x1xf32>
    %138 = arith.addf %134, %137 : vector<128x1xf32>
    %139 = math.rsqrt %138 : vector<128x1xf32>
    %140 = vector.broadcast %139 : vector<128x1xf32> to vector<128x64xf32>
    %141 = arith.mulf %136, %140 : vector<128x64xf32>
    %142 = vector.broadcast %121 : vector<1x64xf32> to vector<128x64xf32>
    %143 = arith.mulf %141, %142 : vector<128x64xf32>
    %144 = vector.broadcast %123 : vector<1x64xf32> to vector<128x64xf32>
    %145 = arith.addf %143, %144 : vector<128x64xf32>
    %cst_69 = arith.constant 1.000000e+00 : f32
    %146 = vector.broadcast %cst_69 : f32 to vector<128x64xf32>
    %147 = arith.addf %146, %116 : vector<128x64xf32>
    %148 = arith.mulf %145, %147 : vector<128x64xf32>
    %149 = arith.addf %148, %114 : vector<128x64xf32>
    %c1_70 = arith.constant 1 : index
    %c0_71 = arith.constant 0 : index
    %c0_72 = arith.constant 0 : index
    %150 = vector.load %arg13[%c1_70, %c0_71, %c0_72] : memref<2x64x64xbf16, #tpu.memory_space<vmem>>, vector<1x64x64xbf16>
    %151 = vector.shape_cast %150 : vector<1x64x64xbf16> to vector<64x64xbf16>
    %152 = arith.truncf %149 : vector<128x64xf32> to vector<128x64xbf16>
    %cst_73 = arith.constant dense<0.000000e+00> : vector<128x64xf32>
    %153 = tpu.matmul %152, %151, %cst_73 {dimension_numbers = #tpu.dot_dimension_numbers<[1], [0], [0], [1], [0, 0, 1, 1], [], []>} : vector<128x64xbf16>, vector<64x64xbf16>, vector<128x64xf32> -> vector<128x64xf32>
    %c1_74 = arith.constant 1 : index
    %c0_75 = arith.constant 0 : index
    %c0_76 = arith.constant 0 : index
    %154 = vector.load %arg14[%c1_74, %c0_75, %c0_76] : memref<2x1x64xf32, #tpu.memory_space<vmem>>, vector<1x1x64xf32>
    %155 = vector.shape_cast %154 : vector<1x1x64xf32> to vector<1x64xf32>
    %156 = vector.broadcast %155 : vector<1x64xf32> to vector<128x64xf32>
    %157 = arith.addf %153, %156 : vector<128x64xf32>
    %158 = arith.negf %157 : vector<128x64xf32>
    %159 = math.exp %158 : vector<128x64xf32>
    %cst_77 = arith.constant 1.000000e+00 : f32
    %160 = vector.broadcast %cst_77 : f32 to vector<128x64xf32>
    %161 = arith.addf %160, %159 : vector<128x64xf32>
    %162 = arith.divf %160, %161 : vector<128x64xf32>
    %163 = arith.mulf %157, %162 : vector<128x64xf32>
    %c1_78 = arith.constant 1 : index
    %c0_79 = arith.constant 0 : index
    %c0_80 = arith.constant 0 : index
    %164 = vector.load %arg15[%c1_78, %c0_79, %c0_80] : memref<2x64x64xbf16, #tpu.memory_space<vmem>>, vector<1x64x64xbf16>
    %165 = vector.shape_cast %164 : vector<1x64x64xbf16> to vector<64x64xbf16>
    %166 = arith.truncf %163 : vector<128x64xf32> to vector<128x64xbf16>
    %cst_81 = arith.constant dense<0.000000e+00> : vector<128x64xf32>
    %167 = tpu.matmul %166, %165, %cst_81 {dimension_numbers = #tpu.dot_dimension_numbers<[1], [0], [0], [1], [0, 0, 1, 1], [], []>} : vector<128x64xbf16>, vector<64x64xbf16>, vector<128x64xf32> -> vector<128x64xf32>
    %c1_82 = arith.constant 1 : index
    %c0_83 = arith.constant 0 : index
    %c0_84 = arith.constant 0 : index
    %168 = vector.load %arg16[%c1_82, %c0_83, %c0_84] : memref<2x1x64xf32, #tpu.memory_space<vmem>>, vector<1x1x64xf32>
    %169 = vector.shape_cast %168 : vector<1x1x64xf32> to vector<1x64xf32>
    %170 = vector.broadcast %169 : vector<1x64xf32> to vector<128x64xf32>
    %171 = arith.addf %167, %170 : vector<128x64xf32>
    %172 = arith.mulf %119, %171 : vector<128x64xf32>
    %173 = arith.addf %111, %172 : vector<128x64xf32>
    %174 = vector.extract_strided_slice %50 {offsets = [0, 384], sizes = [128, 128], strides = [1, 1]} : vector<128x512xf32> to vector<128x128xf32>
    %175 = vector.extract_strided_slice %174 {offsets = [0, 0], sizes = [128, 64], strides = [1, 1]} : vector<128x128xf32> to vector<128x64xf32>
    %176 = vector.extract_strided_slice %50 {offsets = [0, 384], sizes = [128, 128], strides = [1, 1]} : vector<128x512xf32> to vector<128x128xf32>
    %c64_i32_85 = arith.constant 64 : i32
    %177 = tpu.dynamic_rotate %176 by %c64_i32_85 dim 1 : vector<128x128xf32>, i32 -> vector<128x128xf32>
    %178 = vector.extract_strided_slice %177 {offsets = [0, 0], sizes = [128, 64], strides = [1, 1]} : vector<128x128xf32> to vector<128x64xf32>
    %cst_86 = arith.constant dense<0.000000e+00> : vector<128xf32>
    %179 = vector.multi_reduction <add>, %173, %cst_86 [1] : vector<128x64xf32> to vector<128xf32>
    %180 = vector.shape_cast %179 : vector<128xf32> to vector<128x1xf32>
    %cst_87 = arith.constant 6.400000e+01 : f32
    %181 = vector.broadcast %cst_87 : f32 to vector<128x1xf32>
    %182 = arith.divf %180, %181 : vector<128x1xf32>
    %183 = vector.broadcast %182 : vector<128x1xf32> to vector<128x64xf32>
    %184 = arith.subf %173, %183 : vector<128x64xf32>
    %185 = arith.mulf %184, %184 : vector<128x64xf32>
    %cst_88 = arith.constant dense<0.000000e+00> : vector<128xf32>
    %186 = vector.multi_reduction <add>, %185, %cst_88 [1] : vector<128x64xf32> to vector<128xf32>
    %187 = vector.shape_cast %186 : vector<128xf32> to vector<128x1xf32>
    %cst_89 = arith.constant 6.400000e+01 : f32
    %188 = vector.broadcast %cst_89 : f32 to vector<128x1xf32>
    %189 = arith.divf %187, %188 : vector<128x1xf32>
    %190 = vector.broadcast %182 : vector<128x1xf32> to vector<128x64xf32>
    %191 = arith.subf %173, %190 : vector<128x64xf32>
    %cst_90 = arith.constant 9.99999997E-7 : f32
    %192 = vector.broadcast %cst_90 : f32 to vector<128x1xf32>
    %193 = arith.addf %189, %192 : vector<128x1xf32>
    %194 = math.rsqrt %193 : vector<128x1xf32>
    %195 = vector.broadcast %194 : vector<128x1xf32> to vector<128x64xf32>
    %196 = arith.mulf %191, %195 : vector<128x64xf32>
    %cst_91 = arith.constant 1.000000e+00 : f32
    %197 = vector.broadcast %cst_91 : f32 to vector<128x64xf32>
    %198 = arith.addf %197, %178 : vector<128x64xf32>
    %199 = arith.mulf %196, %198 : vector<128x64xf32>
    %200 = arith.addf %199, %175 : vector<128x64xf32>
    %c0_92 = arith.constant 0 : index
    %c0_93 = arith.constant 0 : index
    %201 = vector.load %arg19[%c0_92, %c0_93] : memref<64x32xbf16, #tpu.memory_space<vmem>>, vector<64x32xbf16>
    %202 = arith.truncf %200 : vector<128x64xf32> to vector<128x64xbf16>
    %cst_94 = arith.constant dense<0.000000e+00> : vector<128x32xf32>
    %203 = tpu.matmul %202, %201, %cst_94 {dimension_numbers = #tpu.dot_dimension_numbers<[1], [0], [0], [1], [0, 0, 1, 1], [], []>} : vector<128x64xbf16>, vector<64x32xbf16>, vector<128x32xf32> -> vector<128x32xf32>
    %c0_95 = arith.constant 0 : index
    %c0_96 = arith.constant 0 : index
    %204 = vector.load %arg20[%c0_95, %c0_96] : memref<1x32xf32, #tpu.memory_space<vmem>>, vector<1x32xf32>
    %205 = vector.broadcast %204 : vector<1x32xf32> to vector<128x32xf32>
    %206 = arith.addf %203, %205 : vector<128x32xf32>
    %c0_97 = arith.constant 0 : index
    %c0_98 = arith.constant 0 : index
    %207 = vector.load %arg21[%c0_97, %c0_98] : memref<128x32xf32, #tpu.memory_space<vmem>>, vector<128x32xf32>
    tpu.vector_store %arg21[%c0_97, %c0_98], %206 {strides = array<i32>} : memref<128x32xf32, #tpu.memory_space<vmem>>, vector<128x32xf32>,
    return
  }
  func.func @transform_0(%arg0: i32) -> (i32, i32) {
    %c0_i32 = arith.constant 0 : i32
    %c0_i32_0 = arith.constant 0 : i32
    return %arg0, %c0_i32 : i32, i32
  }
  func.func @transform_1(%arg0: i32) -> (i32, i32) {
    %c0_i32 = arith.constant 0 : i32
    %c0_i32_0 = arith.constant 0 : i32
    return %arg0, %c0_i32 : i32, i32
  }
  func.func @transform_2(%arg0: i32) -> (i32, i32) {
    %c0_i32 = arith.constant 0 : i32
    %c0_i32_0 = arith.constant 0 : i32
    %c0_i32_1 = arith.constant 0 : i32
    return %c0_i32, %c0_i32_0 : i32, i32
  }
  func.func @transform_3(%arg0: i32) -> (i32, i32) {
    %c0_i32 = arith.constant 0 : i32
    %c0_i32_0 = arith.constant 0 : i32
    %c0_i32_1 = arith.constant 0 : i32
    return %c0_i32, %c0_i32_0 : i32, i32
  }
  func.func @transform_4(%arg0: i32) -> (i32, i32) {
    %c0_i32 = arith.constant 0 : i32
    %c0_i32_0 = arith.constant 0 : i32
    %c0_i32_1 = arith.constant 0 : i32
    return %c0_i32, %c0_i32_0 : i32, i32
  }
  func.func @transform_5(%arg0: i32) -> (i32, i32) {
    %c0_i32 = arith.constant 0 : i32
    %c0_i32_0 = arith.constant 0 : i32
    %c0_i32_1 = arith.constant 0 : i32
    return %c0_i32, %c0_i32_0 : i32, i32
  }
  func.func @transform_6(%arg0: i32) -> (i32, i32) {
    %c0_i32 = arith.constant 0 : i32
    %c0_i32_0 = arith.constant 0 : i32
    %c0_i32_1 = arith.constant 0 : i32
    return %c0_i32, %c0_i32_0 : i32, i32
  }
  func.func @transform_7(%arg0: i32) -> (i32, i32) {
    %c0_i32 = arith.constant 0 : i32
    %c0_i32_0 = arith.constant 0 : i32
    %c0_i32_1 = arith.constant 0 : i32
    return %c0_i32, %c0_i32_0 : i32, i32
  }
  func.func @transform_8(%arg0: i32) -> (i32, i32) {
    %c0_i32 = arith.constant 0 : i32
    %c0_i32_0 = arith.constant 0 : i32
    %c0_i32_1 = arith.constant 0 : i32
    return %c0_i32, %c0_i32_0 : i32, i32
  }
  func.func @transform_9(%arg0: i32) -> (i32, i32) {
    %c0_i32 = arith.constant 0 : i32
    %c0_i32_0 = arith.constant 0 : i32
    %c0_i32_1 = arith.constant 0 : i32
    return %c0_i32, %c0_i32_0 : i32, i32
  }
  func.func @transform_10(%arg0: i32) -> (i32, i32, i32) {
    %c0_i32 = arith.constant 0 : i32
    %c0_i32_0 = arith.constant 0 : i32
    %c0_i32_1 = arith.constant 0 : i32
    %c0_i32_2 = arith.constant 0 : i32
    return %c0_i32, %c0_i32_0, %c0_i32_1 : i32, i32, i32
  }
  func.func @transform_11(%arg0: i32) -> (i32, i32, i32) {
    %c0_i32 = arith.constant 0 : i32
    %c0_i32_0 = arith.constant 0 : i32
    %c0_i32_1 = arith.constant 0 : i32
    %c0_i32_2 = arith.constant 0 : i32
    return %c0_i32, %c0_i32_0, %c0_i32_1 : i32, i32, i32
  }
  func.func @transform_12(%arg0: i32) -> (i32, i32, i32) {
    %c0_i32 = arith.constant 0 : i32
    %c0_i32_0 = arith.constant 0 : i32
    %c0_i32_1 = arith.constant 0 : i32
    %c0_i32_2 = arith.constant 0 : i32
    return %c0_i32, %c0_i32_0, %c0_i32_1 : i32, i32, i32
  }
  func.func @transform_13(%arg0: i32) -> (i32, i32, i32) {
    %c0_i32 = arith.constant 0 : i32
    %c0_i32_0 = arith.constant 0 : i32
    %c0_i32_1 = arith.constant 0 : i32
    %c0_i32_2 = arith.constant 0 : i32
    return %c0_i32, %c0_i32_0, %c0_i32_1 : i32, i32, i32
  }
  func.func @transform_14(%arg0: i32) -> (i32, i32, i32) {
    %c0_i32 = arith.constant 0 : i32
    %c0_i32_0 = arith.constant 0 : i32
    %c0_i32_1 = arith.constant 0 : i32
    %c0_i32_2 = arith.constant 0 : i32
    return %c0_i32, %c0_i32_0, %c0_i32_1 : i32, i32, i32
  }
  func.func @transform_15(%arg0: i32) -> (i32, i32, i32) {
    %c0_i32 = arith.constant 0 : i32
    %c0_i32_0 = arith.constant 0 : i32
    %c0_i32_1 = arith.constant 0 : i32
    %c0_i32_2 = arith.constant 0 : i32
    return %c0_i32, %c0_i32_0, %c0_i32_1 : i32, i32, i32
  }
  func.func @transform_16(%arg0: i32) -> (i32, i32) {
    %c0_i32 = arith.constant 0 : i32
    %c0_i32_0 = arith.constant 0 : i32
    %c0_i32_1 = arith.constant 0 : i32
    return %c0_i32, %c0_i32_0 : i32, i32
  }
  func.func @transform_17(%arg0: i32) -> (i32, i32) {
    %c0_i32 = arith.constant 0 : i32
    %c0_i32_0 = arith.constant 0 : i32
    %c0_i32_1 = arith.constant 0 : i32
    return %c0_i32, %c0_i32_0 : i32, i32
  }
  func.func @transform_18(%arg0: i32) -> (i32, i32) {
    %c0_i32 = arith.constant 0 : i32
    %c0_i32_0 = arith.constant 0 : i32
    %c0_i32_1 = arith.constant 0 : i32
    return %c0_i32, %c0_i32_0 : i32, i32
  }
  func.func @transform_19(%arg0: i32) -> (i32, i32) {
    %c0_i32 = arith.constant 0 : i32
    %c0_i32_0 = arith.constant 0 : i32
    %c0_i32_1 = arith.constant 0 : i32
    return %c0_i32, %c0_i32_0 : i32, i32
  }
  func.func @transform_20(%arg0: i32) -> (i32, i32) {
    %c0_i32 = arith.constant 0 : i32
    %c0_i32_0 = arith.constant 0 : i32
    return %arg0, %c0_i32 : i32, i32
  }
}

</mosaic_0001>

<bundles_post_ra>
// kernel: simple_mlp_adaln.1
= control target key start
LH: loop header
LB: loop body
LE: loop exit
PB: predicated region body
PF: predicated region fallthrough
CT: control target
= control target key end

     0   :  { %s16950_s0 = inlined_call_operand.vmem [shape: bf16[512,40], index: 0, kind: input, shape index: {}]   ;;  %s16951_s1 = inlined_call_operand.vmem [shape: f32[512,1], index: 1, kind: input, shape index: {}]   ;;  %s16952_s2 = inlined_call_operand.vmem [shape: f32[1,128], index: 2, kind: input, shape index: {}]   ;;  %s16953_s3 = inlined_call_operand.vmem [shape: bf16[40,128], index: 3, kind: input, shape index: {}]   ;;  %s16954_s4 = inlined_call_operand.vmem [shape: f32[1,128], index: 4, kind: input, shape index: {}]   ;;  %s16955_s5 = inlined_call_operand.vmem [shape: bf16[128,64], index: 5, kind: input, shape index: {}]   ;;  %s16956_s6 = inlined_call_operand.vmem [shape: bf16[128,64], index: 6, kind: input, shape index: {}]   ;;  %s16957_s7 = inlined_call_operand.vmem [shape: f32[1,64], index: 7, kind: input, shape index: {}]   ;;  %s16958_s8 = inlined_call_operand.vmem [shape: bf16[64,64], index: 8, kind: input, shape index: {}]   ;;  %s16959_s9 = inlined_call_operand.vmem [shape: f32[1,64], index: 9, kind: input, shape index: {}]   ;;  %s16960_s10 = inlined_call_operand.vmem [shape: f32[2,1,64], index: 10, kind: input, shape index: {}]   ;;  %s16961_s11 = inlined_call_operand.vmem [shape: f32[2,1,64], index: 11, kind: input, shape index: {}]   ;;  %s16962_s12 = inlined_call_operand.vmem [shape: bf16[2,64,64], index: 12, kind: input, shape index: {}]   ;;  %s16963_s13 = inlined_call_operand.vmem [shape: f32[2,1,64], index: 13, kind: input, shape index: {}]   ;;  %s16964_s14 = inlined_call_operand.vmem [shape: bf16[2,64,64], index: 14, kind: input, shape index: {}]   ;;  %s16965_s15 = inlined_call_operand.vmem [shape: f32[2,1,64], index: 15, kind: input, shape index: {}]   ;;  %s16966_s16 = inlined_call_operand.vmem [shape: bf16[64,512], index: 16, kind: input, shape index: {}]   ;;  %s16967_s17 = inlined_call_operand.vmem [shape: f32[1,512], index: 17, kind: input, shape index: {}]   ;;  %s16968_s18 = inlined_call_operand.vmem [shape: bf16[64,32], index: 18, kind: input, shape index: {}]   ;;  %s16969_s19 = inlined_call_operand.vmem [shape: f32[1,32], index: 19, kind: input, shape index: {}]   ;;  %s16970_s20 = inlined_call_operand.vmem [shape: f32[512,32], index: 20, kind: output, shape index: {}]  }
   0x1   :  { %17224 = sst [smem:[#allocation157_spill]] %s16950_s0 }
   0x2   :  { %17225 = sst [smem:[#allocation158_spill]] %s16951_s1  ;;  %s11204_s1 = smov 0  }
   0x3   :  { %17226 = sst [smem:[#allocation159_spill]] %s16952_s2 }
   0x4   :  { %17227 = sst [smem:[#allocation160_spill]] %s16953_s3 }
   0x5   :  { %17228 = sst [smem:[#allocation161_spill]] %s16954_s4 }
   0x6 LB: > { %s10071_s22 = sadd.s32 4294967295, %s11088_s1   ;;  %p10075_p0 = scmp.ge.s32.totalorder %s11088_s1, 1  ;;  %s11088_s1 = sphi %s11204_s1, %s30_s1  }
   0x7   : > { %p574_p1 = scmp.lt.s32.totalorder %s11088_s1, 5 }
   0x9   : > { %p575_p2 = pnand %p10075_p0, %p574_p1 }
   0xb   : > { %578 = sbr.rel (%p575_p2) target bundleno = 2883 (0xb43), region = 100 }
  0x10   : > { %s17229_s2 = sld [smem:[#allocation160_spill]]  ;;  %s10076_s25 = sshll.u32 %s10071_s22, 4  ;;  %vm761_vm0 = vcmask 1043456   ;;  %v16978_v2 = vmov 0   ;;  %vm736_vm1 = vcmask 326656  }
  0x11   : > { %10710 = vset.pattern.permute.xlu2 %v16978_v2  ;;  %10709 = vset.pattern.permute.xlu1 %v16978_v2  ;;  %p638_p3 = scmp.lt.s32.totalorder %s10076_s25, 63  ;;  %s17230_s29 = sld [smem:[#allocation158_spill]]  ;;  %v16985_v56 = vmov 2102212464   ;;  %v16982_v58 = vmov 920167782  }
  0x12   : > { %10708 = vset.pattern.permute.xlu0 %v16978_v2  ;;  %s17231_s26 = sld [smem:[#allocation157_spill]]  ;;  %v16995_v63 = vmov 683565275   ;;  %s17203_s22 = smov 64  }
  0x13   : > { %s17940_s25 = smov (!%p638_p3, %s10076_s25), 63  ;;  %s17290_s21 = sld [smem:[#allocation161_spill]] }
  0x14   : > { %s17202_s3 = sshll.u32 %s17940_s25, 3  ;;  %s10077_s0 = sshll.u32 %s17940_s25, 2 }
  0x16   : > { %v676_v0 = vld [vmem:[%s17229_s2 + $0x10] sm:$0xf]  ;;  %v10625_v5 = vld [vmem:[%s17229_s2 + $0x8] sm:$0xff]  ;;  %v10624_v9 = vld [vmem:[%s17229_s2] sm:$0xff] }
  0x17   : > { %v730_v1 = vunpack.c.l.b16 %v676_v0  ;;  %s11229_s30 = scalar_lea.vmem %s17230_s29, %s17202_s3  ;;  %s17232_s29 = sld [smem:[#allocation159_spill]] }
  0x18   : > { %v850_v6 = vld [vmem:[%s11229_s30 + $0x20] sm:$0xff]  ;;  %v848_v7 = vld [vmem:[%s11229_s30 + $0x10] sm:$0xff]  ;;  %s11241_s27 = scalar_lea.vmem %s17231_s26, %s10077_s0  ;;  %v851_v10 = vld [vmem:[%s11229_s30 + $0x28] sm:$0xff]  ;;  %s17747_s26 = smov 64  }
  0x19   : > { %v733_v3 = vpack.c.b16 %v730_v1, %v730_v1  ;;  %v846_v8 = vld [vmem:[%s11229_s30] sm:$0xff]  ;;  %885 = vperm.xlu2 %10710, %v850_v6   ;;  %875 = vperm.xlu1 %10709, %v848_v7   ;;  %v849_v11 = vld [vmem:[%s11229_s30 + $0x18] sm:$0xff]  ;;  %v847_v13 = vld [vmem:[%s11229_s30 + $0x8] sm:$0xff] }
  0x1a   : > { %865 = vperm.xlu0 %10708, %v846_v8   ;;  %v10616_v12 = vld [vmem:[%s11241_s27] sm:$0xff]  ;;  %v10622_v15 = vld [vmem:[%s11241_s27 + $0x30] sm:$0xff]  ;;  %v853_v18 = vld [vmem:[%s11229_s30 + $0x38] sm:$0xff] }
  0x1b   : > { %v763_v4 = vsel %vm761_vm0, %v733_v3, 0  ;;  %v10620_v14 = vld [vmem:[%s11241_s27 + $0x20] sm:$0xff]  ;;  %v10618_v16 = vld [vmem:[%s11241_s27 + $0x10] sm:$0xff]  ;;  %v857_v20 = vld [vmem:[%s11229_s30 + $0x58] sm:$0xff]  ;;  %v16998_v3 = vmov 2475754826  }
  0x1c   : > { %770 = vmatpush.bf16.msra.mxu0 %v763_v4  ;;  %10683 = vmatpush.bf16.msra.mxu2 %v763_v4  ;;  %v854_v17 = vld [vmem:[%s11229_s30 + $0x40] sm:$0xff]  ;;  %v852_v19 = vld [vmem:[%s11229_s30 + $0x30] sm:$0xff]  ;;  %v10617_v22 = vld [vmem:[%s11241_s27 + $0x8] sm:$0xff] }
  0x1d   : > { %10684 = vmatpush.bf16.msra.mxu3 %v763_v4  ;;  %10682 = vmatpush.bf16.msra.mxu1 %v763_v4  ;;  %v856_v21 = vld [vmem:[%s11229_s30 + $0x50] sm:$0xff]  ;;  %v855_v23 = vld [vmem:[%s11229_s30 + $0x48] sm:$0xff]  ;;  %v10623_v25 = vld [vmem:[%s11241_s27 + $0x38] sm:$0xff] }
  0x1e   : > { %v10621_v24 = vld [vmem:[%s11241_s27 + $0x28] sm:$0xff]  ;;  %v10619_v26 = vld [vmem:[%s11241_s27 + $0x18] sm:$0xff]  ;;  %v860_v27 = vld [vmem:[%s11229_s30 + $0x70] sm:$0xff] }
  0x1f   : > { %v859_v28 = vld [vmem:[%s11229_s30 + $0x68] sm:$0xff]  ;;  %v858_v29 = vld [vmem:[%s11229_s30 + $0x60] sm:$0xff]  ;;  %v861_v30 = vld [vmem:[%s11229_s30 + $0x78] sm:$0xff]  ;;  %s17934_s30 = sshll.u32 %s17940_s25, 3 }
  0x20   : > { %771 = vmatpush.bf16.msra.mxu0 %v10625_v5  ;;  %10686 = vmatpush.bf16.msra.mxu2 %v10625_v5  ;;  %v11275_v31 = vld [vmem:[%s17232_s29] ss:$0 sm:$0xff] }
  0x21   : > { %10687 = vmatpush.bf16.msra.mxu3 %v10625_v5  ;;  %10685 = vmatpush.bf16.msra.mxu1 %v10625_v5 }
  0x22   : > { %890 = vperm.xlu2 %10710, %v851_v10   ;;  %880 = vperm.xlu1 %10709, %v849_v11  }
  0x23   : > { %870 = vperm.xlu0 %10708, %v847_v13  }
  0x24   : > { %772 = vmatpush.bf16.msra.mxu0 %v10624_v9  ;;  %10689 = vmatpush.bf16.msra.mxu2 %v10624_v9 }
  0x25   : > { %10690 = vmatpush.bf16.msra.mxu3 %v10624_v9  ;;  %10688 = vmatpush.bf16.msra.mxu1 %v10624_v9  ;;  %v17000_v9 = vmov 2131351028  }
  0x27   : > { %10122 = vmatmul.msk.bf16.vlgmr.msra.gmra.mxu0 %vm736_vm1, %v10616_v12  ;;  %10126 = vmatmul.msk.bf16.vlgmr.msra.gmra.mxu2 %vm736_vm1, %v10620_v14 }
  0x28   : > { %10128 = vmatmul.msk.bf16.vlgmr.msra.gmra.mxu3 %vm736_vm1, %v10622_v15  ;;  %10124 = vmatmul.msk.bf16.vlgmr.msra.gmra.mxu1 %vm736_vm1, %v10618_v16 }
  0x2a   : > { %905 = vperm.xlu2 %10710, %v854_v17   ;;  %900 = vperm.xlu1 %10709, %v853_v18   ;;  %v16980_v18 = vmov 1326507024  }
  0x2b   : > { %895 = vperm.xlu0 %10708, %v852_v19  }
  0x32   : > { %920 = vperm.xlu2 %10710, %v857_v20   ;;  %915 = vperm.xlu1 %10709, %v856_v21  }
  0x33   : > { %910 = vperm.xlu0 %10708, %v855_v23  }
  0x37   : > { %10123 = vmatmul.msk.bf16.gmra.mxu0 %vm736_vm1, %v10617_v22  ;;  %10127 = vmatmul.msk.bf16.gmra.mxu2 %vm736_vm1, %v10621_v24 }
  0x38   : > { %10129 = vmatmul.msk.bf16.gmra.mxu3 %vm736_vm1, %v10623_v25  ;;  %10125 = vmatmul.msk.bf16.gmra.mxu1 %vm736_vm1, %v10619_v26 }
  0x3a   : > { %935 = vperm.xlu2 %10710, %v860_v27   ;;  %930 = vperm.xlu1 %10709, %v859_v28  }
  0x3b   : > { %925 = vperm.xlu0 %10708, %v858_v29  }
  0x43   : > { %940 = vperm.xlu0 %10708, %v861_v30  }
  0x73   : > { %v886_v32 = vpop.permute.xlu2 %885 }
  0x74   : > { %v11278_v33 = vmul.f32 %v11275_v31, %v886_v32 }
  0x76   : > { %17233 = vst [vmem:[#allocation2_spill] sm:$0xff] %v11278_v33  ;;  %v1581_v34 = vand.u32 2139095040, %v11278_v33  ;;  %v16977_v48 = vand.u32 2147483647, %v11278_v33 }
  0x78   : > { %v1582_v35 = vshrl.u32 %v1581_v34, 23  ;;  %v1585_v52 = vand.u32 8388607, %v16977_v48 }
  0x7a   : > { %v10142_v37 = vadd.s32 4294967169, %v1582_v35  ;;  %v1586_v61 = vor.u32 8388608, %v1585_v52 }
  0x7c   : > { %v891_v36 = vpop.permute.xlu2 %890  ;;  %v1588_v39 = vadd.s32 1, %v10142_v37  ;;  %v11319_v16 = vshll.u32 %v1586_v61, 8 }
  0x7d   : > { %v11282_v38 = vmul.f32 %v11275_v31, %v891_v36 }
  0x7e   : > { %vm1589_vm2 = vcmp.gt.s32.totalorder %v1588_v39, 0  ;;  %17240 = vst [vmem:[#allocation9_spill] sm:$0xff] %v11319_v16  ;;  %v11337_v28 = vand.u32 65535, %v11319_v16  ;;  %v11340_v29 = vshrl.u32 %v11319_v16, 16 }
  0x7f   : > { %17234 = vst [vmem:[#allocation3_spill] sm:$0xff] %v11282_v38  ;;  %v1735_v40 = vand.u32 2139095040, %v11282_v38  ;;  %v1590_v44 = vsel %vm1589_vm2, %v1588_v39, 0  ;;  %v16976_v53 = vand.u32 2147483647, %v11282_v38 }
  0x80   : > { %v1592_v46 = vand.u32 31, %v1590_v44  ;;  %v11298_v62 = vshrl.u32 %v1590_v44, 5  ;;  %17244 = vst [vmem:[#allocation13_spill] sm:$0xff] %v11337_v28 }
  0x81   : > { %v1736_v42 = vshrl.u32 %v1735_v40, 23  ;;  %v1739_v1 = vand.u32 8388607, %v16976_v53  ;;  %17245 = vst [vmem:[#allocation14_spill] sm:$0xff] %v11340_v29 }
  0x82   : > { %v11290_v50 = vsub.s32 32, %v1592_v46  ;;  %v1604_v57 = vshll.u32 %v16985_v56, %v1592_v46  ;;  %17237 = vst [vmem:[#allocation6_spill] sm:$0xff] %v11298_v62  ;;  %v1595_v0 = vshll.u32 %v16995_v63, %v1592_v46  ;;  %v1598_v4 = vshll.u32 %v16998_v3, %v1592_v46 }
  0x83   : > { %v10145_v45 = vadd.s32 4294967169, %v1736_v42  ;;  %v1601_v11 = vshll.u32 %v17000_v9, %v1592_v46  ;;  %v1607_v15 = vshll.u32 %v16982_v58, %v1592_v46  ;;  %vm17180_vm4 = vcmp.lt.s32.totalorder %v11298_v62, 4 }
  0x84   : > { %v906_v41 = vpop.permute.xlu2 %905  ;;  %17236 = vst [vmem:[#allocation5_spill] sm:$0xff] %v11290_v50  ;;  %v1605_v59 = vshrl.u32 %v16982_v58, %v11290_v50  ;;  %v1596_v8 = vshrl.u32 %v16998_v3, %v11290_v50  ;;  %v1599_v10 = vshrl.u32 %v17000_v9, %v11290_v50  ;;  %v1602_v12 = vshrl.u32 %v16985_v56, %v11290_v50 }
  0x85   : > { %v11286_v43 = vmul.f32 %v11275_v31, %v906_v41  ;;  %v1742_v49 = vadd.s32 1, %v10145_v45  ;;  %v1608_v19 = vshrl.u32 %v16980_v18, %v11290_v50  ;;  %v1740_v20 = vor.u32 8388608, %v1739_v1 }
  0x86   : > { %v1606_v13 = vor.u32 %v1605_v59, %v1604_v57  ;;  %v11325_v23 = vor.u32 %v1596_v8, %v1595_v0  ;;  %v11327_v24 = vor.u32 %v1599_v10, %v1598_v4  ;;  %v11329_v25 = vor.u32 %v1602_v12, %v1601_v11 }
  0x87   : > { %17235 = vst [vmem:[#allocation4_spill] sm:$0xff] %v11286_v43  ;;  %v2197_v47 = vand.u32 2139095040, %v11286_v43  ;;  %vm1743_vm3 = vcmp.gt.s32.totalorder %v1742_v49, 0  ;;  %vm17179_vm5 = vcmp.lt.s32.totalorder %v11298_v62, 1  ;;  %vm17177_vm6 = vcmp.lt.s32.totalorder %v11298_v62, 3 }
  0x88   : > { %v1744_v5 = vsel %vm1743_vm3, %v1742_v49, 0  ;;  %17241 = vst [vmem:[#allocation10_spill] sm:$0xff] %v11325_v23  ;;  %v1619_v26 = vsel %vm17180_vm4, %v1606_v13, 920167782  ;;  %v16975_v27 = vand.u32 2147483647, %v11286_v43  ;;  %v1609_v32 = vor.u32 %v1608_v19, %v1607_v15 }
  0x89   : > { %v2198_v51 = vshrl.u32 %v2197_v47, 23  ;;  %v1746_v17 = vand.u32 31, %v1744_v5  ;;  %17242 = vst [vmem:[#allocation11_spill] sm:$0xff] %v11327_v24  ;;  %v11344_v34 = vshll.u32 %v1740_v20, 8  ;;  %v11350_v37 = vsel %vm17179_vm5, %v11325_v23, %v11327_v24 }
  0x8a   : > { %17243 = vst [vmem:[#allocation12_spill] sm:$0xff] %v11329_v25  ;;  %v11355_v39 = vsel %vm17177_vm6, %v11329_v25, %v1619_v26  ;;  %v11361_v40 = vsel %vm17179_vm5, %v11327_v24, %v11329_v25  ;;  %v11363_v42 = vshrl.u32 %v1744_v5, 5  ;;  %v2201_v46 = vand.u32 8388607, %v16975_v27 }
  0x8b   : > { %v10154_v60 = vadd.s32 4294967169, %v2198_v51  ;;  %v11342_v30 = vsub.s32 32, %v1746_v17  ;;  %17247 = vst [vmem:[#allocation16_spill] sm:$0xff] %v11344_v34  ;;  %v1749_v44 = vshll.u32 %v16995_v63, %v1746_v17  ;;  %v1752_v45 = vshll.u32 %v16998_v3, %v1746_v17  ;;  %v876_v47 = vpop.permute.xlu1 %875 }
  0x8c   : > { %v921_v54 = vpop.permute.xlu2 %920  ;;  %v866_v55 = vpop.permute.xlu0 %865  ;;  %17248 = vst [vmem:[#allocation17_spill] sm:$0xff] %v11350_v37  ;;  %v1758_v52 = vshll.u32 %v16985_v56, %v1746_v17  ;;  %v1755_v61 = vshll.u32 %v17000_v9, %v1746_v17  ;;  %v11380_v0 = vand.u32 65535, %v11344_v34  ;;  %v11384_v4 = vmul.f32 %v11275_v31, %v876_v47 }
  0x8d   : > { %v11305_v6 = vmul.f32 %v11275_v31, %v921_v54  ;;  %v11308_v7 = vmul.f32 %v11275_v31, %v866_v55  ;;  %v2204_v14 = vadd.s32 1, %v10154_v60  ;;  %17246 = vst [vmem:[#allocation15_spill] sm:$0xff] %v11342_v30  ;;  %v1750_v49 = vshrl.u32 %v16998_v3, %v11342_v30 }
  0x8e   : > { %17249 = vst [vmem:[#allocation18_spill] sm:$0xff] %v11355_v39  ;;  %v1753_v51 = vshrl.u32 %v17000_v9, %v11342_v30  ;;  %v1759_v54 = vshrl.u32 %v16982_v58, %v11342_v30  ;;  %v1623_v55 = vsel %vm17180_vm4, %v1609_v32, 1326507024  ;;  %v1756_v5 = vshrl.u32 %v16985_v56, %v11342_v30 }
  0x8f   : > { %17238 = vst [vmem:[#allocation7_spill] sm:$0xff] %v11305_v6  ;;  %v2659_v21 = vand.u32 2139095040, %v11305_v6  ;;  %v965_v22 = vand.u32 2139095040, %v11308_v7  ;;  %vm2205_vm7 = vcmp.gt.s32.totalorder %v2204_v14, 0  ;;  %v16974_v1 = vand.u32 2147483647, %v11305_v6 }
  0x90   : > { %17239 = vst [vmem:[#allocation8_spill] sm:$0xff] %v11308_v7  ;;  %v2206_v41 = vsel %vm2205_vm7, %v2204_v14, 0  ;;  %v1761_v8 = vshll.u32 %v16982_v58, %v1746_v17  ;;  %v1762_v10 = vshrl.u32 %v16980_v18, %v11342_v30  ;;  %v2202_v11 = vor.u32 8388608, %v2201_v46 }
  0x91   : > { %v2660_v35 = vshrl.u32 %v2659_v21, 23  ;;  %v966_v36 = vshrl.u32 %v965_v22, 23  ;;  %17250 = vst [vmem:[#allocation19_spill] sm:$0xff] %v11361_v40  ;;  %v2208_v57 = vand.u32 31, %v2206_v41  ;;  %v11391_v12 = vor.u32 %v1750_v49, %v1749_v44 }
  0x92   : > { %17251 = vst [vmem:[#allocation20_spill] sm:$0xff] %v11363_v42  ;;  %v11393_v14 = vor.u32 %v1753_v51, %v1752_v45  ;;  %v1760_v15 = vor.u32 %v1759_v54, %v1758_v52  ;;  %vm17157_vm8 = vcmp.lt.s32.totalorder %v11363_v42, 1  ;;  %vm17175_vm9 = vcmp.lt.s32.totalorder %v11363_v42, 4 }
  0x93   : > { %v10163_v59 = vadd.s32 4294967169, %v2660_v35  ;;  %v10130_v60 = vadd.s32 4294967169, %v966_v36  ;;  %17252 = vst [vmem:[#allocation21_spill] sm:$0xff] %v11380_v0  ;;  %v11397_v19 = vsub.s32 32, %v2208_v57  ;;  %v11401_v17 = vsel %vm17177_vm6, %v1606_v13, %v1623_v55 }
  0x94   : > { %17253 = vst [vmem:[#allocation22_spill] sm:$0xff] %v11384_v4  ;;  %v11404_v22 = vshrl.u32 %v11344_v34, 16  ;;  %v2663_v26 = vand.u32 8388607, %v16974_v1  ;;  %v1273_v32 = vand.u32 2139095040, %v11384_v4  ;;  %v11409_v35 = vor.u32 %v1756_v5, %v1755_v61 }
  0x95   : > { %17254 = vst [vmem:[#allocation23_spill] sm:$0xff] %v11391_v12  ;;  %v2666_v20 = vadd.s32 1, %v10163_v59  ;;  %v972_v21 = vadd.s32 1, %v10130_v60  ;;  %v1763_v36 = vor.u32 %v1762_v10, %v1761_v8  ;;  %vm17158_vm10 = vcmp.lt.s32.totalorder %v11363_v42, 3 }
  0x96   : > { %17255 = vst [vmem:[#allocation24_spill] sm:$0xff] %v11393_v14  ;;  %v11412_v44 = vshll.u32 %v2202_v11, 8  ;;  %v11418_v13 = vsel %vm17157_vm8, %v11391_v12, %v11393_v14  ;;  %v1773_v45 = vsel %vm17175_vm9, %v1760_v15, 920167782  ;;  %v2220_v46 = vshll.u32 %v16985_v56, %v2208_v57 }
  0x97   : > { %17256 = vst [vmem:[#allocation25_spill] sm:$0xff] %v11397_v19  ;;  %v2223_v47 = vshll.u32 %v16982_v58, %v2208_v57  ;;  %v2221_v49 = vshrl.u32 %v16982_v58, %v11397_v19  ;;  %v2224_v51 = vshrl.u32 %v16980_v18, %v11397_v19  ;;  %vm2667_vm11 = vcmp.gt.s32.totalorder %v2666_v20, 0 }
  0x98   : > { %17257 = vst [vmem:[#allocation26_spill] sm:$0xff] %v11401_v17  ;;  %vm973_vm12 = vcmp.gt.s32.totalorder %v972_v21, 0  ;;  %v11428_v52 = vshrl.u32 %v2206_v41, 5  ;;  %v2664_v54 = vor.u32 8388608, %v2663_v26  ;;  %v16984_v55 = vand.u32 2147483647, %v11384_v4 }
  0x99   : > { %17258 = vst [vmem:[#allocation27_spill] sm:$0xff] %v11404_v22  ;;  %v1274_v59 = vshrl.u32 %v1273_v32, 23  ;;  %v2211_v60 = vshll.u32 %v16995_v63, %v2208_v57  ;;  %v2212_v61 = vshrl.u32 %v16998_v3, %v11397_v19  ;;  %v2214_v5 = vshll.u32 %v16998_v3, %v2208_v57 }
  0x9a   : > { %17259 = vst [vmem:[#allocation28_spill] sm:$0xff] %v11409_v35  ;;  %v2215_v8 = vshrl.u32 %v17000_v9, %v11397_v19  ;;  %v2217_v10 = vshll.u32 %v17000_v9, %v2208_v57  ;;  %v2218_v41 = vshrl.u32 %v16985_v56, %v11397_v19  ;;  %v2668_v11 = vsel %vm2667_vm11, %v2666_v20, 0 }
  0x9b   : > { %17260 = vst [vmem:[#allocation29_spill] sm:$0xff] %v11412_v44  ;;  %v974_v26 = vsel %vm973_vm12, %v972_v21, 0  ;;  %v11443_v32 = vsel %vm17158_vm10, %v11409_v35, %v1773_v45  ;;  %v11449_v1 = vsel %vm17157_vm8, %v11393_v14, %v11409_v35  ;;  %v2222_v27 = vor.u32 %v2221_v49, %v2220_v46 }
  0x9c   : > { %17261 = vst [vmem:[#allocation30_spill] sm:$0xff] %v11418_v13  ;;  %v2225_v53 = vor.u32 %v2224_v51, %v2223_v47  ;;  %v1777_v57 = vsel %vm17175_vm9, %v1763_v36, 1326507024  ;;  %vm17075_vm13 = vcmp.lt.s32.totalorder %v11428_v52, 4  ;;  %v11454_v20 = vshll.u32 %v2664_v54, 8 }
  0x9d   : > { %17262 = vst [vmem:[#allocation31_spill] sm:$0xff] %v11428_v52  ;;  %v10136_v21 = vadd.s32 4294967169, %v1274_v59  ;;  %v11456_v48 = vor.u32 %v2212_v61, %v2211_v60  ;;  %v11458_v45 = vor.u32 %v2215_v8, %v2214_v5  ;;  %v2670_v2 = vand.u32 31, %v2668_v11 }
  0x9e   : > { %17263 = vst [vmem:[#allocation32_spill] sm:$0xff] %v11443_v32  ;;  %v11460_v18 = vand.u32 31, %v974_v26  ;;  %v11462_v58 = vor.u32 %v2218_v41, %v2217_v10  ;;  %vm17067_vm14 = vcmp.lt.s32.totalorder %v11428_v52, 1  ;;  %v11466_v46 = vand.u32 65535, %v11412_v44  ;;  %v936_v10 = vpop.permute.xlu2 %935 }
  0x9f   : > { %17264 = vst [vmem:[#allocation33_spill] sm:$0xff] %v11449_v1  ;;  %v1277_v36 = vand.u32 8388607, %v16984_v55  ;;  %v11472_v47 = vsel %vm17158_vm10, %v1760_v15, %v1777_v57  ;;  %vm17066_vm15 = vcmp.lt.s32.totalorder %v11428_v52, 3  ;;  %v2235_v49 = vsel %vm17075_vm13, %v2222_v27, 920167782 }
  0xa0   : > { %17265 = vst [vmem:[#allocation34_spill] sm:$0xff] %v11454_v20  ;;  %v2239_v51 = vsel %vm17075_vm13, %v2225_v53, 1326507024  ;;  %v11480_v54 = vshrl.u32 %v11412_v44, 16  ;;  %v11483_v59 = vand.u32 65535, %v11454_v20  ;;  %v1280_v60 = vadd.s32 1, %v10136_v21 }
  0xa1   : > { %17266 = vst [vmem:[#allocation35_spill] sm:$0xff] %v11456_v48  ;;  %v11490_v15 = vsel %vm17067_vm14, %v11456_v48, %v11458_v45  ;;  %v11492_v5 = vsub.s32 32, %v2670_v2  ;;  %v11495_v8 = vshrl.u32 %v11454_v20, 16  ;;  %v11498_v53 = vsub.s32 32, %v11460_v18 }
  0xa2   : > { %17267 = vst [vmem:[#allocation36_spill] sm:$0xff] %v11458_v45  ;;  %v11503_v41 = vsel %vm17066_vm15, %v11462_v58, %v2235_v49  ;;  %v11509_v57 = vsel %vm17067_vm14, %v11458_v45, %v11462_v58  ;;  %v11513_v21 = vsel %vm17066_vm15, %v2222_v27, %v2239_v51  ;;  %v11515_v55 = vshrl.u32 %v2668_v11, 5 }
  0xa3   : > { %17268 = vst [vmem:[#allocation37_spill] sm:$0xff] %v11462_v58  ;;  %v2673_v61 = vshll.u32 %v16995_v63, %v2670_v2  ;;  %v2676_v56 = vshll.u32 %v16998_v3, %v2670_v2  ;;  %v2679_v6 = vshll.u32 %v17000_v9, %v2670_v2  ;;  %v1278_v49 = vor.u32 8388608, %v1277_v36  ;;  %v871_v58 = vpop.permute.xlu0 %870 }
  0xa4   : > { %17269 = vst [vmem:[#allocation38_spill] sm:$0xff] %v11466_v46  ;;  %v17280_v20 = vmov 2102212464   ;;  %vm1281_vm0 = vcmp.gt.s32.totalorder %v1280_v60, 0  ;;  %v11523_v44 = vmul.f32 %v11275_v31, %v936_v10  ;;  %v2674_v27 = vshrl.u32 %v16998_v3, %v11492_v5 }
  0xa5   : > { %17270 = vst [vmem:[#allocation39_spill] sm:$0xff] %v11472_v47  ;;  %v2677_v11 = vshrl.u32 %v17000_v9, %v11492_v5  ;;  %v17283_v63 = vmov 1326507024   ;;  %v2680_v45 = vshrl.u32 %v17280_v20, %v11492_v5  ;;  %vm17028_vm1 = vcmp.lt.s32.totalorder %v11515_v55, 1 }
  0xa6   : > { %17271 = vst [vmem:[#allocation40_spill] sm:$0xff] %v11480_v54  ;;  %v992_v36 = vshrl.u32 %v17283_v63, %v11498_v53  ;;  %vm17022_vm2 = vcmp.lt.s32.totalorder %v11515_v55, 3  ;;  %vm17018_vm3 = vcmp.lt.s32.totalorder %v11515_v55, 4  ;;  %v1282_v10 = vsel %vm1281_vm0, %v1280_v60, 0 }
  0xa7   : > { %17272 = vst [vmem:[#allocation41_spill] sm:$0xff] %v11483_v59  ;;  %v2682_v59 = vshll.u32 %v17280_v20, %v2670_v2  ;;  %v11540_v3 = vshll.u32 %v1278_v49, 8  ;;  %v11542_v9 = vshrl.u32 %v974_v26, 5  ;;  %v3121_v54 = vand.u32 2139095040, %v11523_v44 }
  0xa8   : > { %17273 = vst [vmem:[#allocation42_spill] sm:$0xff] %v11490_v15  ;;  %v17285_v15 = vmov 2131351028   ;;  %v11553_v60 = vor.u32 %v2674_v27, %v2673_v61  ;;  %v11555_v49 = vor.u32 %v2677_v11, %v2676_v56  ;;  %v988_v38 = vshll.u32 %v17280_v20, %v11460_v18  ;;  %v11569_v61 = vld [vmem:[%s17290_s21] ss:$0 sm:$0xff]  ;;  %v774_v11 = vpop.f32.mrf.mxu0 }
  0xa9   : > { %17274 = vst [vmem:[#allocation43_spill] sm:$0xff] %v11492_v5  ;;  %v985_v52 = vshll.u32 %v17285_v15, %v11460_v18  ;;  %v11564_v34 = vmul.f32 %v11275_v31, %v871_v58  ;;  %vm997_vm7 = vcmp.lt.s32.totalorder %v11542_v9, 4  ;;  %v3122_v12 = vshrl.u32 %v3121_v54, 23 }
  0xaa   : > { %17275 = vst [vmem:[#allocation44_spill] sm:$0xff] %v11495_v8  ;;  %v17281_v8 = vmov 920167782   ;;  %v11576_v58 = vor.u32 %v2680_v45, %v2679_v6  ;;  %v11579_v14 = vand.u32 65535, %v11540_v3  ;;  %v11588_v0 = vshrl.u32 %v1282_v10, 5 }
  0xab   : > { %17276 = vst [vmem:[#allocation45_spill] sm:$0xff] %v11503_v41  ;;  %v2685_v43 = vshll.u32 %v17281_v8, %v2670_v2  ;;  %v2683_v51 = vshrl.u32 %v17281_v8, %v11492_v5  ;;  %v2686_v2 = vshrl.u32 %v17283_v63, %v11492_v5  ;;  %v991_v48 = vshll.u32 %v17281_v8, %v11460_v18 }
  0xac   : > { %17277 = vst [vmem:[#allocation46_spill] sm:$0xff] %v11509_v57  ;;  %v983_v41 = vshrl.u32 %v17285_v15, %v11498_v53  ;;  %v986_v5 = vshrl.u32 %v17280_v20, %v11498_v53  ;;  %v989_v19 = vshrl.u32 %v17281_v8, %v11498_v53  ;;  %v17288_v57 = vmov 2475754826  }
  0xad   : > { %17278 = vst [vmem:[#allocation47_spill] sm:$0xff] %v11513_v21  ;;  %v2684_v26 = vor.u32 %v2683_v51, %v2682_v59  ;;  %v993_v46 = vor.u32 %v992_v36, %v991_v48  ;;  %v982_v21 = vshll.u32 %v17288_v57, %v11460_v18  ;;  %v2687_v56 = vor.u32 %v2686_v2, %v2685_v43 }
  0xae   : > { %17279 = vst [vmem:[#allocation48_spill] sm:$0xff] %v11515_v55  ;;  %v1284_v59 = vand.u32 31, %v1282_v10  ;;  %v17291_v48 = vand.u32 2147483647, %v11308_v7  ;;  %v987_v36 = vor.u32 %v986_v5, %v985_v52  ;;  %v990_v33 = vor.u32 %v989_v19, %v988_v38 }
  0xaf   : > { %17282 = vst [vmem:[#allocation49_spill] sm:$0xff] %v11523_v44  ;;  %v11574_v51 = vor.u32 %v983_v41, %v982_v21  ;;  %v1007_v43 = vsel %vm997_vm7, %v993_v46, 1326507024  ;;  %v11584_v2 = vadd.f32 %v11569_v61, %v774_v11  ;;  %v11591_v52 = vshrl.u32 %v11540_v3, 16  ;;  %v881_v41 = vpop.permute.xlu1 %880 }
  0xb0   : > { %17284 = vst [vmem:[#allocation50_spill] sm:$0xff] %v11540_v3  ;;  %v969_v27 = vand.u32 8388607, %v17291_v48  ;;  %v2697_v48 = vsel %vm17018_vm3, %v2684_v26, 920167782  ;;  %v1119_v38 = vand.u32 2139095040, %v11564_v34  ;;  %v11611_v21 = vsel %vm17028_vm1, %v11553_v60, %v11555_v49 }
  0xb1   : > { %17286 = vst [vmem:[#allocation51_spill] sm:$0xff] %v11553_v60  ;;  %v2701_v6 = vsel %vm17018_vm3, %v2687_v56, 1326507024  ;;  %v11596_v19 = vsub.s32 32, %v1284_v59  ;;  %vm994_vm11 = vcmp.lt.s32.totalorder %v11542_v9, 1  ;;  %vm996_vm12 = vcmp.lt.s32.totalorder %v11542_v9, 3  ;;  %814 = vrot.lane.b32.xlu1 %v11584_v2, %s17203_s22 }
  0xb2   : > { %17287 = vst [vmem:[#allocation52_spill] sm:$0xff] %v11555_v49  ;;  %v970_v45 = vor.u32 8388608, %v969_v27  ;;  %v1006_v46 = vsel %vm994_vm11, %v11574_v51, %v987_v36  ;;  %v1008_v54 = vsel %vm996_vm12, %v990_v33, %v1007_v43  ;;  %v10172_v5 = vadd.s32 4294967169, %v3122_v12 }
  0xb3   : > { %17289 = vst [vmem:[#allocation53_spill] sm:$0xff] %v11564_v34  ;;  %v11616_v10 = vsel %vm17022_vm2, %v11576_v58, %v2697_v48  ;;  %v11622_v56 = vsel %vm17028_vm1, %v11555_v49, %v11576_v58  ;;  %v980_v12 = vshrl.u32 %v17288_v57, %v11498_v53  ;;  %v11628_v27 = vsel %vm17022_vm2, %v2684_v26, %v2701_v6 }
  0xb4   : > { %17292 = vst [vmem:[#allocation54_spill] sm:$0xff] %v11576_v58  ;;  %vm1305_vm0 = vcmp.lt.s32.totalorder %v11588_v0, 4  ;;  %vm995_vm3 = vcmp.lt.s32.totalorder %v11542_v9, 2  ;;  %v1120_v11 = vshrl.u32 %v1119_v38, 23  ;;  %v17301_v43 = vmov 683565275  }
  0xb5   : > { %17293 = vst [vmem:[#allocation55_spill] sm:$0xff] %v11579_v14  ;;  %v1287_v48 = vshll.u32 %v17301_v43, %v1284_v59  ;;  %v979_v60 = vshll.u32 %v17301_v43, %v11460_v18  ;;  %v11637_v49 = vsel %vm995_vm3, %v1006_v46, %v1008_v54  ;;  %v11640_v58 = vmul.f32 %v11275_v31, %v881_v41 }
  0xb6   : > { %17294 = vst [vmem:[#allocation56_spill] sm:$0xff] %v11584_v2  ;;  %v1296_v26 = vshll.u32 %v17280_v20, %v1284_v59  ;;  %v1297_v6 = vshrl.u32 %v17281_v8, %v11596_v19  ;;  %v3128_v38 = vadd.s32 1, %v10172_v5  ;;  %v1300_v18 = vshrl.u32 %v17283_v63, %v11596_v19 }
  0xb7   : > { %17295 = vst [vmem:[#allocation57_spill] sm:$0xff] %v11591_v52  ;;  %vm1302_vm2 = vcmp.lt.s32.totalorder %v11588_v0, 1  ;;  %v981_v46 = vor.u32 %v980_v12, %v979_v60  ;;  %v1288_v54 = vshrl.u32 %v17288_v57, %v11596_v19  ;;  %v1003_v41 = vsel %vm997_vm7, %v990_v33, 920167782 }
  0xb8   : > { %17296 = vst [vmem:[#allocation58_spill] sm:$0xff] %v11596_v19  ;;  %v1291_v5 = vshrl.u32 %v17285_v15, %v11596_v19  ;;  %v1293_v55 = vshll.u32 %v17285_v15, %v1284_v59  ;;  %v1427_v22 = vand.u32 2139095040, %v11640_v58  ;;  %v1294_v60 = vshrl.u32 %v17280_v20, %v11596_v19 }
  0xb9   : > { %17297 = vst [vmem:[#allocation59_spill] sm:$0xff] %v11611_v21  ;;  %v1299_v21 = vshll.u32 %v17281_v8, %v1284_v59  ;;  %v1298_v12 = vor.u32 %v1297_v6, %v1296_v26  ;;  %vm3129_vm1 = vcmp.gt.s32.totalorder %v3128_v38, 0  ;;  %v1002_v16 = vsel %vm994_vm11, %v981_v46, %v11574_v51 }
  0xba   : > { %17298 = vst [vmem:[#allocation60_spill] sm:$0xff] %v11616_v10  ;;  %v10133_v10 = vadd.s32 4294967169, %v1120_v11  ;;  %v999_v11 = vsel %vm997_vm7, %v987_v36, 2102212464  ;;  %v11672_v35 = vor.u32 %v1288_v54, %v1287_v48  ;;  %v978_v1 = vshrl.u32 %v17301_v43, %v11498_v53 }
  0xbb   : > { %17299 = vst [vmem:[#allocation61_spill] sm:$0xff] %v11622_v56  ;;  %v11645_v56 = vshll.u32 %v970_v45, 8  ;;  %v1014_v45 = vshrl.u32 %v11637_v49, 16  ;;  %v1301_v33 = vor.u32 %v1300_v18, %v1299_v21  ;;  %v17305_v21 = vand.u32 2147483647, %v11523_v44  ;;  %v901_v44 = vpop.permute.xlu1 %900 }
  0xbc   : > { %17300 = vst [vmem:[#allocation62_spill] sm:$0xff] %v11628_v27  ;;  %v1290_v27 = vshll.u32 %v17288_v57, %v1284_v59  ;;  %v1004_v59 = vsel %vm996_vm12, %v987_v36, %v1003_v41  ;;  %v1126_v6 = vadd.s32 1, %v10133_v10  ;;  %v3130_v13 = vsel %vm3129_vm1, %v3128_v38, 0 }
  0xbd   : > { %17302 = vst [vmem:[#allocation63_spill] sm:$0xff] %v11640_v58  ;;  %v1011_v30 = vand.u32 65535, %v11645_v56  ;;  %v3125_v18 = vand.u32 8388607, %v17305_v21  ;;  %v1428_v32 = vshrl.u32 %v1427_v22, 23  ;;  %v998_v42 = vsel %vm994_vm11, %v978_v1, %v981_v46 }
  0xbe   : > { %17303 = vst [vmem:[#allocation64_spill] sm:$0xff] %v11672_v35  ;;  %v11678_v47 = vor.u32 %v1291_v5, %v1290_v27  ;;  %v1000_v36 = vsel %vm996_vm12, %v11574_v51, %v999_v11  ;;  %v1005_v53 = vsel %vm995_vm3, %v1002_v16, %v1004_v59  ;;  %v1013_v48 = vand.u32 65535, %v11637_v49 }
  0xbf   : > { %v11676_v26 = vmul.u32 %v1014_v45, %v1011_v30  ;;  %v11690_v10 = vor.u32 %v1294_v60, %v1293_v55  ;;  %vm1304_vm7 = vcmp.lt.s32.totalorder %v11588_v0, 3  ;;  %v1311_v27 = vsel %vm1305_vm0, %v1298_v12, 920167782 }
  0xc0   : > { %17304 = vst [vmem:[#allocation65_spill] sm:$0xff] %v11678_v47  ;;  %v1315_v22 = vsel %vm1305_vm0, %v1301_v33, 1326507024  ;;  %v1012_v1 = vshrl.u32 %v11645_v56, 16  ;;  %v3132_v51 = vand.u32 31, %v3130_v13  ;;  %vm1127_vm1 = vcmp.gt.s32.totalorder %v1126_v6, 0 }
  0xc1   : > { %17306 = vst [vmem:[#allocation66_spill] sm:$0xff] %v11690_v10  ;;  %v1019_v38 = vshll.u32 %v11676_v26, 16  ;;  %v11701_v16 = vsel %vm995_vm3, %v998_v42, %v1000_v36  ;;  %v1035_v55 = vand.u32 65535, %v1005_v53  ;;  %v3126_v49 = vor.u32 8388608, %v3125_v18 }
  0xc2   : > { %v10139_v46 = vadd.s32 4294967169, %v1428_v32  ;;  %v11707_v54 = vsel %vm1302_vm2, %v11672_v35, %v11678_v47  ;;  %v1015_v41 = vmul.u32 %v1013_v48, %v1011_v30  ;;  %v1036_v5 = vshrl.u32 %v1005_v53, 16  ;;  %v804_v35 = vpop.f32.mrf.mxu3 }
  0xc3   : > { %17307 = vst [vmem:[#allocation67_spill] sm:$0xff] %v11707_v54  ;;  %v11713_v33 = vsel %vm1304_vm7, %v11690_v10, %v1311_v27  ;;  %v11719_v9 = vsel %vm1302_vm2, %v11678_v47, %v11690_v10  ;;  %v11721_v42 = vmul.u32 %v1013_v48, %v1012_v1  ;;  %v1128_v32 = vsel %vm1127_vm1, %v1126_v6, 0 }
  0xc4   : > { %v11725_v11 = vsel %vm1304_vm7, %v1298_v12, %v1315_v22  ;;  %vm1023_vm3 = vc.u32 %v1015_v41, %v1019_v38  ;;  %v11729_v21 = vsub.s32 32, %v3132_v51  ;;  %v1018_v18 = vmul.u32 %v1014_v45, %v1012_v1 }
  0xc5   : > { %v11731_v36 = vmul.u32 %v1035_v55, %v1011_v30  ;;  %v11733_v53 = vshll.u32 %v3126_v49, 8  ;;  %v1434_v27 = vadd.s32 1, %v10139_v46  ;;  %v11735_v60 = vmul.u32 %v1036_v5, %v1011_v30 }
  0xc6   : > { %17308 = vst [vmem:[#allocation68_spill] sm:$0xff] %v11729_v21  ;;  %v11737_v48 = vmul.u32 %v1035_v55, %v1012_v1  ;;  %v17310_v6 = vand.u32 2147483647, %v11640_v58  ;;  %v11741_v22 = vand.u32 31, %v1128_v32  ;;  %v17311_v24 = vmov 0  }
  0xc7   : > { %17309 = vst [vmem:[#allocation69_spill] sm:$0xff] %v11733_v53  ;;  %v1024_v23 = vsel %vm1023_vm3, 1, %v17311_v24  ;;  %v11745_v45 = vmul.u32 %v1036_v5, %v1012_v1  ;;  %v11747_v25 = vshrl.u32 %v3130_v13, 5  ;;  %v3144_v49 = vshll.u32 %v17280_v20, %v3132_v51 }
  0xc8   : > { %v1431_v12 = vand.u32 8388607, %v17310_v6  ;;  %v3145_v30 = vshrl.u32 %v17281_v8, %v11729_v21  ;;  %v3147_v55 = vshll.u32 %v17281_v8, %v3132_v51  ;;  %v3148_v46 = vshrl.u32 %v17283_v63, %v11729_v21 }
  0xc9   : > { %17312 = vst [vmem:[#allocation70_spill] sm:$0xff] %v11747_v25  ;;  %v3138_v6 = vshll.u32 %v17288_v57, %v3132_v51  ;;  %v3139_v59 = vshrl.u32 %v17285_v15, %v11729_v21  ;;  %vm1435_vm11 = vcmp.gt.s32.totalorder %v1434_v27, 0  ;;  %v11759_v1 = vmul.f32 %v11275_v31, %v901_v44 }
  0xca   : > { %v3141_v13 = vshll.u32 %v17285_v15, %v3132_v51  ;;  %v3142_v5 = vshrl.u32 %v17280_v20, %v11729_v21  ;;  %v1432_v50 = vor.u32 8388608, %v1431_v12  ;;  %v11765_v58 = vsub.s32 32, %v11741_v22 }
  0xcb   : > { %17313 = vst [vmem:[#allocation71_spill] sm:$0xff] %v11759_v1  ;;  %v3135_v28 = vshll.u32 %v17301_v43, %v3132_v51  ;;  %v3136_v37 = vshrl.u32 %v17288_v57, %v11729_v21  ;;  %v11771_v39 = vand.u32 65535, %v11733_v53  ;;  %v11774_v44 = vshrl.u32 %v11733_v53, 16 }
  0xcc   : > { %v11776_v29 = vadd.s32 %v1019_v38, %v1015_v41  ;;  %v3146_v40 = vor.u32 %v3145_v30, %v3144_v49  ;;  %v3149_v17 = vor.u32 %v3148_v46, %v3147_v55  ;;  %v1436_v62 = vsel %vm1435_vm11, %v1434_v27, 0  ;;  %v896_v55 = vpop.permute.xlu0 %895 }
  0xcd   : > { %17314 = vst [vmem:[#allocation72_spill] sm:$0xff] %v11771_v39  ;;  %v11778_v12 = vadd.s32 %v1024_v23, %v1018_v18  ;;  %v11780_v4 = vor.u32 %v3139_v59, %v3138_v6  ;;  %vm17057_vm12 = vcmp.lt.s32.totalorder %v11747_v25, 4  ;;  %v2043_v51 = vand.u32 2139095040, %v11759_v1 }
  0xce   : > { %17315 = vst [vmem:[#allocation73_spill] sm:$0xff] %v11774_v44  ;;  %v11784_v21 = vor.u32 %v3142_v5, %v3141_v13  ;;  %v11786_v3 = vshll.u32 %v1432_v50, 8  ;;  %v17051_v53 = vand.u32 2147483647, %v11564_v34  ;;  %v1146_v38 = vshrl.u32 %v17283_v63, %v11765_v58 }
  0xcf   : > { %17316 = vst [vmem:[#allocation74_spill] sm:$0xff] %v11780_v4  ;;  %v11791_v41 = vor.u32 %v3136_v37, %v3135_v28  ;;  %vm17065_vm1 = vcmp.lt.s32.totalorder %v11747_v25, 1  ;;  %vm17058_vm3 = vcmp.lt.s32.totalorder %v11747_v25, 3  ;;  %v1438_v23 = vand.u32 31, %v1436_v62 }
  0xd0   : > { %17317 = vst [vmem:[#allocation75_spill] sm:$0xff] %v11784_v21  ;;  %v11797_v59 = vsel %vm17057_vm12, %v3146_v40, 920167782  ;;  %v3163_v50 = vsel %vm17057_vm12, %v3149_v17, 1326507024  ;;  %v11801_v18 = vshrl.u32 %v1128_v32, 5  ;;  %v1145_v27 = vshll.u32 %v17281_v8, %v11741_v22 }
  0xd1   : > { %17318 = vst [vmem:[#allocation76_spill] sm:$0xff] %v11786_v3  ;;  %v1137_v28 = vshrl.u32 %v17285_v15, %v11765_v58  ;;  %v1140_v37 = vshrl.u32 %v17280_v20, %v11765_v58  ;;  %v1143_v49 = vshrl.u32 %v17281_v8, %v11765_v58  ;;  %v2044_v30 = vshrl.u32 %v2043_v51, 23 }
  0xd2   : > { %17319 = vst [vmem:[#allocation77_spill] sm:$0xff] %v11791_v41  ;;  %v11815_v17 = vsel %vm17065_vm1, %v11780_v4, %v11784_v21  ;;  %v11818_v32 = vand.u32 65535, %v11786_v3  ;;  %v1123_v46 = vand.u32 8388607, %v17051_v53  ;;  %v1147_v6 = vor.u32 %v1146_v38, %v1145_v27 }
  0xd3   : > { %17320 = vst [vmem:[#allocation78_spill] sm:$0xff] %v11797_v59  ;;  %v11822_v13 = vsub.s32 32, %v1438_v23  ;;  %v1136_v5 = vshll.u32 %v17288_v57, %v11741_v22  ;;  %v1139_v51 = vshll.u32 %v17285_v15, %v11741_v22  ;;  %v1142_v44 = vshll.u32 %v17280_v20, %v11741_v22 }
  0xd4   : > { %17321 = vst [vmem:[#allocation79_spill] sm:$0xff] %v11815_v17  ;;  %v11832_v39 = vsel %vm17058_vm3, %v3146_v40, %v3163_v50  ;;  %v11834_v17 = vshrl.u32 %v1436_v62, 5  ;;  %vm1151_vm11 = vcmp.lt.s32.totalorder %v11801_v18, 4  ;;  %v11838_v38 = vmul.f32 %v11275_v31, %v896_v55 }
  0xd5   : > { %17322 = vst [vmem:[#allocation80_spill] sm:$0xff] %v11818_v32  ;;  %v11840_v27 = vor.u32 %v1137_v28, %v1136_v5  ;;  %v1141_v53 = vor.u32 %v1140_v37, %v1139_v51  ;;  %v1144_v21 = vor.u32 %v1143_v49, %v1142_v44  ;;  %v10151_v59 = vadd.s32 4294967169, %v2044_v30 }
  0xd6   : > { %17323 = vst [vmem:[#allocation81_spill] sm:$0xff] %v11822_v13  ;;  %v1441_v41 = vshll.u32 %v17301_v43, %v1438_v23  ;;  %v1444_v4 = vshll.u32 %v17288_v57, %v1438_v23  ;;  %v1134_v40 = vshrl.u32 %v17288_v57, %v11765_v58  ;;  %v1161_v62 = vsel %vm1151_vm11, %v1147_v6, 1326507024 }
  0xd7   : > { %17324 = vst [vmem:[#allocation82_spill] sm:$0xff] %v11832_v39  ;;  %v1447_v50 = vshll.u32 %v17285_v15, %v1438_v23  ;;  %v1450_v55 = vshll.u32 %v17280_v20, %v1438_v23  ;;  %v1451_v28 = vshrl.u32 %v17281_v8, %v11822_v13  ;;  %v1124_v37 = vor.u32 8388608, %v1123_v46  ;;  %v916_v46 = vpop.permute.xlu1 %915 }
  0xd8   : > { %17325 = vst [vmem:[#allocation83_spill] sm:$0xff] %v11834_v17  ;;  %v1133_v44 = vshll.u32 %v17301_v43, %v11741_v22  ;;  %vm1148_vm12 = vcmp.lt.s32.totalorder %v11801_v18, 1  ;;  %vm1150_vm3 = vcmp.lt.s32.totalorder %v11801_v18, 3  ;;  %v1889_v49 = vand.u32 2139095040, %v11838_v38 }
  0xd9   : > { %17326 = vst [vmem:[#allocation84_spill] sm:$0xff] %v11838_v38  ;;  %v1160_v30 = vsel %vm1148_vm12, %v11840_v27, %v1141_v53  ;;  %v1162_v6 = vsel %vm1150_vm3, %v1144_v21, %v1161_v62  ;;  %v2050_v51 = vadd.s32 1, %v10151_v59  ;;  %v1442_v22 = vshrl.u32 %v17288_v57, %v11822_v13  ;;  %v794_v59 = vpop.f32.mrf.mxu2 }
  0xda   : > { %v1453_v39 = vshll.u32 %v17281_v8, %v1438_v23  ;;  %v1454_v25 = vshrl.u32 %v17283_v63, %v11822_v13  ;;  %v1135_v32 = vor.u32 %v1134_v40, %v1133_v44  ;;  %v1445_v2 = vshrl.u32 %v17285_v15, %v11822_v13  ;;  %v776_v44 = vpop.f32.mrf.mxu0 }
  0xdb   : > { %v1448_v47 = vshrl.u32 %v17280_v20, %v11822_v13  ;;  %vm1456_vm1 = vcmp.lt.s32.totalorder %v11834_v17, 1  ;;  %vm1459_vm15 = vcmp.lt.s32.totalorder %v11834_v17, 4  ;;  %vm1149_vm14 = vcmp.lt.s32.totalorder %v11801_v18, 2 }
  0xdc   : > { %v1452_v62 = vor.u32 %v1451_v28, %v1450_v55  ;;  %v11877_v23 = vsel %vm1149_vm14, %v1160_v30, %v1162_v6  ;;  %v1890_v5 = vshrl.u32 %v1889_v49, 23  ;;  %v11880_v40 = vmul.f32 %v11275_v31, %v916_v46  ;;  %v784_v55 = vpop.f32.mrf.mxu1 }
  0xdd   : > { %v1157_v13 = vsel %vm1151_vm11, %v1144_v21, 920167782  ;;  %v11884_v34 = vshll.u32 %v1124_v37, 8  ;;  %v17329_v7 = vand.u32 2147483647, %v11759_v1  ;;  %vm2051_vm13 = vcmp.gt.s32.totalorder %v2050_v51, 0 }
  0xde   : > { %17327 = vst [vmem:[#allocation85_spill] sm:$0xff] %v11880_v40  ;;  %v1455_v28 = vor.u32 %v1454_v25, %v1453_v39  ;;  %v1132_v30 = vshrl.u32 %v17301_v43, %v11765_v58  ;;  %v1153_v49 = vsel %vm1151_vm11, %v1141_v53, 2102212464  ;;  %v1156_v6 = vsel %vm1148_vm12, %v1135_v32, %v11840_v27 }
  0xdf   : > { %17328 = vst [vmem:[#allocation86_spill] sm:$0xff] %v11884_v34  ;;  %v2047_v10 = vand.u32 8388607, %v17329_v7  ;;  %v1168_v21 = vshrl.u32 %v11877_v23, 16  ;;  %v11897_v37 = vadd.f32 %v11569_v61, %v794_v59  ;;  %v11900_v7 = vadd.f32 %v11569_v61, %v776_v44 }
  0xe0   : > { %v11903_v25 = vadd.f32 %v11569_v61, %v804_v35  ;;  %v1158_v39 = vsel %vm1150_vm3, %v1141_v53, %v1157_v13  ;;  %v11907_v58 = vsel %vm2051_vm13, %v2050_v51, 0  ;;  %v10148_v46 = vadd.s32 4294967169, %v1890_v5 }
  0xe1   : > { %17330 = vst [vmem:[#allocation87_spill] sm:$0xff] %v11897_v37  ;;  %v2505_v1 = vand.u32 2139095040, %v11880_v40  ;;  %v11910_v19 = vor.u32 %v1442_v22, %v1441_v41  ;;  %vm17182_vm11 = vcmp.lt.s32.totalorder %v11834_v17, 3  ;;  %v1165_v59 = vand.u32 65535, %v11884_v34  ;;  %830 = vrot.lane.b32.xlu0 %v11897_v37, %s17203_s22  ;;  %816 = vrot.lane.b32.xlu2 %v11900_v7, %s17203_s22 }
  0xe2   : > { %17331 = vst [vmem:[#allocation88_spill] sm:$0xff] %v11900_v7  ;;  %v2048_v52 = vor.u32 8388608, %v2047_v10  ;;  %v11918_v35 = vor.u32 %v1445_v2, %v1444_v4  ;;  %v11920_v53 = vor.u32 %v1448_v47, %v1447_v50  ;;  %v1152_v13 = vsel %vm1148_vm12, %v1132_v30, %v1135_v32  ;;  %838 = vrot.lane.b32.xlu1 %v11903_v25, %s17203_s22 }
  0xe3   : > { %17332 = vst [vmem:[#allocation89_spill] sm:$0xff] %v11903_v25  ;;  %v1154_v41 = vsel %vm1150_vm3, %v11840_v27, %v1153_v49  ;;  %v1465_v10 = vsel %vm1459_vm15, %v1452_v62, 920167782  ;;  %v11933_v5 = vsel %vm1149_vm14, %v1156_v6, %v1158_v39  ;;  %v11935_v4 = vmul.u32 %v1168_v21, %v1165_v59 }
  0xe4   : > { %17333 = vst [vmem:[#allocation90_spill] sm:$0xff] %v11910_v19  ;;  %v2054_v47 = vand.u32 31, %v11907_v58  ;;  %v1469_v2 = vsel %vm1459_vm15, %v1455_v28, 1326507024  ;;  %v11941_v32 = vshrl.u32 %v11786_v3, 16  ;;  %v1896_v27 = vadd.s32 1, %v10148_v46  ;;  %v786_v39 = vpop.f32.mrf.mxu1  ;;  %v911_v3 = vpop.permute.xlu0 %910 }
  0xe5   : > { %17334 = vst [vmem:[#allocation91_spill] sm:$0xff] %v11918_v35  ;;  %v2506_v50 = vshrl.u32 %v2505_v1, 23  ;;  %v11945_v51 = vsel %vm1149_vm14, %v1152_v13, %v1154_v41  ;;  %v1167_v22 = vand.u32 65535, %v11877_v23  ;;  %v11948_v44 = vshll.u32 %v2048_v52, 8 }
  0xe6   : > { %17335 = vst [vmem:[#allocation92_spill] sm:$0xff] %v11920_v53  ;;  %v11951_v30 = vadd.f32 %v11569_v61, %v784_v55  ;;  %v11957_v28 = vsel %vm1456_vm1, %v11910_v19, %v11918_v35  ;;  %v11962_v1 = vsel %vm17182_vm11, %v11920_v53, %v1465_v10  ;;  %v11968_v52 = vsel %vm1456_vm1, %v11918_v35, %v11920_v53  ;;  %v796_v35 = vpop.f32.mrf.mxu2 }
  0xe7   : > { %17336 = vst [vmem:[#allocation93_spill] sm:$0xff] %v11941_v32  ;;  %v1189_v18 = vand.u32 65535, %v11933_v5  ;;  %v11973_v23 = vsel %vm17182_vm11, %v1452_v62, %v1469_v2  ;;  %v1173_v55 = vshll.u32 %v11935_v4, 16  ;;  %v11976_v49 = vsub.s32 32, %v2054_v47 }
  0xe8   : > { %17337 = vst [vmem:[#allocation94_spill] sm:$0xff] %v11945_v51  ;;  %v1166_v46 = vshrl.u32 %v11884_v34, 16  ;;  %vm1897_vm13 = vcmp.gt.s32.totalorder %v1896_v27, 0  ;;  %v10160_v41 = vadd.s32 4294967169, %v2506_v50  ;;  %v1169_v10 = vmul.u32 %v1167_v22, %v1165_v59 }
  0xe9   : > { %17338 = vst [vmem:[#allocation95_spill] sm:$0xff] %v11948_v44  ;;  %v1190_v25 = vshrl.u32 %v11933_v5, 16  ;;  %v11984_v62 = vand.u32 65535, %v11948_v44  ;;  %v11987_v2 = vshrl.u32 %v11948_v44, 16  ;;  %822 = vrot.lane.b32.xlu2 %v11951_v30, %s17203_s22  ;;  %v11993_v13 = vmul.u32 %v1189_v18, %v1165_v59 }
  0xea   : > { %17339 = vst [vmem:[#allocation96_spill] sm:$0xff] %v11951_v30  ;;  %v11991_v6 = vmul.u32 %v1167_v22, %v1166_v46  ;;  %v1172_v19 = vmul.u32 %v1168_v21, %v1166_v46  ;;  %v11996_v50 = vadd.f32 %v11569_v61, %v786_v39  ;;  %vm11998_vm14 = vc.u32 %v1169_v10, %v1173_v55 }
  0xeb   : > { %17340 = vst [vmem:[#allocation97_spill] sm:$0xff] %v11957_v28  ;;  %v2067_v44 = vshrl.u32 %v17281_v8, %v11976_v49  ;;  %v1898_v32 = vsel %vm1897_vm13, %v1896_v27, 0  ;;  %v2058_v21 = vshrl.u32 %v17288_v57, %v11976_v49  ;;  %v2512_v22 = vadd.s32 1, %v10160_v41 }
  0xec   : > { %17341 = vst [vmem:[#allocation98_spill] sm:$0xff] %v11962_v1  ;;  %v12010_v37 = vmul.f32 %v11275_v31, %v911_v3  ;;  %v12013_v39 = vadd.f32 %v11569_v61, %v796_v35  ;;  %824 = vrot.lane.b32.xlu0 %v11996_v50, %s17203_s22  ;;  %v2061_v30 = vshrl.u32 %v17285_v15, %v11976_v49  ;;  %v12027_v31 = vshrl.u32 %v11907_v58, 5 }
  0xed   : > { %17342 = vst [vmem:[#allocation99_spill] sm:$0xff] %v11968_v52  ;;  %v2066_v27 = vshll.u32 %v17280_v20, %v2054_v47  ;;  %v2070_v41 = vshrl.u32 %v17283_v63, %v11976_v49  ;;  %v2057_v3 = vshll.u32 %v17301_v43, %v2054_v47  ;;  %v12030_v35 = vand.u32 31, %v1898_v32 }
  0xee   : > { %17343 = vst [vmem:[#allocation100_spill] sm:$0xff] %v11973_v23  ;;  %832 = vrot.lane.b32.xlu1 %v12013_v39, %s17203_s22  ;;  %v2060_v53 = vshll.u32 %v17288_v57, %v2054_v47  ;;  %v2063_v52 = vshll.u32 %v17285_v15, %v2054_v47  ;;  %v2069_v28 = vshll.u32 %v17281_v8, %v2054_v47  ;;  %vm2513_vm12 = vcmp.gt.s32.totalorder %v2512_v22, 0 }
  0xef   : > { %17344 = vst [vmem:[#allocation101_spill] sm:$0xff] %v11976_v49  ;;  %v2068_v23 = vor.u32 %v2067_v44, %v2066_v27  ;;  %v12040_v58 = vor.u32 %v2058_v21, %v2057_v3  ;;  %v12047_v7 = vmul.u32 %v1189_v18, %v1166_v46  ;;  %vm17118_vm3 = vcmp.lt.s32.totalorder %v12027_v31, 4  ;;  %v779_v18 = vpop.f32.mrf.mxu0 }
  0xf0   : > { %17345 = vst [vmem:[#allocation102_spill] sm:$0xff] %v11984_v62  ;;  %v12043_v1 = vor.u32 %v2061_v30, %v2060_v53  ;;  %v12051_v47 = vsub.s32 32, %v12030_v35  ;;  %v17105_v44 = vand.u32 2147483647, %v11880_v40  ;;  %v12054_v5 = vadd.s32 %v1173_v55, %v1169_v10 }
  0xf1   : > { %17346 = vst [vmem:[#allocation103_spill] sm:$0xff] %v11987_v2  ;;  %v17350_v2 = vand.u32 2147483647, %v11838_v38  ;;  %v12024_v38 = vmul.u32 %v1190_v25, %v1165_v59  ;;  %v1178_v59 = vsel %vm11998_vm14, 1, %v17311_v24  ;;  %v12056_v21 = vmul.u32 %v1190_v25, %v1166_v46 }
  0xf2   : > { %17347 = vst [vmem:[#allocation104_spill] sm:$0xff] %v11996_v50  ;;  %v2081_v53 = vsel %vm17118_vm3, %v2068_v23, 920167782  ;;  %v2514_v30 = vsel %vm2513_vm12, %v2512_v22, 0  ;;  %vm17112_vm13 = vcmp.lt.s32.totalorder %v12027_v31, 1  ;;  %vm17111_vm14 = vcmp.lt.s32.totalorder %v12027_v31, 3 }
  0xf3   : > { %v1893_v62 = vand.u32 8388607, %v17350_v2  ;;  %17351 = vst [vmem:[#allocation105_spill] sm:$0xff] %v12010_v37  ;;  %v2064_v2 = vshrl.u32 %v17280_v20, %v11976_v49  ;;  %v2351_v49 = vand.u32 2139095040, %v12010_v37  ;;  %v12068_v55 = vsel %vm17112_vm13, %v12040_v58, %v12043_v1 }
  0xf4   : > { %17352 = vst [vmem:[#allocation106_spill] sm:$0xff] %v12013_v39  ;;  %v2071_v39 = vor.u32 %v2070_v41, %v2069_v28  ;;  %v1904_v10 = vshrl.u32 %v17288_v57, %v12051_v47  ;;  %v12089_v22 = vand.u32 31, %v2514_v30  ;;  %v12098_v27 = vadd.f32 %v11569_v61, %v779_v18 }
  0xf5   : > { %17353 = vst [vmem:[#allocation107_spill] sm:$0xff] %v12027_v31  ;;  %v12045_v17 = vor.u32 %v2064_v2, %v2063_v52  ;;  %v1894_v50 = vor.u32 8388608, %v1893_v62  ;;  %v12060_v52 = vadd.s32 %v1178_v59, %v1172_v19  ;;  %v2352_v28 = vshrl.u32 %v2351_v49, 23 }
  0xf6   : > { %17354 = vst [vmem:[#allocation108_spill] sm:$0xff] %v12040_v58  ;;  %v2085_v19 = vsel %vm17118_vm3, %v2071_v39, 1326507024  ;;  %v2509_v62 = vand.u32 8388607, %v17105_v44  ;;  %v1907_v2 = vshrl.u32 %v17285_v15, %v12051_v47  ;;  %v1913_v39 = vshrl.u32 %v17281_v8, %v12051_v47  ;;  %818 = vrot.lane.b32.xlu0 %v12098_v27, %s17203_s22 }
  0xf7   : > { %17355 = vst [vmem:[#allocation109_spill] sm:$0xff] %v12043_v1  ;;  %v12074_v25 = vsel %vm17112_vm13, %v12043_v1, %v12045_v17  ;;  %v12078_v46 = vshll.u32 %v1894_v50, 8  ;;  %v12083_v49 = vsel %vm17111_vm14, %v12045_v17, %v2081_v53  ;;  %v1910_v50 = vshrl.u32 %v17280_v20, %v12051_v47  ;;  %v12130_v1 = vpop.f32.mrf.mxu3 }
  0xf8   : > { %17356 = vst [vmem:[#allocation110_spill] sm:$0xff] %v12045_v17  ;;  %v12102_v41 = vsel %vm17111_vm14, %v2068_v23, %v2085_v19  ;;  %v12104_v3 = vshrl.u32 %v1898_v32, 5  ;;  %v1903_v59 = vshll.u32 %v17301_v43, %v12030_v35  ;;  %v10157_v53 = vadd.s32 4294967169, %v2352_v28  ;;  %v10633_v32 = vld [vmem:[%s16955_s5 + $0x38] sm:$0xff] }
  0xf9   : > { %17357 = vst [vmem:[#allocation111_spill] sm:$0xff] %v12051_v47  ;;  %v1906_v44 = vshll.u32 %v17288_v57, %v12030_v35  ;;  %v1909_v40 = vshll.u32 %v17285_v15, %v12030_v35  ;;  %v1912_v18 = vshll.u32 %v17280_v20, %v12030_v35  ;;  %v10641_v23 = vld [vmem:[%s16956_s6 + $0x38] sm:$0xff]  ;;  %v1916_v19 = vshrl.u32 %v17283_v63, %v12051_v47 }
  0xfa   : > { %17358 = vst [vmem:[#allocation112_spill] sm:$0xff] %v12068_v55  ;;  %v12123_v28 = vor.u32 %v1904_v10, %v1903_v59  ;;  %v2510_v58 = vor.u32 8388608, %v2509_v62  ;;  %6099 = vmatpush.bf16.msrb.mxu2 %v10633_v32  ;;  %6002 = vmatpush.bf16.msrb.mxu1 %v10641_v23  ;;  %v10632_v10 = vld [vmem:[%s16955_s5 + $0x30] sm:$0xff]  ;;  %v1915_v59 = vshll.u32 %v17281_v8, %v12030_v35  ;;  %vm17129_vm12 = vcmp.lt.s32.totalorder %v12104_v3, 1 }
  0xfb   : > { %17359 = vst [vmem:[#allocation113_spill] sm:$0xff] %v12074_v25  ;;  %v12128_v25 = vsub.s32 32, %v12089_v22  ;;  %v12133_v17 = vor.u32 %v1907_v2, %v1906_v44  ;;  %v12135_v55 = vor.u32 %v1910_v50, %v1909_v40  ;;  %v10640_v62 = vld [vmem:[%s16956_s6 + $0x30] sm:$0xff]  ;;  %v12148_v44 = vand.u32 65535, %v12078_v46 }
  0xfc   : > { %17360 = vst [vmem:[#allocation114_spill] sm:$0xff] %v12078_v46  ;;  %v12151_v40 = vshrl.u32 %v12078_v46, 16  ;;  %v2358_v2 = vadd.s32 1, %v10157_v53  ;;  %vm17149_vm14 = vcmp.lt.s32.totalorder %v12104_v3, 3  ;;  %vm17155_vm13 = vcmp.lt.s32.totalorder %v12104_v3, 4 }
  0xfd   : > { %17361 = vst [vmem:[#allocation115_spill] sm:$0xff] %v12083_v49  ;;  %v12137_v49 = vor.u32 %v1913_v39, %v1912_v18  ;;  %v17370_v50 = vand.u32 2147483647, %v12010_v37  ;;  %v931_v18 = vpop.permute.xlu1 %930  ;;  %v1917_v32 = vor.u32 %v1916_v19, %v1915_v59  ;;  %v2529_v35 = vshrl.u32 %v17281_v8, %v12128_v25  ;;  %v10631_v37 = vld [vmem:[%s16955_s5 + $0x28] sm:$0xff] }
  0xfe   : > { %17362 = vst [vmem:[#allocation116_spill] sm:$0xff] %v12098_v27  ;;  %v2532_v23 = vshrl.u32 %v17283_v63, %v12128_v25  ;;  %v12168_v53 = vsel %vm17129_vm12, %v12123_v28, %v12133_v17  ;;  %v12177_v19 = vsel %vm17129_vm12, %v12133_v17, %v12135_v55  ;;  %v12179_v59 = vshrl.u32 %v2514_v30, 5  ;;  %6100 = vmatpush.bf16.msrb.mxu2 %v10632_v10  ;;  %v789_v10 = vpop.f32.mrf.mxu1 }
  0xff   : > { %17363 = vst [vmem:[#allocation117_spill] sm:$0xff] %v12102_v41  ;;  %v2355_v39 = vand.u32 8388607, %v17370_v50  ;;  %v12162_v41 = vshll.u32 %v2510_v58, 8  ;;  %v1927_v50 = vsel %vm17155_vm13, %v12137_v49, 920167782  ;;  %v926_v58 = vpop.permute.xlu0 %925  ;;  %6003 = vmatpush.bf16.msrb.mxu1 %v10640_v62  ;;  %v2528_v31 = vshll.u32 %v17280_v20, %v12089_v22 }
 0x100   : > { %17364 = vst [vmem:[#allocation118_spill] sm:$0xff] %v12123_v28  ;;  %v2531_v46 = vshll.u32 %v17281_v8, %v12089_v22  ;;  %vm2359_vm3 = vcmp.gt.s32.totalorder %v2358_v2, 0  ;;  %v10639_v62 = vld [vmem:[%s16956_s6 + $0x28] sm:$0xff]  ;;  %v2520_v28 = vshrl.u32 %v17288_v57, %v12128_v25  ;;  %v2526_v47 = vshrl.u32 %v17280_v20, %v12128_v25 }
 0x101   : > { %17365 = vst [vmem:[#allocation119_spill] sm:$0xff] %v12128_v25  ;;  %v2522_v51 = vshll.u32 %v17288_v57, %v12089_v22  ;;  %v2525_v34 = vshll.u32 %v17285_v15, %v12089_v22  ;;  %v2360_v14 = vsel %vm2359_vm3, %v2358_v2, 0  ;;  %vm17133_vm12 = vcmp.lt.s32.totalorder %v12179_v59, 4  ;;  %v799_v2 = vpop.f32.mrf.mxu2 }
 0x102   : > { %17366 = vst [vmem:[#allocation120_spill] sm:$0xff] %v12133_v17  ;;  %v12191_v17 = vld [vmem:[%s17232_s29] ss:$0 sm:$0xff]  ;;  %v2533_v27 = vor.u32 %v2532_v23, %v2531_v46  ;;  %6101 = vmatpush.bf16.msrb.mxu2 %v10631_v37  ;;  %v12226_v46 = vand.u32 65535, %v12162_v41  ;;  %vm17148_vm3 = vcmp.lt.s32.totalorder %v12179_v59, 1  ;;  %vm1303_vm10 = vcmp.lt.s32.totalorder %v11588_v0, 2 }
 0x103   : > { %17367 = vst [vmem:[#allocation121_spill] sm:$0xff] %v12135_v55  ;;  %v12194_v30 = vmul.f32 %v12191_v17, %v931_v18  ;;  %v2519_v18 = vshll.u32 %v17301_v43, %v12089_v22  ;;  %v12214_v54 = vmul.f32 %v12191_v17, %v926_v58  ;;  %6004 = vmatpush.bf16.msrb.mxu1 %v10639_v62  ;;  %v10638_v37 = vld [vmem:[%s16956_s6 + $0x20] sm:$0xff] }
 0x104   : > { %17368 = vst [vmem:[#allocation122_spill] sm:$0xff] %v12148_v44  ;;  %v2356_v44 = vor.u32 8388608, %v2355_v39  ;;  %v10630_v39 = vld [vmem:[%s16955_s5 + $0x20] sm:$0xff]  ;;  %v2547_v22 = vsel %vm17133_vm12, %v2533_v27, 1326507024 }
 0x105   : > { %17369 = vst [vmem:[#allocation123_spill] sm:$0xff] %v12151_v40  ;;  %v2523_v40 = vshrl.u32 %v17285_v15, %v12128_v25  ;;  %v2967_v62 = vand.u32 2139095040, %v12194_v30 }
 0x106   : > { %17371 = vst [vmem:[#allocation124_spill] sm:$0xff] %v12162_v41  ;;  %v12238_v58 = vshll.u32 %v2356_v44, 8  ;;  %6102 = vmatpush.bf16.msrb.mxu2 %v10630_v39  ;;  %v17385_v44 = vand.u32 2147483647, %v12194_v30  ;;  %v12284_v39 = vshrl.u32 %v12162_v41, 16  ;;  %v791_v41 = vpop.f32.mrf.mxu1 }
 0x107   : > { %17372 = vst [vmem:[#allocation125_spill] sm:$0xff] %v12168_v53  ;;  %v1931_v53 = vsel %vm17155_vm13, %v1917_v32, 1326507024  ;;  %v809_v32 = vpop.f32.mrf.mxu3  ;;  %v12234_v23 = vor.u32 %v2523_v40, %v2522_v51  ;;  %v12250_v51 = vadd.f32 %v11569_v61, %v799_v2  ;;  %6005 = vmatpush.bf16.msrb.mxu1 %v10638_v37  ;;  %v941_v2 = vpop.permute.xlu0 %940 }
 0x108   : > { %17373 = vst [vmem:[#allocation126_spill] sm:$0xff] %v12177_v19  ;;  %v2530_v19 = vor.u32 %v2529_v35, %v2528_v31  ;;  %v12222_v31 = vsel %vm17149_vm14, %v12135_v55, %v1927_v50  ;;  %v12232_v35 = vor.u32 %v2520_v28, %v2519_v18  ;;  %v12236_v50 = vor.u32 %v2526_v47, %v2525_v34  ;;  %v10629_v47 = vld [vmem:[%s16955_s5 + $0x18] sm:$0xff] }
 0x109   : > { %17374 = vst [vmem:[#allocation127_spill] sm:$0xff] %v12179_v59  ;;  %v12247_v28 = vadd.f32 %v11569_v61, %v789_v10  ;;  %v12253_v34 = vadd.f32 %v11569_v61, %v809_v32  ;;  %v12261_v27 = vsel %vm17149_vm14, %v12137_v49, %v1931_v53  ;;  %v2971_v40 = vand.u32 8388607, %v17385_v44  ;;  %v10637_v18 = vld [vmem:[%s16956_s6 + $0x18] sm:$0xff]  ;;  %834 = vrot.lane.b32.xlu2 %v12250_v51, %s17203_s22 }
 0x10a   : > { %17375 = vst [vmem:[#allocation128_spill] sm:$0xff] %v12194_v30  ;;  %v2543_v25 = vsel %vm17133_vm12, %v2530_v19, 920167782  ;;  %v2813_v10 = vand.u32 2139095040, %v12214_v54  ;;  %vm17145_vm12 = vcmp.lt.s32.totalorder %v12179_v59, 3  ;;  %v12275_v49 = vsel %vm17148_vm3, %v12232_v35, %v12234_v23  ;;  %v781_v30 = vpop.f32.mrf.mxu0  ;;  %6103 = vmatpush.bf16.msrb.mxu2 %v10629_v47 }
 0x10b   : > { %17376 = vst [vmem:[#allocation129_spill] sm:$0xff] %v12214_v54  ;;  %v12281_v53 = vsel %vm17148_vm3, %v12234_v23, %v12236_v50  ;;  %826 = vrot.lane.b32.xlu1 %v12247_v28, %s17203_s22  ;;  %v12293_v32 = vsel %vm17145_vm12, %v12236_v50, %v2543_v25  ;;  %v12297_v37 = vsel %vm17145_vm12, %v2530_v19, %v2547_v22  ;;  %v12302_v55 = vand.u32 65535, %v12238_v58 }
 0x10c   : > { %17377 = vst [vmem:[#allocation130_spill] sm:$0xff] %v12226_v46  ;;  %v2362_v46 = vand.u32 31, %v2360_v14  ;;  %842 = vrot.lane.b32.xlu0 %v12253_v34, %s17203_s22  ;;  %v2968_v25 = vshrl.u32 %v2967_v62, 23  ;;  %v2972_v22 = vor.u32 8388608, %v2971_v40  ;;  %6006 = vmatpush.bf16.msrb.mxu1 %v10637_v18  ;;  %v12325_v62 = vadd.f32 %v11569_v61, %v781_v30 }
 0x10d   : > { %17378 = vst [vmem:[#allocation131_spill] sm:$0xff] %v12232_v35  ;;  %v12315_v35 = vshrl.u32 %v2813_v10, 23  ;;  %v1041_v47 = vshll.u32 %v11735_v60, 16 }
 0x10e   : > { %17379 = vst [vmem:[#allocation132_spill] sm:$0xff] %v12234_v23  ;;  %v12299_v44 = vsub.s32 32, %v2362_v46  ;;  %v12309_v23 = vshrl.u32 %v12238_v58, 16  ;;  %v2374_v30 = vshll.u32 %v17280_v20, %v2362_v46 }
 0x10f   : > { %17380 = vst [vmem:[#allocation133_spill] sm:$0xff] %v12236_v50  ;;  %v17394_v50 = vand.u32 2147483647, %v12214_v54 }
 0x110   : > { %17381 = vst [vmem:[#allocation134_spill] sm:$0xff] %v12238_v58  ;;  %v2366_v40 = vshrl.u32 %v17288_v57, %v12299_v44  ;;  %v2369_v10 = vshrl.u32 %v17285_v15, %v12299_v44  ;;  %v12348_v54 = vshrl.u32 %v17283_v63, %v12299_v44 }
 0x111   : > { %17382 = vst [vmem:[#allocation135_spill] sm:$0xff] %v12247_v28  ;;  %v12313_v19 = vand.u32 8388607, %v17394_v50  ;;  %v12328_v50 = vadd.f32 %v11569_v61, %v791_v41  ;;  %v2375_v41 = vshrl.u32 %v17281_v8, %v12299_v44 }
 0x112   : > { %17383 = vst [vmem:[#allocation136_spill] sm:$0xff] %v12250_v51  ;;  %v12306_v51 = vshrl.u32 %v2360_v14, 5  ;;  %v2365_v14 = vshll.u32 %v17301_v43, %v2362_v46 }
 0x113   : > { %17384 = vst [vmem:[#allocation137_spill] sm:$0xff] %v12253_v34  ;;  %v17396_v34 = vshll.u32 %v11721_v42, 16  ;;  %828 = vrot.lane.b32.xlu2 %v12328_v50, %s17203_s22  ;;  %820 = vrot.lane.b32.xlu1 %v12325_v62, %s17203_s22  ;;  %v12368_v58 = vor.u32 %v2375_v41, %v2374_v30  ;;  %v1044_v41 = vshrl.u32 %v11737_v48, 16 }
 0x114   : > { %17386 = vst [vmem:[#allocation138_spill] sm:$0xff] %v12275_v49  ;;  %vm17156_vm3 = vcmp.lt.s32.totalorder %v12306_v51, 1  ;;  %v10169_v49 = vadd.s32 4294967169, %v2968_v25  ;;  %vm17167_vm14 = vcmp.lt.s32.totalorder %v12306_v51, 4  ;;  %v1020_v25 = vshrl.u32 %v11676_v26, 16 }
 0x115   : > { %17387 = vst [vmem:[#allocation139_spill] sm:$0xff] %v12281_v53  ;;  %vm1027_vm12 = vc.u32 %v11776_v29, %v17396_v34  ;;  %v2371_v29 = vshll.u32 %v17285_v15, %v2362_v46  ;;  %v2372_v34 = vshrl.u32 %v17280_v20, %v12299_v44  ;;  %v12360_v53 = vor.u32 %v2366_v40, %v2365_v14  ;;  %v10628_v14 = vld [vmem:[%s16955_s5 + $0x10] sm:$0xff] }
 0x116   : > { %17388 = vst [vmem:[#allocation140_spill] sm:$0xff] %v12284_v39  ;;  %v12318_v39 = vmul.f32 %v12191_v17, %v941_v2  ;;  %v2368_v17 = vshll.u32 %v17288_v57, %v2362_v46  ;;  %v1028_v18 = vsel %vm1027_vm12, 1, %v17311_v24  ;;  %v12344_v2 = vshll.u32 %v17281_v8, %v2362_v46  ;;  %6104 = vmatpush.bf16.msrb.mxu2 %v10628_v14 }
 0x117   : > { %17389 = vst [vmem:[#allocation141_spill] sm:$0xff] %v12293_v32  ;;  %v12352_v32 = vshll.u32 %v2972_v22, 8  ;;  %v1030_v46 = vadd.s32 %v1028_v18, %v11778_v12  ;;  %vm1045_vm12 = vc.u32 %v11731_v36, %v1041_v47  ;;  %v12366_v22 = vor.u32 %v2372_v34, %v2371_v29 }
 0x118   : > { %17390 = vst [vmem:[#allocation142_spill] sm:$0xff] %v12297_v37  ;;  %v12362_v37 = vor.u32 %v2369_v10, %v2368_v17  ;;  %v1046_v59 = vsel %vm1045_vm12, 1, %v17311_v24  ;;  %v2379_v12 = vor.u32 %v12348_v54, %v12344_v2  ;;  %v2974_v18 = vadd.s32 1, %v10169_v49 }
 0x119   : > { %17391 = vst [vmem:[#allocation143_spill] sm:$0xff] %v12299_v44  ;;  %v1031_v40 = vadd.s32 %v1030_v46, %v1020_v25  ;;  %v1048_v26 = vadd.s32 %v1046_v59, %v11745_v45  ;;  %v12379_v17 = vand.u32 65535, %v12352_v32  ;;  %v12382_v10 = vshrl.u32 %v12352_v32, 16  ;;  %v10636_v25 = vld [vmem:[%s16956_s6 + $0x10] sm:$0xff] }
 0x11a   : > { %17392 = vst [vmem:[#allocation144_spill] sm:$0xff] %v12302_v55  ;;  %v1043_v55 = vshll.u32 %v11737_v48, 16  ;;  %v12392_v54 = vsel %vm17156_vm3, %v12360_v53, %v12362_v37  ;;  %v1022_v45 = vshrl.u32 %v11721_v42, 16  ;;  %v1195_v49 = vshll.u32 %v12024_v38, 16  ;;  %v10627_v48 = vld [vmem:[%s16955_s5 + $0x8] sm:$0xff]  ;;  %6007 = vmatpush.bf16.msrb.mxu1 %v10636_v25 }
 0x11b   : > { %17393 = vst [vmem:[#allocation145_spill] sm:$0xff] %v12309_v23  ;;  %v1047_v23 = vadd.s32 %v1041_v47, %v11731_v36  ;;  %v12386_v36 = vadd.f32 %v11569_v61, %v12130_v1  ;;  %v2389_v47 = vsel %vm17167_vm14, %v12368_v58, 920167782  ;;  %v12404_v61 = vsel %vm17156_vm3, %v12362_v37, %v12366_v22  ;;  %6105 = vmatpush.bf16.msrb.mxu2 %v10627_v48 }
 0x11c   : > { %17395 = vst [vmem:[#allocation146_spill] sm:$0xff] %v12318_v39  ;;  %v1042_v1 = vshrl.u32 %v11735_v60, 16  ;;  %v12407_v34 = vadd.s32 %v1031_v40, %v1022_v45  ;;  %v1197_v42 = vshll.u32 %v12047_v7, 16  ;;  %v1201_v30 = vadd.s32 %v1195_v49, %v11993_v13 }
 0x11d   : > { %17397 = vst [vmem:[#allocation147_spill] sm:$0xff] %v12325_v62  ;;  %vm1049_vm12 = vc.u32 %v1047_v23, %v1043_v55  ;;  %vm17160_vm13 = vcmp.lt.s32.totalorder %v12306_v51, 3  ;;  %840 = vrot.lane.b32.xlu2 %v12386_v36, %s17203_s22  ;;  %v17407_v46 = vshll.u32 %v11991_v6, 16  ;;  %v12423_v14 = vadd.s32 %v1047_v23, %v1043_v55  ;;  %v10635_v55 = vld [vmem:[%s16956_s6 + $0x8] sm:$0xff] }
 0x11e   : > { %17398 = vst [vmem:[#allocation148_spill] sm:$0xff] %v12328_v50  ;;  %v1050_v59 = vsel %vm1049_vm12, 1, %v17311_v24  ;;  %vm1199_vm12 = vc.u32 %v11993_v13, %v1195_v49  ;;  %vm1203_vm8 = vc.u32 %v1201_v30, %v1197_v42  ;;  %6008 = vmatpush.bf16.msrb.mxu1 %v10635_v55 }
 0x11f   : > { %17399 = vst [vmem:[#allocation149_spill] sm:$0xff] %v12352_v32  ;;  %v1052_v29 = vadd.s32 %v1050_v59, %v1048_v26  ;;  %vm1181_vm3 = vc.u32 %v12054_v5, %v17407_v46  ;;  %v1200_v60 = vsel %vm1199_vm12, 1, %v17311_v24  ;;  %v1174_v5 = vshrl.u32 %v11935_v4, 16 }
 0x120   : > { %17400 = vst [vmem:[#allocation150_spill] sm:$0xff] %v12360_v53  ;;  %v1182_v13 = vsel %vm1181_vm3, 1, %v17311_v24  ;;  %v1202_v40 = vadd.s32 %v1200_v60, %v12056_v21  ;;  %v1204_v59 = vsel %vm1203_vm8, 1, %v17311_v24  ;;  %vm2975_vm12 = vcmp.gt.s32.totalorder %v2974_v18, 0 }
 0x121   : > { %17401 = vst [vmem:[#allocation151_spill] sm:$0xff] %v12362_v37  ;;  %v1053_v2 = vadd.s32 %v1052_v29, %v1042_v1  ;;  %v1184_v45 = vadd.s32 %v1182_v13, %v12060_v52  ;;  %vm1057_vm3 = vc.u32 %v12407_v34, %v12423_v14  ;;  %v1196_v21 = vshrl.u32 %v12024_v38, 16 }
 0x122   : > { %17402 = vst [vmem:[#allocation152_spill] sm:$0xff] %v12366_v22  ;;  %v1206_v23 = vadd.s32 %v1204_v59, %v1202_v40  ;;  %v1176_v4 = vshrl.u32 %v11991_v6, 16  ;;  %v2393_v52 = vsel %vm17167_vm14, %v2379_v12, 1326507024  ;;  %v10166_v29 = vadd.s32 4294967169, %v12315_v35 }
 0x123   : > { %17403 = vst [vmem:[#allocation153_spill] sm:$0xff] %v12379_v17  ;;  %v1054_v26 = vadd.s32 %v1053_v2, %v1044_v41  ;;  %v1185_v1 = vadd.s32 %v1184_v45, %v1174_v5  ;;  %v1198_v41 = vshrl.u32 %v12047_v7, 16  ;;  %v12447_v38 = vadd.s32 %v1201_v30, %v1197_v42  ;;  %v17409_v42 = vld [vmem:[#allocation67_spill] sm:$0xff]  ;;  %v17423_v17 = vld [vmem:[#allocation64_spill] sm:$0xff] }
 0x124   : > { %17404 = vst [vmem:[#allocation154_spill] sm:$0xff] %v12382_v10  ;;  %v1207_v2 = vadd.s32 %v1206_v23, %v1196_v21  ;;  %v1317_v6 = vsel %vm1303_vm10, %v11719_v9, %v11725_v11  ;;  %v2976_v25 = vsel %vm2975_vm12, %v2974_v18, 0  ;;  %v17408_v12 = vmul.u32 %v11645_v56, %v11701_v16  ;;  %v10626_v16 = vld [vmem:[%s16955_s5] sm:$0xff]  ;;  %v17411_v5 = vld [vmem:[#allocation55_spill] sm:$0xff]  ;;  %v17424_v10 = vld [vmem:[#allocation65_spill] sm:$0xff] }
 0x125   : > { %17405 = vst [vmem:[#allocation155_spill] sm:$0xff] %v12386_v36  ;;  %v1058_v49 = vadd.s32 1, %v1054_v26  ;;  %v12445_v60 = vadd.s32 %v1185_v1, %v1176_v4  ;;  %v1322_v7 = vshrl.u32 %v1317_v6, 16  ;;  %v2818_v40 = vor.u32 8388608, %v12313_v19  ;;  %v10634_v19 = vld [vmem:[%s16956_s6] sm:$0xff]  ;;  %6106 = vmatpush.bf16.msrb.mxu2 %v10626_v16 }
 0x126   : > { %17406 = vst [vmem:[#allocation156_spill] sm:$0xff] %v12404_v61  ;;  %v1208_v13 = vadd.s32 %v1207_v2, %v1198_v41  ;;  %v12464_v30 = vsel %vm1303_vm10, %v17409_v42, %v11713_v33  ;;  %v1321_v9 = vand.u32 65535, %v1317_v6  ;;  %v12469_v11 = vsel %vm17160_vm13, %v12366_v22, %v2389_v47  ;;  %6009 = vmatpush.bf16.msrb.mxu1 %v10634_v19  ;;  %v17417_v16 = vld [vmem:[#allocation58_spill] sm:$0xff]  ;;  %v17420_v6 = vld [vmem:[#allocation88_spill] sm:$0xff] }
 0x127   : > { %v1059_v46 = vsel %vm1057_vm3, %v1058_v49, %v1054_v26  ;;  %vm1211_vm8 = vc.u32 %v12445_v60, %v12447_v38  ;;  %v17159_v56 = vand.u32 2147483647, %v12318_v39  ;;  %v12481_v33 = vsel %vm17160_vm13, %v12368_v58, %v2393_v52  ;;  %v17412_v58 = vld [vmem:[#allocation86_spill] sm:$0xff] }
 0x128   : > { %v1060_v35 = vadd.s32 %v1059_v46, %v17408_v12  ;;  %v1212_v48 = vadd.s32 1, %v1208_v13  ;;  %17410 = vst [vmem:[#allocation67_spill] sm:$0xff] %v12481_v33  ;;  %v12483_v26 = vand.u32 31, %v2976_v25  ;;  %v12485_v47 = vadd.s32 1, %v10166_v29  ;;  %v17413_v49 = vld [vmem:[#allocation94_spill] sm:$0xff]  ;;  %v17415_v29 = vld [vmem:[#allocation57_spill] sm:$0xff] }
 0x129   : > { %v12488_v45 = vmul.u32 %v1322_v7, %v17411_v5  ;;  %v12490_v59 = vshrl.u32 %v2976_v25, 5  ;;  %v1344_v23 = vshrl.u32 %v12464_v30, 16  ;;  %v17414_v4 = vmul.u32 %v17412_v58, %v17413_v49  ;;  %v17419_v58 = vld [vmem:[#allocation8_spill] sm:$0xff] }
 0x12a   : > { %v1061_v18 = vadd.s32 536870912, %v1060_v35  ;;  %v1213_v21 = vsel %vm1211_vm8, %v1212_v48, %v1208_v13  ;;  %v1323_v52 = vmul.u32 %v1321_v9, %v17411_v5  ;;  %v12501_v41 = vmul.u32 %v1321_v9, %v17415_v29 }
 0x12b   : > { %v1214_v1 = vadd.s32 %v1213_v21, %v17414_v4  ;;  %v1327_v2 = vshll.u32 %v12488_v45, 16  ;;  %v12504_v46 = vshll.u32 %v2818_v40, 8  ;;  %v12509_v25 = vand.u32 8388607, %v17159_v56  ;;  %v17418_v40 = vld [vmem:[#allocation66_spill] sm:$0xff] }
 0x12c   : > { %v1062_v55 = vshrl.u32 %v1061_v18, 30  ;;  %v12513_v13 = vshll.u32 %v17301_v43, %v12483_v26  ;;  %vm17176_vm12 = vcmask 523264   ;;  %v1286_v9 = vshrl.u32 %v17301_v43, %v17417_v16 }
 0x12d   : > { %17416 = vst [vmem:[#allocation55_spill] sm:$0xff] %v12509_v25  ;;  %v1215_v42 = vadd.s32 536870912, %v1214_v1  ;;  %v1307_v18 = vsel %vm1305_vm0, %v17418_v40, 2102212464  ;;  %v1343_v48 = vand.u32 65535, %v12464_v30  ;;  %v12524_v21 = vmul.u32 %v1344_v23, %v17411_v5  ;;  %v17422_v40 = vld [vmem:[#allocation53_spill] sm:$0xff] }
 0x12e   : > { %v1063_v12 = vshll.u32 %v1062_v55, 30  ;;  %vm964_vm3 = vcmp.lt.s32.totalorder %v17419_v58, 0  ;;  %v1329_v4 = vshll.u32 %v12501_v41, 16  ;;  %vm1331_vm8 = vc.u32 %v1323_v52, %v1327_v2 }
 0x12f   : > { %v1216_v49 = vshrl.u32 %v1215_v42, 30  ;;  %v1333_v56 = vadd.s32 %v1327_v2, %v1323_v52  ;;  %vm1118_vm13 = vcmp.lt.s32.totalorder %v17422_v40, 0  ;;  %v1306_v42 = vsel %vm1302_vm2, %v1286_v9, %v17423_v17 }
 0x130   : > { %v12517_v19 = vsub.s32 %v1060_v35, %v1063_v12  ;;  %v7313_v35 = vsel %vm17176_vm12, %v17420_v6, 0.0  ;;  %v17421_v12 = vld [vmem:[#allocation116_spill] sm:$0xff]  ;;  %v1308_v52 = vsel %vm1304_vm7, %v17424_v10, %v1307_v18  ;;  %v1326_v2 = vmul.u32 %v1322_v7, %v17415_v29 }
 0x131   : > { %v12532_v16 = vsel %vm17176_vm12, %v17421_v12, 0.0  ;;  %v1217_v32 = vshll.u32 %v1216_v49, 30  ;;  %v1332_v6 = vsel %vm1331_vm8, 1, %v17311_v24  ;;  %v1345_v36 = vmul.u32 %v1343_v48, %v17411_v5  ;;  %v17428_v7 = vld [vmem:[#allocation104_spill] sm:$0xff] }
 0x132   : > { %vm1065_vm0 = vcmp.lt.s32.totalorder %v12517_v19, 0  ;;  %v1066_v30 = vsub.s32 0, %v12517_v19  ;;  %v1349_v25 = vshll.u32 %v12524_v21, 16  ;;  %v17425_v37 = vand.u32 2147483647, %v17419_v58 }
 0x133   : > { %v1056_v17 = vadd.s32 %v12423_v14, %v12407_v34  ;;  %v12556_v9 = vsub.s32 %v1214_v1, %v1217_v32  ;;  %vm1335_vm2 = vc.u32 %v1333_v56, %v1329_v4  ;;  %v7325_v18 = vsel %vm17176_vm12, %v17428_v7, 0.0 }
 0x134   : > { %v1067_v12 = vsel %vm1065_vm0, %v1066_v30, %v12517_v19  ;;  %vm12550_vm14 = vcmp.le.f32.partialorder %v17425_v37, 0.7853982  ;;  %v17429_v30 = vld [vmem:[#allocation56_spill] sm:$0xff]  ;;  %v1086_v53 = vsub.s32 4, %v1062_v55  ;;  %v12566_v37 = vsel %vm1303_vm10, %v1306_v42, %v1308_v52 }
 0x135   : > { %v1068_v10 = vclz %v1067_v12  ;;  %v12562_v5 = vsel %vm17176_vm12, %v17429_v30, 0.0  ;;  %v17430_v33 = vand.u32 2147483647, %v17422_v40  ;;  %vm1219_vm8 = vcmp.lt.s32.totalorder %v12556_v9, 0 }
 0x136   : > { %v1220_v32 = vsub.s32 0, %v12556_v9  ;;  %v1334_v14 = vadd.s32 %v1332_v6, %v1326_v2  ;;  %v1240_v56 = vsub.s32 4, %v1216_v49  ;;  %v1336_v1 = vsel %vm1335_vm2, 1, %v17311_v24  ;;  %7314 = vadd.xlane.f32.xlu0 %v7313_v35 }
 0x137   : > { %v10131_v61 = vadd.s32 4294967294, %v1068_v10  ;;  %vm12570_vm7 = vcmp.le.f32.partialorder %v17430_v33, 0.7853982  ;;  %v1347_v4 = vmul.u32 %v1343_v48, %v17415_v29  ;;  %vm1353_vm0 = vc.u32 %v1345_v36, %v1349_v25 }
 0x138   : > { %v12580_v0 = vsel %vm17176_vm12, %v12328_v50, 0.0  ;;  %v1210_v33 = vadd.s32 %v12447_v38, %v12445_v60  ;;  %v1221_v12 = vsel %vm1219_vm8, %v1220_v32, %v12556_v9  ;;  %v1087_v6 = vsel %vm964_vm3, %v1086_v53, %v1062_v55 }
 0x139   : > { %vm10132_vm10 = vcmp.lt.s32.totalorder %v10131_v61, 0  ;;  %v1222_v52 = vclz %v1221_v12  ;;  %v1348_v2 = vmul.u32 %v1344_v23, %v17415_v29  ;;  %v1338_v7 = vadd.s32 %v1336_v1, %v1334_v14 }
 0x13a   : > { %v1071_v42 = vsel %vm10132_vm10, 0, %v10131_v61  ;;  %v1354_v30 = vsel %vm1353_vm0, 1, %v17311_v24  ;;  %v1241_v44 = vsel %vm1118_vm13, %v1240_v56, %v1216_v49  ;;  %v1328_v60 = vshrl.u32 %v12488_v45, 16 }
 0x13b   : > { %v1072_v10 = vsub.s32 32, %v1071_v42  ;;  %v1076_v48 = vsub.s32 4294967266, %v1071_v42  ;;  %v10134_v50 = vadd.s32 4294967294, %v1222_v52  ;;  %v1351_v38 = vshll.u32 %v1347_v4, 16 }
 0x13c   : > { %v1073_v61 = vshll.u32 %v12517_v19, %v1071_v42  ;;  %v1355_v55 = vadd.s32 %v1349_v25, %v1345_v36  ;;  %v1089_v23 = vsel %vm12550_vm14, 0, %v1087_v6  ;;  %v1330_v29 = vshrl.u32 %v12501_v41, 16 }
 0x13d   : > { %v1074_v32 = vshrl.u32 %v1056_v17, %v1072_v10  ;;  %v1077_v53 = vadd.s32 127, %v1076_v48  ;;  %vm10135_vm2 = vcmp.lt.s32.totalorder %v10134_v50, 0  ;;  %v1356_v14 = vadd.s32 %v1354_v30, %v1348_v2  ;;  %7317 = vadd.xlane.f32.xlu1 %v12532_v16  ;;  %v17433_v16 = vld [vmem:[#allocation83_spill] sm:$0xff] }
 0x13e   : > { %v1225_v12 = vsel %vm10135_vm2, 0, %v10134_v50  ;;  %v1339_v52 = vadd.s32 %v1338_v7, %v1328_v60  ;;  %v1243_v45 = vsel %vm12570_vm7, 0, %v1241_v44  ;;  %vm1357_vm8 = vc.u32 %v1355_v55, %v1351_v38  ;;  %7326 = vadd.xlane.f32.xlu0 %v7325_v18  ;;  %v17434_v18 = vld [vmem:[#allocation50_spill] sm:$0xff] }
 0x13f   : > { %v1075_v35 = vor.u32 %v1074_v32, %v1073_v61  ;;  %v1078_v1 = vshll.u32 %v1077_v53, 23  ;;  %v1226_v49 = vsub.s32 32, %v1225_v12  ;;  %v1230_v56 = vsub.s32 4294967266, %v1225_v12 }
 0x140   : > { %v3594_v17 = vadd.s32 3, %v1089_v23  ;;  %v1350_v36 = vshrl.u32 %v12524_v21, 16  ;;  %v1358_v25 = vsel %vm1357_vm8, 1, %v17311_v24  ;;  %v1227_v42 = vshll.u32 %v12556_v9, %v1225_v12 }
 0x141   : > { %v1079_v19 = vor.u32 4788187, %v1078_v1  ;;  %v1228_v41 = vshrl.u32 %v1210_v33, %v1226_v49  ;;  %v1231_v30 = vadd.s32 127, %v1230_v56  ;;  %v1360_v6 = vadd.s32 %v1358_v25, %v1356_v14 }
 0x142   : > { %v1082_v7 = vcvt.s32.f32 %v1075_v35  ;;  %v3749_v2 = vadd.s32 3, %v1243_v45  ;;  %v1340_v10 = vadd.s32 %v1339_v52, %v1330_v29  ;;  %v1352_v60 = vshrl.u32 %v1347_v4, 16 }
 0x143   : > { %v1080_v50 = vand.u32 2147483647, %v1079_v19  ;;  %v1229_v44 = vor.u32 %v1228_v41, %v1227_v42  ;;  %v1232_v48 = vshll.u32 %v1231_v30, 23  ;;  %v1361_v61 = vadd.s32 %v1360_v6, %v1350_v36  ;;  %v17437_v19 = vld [vmem:[#allocation97_spill] sm:$0xff]  ;;  %v17439_v36 = vld [vmem:[#allocation99_spill] sm:$0xff]  ;;  %v17440_v6 = vld [vmem:[#allocation92_spill] sm:$0xff] }
 0x144   : > { %v12602_v21 = vand.u32 3, %v3594_v17  ;;  %v12604_v53 = vand.u32 3, %v1089_v23  ;;  %v1359_v9 = vadd.s32 %v1355_v55, %v1351_v38  ;;  %v12606_v1 = vand.u32 3, %v1243_v45  ;;  %v17435_v55 = vld [vmem:[#allocation81_spill] sm:$0xff]  ;;  %v17436_v45 = vld [vmem:[#allocation98_spill] sm:$0xff] }
 0x145   : > { %v1083_v32 = vmul.f32 %v1082_v7, %v1080_v50  ;;  %v1233_v33 = vor.u32 4788187, %v1232_v48  ;;  %v1362_v14 = vadd.s32 %v1361_v61, %v1352_v60  ;;  %vm17181_vm0 = vcmp.lt.s32.totalorder %v17433_v16, 2  ;;  %7332 = vadd.xlane.f32.xlu1 %v12580_v0  ;;  %v17442_v60 = vld [vmem:[#allocation87_spill] sm:$0xff]  ;;  %v17443_v0 = vld [vmem:[#allocation80_spill] sm:$0xff] }
 0x146   : > { %v12609_v12 = vand.u32 3, %v3749_v2  ;;  %v1363_v29 = vmul.u32 %v17434_v18, %v12566_v37  ;;  %vm1365_vm10 = vc.u32 %v1340_v10, %v1359_v9  ;;  %v1236_v52 = vcvt.s32.f32 %v1229_v44  ;;  %v17438_v37 = vld [vmem:[#allocation100_spill] sm:$0xff]  ;;  %7311 = vadd.xlane.f32.xlu2 %v12562_v5 }
 0x147   : > { %v1084_v35 = vxor.u32 2147483648, %v1083_v32  ;;  %v1234_v4 = vand.u32 2147483647, %v1233_v33  ;;  %v12613_v49 = vadd.s32 %v1359_v9, %v1340_v10  ;;  %v1366_v23 = vadd.s32 1, %v1362_v14  ;;  %v17441_v2 = vld [vmem:[#allocation96_spill] sm:$0xff]  ;;  %v801_v10 = vpop.f32.mrf.mxu2 }
 0x148   : > { %v12619_v56 = vshrl.u32 %v17301_v43, %v17435_v55  ;;  %v12625_v17 = vsel %vm17181_vm0, %v17437_v19, %v17436_v45  ;;  %v1471_v25 = vsel %vm17181_vm0, %v17439_v36, %v17438_v37  ;;  %v12640_v50 = vsel %vm1459_vm15, %v17440_v6, 2102212464 }
 0x149   : > { %v1085_v38 = vsel %vm964_vm3, %v1084_v35, %v1083_v32  ;;  %v1237_v41 = vmul.f32 %v1236_v52, %v1234_v4  ;;  %v1367_v30 = vsel %vm1365_vm10, %v1366_v23, %v1362_v14  ;;  %v7322_v5 = vsel %vm17176_vm12, %v17441_v2, 0.0 }
 0x14a   : > { %v12635_v42 = vsel %vm12550_vm14, %v17419_v58, %v1085_v38  ;;  %v1368_v44 = vadd.s32 %v1367_v30, %v1363_v29  ;;  %v1476_v22 = vshrl.u32 %v1471_v25, 16  ;;  %v7334_v61 = vsel %vm17176_vm12, %v17442_v60, 0.0  ;;  %v11079_v29 = vld [vmem:[%s17290_s21] ss:$0 sm:$0xff] }
 0x14b   : > { %v1090_v7 = vmul.f32 %v12635_v42, %v12635_v42  ;;  %v1238_v48 = vxor.u32 2147483648, %v1237_v41  ;;  %v1475_v32 = vand.u32 65535, %v1471_v25  ;;  %v17178_v9 = vshrl.u32 %v12625_v17, 16 }
 0x14c   : > { %v1369_v35 = vadd.s32 536870912, %v1368_v44  ;;  %v12651_v18 = vmul.u32 %v1476_v22, %v17443_v0  ;;  %v12658_v52 = vadd.f32 %v11079_v29, %v801_v10  ;;  %v12662_v23 = vsel %vm17176_vm12, %v12325_v62, 0.0 }
 0x14d   : > { %v1091_v33 = vmul.f32 -0.001358992, %v1090_v7  ;;  %v1098_v14 = vmul.f32 -0.00019511016, %v1090_v7  ;;  %v1239_v4 = vsel %vm1118_vm13, %v1238_v48, %v1237_v41  ;;  %v1477_v25 = vmul.u32 %v1475_v32, %v17443_v0  ;;  %v17445_v41 = vld [vmem:[#allocation93_spill] sm:$0xff]  ;;  %7335 = vadd.xlane.f32.xlu1 %v7334_v61 }
 0x14e   : > { %17444 = vst [vmem:[#allocation86_spill] sm:$0xff] %v12658_v52  ;;  %v12668_v19 = vsel %vm12570_vm7, %v17422_v40, %v1239_v4  ;;  %v12670_v37 = vshrl.u32 %v1369_v35, 30  ;;  %v12676_v30 = vmul.u32 %v1475_v32, %v17445_v41  ;;  %v1481_v6 = vshll.u32 %v12651_v18, 16  ;;  %7323 = vadd.xlane.f32.xlu2 %v7322_v5 }
 0x14f   : > { %v1092_v55 = vadd.f32 0.041655596, %v1091_v33  ;;  %v1099_v45 = vadd.f32 0.008332121, %v1098_v14  ;;  %v1244_v36 = vmul.f32 %v12668_v19, %v12668_v19  ;;  %v12683_v34 = vmul.u32 %v17178_v9, %v17443_v0 }
 0x150   : > { %v1371_v33 = vshll.u32 %v12670_v37, 30  ;;  %vm1485_vm15 = vc.u32 %v1477_v25, %v1481_v6  ;;  %v1487_v4 = vadd.s32 %v1481_v6, %v1477_v25  ;;  %vm3600_vm13 = vcmp.eq.s32.totalorder %v12602_v21, 2 }
 0x151   : > { %v1093_v10 = vmul.f32 %v1092_v55, %v1090_v7  ;;  %v1100_v48 = vmul.f32 %v1099_v45, %v1090_v7  ;;  %v1245_v14 = vmul.f32 -0.001358992, %v1244_v36  ;;  %v1252_v35 = vmul.f32 -0.00019511016, %v1244_v36 }
 0x152   : > { %v12686_v32 = vsub.s32 %v1368_v44, %v1371_v33  ;;  %v1480_v55 = vmul.u32 %v1476_v22, %v17445_v41  ;;  %vm3597_vm14 = vcmp.eq.s32.totalorder %v12602_v21, 0  ;;  %vm1108_vm3 = vcmp.eq.s32.totalorder %v12604_v53, 0  ;;  %836 = vrot.lane.b32.xlu0 %v12658_v52, %s17203_s22 }
 0x153   : > { %v1094_v29 = vadd.f32 -0.4999988, %v1093_v10  ;;  %v1101_v38 = vadd.f32 -0.16666654, %v1100_v48  ;;  %v1246_v45 = vadd.f32 0.041655596, %v1245_v14  ;;  %vm1105_vm9 = vweird.f32 %v17419_v58 }
 0x154   : > { %v1253_v62 = vadd.f32 0.008332121, %v1252_v35  ;;  %vm1111_vm7 = vcmp.eq.s32.totalorder %v12604_v53, 2  ;;  %v1483_v5 = vshll.u32 %v12676_v30, 16  ;;  %v1486_v25 = vsel %vm1485_vm15, 1, %v17311_v24 }
 0x155   : > { %v1095_v6 = vmul.f32 %v1094_v29, %v1090_v7  ;;  %v1102_v10 = vmul.f32 %v1101_v38, %v1090_v7  ;;  %vm3596_vm2 = vcmp.lt.s32.totalorder %v12602_v21, 2  ;;  %vm1107_vm8 = vcmp.lt.s32.totalorder %v12604_v53, 2 }
 0x156   : > { %vm1373_vm10 = vcmp.lt.s32.totalorder %v12686_v32, 0  ;;  %v1374_v44 = vsub.s32 0, %v12686_v32  ;;  %v1247_v22 = vmul.f32 %v1246_v45, %v1244_v36  ;;  %v1254_v61 = vmul.f32 %v1253_v62, %v1244_v36  ;;  %7320 = vadd.xlane.f32.xlu2 %v12662_v23 }
 0x157   : > { %v1488_v48 = vadd.s32 %v1486_v25, %v1480_v55  ;;  %vm1489_vm12 = vc.u32 %v1487_v4, %v1483_v5  ;;  %v1096_v33 = vadd.f32 1.0, %v1095_v6  ;;  %v1103_v14 = vadd.f32 1.0, %v1102_v10 }
 0x158   : > { %vm3755_vm15 = vcmp.eq.s32.totalorder %v12609_v12, 2  ;;  %v1375_v7 = vsel %vm1373_vm10, %v1374_v44, %v12686_v32  ;;  %v1490_v38 = vsel %vm1489_vm12, 1, %v17311_v24  ;;  %v1248_v35 = vadd.f32 -0.4999988, %v1247_v22 }
 0x159   : > { %v1255_v29 = vadd.f32 -0.16666654, %v1254_v61  ;;  %vm1265_vm6 = vcmp.eq.s32.totalorder %v12606_v1, 2  ;;  %v1376_v9 = vclz %v1375_v7  ;;  %v1492_v45 = vadd.s32 %v1490_v38, %v1488_v48 }
 0x15a   : > { %v1104_v62 = vmul.f32 %v1103_v14, %v12635_v42  ;;  %v1112_v4 = vxor.u32 2147483648, %v1096_v33  ;;  %vm3752_vm5 = vcmp.eq.s32.totalorder %v12609_v12, 0  ;;  %vm1262_vm4 = vcmp.eq.s32.totalorder %v12606_v1, 0 }
 0x15b   : > { %v1482_v55 = vshrl.u32 %v12651_v18, 16  ;;  %v17446_v5 = vand.u32 65535, %v12625_v17  ;;  %v1249_v6 = vmul.f32 %v1248_v35, %v1244_v36  ;;  %v1256_v10 = vmul.f32 %v1255_v29, %v1244_v36 }
 0x15c   : > { %vm3751_vm12 = vcmp.lt.s32.totalorder %v12609_v12, 2  ;;  %vm1261_vm10 = vcmp.lt.s32.totalorder %v12606_v1, 2  ;;  %v10137_v42 = vadd.s32 4294967294, %v1376_v9  ;;  %v1109_v61 = vxor.u32 2147483648, %v1104_v62 }
 0x15d   : > { %v1499_v25 = vmul.u32 %v17446_v5, %v17443_v0  ;;  %v17447_v44 = vmov %v17446_v5  ;;  %vm1259_vm0 = vweird.f32 %v17422_v40  ;;  %v1493_v18 = vadd.s32 %v1492_v45, %v1482_v55 }
 0x15e   : > { %v12718_v22 = vmul.u32 %v17447_v44, %v17445_v41  ;;  %v17448_v0 = vshrl.u32 %v12625_v17, 16  ;;  %v1503_v48 = vshll.u32 %v12683_v34, 16  ;;  %v1250_v14 = vadd.f32 1.0, %v1249_v6 }
 0x15f   : > { %v1257_v7 = vadd.f32 1.0, %v1256_v10  ;;  %v3602_v9 = vsel %vm3600_vm13, %v1112_v4, %v1104_v62  ;;  %vm10138_vm11 = vcmp.lt.s32.totalorder %v10137_v42, 0  ;;  %v3599_v23 = vsel %vm3597_vm14, %v1096_v33, %v1109_v61 }
 0x160   : > { %v1502_v36 = vmul.u32 %v17448_v0, %v17445_v41  ;;  %v1110_v38 = vsel %vm1108_vm3, %v1096_v33, %v1109_v61  ;;  %v1113_v35 = vsel %vm1111_vm7, %v1112_v4, %v1104_v62  ;;  %v1379_v29 = vsel %vm10138_vm11, 0, %v10137_v42 }
 0x161   : > { %v1258_v17 = vmul.f32 %v1257_v7, %v12668_v19  ;;  %v1266_v41 = vxor.u32 2147483648, %v1250_v14  ;;  %v3603_v45 = vsel %vm3596_vm2, %v3599_v23, %v3602_v9  ;;  %v1114_v55 = vsel %vm1107_vm8, %v1110_v38, %v1113_v35 }
 0x162   : > { %v3604_v5 = vsel %vm1105_vm9, nan, %v3603_v45  ;;  %v1115_v6 = vsel %vm1105_vm9, nan, %v1114_v55  ;;  %v1380_v33 = vsub.s32 32, %v1379_v29  ;;  %v1505_v10 = vshll.u32 %v12718_v22, 16  ;;  %v17451_v55 = vld [vmem:[#allocation90_spill] sm:$0xff] }
 0x163   : > { %v1263_v62 = vxor.u32 2147483648, %v1258_v17  ;;  %v3757_v19 = vsel %vm3755_vm15, %v1266_v41, %v1258_v17  ;;  %v1381_v4 = vshll.u32 %v12686_v32, %v1379_v29  ;;  %v1384_v21 = vsub.s32 4294967266, %v1379_v29 }
 0x164   : > { %v1267_v53 = vsel %vm1265_vm6, %v1266_v41, %v1258_v17  ;;  %v1382_v42 = vshrl.u32 %v12613_v49, %v1380_v33  ;;  %vm1507_vm11 = vc.u32 %v1499_v25, %v1503_v48  ;;  %v1509_v44 = vadd.s32 %v1503_v48, %v1499_v25 }
 0x165   : > { %vm2821_vm13 = vcmp.gt.s32.totalorder %v12485_v47, 0  ;;  %v3754_v58 = vsel %vm3752_vm5, %v1250_v14, %v1263_v62  ;;  %v1264_v61 = vsel %vm1262_vm4, %v1250_v14, %v1263_v62  ;;  %v1385_v0 = vadd.s32 127, %v1384_v21  ;;  %v17449_v14 = vld [vmem:[#allocation22_spill] sm:$0xff] }
 0x166   : > { %v1508_v7 = vsel %vm1507_vm11, 1, %v17311_v24  ;;  %v3758_v32 = vsel %vm3751_vm12, %v3754_v58, %v3757_v19  ;;  %v1268_v9 = vsel %vm1261_vm10, %v1264_v61, %v1267_v53  ;;  %v1383_v49 = vor.u32 %v1382_v42, %v1381_v4 }
 0x167   : > { %v1510_v23 = vadd.s32 %v1508_v7, %v1502_v36  ;;  %v3759_v25 = vsel %vm1259_vm0, nan, %v3758_v32  ;;  %v1269_v48 = vsel %vm1259_vm0, nan, %v1268_v9  ;;  %v1386_v38 = vshll.u32 %v1385_v0, 23  ;;  %v17458_v32 = vld [vmem:[#allocation19_spill] sm:$0xff] }
 0x168   : > { %vm1511_vm5 = vc.u32 %v1509_v44, %v1505_v10  ;;  %vm1272_vm4 = vcmp.lt.s32.totalorder %v17449_v14, 0  ;;  %v5946_v35 = vpack.c.bf16 %v3759_v25, %v3604_v5  ;;  %v3442_v29 = vpack.c.bf16 %v1269_v48, %v1115_v6  ;;  %v17460_v25 = vld [vmem:[#allocation76_spill] sm:$0xff] }
 0x169   : > { %v1484_v12 = vshrl.u32 %v12676_v30, 16  ;;  %v1512_v17 = vsel %vm1511_vm5, 1, %v17311_v24  ;;  %v2984_v1 = vshll.u32 %v17288_v57, %v12483_v26  ;;  %v1387_v36 = vor.u32 4788187, %v1386_v38  ;;  %v17452_v30 = vld [vmem:[#allocation91_spill] sm:$0xff] }
 0x16a   : > { %v1504_v41 = vshrl.u32 %v12683_v34, 16  ;;  %v1514_v45 = vadd.s32 %v1512_v17, %v1510_v23  ;;  %v12770_v40 = vsub.s32 32, %v12483_v26  ;;  %6010 = vmatmul.bf16.vlgmr.msrb.gmra.mxu1 %v5946_v35  ;;  %6107 = vmatmul.bf16.vlgmr.msrb.gmra.mxu2 %v3442_v29  ;;  %v1460_v5 = vsel %vm1456_vm1, %v12619_v56, %v17451_v55  ;;  %v17454_v56 = vld [vmem:[#allocation6_spill] sm:$0xff] }
 0x16b   : > { %vm17453_vm6 = vcmp.lt.s32.totalorder %v17433_v16, 3  ;;  %v12780_v33 = vadd.s32 %v1493_v18, %v1484_v12  ;;  %v1388_v62 = vand.u32 2147483647, %v1387_v36  ;;  %v1390_v34 = vcvt.s32.f32 %v1383_v49  ;;  %v17465_v55 = vld [vmem:[#allocation14_spill] sm:$0xff] }
 0x16c   : > { %17450 = vst [vmem:[#allocation94_spill] sm:$0xff] %v12770_v40  ;;  %v1462_v6 = vsel %vm17453_vm6, %v17452_v30, %v12640_v50  ;;  %v1506_v19 = vshrl.u32 %v12718_v22, 16  ;;  %v1515_v4 = vadd.s32 %v1514_v45, %v1504_v41  ;;  %v2987_v21 = vshll.u32 %v17285_v15, %v12483_v26 }
 0x16d   : > { %v2990_v53 = vshll.u32 %v17280_v20, %v12483_v26  ;;  %v12787_v42 = vadd.s32 %v1509_v44, %v1505_v10  ;;  %vm1611_vm9 = vcmp.lt.s32.totalorder %v17454_v56, 2  ;;  %v12792_v50 = vshll.u32 %v17281_v8, %v12483_v26 }
 0x16e   : > { %v1391_v18 = vmul.f32 %v1390_v34, %v1388_v62  ;;  %vm17456_vm1 = vcmp.lt.s32.totalorder %v17433_v16, 2  ;;  %v1516_v22 = vadd.s32 %v1515_v4, %v1506_v19  ;;  %v2982_v61 = vshrl.u32 %v17288_v57, %v12770_v40  ;;  %v17457_v16 = vld [vmem:[#allocation26_spill] sm:$0xff]  ;;  %v17467_v62 = vld [vmem:[#allocation17_spill] sm:$0xff] }
 0x16f   : > { %17455 = vst [vmem:[#allocation57_spill] sm:$0xff] %v12792_v50  ;;  %v1463_v58 = vsel %vm17456_vm1, %v1460_v5, %v1462_v6  ;;  %v2985_v0 = vshrl.u32 %v17285_v15, %v12770_v40  ;;  %v2988_v10 = vshrl.u32 %v17280_v20, %v12770_v40  ;;  %vm1519_vm0 = vc.u32 %v12780_v33, %v12787_v42  ;;  %v17466_v6 = vld [vmem:[#allocation18_spill] sm:$0xff]  ;;  %v17468_v19 = vld [vmem:[#allocation13_spill] sm:$0xff] }
 0x170   : > { %v2991_v26 = vshrl.u32 %v17281_v8, %v12770_v40  ;;  %v1392_v44 = vxor.u32 2147483648, %v1391_v18  ;;  %v1520_v7 = vadd.s32 1, %v1516_v22  ;;  %v1625_v9 = vsel %vm1611_vm9, %v17458_v32, %v17457_v16 }
 0x171   : > { %v12812_v49 = vshrl.u32 %v17283_v63, %v12770_v40  ;;  %v12817_v23 = vsel %vm2821_vm13, %v12485_v47, 0  ;;  %v1517_v48 = vmul.u32 %v17460_v25, %v1463_v58  ;;  %v1629_v38 = vand.u32 65535, %v1625_v9 }
 0x172   : > { %v17461_v35 = vand.u32 2147483647, %v17449_v14  ;;  %v1393_v12 = vsel %vm1272_vm4, %v1392_v44, %v1391_v18  ;;  %v1521_v17 = vsel %vm1519_vm0, %v1520_v7, %v1516_v22  ;;  %v1630_v36 = vshrl.u32 %v1625_v9, 16 }
 0x173   : > { %17459 = vst [vmem:[#allocation58_spill] sm:$0xff] %v12812_v49  ;;  %v12829_v41 = vand.u32 65535, %v12504_v46  ;;  %v1522_v45 = vadd.s32 %v1521_v17, %v1517_v48  ;;  %v12837_v5 = vmul.u32 %v1629_v38, %v17465_v55  ;;  %v1621_v34 = vsel %vm1611_vm9, %v17467_v62, %v17466_v6 }
 0x174   : > { %vm12822_vm14 = vcmp.le.f32.partialorder %v17461_v35, 0.7853982  ;;  %v1631_v4 = vmul.u32 %v1629_v38, %v17468_v19  ;;  %v12849_v18 = vmul.u32 %v1630_v36, %v17468_v19  ;;  %v12852_v58 = vor.u32 %v2982_v61, %v12513_v13  ;;  %v17471_v13 = vld [vmem:[#allocation63_spill] sm:$0xff] }
 0x175   : > { %17464 = vst [vmem:[#allocation66_spill] sm:$0xff] %v12829_v41  ;;  %v12834_v47 = vsel %vm12822_vm14, %v17449_v14, %v1393_v12  ;;  %v12854_v22 = vor.u32 %v2985_v0, %v2984_v1  ;;  %v1394_v44 = vsub.s32 4, %v12670_v37  ;;  %v1523_v7 = vadd.s32 536870912, %v1522_v45 }
 0x176   : > { %v12841_v30 = vmul.f32 %v12834_v47, %v12834_v47  ;;  %17469 = vst [vmem:[#allocation8_spill] sm:$0xff] %v12852_v58  ;;  %v12857_v16 = vor.u32 %v2988_v10, %v2987_v21  ;;  %v1635_v25 = vshll.u32 %v12849_v18, 16  ;;  %v1637_v38 = vshll.u32 %v12837_v5, 16 }
 0x177   : > { %v1524_v48 = vshrl.u32 %v1523_v7, 30  ;;  %v1651_v35 = vand.u32 65535, %v1621_v34  ;;  %v1652_v12 = vshrl.u32 %v1621_v34, 16  ;;  %vm1426_vm3 = vcmp.lt.s32.totalorder %v17471_v13, 0 }
 0x178   : > { %17470 = vst [vmem:[#allocation53_spill] sm:$0xff] %v12857_v16  ;;  %v1399_v32 = vmul.f32 -0.001358992, %v12841_v30  ;;  %v1406_v9 = vmul.f32 -0.00019511016, %v12841_v30  ;;  %vm1639_vm7 = vc.u32 %v1631_v4, %v1635_v25  ;;  %v1641_v0 = vadd.s32 %v1635_v25, %v1631_v4 }
 0x179   : > { %v12864_v17 = vor.u32 %v2991_v26, %v2990_v53  ;;  %v1395_v21 = vsel %vm1272_vm4, %v1394_v44, %v12670_v37  ;;  %v1525_v10 = vshll.u32 %v1524_v48, 30  ;;  %v1634_v6 = vmul.u32 %v1630_v36, %v17465_v55 }
 0x17a   : > { %v1400_v1 = vadd.f32 0.041655596, %v1399_v32  ;;  %v1407_v61 = vadd.f32 0.008332121, %v1406_v9  ;;  %v12873_v34 = vand.u32 31, %v12817_v23  ;;  %v1640_v32 = vsel %vm1639_vm7, 1, %v17311_v24 }
 0x17b   : > { %17472 = vst [vmem:[#allocation64_spill] sm:$0xff] %v12864_v17  ;;  %v17473_v53 = vand.u32 2147483647, %v17471_v13  ;;  %v1526_v37 = vsub.s32 %v1522_v45, %v1525_v10  ;;  %vm1643_vm8 = vc.u32 %v1641_v0, %v1637_v38  ;;  %v1654_v36 = vmul.u32 %v1652_v12, %v17468_v19  ;;  %v17476_v45 = vld [vmem:[#allocation5_spill] sm:$0xff]  ;;  %v17477_v0 = vld [vmem:[#allocation12_spill] sm:$0xff] }
 0x17c   : > { %v1408_v7 = vmul.f32 %v1407_v61, %v12841_v30  ;;  %v1397_v4 = vsel %vm12822_vm14, 0, %v1395_v21  ;;  %v1401_v44 = vmul.f32 %v1400_v1, %v12841_v30  ;;  %v12888_v25 = vmul.u32 %v1651_v35, %v17465_v55 }
 0x17d   : > { %vm12879_vm2 = vcmp.le.f32.partialorder %v17473_v53, 0.7853982  ;;  %vm1527_vm15 = vcmp.lt.s32.totalorder %v1526_v37, 0  ;;  %v1528_v61 = vsub.s32 0, %v1526_v37  ;;  %v1548_v62 = vsub.s32 4, %v1524_v48 }
 0x17e   : > { %v1409_v9 = vadd.f32 -0.16666654, %v1408_v7  ;;  %v1642_v53 = vadd.s32 %v1640_v32, %v1634_v6  ;;  %v1518_v60 = vadd.s32 %v12787_v42, %v12780_v33  ;;  %v1594_v38 = vshrl.u32 %v17301_v43, %v17476_v45 }
 0x17f   : > { %vm17478_vm12 = vcmp.lt.s32.totalorder %v17454_v56, 4  ;;  %v1644_v1 = vsel %vm1643_vm8, 1, %v17311_v24  ;;  %v1529_v10 = vsel %vm1527_vm15, %v1528_v61, %v1526_v37  ;;  %v1653_v7 = vmul.u32 %v1651_v35, %v17468_v19  ;;  %v17481_v35 = vld [vmem:[#allocation11_spill] sm:$0xff] }
 0x180   : > { %v1615_v29 = vsel %vm17478_vm12, %v17477_v0, 2102212464  ;;  %v1410_v21 = vmul.f32 %v1409_v9, %v12841_v30  ;;  %v1657_v2 = vshll.u32 %v1654_v36, 16  ;;  %v1402_v40 = vadd.f32 -0.4999988, %v1401_v44  ;;  %v17479_v9 = vld [vmem:[#allocation10_spill] sm:$0xff] }
 0x181   : > { %v1530_v6 = vclz %v1529_v10  ;;  %v3904_v32 = vadd.s32 3, %v1397_v4  ;;  %v1636_v33 = vshrl.u32 %v12849_v18, 16  ;;  %v1549_v42 = vsel %vm1426_vm3, %v1548_v62, %v1524_v48 }
 0x182   : > { %v1646_v45 = vadd.s32 %v1644_v1, %v1642_v53  ;;  %v1656_v41 = vmul.u32 %v1652_v12, %v17465_v55  ;;  %v1659_v0 = vshll.u32 %v12888_v25, 16  ;;  %v12905_v49 = vand.u32 3, %v1397_v4 }
 0x183   : > { %v10140_v50 = vadd.s32 4294967294, %v1530_v6  ;;  %vm17480_vm10 = vcmp.lt.s32.totalorder %v17454_v56, 1  ;;  %vm17482_vm11 = vcmp.lt.s32.totalorder %v17454_v56, 3  ;;  %v1411_v18 = vadd.f32 1.0, %v1410_v21 }
 0x184   : > { %v1614_v19 = vsel %vm17480_vm10, %v1594_v38, %v17479_v9  ;;  %v1616_v44 = vsel %vm17482_vm11, %v17481_v35, %v1615_v29  ;;  %v1638_v61 = vshrl.u32 %v12837_v5, 16  ;;  %vm1661_vm13 = vc.u32 %v1653_v7, %v1657_v2 }
 0x185   : > { %v1663_v48 = vadd.s32 %v1657_v2, %v1653_v7  ;;  %v1403_v55 = vmul.f32 %v1402_v40, %v12841_v30  ;;  %vm10141_vm5 = vcmp.lt.s32.totalorder %v10140_v50, 0  ;;  %v1551_v12 = vsel %vm12879_vm2, 0, %v1549_v42 }
 0x186   : > { %v1662_v62 = vsel %vm1661_vm13, 1, %v17311_v24  ;;  %v1533_v4 = vsel %vm10141_vm5, 0, %v10140_v50  ;;  %v1647_v53 = vadd.s32 %v1646_v45, %v1636_v33  ;;  %v12918_v29 = vand.u32 3, %v3904_v32  ;;  %v17483_v32 = vld [vmem:[#allocation20_spill] sm:$0xff] }
 0x187   : > { %v1664_v38 = vadd.s32 %v1662_v62, %v1656_v41  ;;  %vm1665_vm4 = vc.u32 %v1663_v48, %v1659_v0  ;;  %v1534_v1 = vsub.s32 32, %v1533_v4  ;;  %v1538_v10 = vsub.s32 4294967266, %v1533_v4  ;;  %v17486_v62 = vld [vmem:[#allocation39_spill] sm:$0xff] }
 0x188   : > { %v1658_v21 = vshrl.u32 %v1654_v36, 16  ;;  %v12921_v5 = vmul.f32 %v1411_v18, %v12834_v47  ;;  %v4059_v2 = vadd.s32 3, %v1551_v12  ;;  %v1660_v40 = vshrl.u32 %v12888_v25, 16 }
 0x189   : > { %v1666_v30 = vsel %vm1665_vm4, 1, %v17311_v24  ;;  %v1535_v7 = vshll.u32 %v1526_v37, %v1533_v4  ;;  %v1536_v6 = vshrl.u32 %v1518_v60, %v1534_v1  ;;  %v1539_v42 = vadd.s32 127, %v1538_v10  ;;  %v17487_v4 = vld [vmem:[#allocation33_spill] sm:$0xff] }
 0x18a   : > { %v1668_v50 = vadd.s32 %v1666_v30, %v1664_v38  ;;  %v12925_v33 = vadd.f32 1.0, %v1403_v55  ;;  %v12927_v41 = vadd.s32 %v1647_v53, %v1638_v61  ;;  %v12929_v45 = vadd.s32 %v1663_v48, %v1659_v0  ;;  %v17484_v0 = vld [vmem:[#allocation32_spill] sm:$0xff]  ;;  %v17485_v48 = vld [vmem:[#allocation30_spill] sm:$0xff]  ;;  %v17490_v38 = vld [vmem:[#allocation9_spill] sm:$0xff] }
 0x18b   : > { %vm1765_vm6 = vcmp.lt.s32.totalorder %v17483_v32, 2  ;;  %v1537_v36 = vor.u32 %v1536_v6, %v1535_v7  ;;  %v1540_v47 = vshll.u32 %v1539_v42, 23  ;;  %v1617_v9 = vsel %vm1611_vm9, %v1614_v19, %v1616_v44  ;;  %v17488_v44 = vld [vmem:[#allocation106_spill] sm:$0xff] }
 0x18c   : > { %v1669_v25 = vadd.s32 %v1668_v50, %v1658_v21  ;;  %v17187_v35 = vxor.u32 2147483648, %v12921_v5  ;;  %vm3907_vm1 = vcmp.eq.s32.totalorder %v12918_v29, 0  ;;  %v12936_v60 = vand.u32 3, %v4059_v2 }
 0x18d   : > { %v12938_v37 = vand.u32 3, %v1551_v12  ;;  %v1541_v18 = vor.u32 4788187, %v1540_v47  ;;  %v1775_v55 = vsel %vm1765_vm6, %v17485_v48, %v17484_v0  ;;  %v1779_v56 = vsel %vm1765_vm6, %v17487_v4, %v17486_v62  ;;  %v17491_v47 = vld [vmem:[#allocation15_spill] sm:$0xff]  ;;  %v17493_v0 = vld [vmem:[#allocation28_spill] sm:$0xff]  ;;  %v17495_v62 = vld [vmem:[#allocation21_spill] sm:$0xff] }
 0x18e   : > { %v1670_v61 = vadd.s32 %v1669_v25, %v1660_v40  ;;  %vm17489_vm9 = vcmask 523264   ;;  %v1671_v12 = vmul.u32 %v17490_v38, %v1617_v9  ;;  %vm1673_vm0 = vc.u32 %v12927_v41, %v12929_v45  ;;  %v17492_v25 = vld [vmem:[#allocation27_spill] sm:$0xff] }
 0x18f   : > { %v7337_v53 = vsel %vm17489_vm9, %v17488_v44, 0.0  ;;  %v1542_v1 = vand.u32 2147483647, %v1541_v18  ;;  %v1544_v10 = vcvt.s32.f32 %v1537_v36  ;;  %v1783_v2 = vand.u32 65535, %v1779_v56  ;;  %vm17496_vm7 = vmmov %vm17489_vm9 }
 0x190   : > { %7338 = vadd.xlane.f32.xlu2 %v7337_v53  ;;  %v1674_v21 = vadd.s32 1, %v1670_v61  ;;  %v12959_v40 = vsel %vm3907_vm1, %v12925_v33, %v17187_v35  ;;  %v1784_v30 = vshrl.u32 %v1779_v56, 16  ;;  %v1805_v7 = vand.u32 65535, %v1775_v55 }
 0x191   : > { %v1806_v6 = vshrl.u32 %v1775_v55, 16  ;;  %v1545_v42 = vmul.f32 %v1544_v10, %v1542_v1  ;;  %v1748_v9 = vshrl.u32 %v17301_v43, %v17491_v47  ;;  %v12964_v36 = vmul.u32 %v1783_v2, %v17492_v25 }
 0x192   : > { %v1675_v50 = vsel %vm1673_vm0, %v1674_v21, %v1670_v61  ;;  %vm17494_vm14 = vcmp.lt.s32.totalorder %v17483_v32, 4  ;;  %v1785_v4 = vmul.u32 %v1783_v2, %v17495_v62  ;;  %v1786_v53 = vmul.u32 %v1784_v30, %v17495_v62 }
 0x193   : > { %v1676_v18 = vadd.s32 %v1675_v50, %v1671_v12  ;;  %v1769_v48 = vsel %vm17494_vm14, %v17493_v0, 2102212464  ;;  %v1546_v56 = vxor.u32 2147483648, %v1545_v42  ;;  %v7343_v55 = vsel %vm17496_vm7, %v12658_v52, 0.0  ;;  %v17497_v50 = vld [vmem:[#allocation24_spill] sm:$0xff] }
 0x194   : > { %v1788_v61 = vmul.u32 %v1784_v30, %v17492_v25  ;;  %v12975_v38 = vmul.u32 %v1806_v6, %v17495_v62  ;;  %v1789_v10 = vshll.u32 %v1786_v53, 16  ;;  %v1791_v12 = vshll.u32 %v12964_v36, 16 }
 0x195   : > { %v1677_v1 = vadd.s32 536870912, %v1676_v18  ;;  %v12979_v21 = vmul.u32 %v1805_v7, %v17492_v25  ;;  %v1547_v2 = vsel %vm1426_vm3, %v1546_v56, %v1545_v42  ;;  %vm3910_vm8 = vcmp.eq.s32.totalorder %v12918_v29, 2 }
 0x196   : > { %vm17498_vm15 = vcmp.lt.s32.totalorder %v17483_v32, 3  ;;  %v1807_v30 = vmul.u32 %v1805_v7, %v17495_v62  ;;  %v1811_v0 = vshll.u32 %v12975_v38, 16  ;;  %v12992_v35 = vsel %vm12879_vm2, %v17471_v13, %v1547_v2 }
 0x197   : > { %v1770_v47 = vsel %vm17498_vm15, %v17497_v50, %v1769_v48  ;;  %v12994_v19 = vshrl.u32 %v1677_v1, 30  ;;  %vm1793_vm12 = vc.u32 %v1785_v4, %v1789_v10  ;;  %v1795_v52 = vadd.s32 %v1789_v10, %v1785_v4 }
 0x198   : > { %v1552_v42 = vmul.f32 %v12992_v35, %v12992_v35  ;;  %vm1416_vm3 = vcmp.eq.s32.totalorder %v12905_v49, 0  ;;  %7344 = vadd.xlane.f32.xlu2 %v7343_v55  ;;  %v1790_v48 = vshrl.u32 %v1786_v53, 16  ;;  %v1794_v7 = vsel %vm1793_vm12, 1, %v17311_v24  ;;  %v17499_v55 = vld [vmem:[#allocation23_spill] sm:$0xff] }
 0x199   : > { %v1810_v62 = vmul.u32 %v1806_v6, %v17492_v25  ;;  %v1679_v56 = vshll.u32 %v12994_v19, 30  ;;  %v1796_v26 = vadd.s32 %v1794_v7, %v1788_v61  ;;  %vm1797_vm2 = vc.u32 %v1795_v52, %v1791_v12 }
 0x19a   : > { %v1813_v1 = vshll.u32 %v12979_v21, 16  ;;  %v1553_v2 = vmul.f32 -0.001358992, %v1552_v42  ;;  %v1560_v50 = vmul.f32 -0.00019511016, %v1552_v42  ;;  %vm3906_vm10 = vcmp.lt.s32.totalorder %v12918_v29, 2 }
 0x19b   : > { %vm1419_vm11 = vcmp.eq.s32.totalorder %v12905_v49, 2  ;;  %v1798_v4 = vsel %vm1797_vm2, 1, %v17311_v24  ;;  %vm1815_vm13 = vc.u32 %v1807_v30, %v1811_v0  ;;  %v13006_v53 = vsub.s32 %v1676_v18, %v1679_v56 }
 0x19c   : > { %vm17500_vm5 = vcmp.lt.s32.totalorder %v17483_v32, 1  ;;  %v1800_v25 = vadd.s32 %v1798_v4, %v1796_v26  ;;  %v1816_v52 = vsel %vm1815_vm13, 1, %v17311_v24  ;;  %v1554_v61 = vadd.f32 0.041655596, %v1553_v2 }
 0x19d   : > { %v1768_v6 = vsel %vm17500_vm5, %v1748_v9, %v17499_v55  ;;  %v1561_v10 = vadd.f32 0.008332121, %v1560_v50  ;;  %vm1415_vm4 = vcmp.lt.s32.totalorder %v12905_v49, 2  ;;  %v1792_v12 = vshrl.u32 %v12964_v36, 16 }
 0x19e   : > { %v1817_v7 = vadd.s32 %v1811_v0, %v1807_v30  ;;  %vm1681_vm1 = vcmp.lt.s32.totalorder %v13006_v53, 0  ;;  %v1682_v44 = vsub.s32 0, %v13006_v53  ;;  %v1801_v18 = vadd.s32 %v1800_v25, %v1790_v48 }
 0x19f   : > { %v1818_v56 = vadd.s32 %v1816_v52, %v1810_v62  ;;  %v1555_v16 = vmul.f32 %v1554_v61, %v1552_v42  ;;  %v1562_v17 = vmul.f32 %v1561_v10, %v1552_v42  ;;  %v1812_v9 = vshrl.u32 %v12975_v38, 16  ;;  %v17502_v62 = vld [vmem:[#allocation2_spill] sm:$0xff] }
 0x1a0   : > { %vm1819_vm9 = vc.u32 %v1817_v7, %v1813_v1  ;;  %vm1413_vm0 = vweird.f32 %v17449_v14  ;;  %v17501_v26 = vxor.u32 2147483648, %v12925_v33  ;;  %v1683_v30 = vsel %vm1681_vm1, %v1682_v44, %v13006_v53 }
 0x1a1   : > { %v1814_v0 = vshrl.u32 %v12979_v21, 16  ;;  %v1820_v48 = vsel %vm1819_vm9, 1, %v17311_v24  ;;  %vm1580_vm14 = vcmp.lt.s32.totalorder %v17502_v62, 0  ;;  %v1556_v2 = vadd.f32 -0.4999988, %v1555_v16 }
 0x1a2   : > { %v3912_v36 = vsel %vm3910_vm8, %v17501_v26, %v12921_v5  ;;  %v1563_v50 = vadd.f32 -0.16666654, %v1562_v17  ;;  %vm1573_vm7 = vcmp.eq.s32.totalorder %v12938_v37, 2  ;;  %v1684_v38 = vclz %v1683_v30 }
 0x1a3   : > { %v1822_v4 = vadd.s32 %v1820_v48, %v1818_v56  ;;  %v17503_v55 = vxor.u32 2147483648, %v12921_v5  ;;  %vm1570_vm8 = vcmp.eq.s32.totalorder %v12938_v37, 0  ;;  %v1771_v44 = vsel %vm1765_vm6, %v1768_v6, %v1770_v47 }
 0x1a4   : > { %v13036_v21 = vadd.s32 %v1801_v18, %v1792_v12  ;;  %v13038_v52 = vadd.s32 %v1817_v7, %v1813_v1  ;;  %v1557_v16 = vmul.f32 %v1556_v2, %v1552_v42  ;;  %v1564_v17 = vmul.f32 %v1563_v50, %v1552_v42  ;;  %v17508_v18 = vld [vmem:[#allocation16_spill] sm:$0xff] }
 0x1a5   : > { %v1418_v25 = vsel %vm1416_vm3, %v12925_v33, %v17503_v55  ;;  %vm4061_vm15 = vcmp.lt.s32.totalorder %v12936_v60, 2  ;;  %vm1569_vm12 = vcmp.lt.s32.totalorder %v12938_v37, 2  ;;  %v10143_v61 = vadd.s32 4294967294, %v1684_v38 }
 0x1a6   : > { %v1823_v10 = vadd.s32 %v1822_v4, %v1812_v9  ;;  %vm1567_vm2 = vweird.f32 %v17471_v13  ;;  %v3913_v56 = vsel %vm3906_vm10, %v12959_v40, %v3912_v36  ;;  %vm4062_vm6 = vcmp.eq.s32.totalorder %v12936_v60, 0 }
 0x1a7   : > { %v17504_v32 = vmov %v17501_v26  ;;  %v17505_v42 = vand.u32 2147483647, %v17502_v62  ;;  %v1672_v6 = vadd.s32 %v12929_v45, %v12927_v41  ;;  %v1558_v12 = vadd.f32 1.0, %v1557_v16 }
 0x1a8   : > { %v1421_v47 = vsel %vm1419_vm11, %v17504_v32, %v12921_v5  ;;  %v1565_v29 = vadd.f32 1.0, %v1564_v17  ;;  %vm10144_vm10 = vcmp.lt.s32.totalorder %v10143_v61, 0  ;;  %v1824_v40 = vadd.s32 %v1823_v10, %v1814_v0 }
 0x1a9   : > { %vm13054_vm3 = vcmp.le.f32.partialorder %v17505_v42, 0.7853982  ;;  %v1422_v7 = vsel %vm1415_vm4, %v1418_v25, %v1421_v47  ;;  %v1687_v33 = vsel %vm10144_vm10, 0, %v10143_v61  ;;  %v1825_v9 = vmul.u32 %v17508_v18, %v1771_v44 }
 0x1aa   : > { %vm1827_vm11 = vc.u32 %v13036_v21, %v13038_v52  ;;  %v1566_v5 = vmul.f32 %v1565_v29, %v12992_v35  ;;  %v1574_v26 = vxor.u32 2147483648, %v1558_v12  ;;  %v1688_v36 = vsub.s32 32, %v1687_v33 }
 0x1ab   : > { %v1689_v30 = vshll.u32 %v13006_v53, %v1687_v33  ;;  %vm2996_vm13 = vcmp.lt.s32.totalorder %v12490_v59, 1  ;;  %vm4065_vm5 = vcmp.eq.s32.totalorder %v12936_v60, 2  ;;  %v1692_v41 = vsub.s32 4294967266, %v1687_v33 }
 0x1ac   : > { %v1702_v49 = vsub.s32 4, %v12994_v19  ;;  %v1828_v45 = vadd.s32 1, %v1824_v40  ;;  %v1571_v0 = vxor.u32 2147483648, %v1566_v5  ;;  %v3914_v48 = vsel %vm1413_vm0, nan, %v3913_v56  ;;  %v17509_v56 = vld [vmem:[#allocation3_spill] sm:$0xff] }
 0x1ad   : > { %v1423_v2 = vsel %vm1413_vm0, nan, %v1422_v7  ;;  %v1690_v35 = vshrl.u32 %v1672_v6, %v1688_v36  ;;  %v4067_v50 = vsel %vm4065_vm5, %v1574_v26, %v1566_v5  ;;  %v1575_v53 = vsel %vm1573_vm7, %v1574_v26, %v1566_v5  ;;  %v17510_v7 = vld [vmem:[#allocation126_spill] sm:$0xff] }
 0x1ae   : > { %v1693_v38 = vadd.s32 127, %v1692_v41  ;;  %v1829_v4 = vsel %vm1827_vm11, %v1828_v45, %v1824_v40  ;;  %v4064_v55 = vsel %vm4062_vm6, %v1558_v12, %v1571_v0  ;;  %v1572_v25 = vsel %vm1570_vm8, %v1558_v12, %v1571_v0  ;;  %v17514_v45 = vld [vmem:[#allocation125_spill] sm:$0xff] }
 0x1af   : > { %v1691_v44 = vor.u32 %v1690_v35, %v1689_v30  ;;  %v1830_v16 = vadd.s32 %v1829_v4, %v1825_v9  ;;  %v4068_v14 = vsel %vm4061_vm15, %v4064_v55, %v4067_v50  ;;  %v1576_v17 = vsel %vm1569_vm12, %v1572_v25, %v1575_v53  ;;  %v17516_v53 = vld [vmem:[#allocation111_spill] sm:$0xff]  ;;  %v17517_v4 = vld [vmem:[#allocation121_spill] sm:$0xff] }
 0x1b0   : > { %v1694_v61 = vshll.u32 %v1693_v38, 23  ;;  %v1703_v10 = vsel %vm1580_vm14, %v1702_v49, %v12994_v19  ;;  %vm1734_vm4 = vcmp.lt.s32.totalorder %v17509_v56, 0  ;;  %v4069_v32 = vsel %vm1567_vm2, nan, %v4068_v14 }
 0x1b1   : > { %v1577_v47 = vsel %vm1567_vm2, nan, %v1576_v17  ;;  %v1831_v42 = vadd.s32 536870912, %v1830_v16  ;;  %vm1919_vm1 = vcmp.lt.s32.totalorder %v12104_v3, 2  ;;  %v5947_v60 = vpack.c.bf16 %v4069_v32, %v3914_v48  ;;  %v17515_v48 = vld [vmem:[#allocation122_spill] sm:$0xff] }
 0x1b2   : > { %v3443_v6 = vpack.c.bf16 %v1577_v47, %v1423_v2  ;;  %v1695_v37 = vor.u32 4788187, %v1694_v61  ;;  %v1698_v12 = vcvt.s32.f32 %v1691_v44  ;;  %v13097_v29 = vshrl.u32 %v12817_v23, 5  ;;  %v17519_v61 = vld [vmem:[#allocation123_spill] sm:$0xff] }
 0x1b3   : > { %v1705_v19 = vsel %vm13054_vm3, 0, %v1703_v10  ;;  %v1832_v40 = vshrl.u32 %v1831_v42, 30  ;;  %v1933_v13 = vsel %vm1919_vm1, %v17510_v7, %v12261_v27  ;;  %v13106_v33 = vshrl.u32 %v12504_v46, 16  ;;  %6015 = vmatmul.bf16.gmra.mxu1 %v5947_v60  ;;  %v17520_v60 = vld [vmem:[#allocation118_spill] sm:$0xff] }
 0x1b4   : > { %6112 = vmatmul.bf16.gmra.mxu2 %v3443_v6  ;;  %v1696_v18 = vand.u32 2147483647, %v1695_v37  ;;  %v1937_v9 = vand.u32 65535, %v1933_v13  ;;  %v1938_v5 = vshrl.u32 %v1933_v13, 16  ;;  %v13112_v23 = vsel %vm2996_vm13, %v12852_v58, %v12854_v22 }
 0x1b5   : > { %v13115_v26 = vsub.s32 32, %v12873_v34  ;;  %v17511_v36 = vand.u32 2147483647, %v17509_v56  ;;  %v1833_v30 = vshll.u32 %v1832_v40, 30  ;;  %v4214_v49 = vadd.s32 3, %v1705_v19 }
 0x1b6   : > { %v1699_v41 = vmul.f32 %v1698_v12, %v1696_v18  ;;  %v1929_v0 = vsel %vm1919_vm1, %v17514_v45, %v12222_v31  ;;  %v1940_v2 = vmul.u32 %v1938_v5, %v17515_v48  ;;  %v1826_v35 = vadd.s32 %v13038_v52, %v13036_v21  ;;  %v17522_v18 = vld [vmem:[#allocation120_spill] sm:$0xff] }
 0x1b7   : > { %vm13119_vm9 = vcmp.le.f32.partialorder %v17511_v36, 0.7853982  ;;  %v1834_v50 = vsub.s32 %v1830_v16, %v1833_v30  ;;  %v1902_v38 = vshrl.u32 %v17301_v43, %v17516_v53  ;;  %vm17518_vm0 = vcmp.lt.s32.totalorder %v12104_v3, 4 }
 0x1b8   : > { %v1923_v55 = vsel %vm17518_vm0, %v17517_v4, 2102212464  ;;  %v1700_v25 = vxor.u32 2147483648, %v1699_v41  ;;  %v1856_v44 = vsub.s32 4, %v1832_v40  ;;  %v1939_v14 = vmul.u32 %v1937_v9, %v17515_v48 }
 0x1b9   : > { %v1943_v17 = vshll.u32 %v1940_v2, 16  ;;  %vm1835_vm7 = vcmp.lt.s32.totalorder %v1834_v50, 0  ;;  %v1836_v31 = vsub.s32 0, %v1834_v50  ;;  %v13137_v10 = vmul.u32 %v1937_v9, %v17519_v61 }
 0x1ba   : > { %v1959_v32 = vand.u32 65535, %v1929_v0  ;;  %v1701_v21 = vsel %vm1580_vm14, %v1700_v25, %v1699_v41  ;;  %v13141_v52 = vand.u32 3, %v4214_v49  ;;  %v13143_v16 = vand.u32 3, %v1705_v19 }
 0x1bb   : > { %vm1947_vm8 = vc.u32 %v1939_v14, %v1943_v17  ;;  %v1704_v47 = vsel %vm13054_vm3, %v17502_v62, %v1701_v21  ;;  %v1837_v42 = vsel %vm1835_vm7, %v1836_v31, %v1834_v50  ;;  %vm17521_vm15 = vcmp.lt.s32.totalorder %v12104_v3, 1 }
 0x1bc   : > { %v1922_v6 = vsel %vm17521_vm15, %v1902_v38, %v17520_v60  ;;  %v1960_v37 = vshrl.u32 %v1929_v0, 16  ;;  %v1706_v12 = vmul.f32 %v1704_v47, %v1704_v47  ;;  %v1838_v7 = vclz %v1837_v42 }
 0x1bd   : > { %v1857_v13 = vsel %vm1734_vm4, %v1856_v44, %v1832_v40  ;;  %vm17523_vm14 = vcmp.lt.s32.totalorder %v12104_v3, 3  ;;  %v1942_v9 = vmul.u32 %v1938_v5, %v17519_v61  ;;  %v1945_v1 = vshll.u32 %v13137_v10, 16 }
 0x1be   : > { %v1924_v19 = vsel %vm17523_vm14, %v17522_v18, %v1923_v55  ;;  %v1948_v36 = vsel %vm1947_vm8, 1, %v17311_v24  ;;  %v1961_v30 = vmul.u32 %v1959_v32, %v17515_v48  ;;  %v1707_v41 = vmul.f32 -0.001358992, %v1706_v12 }
 0x1bf   : > { %v1714_v49 = vmul.f32 -0.00019511016, %v1706_v12  ;;  %v10146_v45 = vadd.s32 4294967294, %v1838_v7  ;;  %v1949_v0 = vadd.s32 %v1943_v17, %v1939_v14  ;;  %v1859_v53 = vsel %vm13119_vm9, 0, %v1857_v13 }
 0x1c0   : > { %v1950_v40 = vadd.s32 %v1948_v36, %v1942_v9  ;;  %v1962_v38 = vmul.u32 %v1960_v37, %v17515_v48  ;;  %v1963_v4 = vmul.u32 %v1959_v32, %v17519_v61  ;;  %v1708_v55 = vadd.f32 0.041655596, %v1707_v41 }
 0x1c1   : > { %v1715_v5 = vadd.f32 0.008332121, %v1714_v49  ;;  %vm10147_vm12 = vcmp.lt.s32.totalorder %v10146_v45, 0  ;;  %vm1951_vm2 = vc.u32 %v1949_v0, %v1945_v1  ;;  %v1944_v44 = vshrl.u32 %v1940_v2, 16 }
 0x1c2   : > { %v1841_v25 = vsel %vm10147_vm12, 0, %v10146_v45  ;;  %v1952_v31 = vsel %vm1951_vm2, 1, %v17311_v24  ;;  %v1965_v21 = vshll.u32 %v1962_v38, 16  ;;  %v1709_v42 = vmul.f32 %v1708_v55, %v1706_v12 }
 0x1c3   : > { %v1716_v60 = vmul.f32 %v1715_v5, %v1706_v12  ;;  %v1842_v14 = vsub.s32 32, %v1841_v25  ;;  %v1843_v17 = vshll.u32 %v1834_v50, %v1841_v25  ;;  %v1846_v7 = vsub.s32 4294967266, %v1841_v25 }
 0x1c4   : > { %v1954_v13 = vadd.s32 %v1952_v31, %v1950_v40  ;;  %v1964_v18 = vmul.u32 %v1960_v37, %v17519_v61  ;;  %v1967_v48 = vshll.u32 %v1963_v4, 16  ;;  %v1710_v9 = vadd.f32 -0.4999988, %v1709_v42 }
 0x1c5   : > { %v1717_v32 = vadd.f32 -0.16666654, %v1716_v60  ;;  %v1844_v36 = vshrl.u32 %v1826_v35, %v1842_v14  ;;  %vm1969_vm6 = vc.u32 %v1961_v30, %v1965_v21  ;;  %v1847_v41 = vadd.s32 127, %v1846_v7 }
 0x1c6   : > { %v1955_v1 = vadd.s32 %v1954_v13, %v1944_v44  ;;  %v1970_v2 = vsel %vm1969_vm6, 1, %v17311_v24  ;;  %v1971_v49 = vadd.s32 %v1965_v21, %v1961_v30  ;;  %v1711_v45 = vmul.f32 %v1710_v9, %v1706_v12  ;;  %v17525_v9 = vld [vmem:[#allocation101_spill] sm:$0xff] }
 0x1c7   : > { %v1718_v0 = vmul.f32 %v1717_v32, %v1706_v12  ;;  %v1845_v55 = vor.u32 %v1844_v36, %v1843_v17  ;;  %v1972_v5 = vadd.s32 %v1970_v2, %v1964_v18  ;;  %v1848_v58 = vshll.u32 %v1847_v41, 23  ;;  %v17528_v2 = vld [vmem:[#allocation112_spill] sm:$0xff] }
 0x1c8   : > { %v4369_v50 = vadd.s32 3, %v1859_v53  ;;  %v1925_v40 = vsel %vm1919_vm1, %v1922_v6, %v1924_v19  ;;  %vm1973_vm3 = vc.u32 %v1971_v49, %v1967_v48  ;;  %v1712_v61 = vadd.f32 1.0, %v1711_v45 }
 0x1c9   : > { %v1719_v37 = vadd.f32 1.0, %v1718_v0  ;;  %v1946_v35 = vshrl.u32 %v13137_v10, 16  ;;  %v1974_v25 = vsel %vm1973_vm3, 1, %v17311_v24  ;;  %v1849_v44 = vor.u32 4788187, %v1848_v58  ;;  %v17529_v0 = vld [vmem:[#allocation110_spill] sm:$0xff] }
 0x1ca   : > { %v1852_v31 = vcvt.s32.f32 %v1845_v55  ;;  %v1966_v42 = vshrl.u32 %v1962_v38, 16  ;;  %v1976_v30 = vadd.s32 %v1974_v25, %v1972_v5  ;;  %vm4217_vm10 = vcmp.eq.s32.totalorder %v13141_v52, 0  ;;  %v17524_v38 = vld [vmem:[#allocation114_spill] sm:$0xff]  ;;  %v17531_v5 = vld [vmem:[#allocation117_spill] sm:$0xff] }
 0x1cb   : > { %v1720_v21 = vmul.f32 %v1719_v37, %v1704_v47  ;;  %vm4220_vm11 = vcmp.eq.s32.totalorder %v13141_v52, 2  ;;  %v1956_v12 = vadd.s32 %v1955_v1, %v1946_v35  ;;  %v1728_v60 = vxor.u32 2147483648, %v1712_v61  ;;  %v17527_v1 = vld [vmem:[#allocation115_spill] sm:$0xff] }
 0x1cc   : > { %v1850_v3 = vand.u32 2147483647, %v1849_v44  ;;  %vm4216_vm5 = vcmp.lt.s32.totalorder %v13141_v52, 2  ;;  %vm1724_vm1 = vcmp.eq.s32.totalorder %v13143_v16, 0  ;;  %v1968_v6 = vshrl.u32 %v1963_v4, 16  ;;  %v17526_v4 = vld [vmem:[#allocation107_spill] sm:$0xff] }
 0x1cd   : > { %v1977_v10 = vadd.s32 %v1976_v30, %v1966_v42  ;;  %v1725_v19 = vxor.u32 2147483648, %v1720_v21  ;;  %vm1727_vm0 = vcmp.eq.s32.totalorder %v13143_v16, 2  ;;  %v1975_v58 = vadd.s32 %v1971_v49, %v1967_v48  ;;  %v17533_v30 = vld [vmem:[#allocation108_spill] sm:$0xff] }
 0x1ce   : > { %v1979_v14 = vmul.u32 %v17524_v38, %v1925_v40  ;;  %v1853_v47 = vmul.f32 %v1852_v31, %v1850_v3  ;;  %v13177_v17 = vand.u32 3, %v4369_v50  ;;  %v13179_v7 = vand.u32 3, %v1859_v53  ;;  %v17532_v50 = vld [vmem:[#allocation113_spill] sm:$0xff]  ;;  %v17538_v38 = vld [vmem:[#allocation103_spill] sm:$0xff] }
 0x1cf   : > { %v1978_v13 = vadd.s32 %v1977_v10, %v1968_v6  ;;  %v13181_v18 = vadd.s32 %v1975_v58, %v1956_v12  ;;  %vm1981_vm7 = vc.u32 %v1956_v12, %v1975_v58  ;;  %v2056_v32 = vshrl.u32 %v17301_v43, %v17525_v9  ;;  %v17535_v3 = vld [vmem:[#allocation109_spill] sm:$0xff]  ;;  %v17537_v10 = vld [vmem:[#allocation102_spill] sm:$0xff] }
 0x1d0   : > { %vm2073_vm8 = vcmp.lt.s32.totalorder %v17526_v4, 2  ;;  %v1854_v36 = vxor.u32 2147483648, %v1853_v47  ;;  %v4222_v48 = vsel %vm4220_vm11, %v1728_v60, %v1720_v21  ;;  %vm1723_vm15 = vcmp.lt.s32.totalorder %v13143_v16, 2 }
 0x1d1   : > { %v1982_v41 = vadd.s32 1, %v1978_v13  ;;  %v2083_v53 = vsel %vm2073_vm8, %v17528_v2, %v17527_v1  ;;  %v4219_v49 = vsel %vm4217_vm10, %v1712_v61, %v1725_v19  ;;  %v1729_v45 = vsel %vm1727_vm0, %v1728_v60, %v1720_v21 }
 0x1d2   : > { %vm17530_vm14 = vcmp.lt.s32.totalorder %v17526_v4, 4  ;;  %v2087_v40 = vsel %vm2073_vm8, %v17532_v50, %v17531_v5  ;;  %v1855_v37 = vsel %vm1734_vm4, %v1854_v36, %v1853_v47  ;;  %vm17534_vm12 = vcmp.lt.s32.totalorder %v17526_v4, 1 }
 0x1d3   : > { %v2077_v55 = vsel %vm17530_vm14, %v17529_v0, 2102212464  ;;  %v1983_v35 = vsel %vm1981_vm7, %v1982_v41, %v1978_v13  ;;  %v2091_v25 = vand.u32 65535, %v2087_v40  ;;  %v2092_v44 = vshrl.u32 %v2087_v40, 16 }
 0x1d4   : > { %v13209_v31 = vsel %vm13119_vm9, %v17509_v56, %v1855_v37  ;;  %v1984_v42 = vadd.s32 %v1983_v35, %v1979_v14  ;;  %v13214_v21 = vsel %vm17534_vm12, %v2056_v32, %v17533_v30  ;;  %v2114_v12 = vshrl.u32 %v2083_v53, 16 }
 0x1d5   : > { %v1860_v60 = vmul.f32 %v13209_v31, %v13209_v31  ;;  %vm17536_vm4 = vcmp.lt.s32.totalorder %v17526_v4, 3  ;;  %v2094_v58 = vmul.u32 %v2092_v44, %v17537_v10  ;;  %v2095_v27 = vmul.u32 %v2091_v25, %v17538_v38 }
 0x1d6   : > { %v2078_v6 = vsel %vm17536_vm4, %v17535_v3, %v2077_v55  ;;  %v13225_v14 = vsel %vm4216_vm5, %v4219_v49, %v4222_v48  ;;  %v1726_v47 = vsel %vm1724_vm1, %v1712_v61, %v1725_v19  ;;  %v1985_v13 = vadd.s32 536870912, %v1984_v42 }
 0x1d7   : > { %v13230_v9 = vmul.u32 %v2114_v12, %v17537_v10  ;;  %v1861_v32 = vmul.f32 -0.001358992, %v1860_v60  ;;  %v1868_v36 = vmul.f32 -0.00019511016, %v1860_v60  ;;  %v2093_v41 = vmul.u32 %v2091_v25, %v17537_v10 }
 0x1d8   : > { %v2097_v1 = vshll.u32 %v2094_v58, 16  ;;  %v13233_v2 = vshrl.u32 %v1985_v13, 30  ;;  %v2096_v0 = vmul.u32 %v2092_v44, %v17538_v38  ;;  %v2099_v55 = vshll.u32 %v2095_v27, 16 }
 0x1d9   : > { %v2113_v52 = vand.u32 65535, %v2083_v53  ;;  %v1862_v48 = vadd.f32 0.041655596, %v1861_v32  ;;  %v1869_v49 = vadd.f32 0.008332121, %v1868_v36  ;;  %v1730_v61 = vsel %vm1723_vm15, %v1726_v47, %v1729_v45 }
 0x1da   : > { %vm2101_vm9 = vc.u32 %v2093_v41, %v2097_v1  ;;  %v2103_v5 = vadd.s32 %v2097_v1, %v2093_v41  ;;  %v1987_v19 = vshll.u32 %v13233_v2, 30  ;;  %v2119_v40 = vshll.u32 %v13230_v9, 16 }
 0x1db   : > { %v2102_v50 = vsel %vm2101_vm9, 1, %v17311_v24  ;;  %vm1721_vm2 = vweird.f32 %v17502_v62  ;;  %v1863_v37 = vmul.f32 %v1862_v48, %v1860_v60  ;;  %v1870_v35 = vmul.f32 %v1869_v49, %v1860_v60 }
 0x1dc   : > { %v2104_v25 = vadd.s32 %v2102_v50, %v2096_v0  ;;  %vm2105_vm6 = vc.u32 %v2103_v5, %v2099_v55  ;;  %v13242_v53 = vsub.s32 %v1984_v42, %v1987_v19  ;;  %v2115_v30 = vmul.u32 %v2113_v52, %v17537_v10 }
 0x1dd   : > { %v2106_v44 = vsel %vm2105_vm6, 1, %v17311_v24  ;;  %v2117_v16 = vmul.u32 %v2113_v52, %v17538_v38  ;;  %v1864_v45 = vadd.f32 -0.4999988, %v1863_v37  ;;  %v1871_v3 = vadd.f32 -0.16666654, %v1870_v35 }
 0x1de   : > { %vm4375_vm3 = vcmp.eq.s32.totalorder %v13177_v17, 2  ;;  %vm1881_vm10 = vcmp.eq.s32.totalorder %v13179_v7, 2  ;;  %v2098_v47 = vshrl.u32 %v2094_v58, 16  ;;  %v2108_v13 = vadd.s32 %v2106_v44, %v2104_v25 }
 0x1df   : > { %vm4372_vm11 = vcmp.eq.s32.totalorder %v13177_v17, 0  ;;  %vm1878_vm5 = vcmp.eq.s32.totalorder %v13179_v7, 0  ;;  %vm1989_vm1 = vcmp.lt.s32.totalorder %v13242_v53, 0  ;;  %v1990_v42 = vsub.s32 0, %v13242_v53 }
 0x1e0   : > { %v2100_v32 = vshrl.u32 %v2095_v27, 16  ;;  %v2118_v10 = vmul.u32 %v2114_v12, %v17538_v38  ;;  %v1865_v36 = vmul.f32 %v1864_v45, %v1860_v60  ;;  %v1872_v41 = vmul.f32 %v1871_v3, %v1860_v60  ;;  %v17539_v3 = vld [vmem:[#allocation31_spill] sm:$0xff] }
 0x1e1   : > { %vm4371_vm0 = vcmp.lt.s32.totalorder %v13177_v17, 2  ;;  %vm1877_vm7 = vcmp.lt.s32.totalorder %v13179_v7, 2  ;;  %v2109_v1 = vadd.s32 %v2108_v13, %v2098_v47  ;;  %vm2123_vm15 = vc.u32 %v2115_v30, %v2119_v40 }
 0x1e2   : > { %vm1875_vm14 = vweird.f32 %v17509_v56  ;;  %v1991_v58 = vsel %vm1989_vm1, %v1990_v42, %v13242_v53  ;;  %v2121_v0 = vshll.u32 %v2117_v16, 16  ;;  %v2124_v55 = vsel %vm2123_vm15, 1, %v17311_v24  ;;  %v17543_v56 = vld [vmem:[#allocation47_spill] sm:$0xff] }
 0x1e3   : > { %v2125_v52 = vadd.s32 %v2119_v40, %v2115_v30  ;;  %v1866_v48 = vadd.f32 1.0, %v1865_v36  ;;  %v1873_v27 = vadd.f32 1.0, %v1872_v41  ;;  %v1992_v49 = vclz %v1991_v58 }
 0x1e4   : > { %v13259_v12 = vadd.s32 %v2109_v1, %v2100_v32  ;;  %v2079_v60 = vsel %vm2073_vm8, %v13214_v21, %v2078_v6  ;;  %v2126_v38 = vadd.s32 %v2124_v55, %v2118_v10  ;;  %v4224_v40 = vsel %vm1721_vm2, nan, %v13225_v14  ;;  %v17540_v32 = vld [vmem:[#allocation84_spill] sm:$0xff] }
 0x1e5   : > { %vm2127_vm12 = vc.u32 %v2125_v52, %v2121_v0  ;;  %v13264_v5 = vadd.s32 %v2125_v52, %v2121_v0  ;;  %v1874_v19 = vmul.f32 %v1873_v27, %v13209_v31  ;;  %v1882_v50 = vxor.u32 2147483648, %v1866_v48  ;;  %v17542_v27 = vld [vmem:[#allocation95_spill] sm:$0xff] }
 0x1e6   : > { %v10149_v37 = vadd.s32 4294967294, %v1992_v49  ;;  %v2128_v35 = vsel %vm2127_vm12, 1, %v17311_v24  ;;  %v1731_v25 = vsel %vm1721_vm2, nan, %v1730_v61  ;;  %v2120_v4 = vshrl.u32 %v13230_v9, 16 }
 0x1e7   : > { %v2130_v21 = vadd.s32 %v2128_v35, %v2126_v38  ;;  %v1879_v6 = vxor.u32 2147483648, %v1874_v19  ;;  %v2122_v44 = vshrl.u32 %v2117_v16, 16  ;;  %vm2135_vm4 = vc.u32 %v13259_v12, %v13264_v5  ;;  %v17544_v38 = vld [vmem:[#allocation46_spill] sm:$0xff] }
 0x1e8   : > { %vm10150_vm8 = vcmp.lt.s32.totalorder %v10149_v37, 0  ;;  %v4377_v31 = vsel %vm4375_vm3, %v1882_v50, %v1874_v19  ;;  %v1883_v30 = vsel %vm1881_vm10, %v1882_v50, %v1874_v19  ;;  %vm2227_vm9 = vcmp.lt.s32.totalorder %v17539_v3, 2 }
 0x1e9   : > { %v1995_v45 = vsel %vm10150_vm8, 0, %v10149_v37  ;;  %v2131_v14 = vadd.s32 %v2130_v21, %v2120_v4  ;;  %v4374_v62 = vsel %vm4372_vm11, %v1866_v48, %v1879_v6  ;;  %v1880_v9 = vsel %vm1878_vm5, %v1866_v48, %v1879_v6 }
 0x1ea   : > { %v1996_v61 = vsub.s32 32, %v1995_v45  ;;  %v4378_v16 = vsel %vm4371_vm0, %v4374_v62, %v4377_v31  ;;  %v1884_v47 = vsel %vm1877_vm7, %v1880_v9, %v1883_v30  ;;  %v2000_v13 = vsub.s32 4294967266, %v1995_v45 }
 0x1eb   : > { %v2132_v42 = vadd.s32 %v2131_v14, %v2122_v44  ;;  %vm1888_vm2 = vcmp.lt.s32.totalorder %v17540_v32, 0  ;;  %v4379_v10 = vsel %vm1875_vm14, nan, %v4378_v16  ;;  %v1885_v36 = vsel %vm1875_vm14, nan, %v1884_v47  ;;  %v17546_v47 = vld [vmem:[#allocation40_spill] sm:$0xff] }
 0x1ec   : > { %v1997_v41 = vshll.u32 %v13242_v53, %v1995_v45  ;;  %v1998_v1 = vshrl.u32 %v13181_v18, %v1996_v61  ;;  %v5948_v58 = vpack.c.bf16 %v4379_v10, %v4224_v40  ;;  %v3444_v17 = vpack.c.bf16 %v1885_v36, %v1731_v25  ;;  %v17545_v45 = vld [vmem:[#allocation38_spill] sm:$0xff] }
 0x1ed   : > { %v2001_v0 = vadd.s32 127, %v2000_v13  ;;  %v2136_v55 = vadd.s32 1, %v2132_v42  ;;  %v13298_v7 = vshll.u32 %v17301_v43, %v12873_v34  ;;  %v17541_v52 = vand.u32 2139095040, %v12318_v39 }
 0x1ee   : > { %v2133_v49 = vmul.u32 %v17542_v27, %v2079_v60  ;;  %v2241_v53 = vsel %vm2227_vm9, %v17544_v38, %v17543_v56  ;;  %6020 = vmatmul.bf16.gmra.mxu1 %v5948_v58  ;;  %6117 = vmatmul.bf16.gmra.mxu2 %v3444_v17  ;;  %v1999_v18 = vor.u32 %v1998_v1, %v1997_v41  ;;  %v2010_v44 = vsub.s32 4, %v13233_v2  ;;  %v17547_v17 = vld [vmem:[#allocation25_spill] sm:$0xff] }
 0x1ef   : > { %v13302_v48 = vshrl.u32 %v17541_v52, 23  ;;  %v2002_v19 = vshll.u32 %v2001_v0, 23  ;;  %v2137_v50 = vsel %vm2135_vm4, %v2136_v55, %v2132_v42  ;;  %v2245_v37 = vand.u32 65535, %v2241_v53  ;;  %v17548_v55 = vld [vmem:[#allocation45_spill] sm:$0xff]  ;;  %v17549_v52 = vld [vmem:[#allocation42_spill] sm:$0xff] }
 0x1f0   : > { %v13314_v35 = vshll.u32 %v17288_v57, %v12873_v34  ;;  %v13318_v60 = vshll.u32 %v17285_v15, %v12873_v34  ;;  %v2138_v40 = vadd.s32 %v2137_v50, %v2133_v49  ;;  %v2246_v25 = vshrl.u32 %v2241_v53, 16  ;;  %v17550_v49 = vld [vmem:[#allocation71_spill] sm:$0xff]  ;;  %v17551_v38 = vld [vmem:[#allocation37_spill] sm:$0xff] }
 0x1f1   : > { %v13322_v4 = vshrl.u32 %v17288_v57, %v13115_v26  ;;  %v13326_v21 = vshll.u32 %v17280_v20, %v12873_v34  ;;  %v2003_v6 = vor.u32 4788187, %v2002_v19  ;;  %v13331_v31 = vshrl.u32 %v17285_v15, %v13115_v26 }
 0x1f2   : > { %v2139_v30 = vadd.s32 536870912, %v2138_v40  ;;  %v2247_v14 = vmul.u32 %v2245_v37, %v17545_v45  ;;  %v13335_v62 = vmul.u32 %v2246_v25, %v17545_v45  ;;  %v13339_v9 = vshrl.u32 %v17280_v20, %v13115_v26 }
 0x1f3   : > { %v2004_v61 = vand.u32 2147483647, %v2003_v6  ;;  %v2006_v16 = vcvt.s32.f32 %v1999_v18  ;;  %v13342_v13 = vmul.u32 %v2245_v37, %v17546_v47  ;;  %v13346_v42 = vshrl.u32 %v17281_v8, %v13115_v26 }
 0x1f4   : > { %v13350_v10 = vshll.u32 %v17281_v8, %v12873_v34  ;;  %v2140_v36 = vshrl.u32 %v2139_v30, 30  ;;  %v2251_v41 = vshll.u32 %v13335_v62, 16  ;;  %v2011_v58 = vsel %vm1888_vm2, %v2010_v44, %v13233_v2 }
 0x1f5   : > { %v2007_v1 = vmul.f32 %v2006_v16, %v2004_v61  ;;  %v2210_v0 = vshrl.u32 %v17301_v43, %v17547_v17  ;;  %v2237_v27 = vsel %vm2227_vm9, %v17549_v52, %v17548_v55  ;;  %vm2042_vm6 = vcmp.lt.s32.totalorder %v17550_v49, 0  ;;  %v17557_v55 = vld [vmem:[#allocation35_spill] sm:$0xff] }
 0x1f6   : > { %v13365_v34 = vshrl.u32 %v17283_v63, %v13115_v26  ;;  %v2141_v56 = vshll.u32 %v2140_v36, 30  ;;  %vm17552_vm3 = vcmp.lt.s32.totalorder %v17539_v3, 4  ;;  %vm2255_vm10 = vc.u32 %v2247_v14, %v2251_v41 }
 0x1f7   : > { %v2231_v53 = vsel %vm17552_vm3, %v17551_v38, 2102212464  ;;  %v17553_v2 = vand.u32 2147483647, %v17540_v32  ;;  %v2008_v18 = vxor.u32 2147483648, %v2007_v1  ;;  %v2253_v19 = vshll.u32 %v13342_v13, 16 }
 0x1f8   : > { %v2257_v50 = vadd.s32 %v2251_v41, %v2247_v14  ;;  %v13373_v6 = vsub.s32 %v2138_v40, %v2141_v56  ;;  %v2250_v44 = vmul.u32 %v2246_v25, %v17546_v47  ;;  %v2268_v30 = vshrl.u32 %v2237_v27, 16  ;;  %v17559_v14 = vld [vmem:[#allocation36_spill] sm:$0xff] }
 0x1f9   : > { %vm1887_vm11 = vcmp.le.f32.partialorder %v17553_v2, 0.7853982  ;;  %v2009_v61 = vsel %vm1888_vm2, %v2008_v18, %v2007_v1  ;;  %v17554_v16 = vand.u32 2147483647, %v17550_v49  ;;  %vm17558_vm1 = vcmp.lt.s32.totalorder %v17539_v3, 1 }
 0x1fa   : > { %v2013_v37 = vsel %vm1887_vm11, 0, %v2011_v58  ;;  %v2230_v52 = vsel %vm17558_vm1, %v2210_v0, %v17557_v55  ;;  %vm17560_vm0 = vcmp.lt.s32.totalorder %v17539_v3, 3  ;;  %v2256_v25 = vsel %vm2255_vm10, 1, %v17311_v24 }
 0x1fb   : > { %vm13380_vm5 = vcmp.le.f32.partialorder %v17554_v16, 0.7853982  ;;  %v2232_v40 = vsel %vm17560_vm0, %v17559_v14, %v2231_v53  ;;  %v2012_v41 = vsel %vm1887_vm11, %v17540_v32, %v2009_v61  ;;  %vm2143_vm7 = vcmp.lt.s32.totalorder %v13373_v6, 0 }
 0x1fc   : > { %v2144_v1 = vsub.s32 0, %v13373_v6  ;;  %v2267_v58 = vand.u32 65535, %v2237_v27  ;;  %v2014_v56 = vmul.f32 %v2012_v41, %v2012_v41  ;;  %v2134_v38 = vadd.s32 %v13264_v5, %v13259_v12 }
 0x1fd   : > { %v2164_v2 = vsub.s32 4, %v2140_v36  ;;  %vm2259_vm15 = vc.u32 %v2257_v50, %v2253_v19  ;;  %v13399_v53 = vsel %vm2227_vm9, %v2230_v52, %v2232_v40  ;;  %v2258_v18 = vadd.s32 %v2256_v25, %v2250_v44 }
 0x1fe   : > { %v2145_v0 = vsel %vm2143_vm7, %v2144_v1, %v13373_v6  ;;  %v2270_v61 = vmul.u32 %v2268_v30, %v17545_v45  ;;  %v2015_v16 = vmul.f32 -0.001358992, %v2014_v56  ;;  %v2022_v55 = vmul.f32 -0.00019511016, %v2014_v56 }
 0x1ff   : > { %v2146_v14 = vclz %v2145_v0  ;;  %v2254_v27 = vshrl.u32 %v13342_v13, 16  ;;  %v4524_v39 = vadd.s32 3, %v2013_v37  ;;  %v2260_v8 = vsel %vm2259_vm15, 1, %v17311_v24 }
 0x200   : > { %v2269_v12 = vmul.u32 %v2267_v58, %v17545_v45  ;;  %v2271_v5 = vmul.u32 %v2267_v58, %v17546_v47  ;;  %v2016_v19 = vadd.f32 0.041655596, %v2015_v16  ;;  %v2023_v50 = vadd.f32 0.008332121, %v2022_v55 }
 0x201   : > { %v10152_v3 = vadd.s32 4294967294, %v2146_v14  ;;  %v2165_v44 = vsel %vm2042_vm6, %v2164_v2, %v2140_v36  ;;  %v2252_v52 = vshrl.u32 %v13335_v62, 16  ;;  %v2262_v40 = vadd.s32 %v2260_v8, %v2258_v18 }
 0x202   : > { %v2272_v25 = vmul.u32 %v2268_v30, %v17546_v47  ;;  %v2273_v1 = vshll.u32 %v2270_v61, 16  ;;  %v2017_v13 = vmul.f32 %v2016_v19, %v2014_v56  ;;  %v2024_v0 = vmul.f32 %v2023_v50, %v2014_v56 }
 0x203   : > { %vm10153_vm14 = vcmp.lt.s32.totalorder %v10152_v3, 0  ;;  %v13410_v63 = vand.u32 3, %v2013_v37  ;;  %v2167_v58 = vsel %vm13380_vm5, 0, %v2165_v44  ;;  %v13414_v16 = vand.u32 3, %v4524_v39 }
 0x204   : > { %v2149_v45 = vsel %vm10153_vm14, 0, %v10152_v3  ;;  %v2275_v55 = vshll.u32 %v2271_v5, 16  ;;  %v2018_v14 = vadd.f32 -0.4999988, %v2017_v13  ;;  %v2025_v36 = vadd.f32 -0.16666654, %v2024_v0 }
 0x205   : > { %v2150_v2 = vsub.s32 32, %v2149_v45  ;;  %v2274_v62 = vshrl.u32 %v2270_v61, 16  ;;  %v2154_v8 = vsub.s32 4294967266, %v2149_v45  ;;  %v2263_v18 = vadd.s32 %v2262_v40, %v2252_v52 }
 0x206   : > { %vm2277_vm12 = vc.u32 %v2269_v12, %v2273_v1  ;;  %v2279_v47 = vadd.s32 %v2273_v1, %v2269_v12  ;;  %v2019_v30 = vmul.f32 %v2018_v14, %v2014_v56  ;;  %v2026_v19 = vmul.f32 %v2025_v36, %v2014_v56 }
 0x207   : > { %v2152_v50 = vshrl.u32 %v2134_v38, %v2150_v2  ;;  %v2278_v37 = vsel %vm2277_vm12, 1, %v17311_v24  ;;  %v2151_v3 = vshll.u32 %v13373_v6, %v2149_v45  ;;  %v2155_v20 = vadd.s32 127, %v2154_v8 }
 0x208   : > { %v2280_v44 = vadd.s32 %v2278_v37, %v2272_v25  ;;  %vm2281_vm8 = vc.u32 %v2279_v47, %v2275_v55  ;;  %v2020_v39 = vadd.f32 1.0, %v2019_v30  ;;  %v2027_v15 = vadd.f32 1.0, %v2026_v19  ;;  %v17561_v25 = vld [vmem:[#allocation29_spill] sm:$0xff]  ;;  %v17564_v19 = vld [vmem:[#allocation67_spill] sm:$0xff] }
 0x209   : > { %v4679_v13 = vadd.s32 3, %v2167_v58  ;;  %v2282_v0 = vsel %vm2281_vm8, 1, %v17311_v24  ;;  %v2153_v61 = vor.u32 %v2152_v50, %v2151_v3  ;;  %v2156_v57 = vshll.u32 %v2155_v20, 23  ;;  %v17565_v50 = vld [vmem:[#allocation156_spill] sm:$0xff] }
 0x20a   : > { %v2276_v52 = vshrl.u32 %v2271_v5, 16  ;;  %v2284_v40 = vadd.s32 %v2282_v0, %v2280_v44  ;;  %v2841_v56 = vor.u32 %v13365_v34, %v13350_v10  ;;  %v2028_v38 = vmul.f32 %v2027_v15, %v2012_v41 }
 0x20b   : > { %v2264_v12 = vadd.s32 %v2263_v18, %v2254_v27  ;;  %v2283_v1 = vadd.s32 %v2279_v47, %v2275_v55  ;;  %v2157_v14 = vor.u32 4788187, %v2156_v57  ;;  %vm4527_vm4 = vcmp.eq.s32.totalorder %v13414_v16, 0  ;;  %v17563_v47 = vld [vmem:[#allocation143_spill] sm:$0xff] }
 0x20c   : > { %v2285_v6 = vadd.s32 %v2284_v40, %v2274_v62  ;;  %v2287_v45 = vmul.u32 %v17561_v25, %v13399_v53  ;;  %v2036_v36 = vxor.u32 2147483648, %v2020_v39  ;;  %vm4526_vm9 = vcmp.lt.s32.totalorder %v13414_v16, 2 }
 0x20d   : > { %vm4530_vm2 = vcmp.eq.s32.totalorder %v13414_v16, 2  ;;  %v13426_v20 = vand.u32 3, %v4679_v13  ;;  %vm2031_vm3 = vcmp.lt.s32.totalorder %v13410_v63, 2  ;;  %vm17562_vm10 = vcmask 523264  }
 0x20e   : > { %v7328_v15 = vsel %vm17562_vm10, %v12247_v28, 0.0  ;;  %v2033_v41 = vxor.u32 2147483648, %v2028_v38  ;;  %v2158_v57 = vand.u32 2147483647, %v2157_v14  ;;  %v2160_v27 = vcvt.s32.f32 %v2153_v61  ;;  %v17568_v14 = vld [vmem:[#allocation145_spill] sm:$0xff] }
 0x20f   : > { %7329 = vadd.xlane.f32.xlu0 %v7328_v15  ;;  %v2286_v5 = vadd.s32 %v2285_v6, %v2276_v52  ;;  %vm2032_vm11 = vcmp.eq.s32.totalorder %v13410_v63, 0  ;;  %vm2035_vm1 = vcmp.eq.s32.totalorder %v13410_v63, 2  ;;  %vm2289_vm0 = vc.u32 %v2264_v12, %v2283_v1 }
 0x210   : > { %vm2381_vm7 = vcmp.lt.s32.totalorder %v12306_v51, 2  ;;  %v2161_v53 = vmul.f32 %v2160_v27, %v2158_v57  ;;  %v13434_v55 = vand.u32 3, %v2167_v58  ;;  %v4532_v8 = vsel %vm4530_vm2, %v2036_v36, %v2028_v38 }
 0x211   : > { %v2290_v2 = vadd.s32 1, %v2286_v5  ;;  %v2391_v62 = vsel %vm2381_vm7, %v12392_v54, %v12469_v11  ;;  %v13442_v18 = vadd.s32 %v2283_v1, %v2264_v12  ;;  %v2364_v30 = vshrl.u32 %v17301_v43, %v17563_v47  ;;  %v17566_v12 = vld [vmem:[#allocation150_spill] sm:$0xff] }
 0x212   : > { %v2395_v58 = vsel %vm2381_vm7, %v17565_v50, %v17564_v19  ;;  %v2162_v37 = vxor.u32 2147483648, %v2161_v53  ;;  %v4529_v3 = vsel %vm4527_vm4, %v2020_v39, %v2033_v41  ;;  %v2034_v54 = vsel %vm2032_vm11, %v2020_v39, %v2033_v41  ;;  %v17571_v41 = vld [vmem:[#allocation144_spill] sm:$0xff] }
 0x213   : > { %v2291_v44 = vsel %vm2289_vm0, %v2290_v2, %v2286_v5  ;;  %v2399_v13 = vand.u32 65535, %v2395_v58  ;;  %v2400_v0 = vshrl.u32 %v2395_v58, 16  ;;  %v2422_v61 = vshrl.u32 %v2391_v62, 16 }
 0x214   : > { %v2292_v11 = vadd.s32 %v2291_v44, %v2287_v45  ;;  %v2163_v52 = vsel %vm2042_vm6, %v2162_v37, %v2161_v53  ;;  %v2037_v40 = vsel %vm2035_vm1, %v2036_v36, %v2028_v38  ;;  %vm17567_vm15 = vcmp.lt.s32.totalorder %v12306_v51, 1  ;;  %v17569_v45 = vld [vmem:[#allocation152_spill] sm:$0xff] }
 0x215   : > { %v13461_v1 = vsel %vm17567_vm15, %v2364_v30, %v17566_v12  ;;  %v2403_v6 = vmul.u32 %v2399_v13, %v17568_v14  ;;  %v13467_v39 = vsel %vm13380_vm5, %v17550_v49, %v2163_v52  ;;  %vm17570_vm14 = vcmp.lt.s32.totalorder %v12306_v51, 4 }
 0x216   : > { %v2293_v25 = vadd.s32 536870912, %v2292_v11  ;;  %v2385_v15 = vsel %vm17570_vm14, %v17569_v45, 2102212464  ;;  %v2402_v57 = vmul.u32 %v2400_v0, %v17571_v41  ;;  %v2168_v38 = vmul.f32 %v13467_v39, %v13467_v39 }
 0x217   : > { %v4533_v36 = vsel %vm4526_vm9, %v4529_v3, %v4532_v8  ;;  %v2038_v27 = vsel %vm2031_vm3, %v2034_v54, %v2037_v40  ;;  %v2421_v5 = vand.u32 65535, %v2391_v62  ;;  %v2401_v53 = vmul.u32 %v2399_v13, %v17571_v41 }
 0x218   : > { %v13479_v17 = vshrl.u32 %v2293_v25, 30  ;;  %v2405_v2 = vshll.u32 %v2402_v57, 16  ;;  %v13483_v47 = vmul.u32 %v2422_v61, %v17571_v41  ;;  %v2169_v30 = vmul.f32 -0.001358992, %v2168_v38 }
 0x219   : > { %v2176_v19 = vmul.f32 -0.00019511016, %v2168_v38  ;;  %v2404_v50 = vmul.u32 %v2400_v0, %v17568_v14  ;;  %v2407_v58 = vshll.u32 %v2403_v6, 16  ;;  %v2408_v8 = vshrl.u32 %v2403_v6, 16 }
 0x21a   : > { %v2295_v16 = vshll.u32 %v13479_v17, 30  ;;  %vm2409_vm6 = vc.u32 %v2401_v53, %v2405_v2  ;;  %v2411_v63 = vadd.s32 %v2405_v2, %v2401_v53  ;;  %vm2029_vm5 = vweird.f32 %v17540_v32 }
 0x21b   : > { %v2170_v62 = vadd.f32 0.041655596, %v2169_v30  ;;  %v2177_v37 = vadd.f32 0.008332121, %v2176_v19  ;;  %v2410_v3 = vsel %vm2409_vm6, 1, %v17311_v24  ;;  %v2425_v44 = vmul.u32 %v2421_v5, %v17568_v14 }
 0x21c   : > { %v13490_v13 = vsub.s32 %v2292_v11, %v2295_v16  ;;  %v2412_v54 = vadd.s32 %v2410_v3, %v2404_v50  ;;  %vm2413_vm12 = vc.u32 %v2411_v63, %v2407_v58  ;;  %v2427_v0 = vshll.u32 %v13483_v47, 16 }
 0x21d   : > { %v2171_v52 = vmul.f32 %v2170_v62, %v2168_v38  ;;  %v2178_v40 = vmul.f32 %v2177_v37, %v2168_v38  ;;  %v2414_v12 = vsel %vm2413_vm12, 1, %v17311_v24  ;;  %v2423_v6 = vmul.u32 %v2421_v5, %v17571_v41 }
 0x21e   : > { %vm2297_vm8 = vcmp.lt.s32.totalorder %v13490_v13, 0  ;;  %v2298_v25 = vsub.s32 0, %v13490_v13  ;;  %v2406_v45 = vshrl.u32 %v2402_v57, 16  ;;  %v2416_v53 = vadd.s32 %v2414_v12, %v2412_v54 }
 0x21f   : > { %v2172_v2 = vadd.f32 -0.4999988, %v2171_v52  ;;  %v2179_v30 = vadd.f32 -0.16666654, %v2178_v40  ;;  %vm4685_vm4 = vcmp.eq.s32.totalorder %v13426_v20, 2  ;;  %vm2189_vm9 = vcmp.eq.s32.totalorder %v13434_v55, 2 }
 0x220   : > { %v2426_v11 = vmul.u32 %v2422_v61, %v17568_v14  ;;  %v2429_v19 = vshll.u32 %v2425_v44, 16  ;;  %vm4682_vm2 = vcmp.eq.s32.totalorder %v13426_v20, 0  ;;  %vm2186_vm3 = vcmp.eq.s32.totalorder %v13434_v55, 0  ;;  %v17572_v61 = vld [vmem:[#allocation151_spill] sm:$0xff] }
 0x221   : > { %v2299_v41 = vsel %vm2297_vm8, %v2298_v25, %v13490_v13  ;;  %v2417_v5 = vadd.s32 %v2416_v53, %v2406_v45  ;;  %vm2431_vm10 = vc.u32 %v2423_v6, %v2427_v0  ;;  %v2433_v50 = vadd.s32 %v2427_v0, %v2423_v6  ;;  %v17574_v25 = vld [vmem:[#allocation4_spill] sm:$0xff] }
 0x222   : > { %v2173_v57 = vmul.f32 %v2172_v2, %v2168_v38  ;;  %v2180_v58 = vmul.f32 %v2179_v30, %v2168_v38  ;;  %vm4681_vm11 = vcmp.lt.s32.totalorder %v13426_v20, 2  ;;  %vm2185_vm1 = vcmp.lt.s32.totalorder %v13434_v55, 2 }
 0x223   : > { %v2300_v16 = vclz %v2299_v41  ;;  %v2432_v63 = vsel %vm2431_vm10, 1, %v17311_v24  ;;  %vm2183_vm0 = vweird.f32 %v17550_v49  ;;  %vm17573_vm15 = vcmp.lt.s32.totalorder %v12306_v51, 3 }
 0x224   : > { %v2386_v14 = vsel %vm17573_vm15, %v17572_v61, %v2385_v15  ;;  %v13510_v62 = vadd.s32 %v2417_v5, %v2408_v8  ;;  %v2434_v37 = vadd.s32 %v2432_v63, %v2426_v11  ;;  %vm2435_vm14 = vc.u32 %v2433_v50, %v2429_v19 }
 0x225   : > { %v2174_v3 = vadd.f32 1.0, %v2173_v57  ;;  %v2181_v54 = vadd.f32 1.0, %v2180_v58  ;;  %v10155_v38 = vadd.s32 4294967294, %v2300_v16  ;;  %v2436_v0 = vsel %vm2435_vm14, 1, %v17311_v24 }
 0x226   : > { %v4534_v52 = vsel %vm2029_vm5, nan, %v4533_v36  ;;  %v2039_v40 = vsel %vm2029_vm5, nan, %v2038_v27  ;;  %v2428_v12 = vshrl.u32 %v13483_v47, 16  ;;  %v2438_v6 = vadd.s32 %v2436_v0, %v2434_v37  ;;  %v17575_v37 = vld [vmem:[#allocation134_spill] sm:$0xff] }
 0x227   : > { %vm2196_vm6 = vcmp.lt.s32.totalorder %v17574_v25, 0  ;;  %v2182_v15 = vmul.f32 %v2181_v54, %v13467_v39  ;;  %v2190_v8 = vxor.u32 2147483648, %v2174_v3  ;;  %vm10156_vm12 = vcmp.lt.s32.totalorder %v10155_v38, 0 }
 0x228   : > { %v2437_v45 = vadd.s32 %v2433_v50, %v2429_v19  ;;  %v2303_v53 = vsel %vm10156_vm12, 0, %v10155_v38  ;;  %v2387_v2 = vsel %vm2381_vm7, %v13461_v1, %v2386_v14  ;;  %v2430_v30 = vshrl.u32 %v2425_v44, 16 }
 0x229   : > { %v2439_v36 = vadd.s32 %v2438_v6, %v2428_v12  ;;  %v2187_v11 = vxor.u32 2147483648, %v2182_v15  ;;  %v2304_v32 = vsub.s32 32, %v2303_v53  ;;  %v2318_v27 = vsub.s32 4, %v13479_v17 }
 0x22a   : > { %vm2443_vm5 = vc.u32 %v13510_v62, %v2437_v45  ;;  %v4687_v47 = vsel %vm4685_vm4, %v2190_v8, %v2182_v15  ;;  %v2191_v39 = vsel %vm2189_vm9, %v2190_v8, %v2182_v15  ;;  %v2308_v19 = vsub.s32 4294967266, %v2303_v53  ;;  %v17582_v15 = vld [vmem:[#allocation139_spill] sm:$0xff] }
 0x22b   : > { %v2440_v41 = vadd.s32 %v2439_v36, %v2430_v30  ;;  %v4684_v51 = vsel %vm4682_vm2, %v2174_v3, %v2187_v11  ;;  %v2188_v1 = vsel %vm2186_vm3, %v2174_v3, %v2187_v11  ;;  %v2305_v44 = vshll.u32 %v13490_v13, %v2303_v53  ;;  %v17584_v30 = vld [vmem:[#allocation138_spill] sm:$0xff] }
 0x22c   : > { %v2306_v5 = vshrl.u32 %v13442_v18, %v2304_v32  ;;  %v4688_v50 = vsel %vm4681_vm11, %v4684_v51, %v4687_v47  ;;  %v2192_v57 = vsel %vm2185_vm1, %v2188_v1, %v2191_v39  ;;  %v2309_v58 = vadd.s32 127, %v2308_v19 }
 0x22d   : > { %v2444_v16 = vadd.s32 1, %v2440_v41  ;;  %v4689_v63 = vsel %vm2183_vm0, nan, %v4688_v50  ;;  %v2193_v61 = vsel %vm2183_vm0, nan, %v2192_v57  ;;  %v2441_v3 = vmul.u32 %v17575_v37, %v2387_v2  ;;  %v17583_v2 = vld [vmem:[#allocation141_spill] sm:$0xff]  ;;  %v17588_v50 = vld [vmem:[#allocation130_spill] sm:$0xff] }
 0x22e   : > { %v2307_v14 = vor.u32 %v2306_v5, %v2305_v44  ;;  %v5949_v13 = vpack.c.bf16 %v4689_v63, %v4534_v52  ;;  %v3445_v54 = vpack.c.bf16 %v2193_v61, %v2039_v40  ;;  %v2310_v18 = vshll.u32 %v2309_v58, 23  ;;  %v17576_v40 = vld [vmem:[#allocation105_spill] sm:$0xff]  ;;  %v17589_v63 = vld [vmem:[#allocation119_spill] sm:$0xff] }
 0x22f   : > { %v2445_v20 = vsel %vm2443_vm5, %v2444_v16, %v2440_v41  ;;  %v13548_v55 = vor.u32 %v13331_v31, %v13314_v35  ;;  %v13552_v38 = vor.u32 %v13339_v9, %v13318_v60  ;;  %vm2842_vm7 = vcmp.lt.s32.totalorder %v13097_v29, 1 }
 0x230   : > { %v2446_v49 = vadd.s32 %v2445_v20, %v2441_v3  ;;  %vm17200_vm8 = vcmp.lt.s32.totalorder %v13097_v29, 3  ;;  %vm2845_vm4 = vcmp.lt.s32.totalorder %v13097_v29, 4  ;;  %6025 = vmatmul.bf16.gmra.mxu1 %v5949_v13  ;;  %6122 = vmatmul.bf16.gmra.mxu2 %v3445_v54  ;;  %v2311_v0 = vor.u32 4788187, %v2310_v18  ;;  %v17590_v18 = vld [vmem:[#allocation140_spill] sm:$0xff] }
 0x231   : > { %v2319_v52 = vsel %vm2196_vm6, %v2318_v27, %v13479_v17  ;;  %v13562_v35 = vor.u32 %v13346_v42, %v13326_v21  ;;  %v2855_v60 = vsel %vm2845_vm4, %v2841_v56, 1326507024  ;;  %v10175_v31 = vadd.s32 4294967169, %v13302_v48  ;;  %v17580_v42 = vld [vmem:[#allocation127_spill] sm:$0xff]  ;;  %v17581_v56 = vld [vmem:[#allocation142_spill] sm:$0xff] }
 0x232   : > { %v2447_v9 = vadd.s32 536870912, %v2446_v49  ;;  %vm2350_vm9 = vcmp.lt.s32.totalorder %v17576_v40, 0  ;;  %v17577_v12 = vand.u32 2147483647, %v17574_v25  ;;  %v2312_v17 = vand.u32 2147483647, %v2311_v0 }
 0x233   : > { %v2314_v21 = vcvt.s32.f32 %v2307_v14  ;;  %vm2535_vm3 = vcmp.lt.s32.totalorder %v17580_v42, 2  ;;  %v13582_v10 = vsel %vm2842_vm7, %v13548_v55, %v13552_v38  ;;  %v13597_v27 = vsel %vm17200_vm8, %v13562_v35, %v2855_v60 }
 0x234   : > { %vm13573_vm2 = vcmp.le.f32.partialorder %v17577_v12, 0.7853982  ;;  %v2448_v34 = vshrl.u32 %v2447_v9, 30  ;;  %v2549_v8 = vsel %vm2535_vm3, %v17582_v15, %v17581_v56  ;;  %v2545_v36 = vsel %vm2535_vm3, %v17584_v30, %v17583_v2 }
 0x235   : > { %v2321_v48 = vsel %vm13573_vm2, 0, %v2319_v52  ;;  %v2315_v53 = vmul.f32 %v2314_v21, %v2312_v17  ;;  %v2553_v11 = vand.u32 65535, %v2549_v8  ;;  %v2554_v32 = vshrl.u32 %v2549_v8, 16  ;;  %v17591_v52 = vld [vmem:[#allocation131_spill] sm:$0xff]  ;;  %v17595_v8 = vld [vmem:[#allocation132_spill] sm:$0xff] }
 0x236   : > { %v13599_v47 = vadd.s32 1, %v10175_v31  ;;  %v2442_v39 = vadd.s32 %v2437_v45, %v13510_v62  ;;  %v2449_v19 = vshll.u32 %v2448_v34, 30  ;;  %v17585_v51 = vand.u32 2147483647, %v17576_v40  ;;  %v17593_v31 = vld [vmem:[#allocation133_spill] sm:$0xff] }
 0x237   : > { %v2316_v41 = vxor.u32 2147483648, %v2315_v53  ;;  %v4834_v44 = vadd.s32 3, %v2321_v48  ;;  %v13608_v5 = vand.u32 3, %v2321_v48  ;;  %v2556_v57 = vmul.u32 %v2554_v32, %v17588_v50 }
 0x238   : > { %vm13604_vm10 = vcmp.le.f32.partialorder %v17585_v51, 0.7853982  ;;  %v13611_v58 = vsub.s32 %v2446_v49, %v2449_v19  ;;  %v2472_v16 = vsub.s32 4, %v2448_v34  ;;  %v2518_v61 = vshrl.u32 %v17301_v43, %v17589_v63 }
 0x239   : > { %v2576_v62 = vshrl.u32 %v2545_v36, 16  ;;  %v2317_v45 = vsel %vm2196_vm6, %v2316_v41, %v2315_v53  ;;  %v2555_v14 = vmul.u32 %v2553_v11, %v17588_v50  ;;  %v2559_v37 = vshll.u32 %v2556_v57, 16 }
 0x23a   : > { %v2575_v3 = vand.u32 65535, %v2545_v36  ;;  %v13621_v13 = vsel %vm13573_vm2, %v17574_v25, %v2317_v45  ;;  %vm2451_vm11 = vcmp.lt.s32.totalorder %v13611_v58, 0  ;;  %v2452_v54 = vsub.s32 0, %v13611_v58 }
 0x23b   : > { %v13626_v20 = vmul.u32 %v2553_v11, %v17590_v18  ;;  %v2322_v49 = vmul.f32 %v13621_v13, %v13621_v13  ;;  %v13630_v0 = vand.u32 3, %v4834_v44  ;;  %vm17592_vm1 = vcmp.lt.s32.totalorder %v17580_v42, 1 }
 0x23c   : > { %v2538_v60 = vsel %vm17592_vm1, %v2518_v61, %v17591_v52  ;;  %vm17594_vm0 = vcmp.lt.s32.totalorder %v17580_v42, 4  ;;  %v2453_v12 = vsel %vm2451_vm11, %v2452_v54, %v13611_v58  ;;  %v2473_v6 = vsel %vm2350_vm9, %v2472_v16, %v2448_v34 }
 0x23d   : > { %v2539_v9 = vsel %vm17594_vm0, %v17593_v31, 2102212464  ;;  %v2565_v17 = vadd.s32 %v2559_v37, %v2555_v14  ;;  %v13642_v21 = vmul.u32 %v2576_v62, %v17588_v50  ;;  %v2323_v48 = vmul.f32 -0.001358992, %v2322_v49 }
 0x23e   : > { %v2330_v56 = vmul.f32 -0.00019511016, %v2322_v49  ;;  %v2454_v15 = vclz %v2453_v12  ;;  %vm2563_vm15 = vc.u32 %v2555_v14, %v2559_v37  ;;  %vm17596_vm14 = vcmp.lt.s32.totalorder %v17580_v42, 3 }
 0x23f   : > { %v2540_v53 = vsel %vm17596_vm14, %v17595_v8, %v2539_v9  ;;  %v2561_v2 = vshll.u32 %v13626_v20, 16  ;;  %v2577_v30 = vmul.u32 %v2575_v3, %v17588_v50  ;;  %v13650_v36 = vmul.u32 %v2575_v3, %v17590_v18 }
 0x240   : > { %v2324_v34 = vadd.f32 0.041655596, %v2323_v48  ;;  %v2331_v11 = vadd.f32 0.008332121, %v2330_v56  ;;  %v10158_v19 = vadd.s32 4294967294, %v2454_v15  ;;  %v2558_v41 = vmul.u32 %v2554_v32, %v17590_v18 }
 0x241   : > { %v2475_v51 = vsel %vm13604_vm10, 0, %v2473_v6  ;;  %v2564_v44 = vsel %vm2563_vm15, 1, %v17311_v24  ;;  %vm2567_vm6 = vc.u32 %v2565_v17, %v2561_v2  ;;  %v2581_v16 = vshll.u32 %v13642_v21, 16 }
 0x242   : > { %v2325_v63 = vmul.f32 %v2324_v34, %v2322_v49  ;;  %v2332_v61 = vmul.f32 %v2331_v11, %v2322_v49  ;;  %vm10159_vm12 = vcmp.lt.s32.totalorder %v10158_v19, 0  ;;  %v2566_v50 = vadd.s32 %v2564_v44, %v2558_v41 }
 0x243   : > { %v2457_v45 = vsel %vm10159_vm12, 0, %v10158_v19  ;;  %v2560_v14 = vshrl.u32 %v2556_v57, 16  ;;  %v2568_v37 = vsel %vm2567_vm6, 1, %v17311_v24  ;;  %v2580_v3 = vmul.u32 %v2576_v62, %v17590_v18 }
 0x244   : > { %v2326_v54 = vadd.f32 -0.4999988, %v2325_v63  ;;  %v2333_v32 = vadd.f32 -0.16666654, %v2332_v61  ;;  %v2458_v52 = vsub.s32 32, %v2457_v45  ;;  %v2583_v31 = vshll.u32 %v13650_v36, 16 }
 0x245   : > { %v2459_v9 = vshll.u32 %v13611_v58, %v2457_v45  ;;  %v2462_v12 = vsub.s32 4294967266, %v2457_v45  ;;  %v2570_v6 = vadd.s32 %v2568_v37, %v2566_v50  ;;  %vm2585_vm5 = vc.u32 %v2577_v30, %v2581_v16  ;;  %v17597_v50 = vld [vmem:[#allocation136_spill] sm:$0xff]  ;;  %v811_v45 = vpop.f32.mrf.mxu3 }
 0x246   : > { %v2327_v17 = vmul.f32 %v2326_v54, %v2322_v49  ;;  %v2334_v48 = vmul.f32 %v2333_v32, %v2322_v49  ;;  %v2460_v56 = vshrl.u32 %v2442_v39, %v2458_v52  ;;  %vm4837_vm2 = vcmp.eq.s32.totalorder %v13630_v0, 0  ;;  %v17599_v52 = vld [vmem:[#allocation124_spill] sm:$0xff] }
 0x247   : > { %v2586_v57 = vsel %vm2585_vm5, 1, %v17311_v24  ;;  %v2463_v15 = vadd.s32 127, %v2462_v12  ;;  %v2571_v8 = vadd.s32 %v2570_v6, %v2560_v14  ;;  %v2587_v62 = vadd.s32 %v2581_v16, %v2577_v30 }
 0x248   : > { %v2588_v18 = vadd.s32 %v2586_v57, %v2580_v3  ;;  %v2328_v2 = vadd.f32 1.0, %v2327_v17  ;;  %v2335_v34 = vadd.f32 1.0, %v2334_v48  ;;  %vm4840_vm11 = vcmp.eq.s32.totalorder %v13630_v0, 2  ;;  %v17600_v57 = vld [vmem:[#allocation48_spill] sm:$0xff] }
 0x249   : > { %v2541_v58 = vsel %vm2535_vm3, %v2538_v60, %v2540_v53  ;;  %v2461_v11 = vor.u32 %v2460_v56, %v2459_v9  ;;  %v2464_v19 = vshll.u32 %v2463_v15, 23  ;;  %vm4836_vm1 = vcmp.lt.s32.totalorder %v13630_v0, 2  ;;  %v17601_v15 = vld [vmem:[#allocation89_spill] sm:$0xff] }
 0x24a   : > { %vm2340_vm0 = vcmp.eq.s32.totalorder %v13608_v5, 0  ;;  %v2562_v39 = vshrl.u32 %v13626_v20, 16  ;;  %vm2589_vm15 = vc.u32 %v2587_v62, %v2583_v31  ;;  %v2336_v49 = vmul.f32 %v2335_v34, %v13621_v13  ;;  %v17604_v34 = vld [vmem:[#allocation59_spill] sm:$0xff] }
 0x24b   : > { %v4989_v30 = vadd.s32 3, %v2475_v51  ;;  %v2582_v41 = vshrl.u32 %v13642_v21, 16  ;;  %v2590_v44 = vsel %vm2589_vm15, 1, %v17311_v24  ;;  %v2465_v16 = vor.u32 4788187, %v2464_v19 }
 0x24c   : > { %v2572_v63 = vadd.s32 %v2571_v8, %v2562_v39  ;;  %v2584_v42 = vshrl.u32 %v13650_v36, 16  ;;  %v2592_v60 = vadd.s32 %v2590_v44, %v2588_v18  ;;  %v2341_v53 = vxor.u32 2147483648, %v2336_v49  ;;  %v11080_v21 = vld [vmem:[%s17290_s21] ss:$0 sm:$0xff]  ;;  %v17603_v18 = vld [vmem:[#allocation60_spill] sm:$0xff]  ;;  %v17605_v39 = vld [vmem:[#allocation43_spill] sm:$0xff] }
 0x24d   : > { %v2344_v61 = vxor.u32 2147483648, %v2328_v2  ;;  %vm2339_vm3 = vcmp.lt.s32.totalorder %v13608_v5, 2  ;;  %vm17598_vm14 = vcmask 523264   ;;  %v2591_v14 = vadd.s32 %v2587_v62, %v2583_v31 }
 0x24e   : > { %v7340_v20 = vsel %vm17598_vm14, %v17597_v50, 0.0  ;;  %v2466_v13 = vand.u32 2147483647, %v2465_v16  ;;  %v2468_v37 = vcvt.s32.f32 %v2461_v11  ;;  %v13679_v3 = vadd.f32 %v11080_v21, %v811_v45  ;;  %vm17602_vm15 = vmmov %vm17598_vm14 }
 0x24f   : > { %7341 = vadd.xlane.f32.xlu0 %v7340_v20  ;;  %v2593_v36 = vadd.s32 %v2592_v60, %v2582_v41  ;;  %v13681_v54 = vand.u32 3, %v4989_v30  ;;  %vm2343_vm6 = vcmp.eq.s32.totalorder %v13608_v5, 2  ;;  %v13684_v32 = vand.u32 3, %v2475_v51  ;;  %v17606_v30 = vld [vmem:[#allocation62_spill] sm:$0xff]  ;;  %v17607_v41 = vld [vmem:[#allocation61_spill] sm:$0xff] }
 0x250   : > { %v2595_v9 = vmul.u32 %v17599_v52, %v2541_v58  ;;  %v2469_v12 = vmul.f32 %v2468_v37, %v2466_v13  ;;  %v4839_v31 = vsel %vm4837_vm2, %v2328_v2, %v2341_v53  ;;  %844 = vrot.lane.b32.xlu1 %v13679_v3, %s17203_s22  ;;  %v13691_v17 = vadd.s32 %v2591_v14, %v2572_v63  ;;  %v17610_v13 = vld [vmem:[#allocation44_spill] sm:$0xff]  ;;  %s16853_s22 = scalar_lea.vmem %s16970_s20, %s17934_s30 }
 0x251   : > { %v2594_v6 = vadd.s32 %v2593_v36, %v2584_v42  ;;  %v4842_v48 = vsel %vm4840_vm11, %v2344_v61, %v2336_v49  ;;  %v2345_v56 = vsel %vm2343_vm6, %v2344_v61, %v2336_v49  ;;  %vm2597_vm12 = vc.u32 %v2572_v63, %v2591_v14  ;;  %v17611_v36 = vld [vmem:[#allocation51_spill] sm:$0xff] }
 0x252   : > { %vm2689_vm5 = vcmp.lt.s32.totalorder %v17600_v57, 2  ;;  %v2470_v51 = vxor.u32 2147483648, %v2469_v12  ;;  %v7346_v8 = vsel %vm17602_vm15, %v17601_v15, 0.0  ;;  %v13704_v11 = vsel %vm4836_vm1, %v4839_v31, %v4842_v48 }
 0x253   : > { %v2598_v62 = vadd.s32 1, %v2594_v6  ;;  %v2699_v58 = vsel %vm2689_vm5, %v17604_v34, %v17603_v18  ;;  %v2342_v19 = vsel %vm2340_vm0, %v2328_v2, %v2341_v53  ;;  %v2672_v49 = vshrl.u32 %v17301_v43, %v17605_v39  ;;  %v17608_v53 = vld [vmem:[#allocation54_spill] sm:$0xff] }
 0x254   : > { %v2703_v44 = vsel %vm2689_vm5, %v17607_v41, %v17606_v30  ;;  %v2471_v16 = vsel %vm2350_vm9, %v2470_v51, %v2469_v12  ;;  %v2730_v60 = vshrl.u32 %v2699_v58, 16  ;;  %vm17609_vm2 = vcmp.lt.s32.totalorder %v17600_v57, 4  ;;  %v17614_v51 = vld [vmem:[#allocation52_spill] sm:$0xff] }
 0x255   : > { %v2599_v63 = vsel %vm2597_vm12, %v2598_v62, %v2594_v6  ;;  %v2707_v42 = vand.u32 65535, %v2703_v44  ;;  %v13719_v0 = vsel %vm13604_vm10, %v17576_v40, %v2471_v16  ;;  %v2693_v61 = vsel %vm17609_vm2, %v17608_v53, 2102212464 }
 0x256   : > { %v2600_v2 = vadd.s32 %v2599_v63, %v2595_v9  ;;  %v2708_v20 = vshrl.u32 %v2703_v44, 16  ;;  %v2476_v45 = vmul.f32 %v13719_v0, %v13719_v0  ;;  %v13728_v14 = vsel %vm2339_vm3, %v2342_v19, %v2345_v56  ;;  %v17613_v9 = vld [vmem:[#allocation41_spill] sm:$0xff] }
 0x257   : > { %7347 = vadd.xlane.f32.xlu0 %v7346_v8  ;;  %v2711_v37 = vmul.u32 %v2707_v42, %v17610_v13  ;;  %v2729_v21 = vand.u32 65535, %v2699_v58  ;;  %vm17612_vm9 = vcmp.lt.s32.totalorder %v17600_v57, 1  ;;  %v2709_v12 = vmul.u32 %v2707_v42, %v17613_v9 }
 0x258   : > { %v2601_v1 = vadd.s32 536870912, %v2600_v2  ;;  %v2692_v52 = vsel %vm17612_vm9, %v2672_v49, %v17611_v36  ;;  %v2710_v31 = vmul.u32 %v2708_v20, %v17613_v9  ;;  %v2477_v6 = vmul.f32 -0.001358992, %v2476_v45 }
 0x259   : > { %v2484_v48 = vmul.f32 -0.00019511016, %v2476_v45  ;;  %vm17615_vm10 = vcmp.lt.s32.totalorder %v17600_v57, 3  ;;  %v13740_v56 = vmul.u32 %v2730_v60, %v17613_v9  ;;  %v2712_v62 = vmul.u32 %v2708_v20, %v17610_v13 }
 0x25a   : > { %v2694_v5 = vsel %vm17615_vm10, %v17614_v51, %v2693_v61  ;;  %v13742_v8 = vshrl.u32 %v2601_v1, 30  ;;  %v2713_v18 = vshll.u32 %v2710_v31, 16  ;;  %v2715_v34 = vshll.u32 %v2711_v37, 16 }
 0x25b   : > { %v2478_v58 = vadd.f32 0.041655596, %v2477_v6  ;;  %v2485_v19 = vadd.f32 0.008332121, %v2484_v48  ;;  %v2731_v39 = vmul.u32 %v2729_v21, %v17613_v9  ;;  %v13747_v49 = vmul.u32 %v2729_v21, %v17610_v13 }
 0x25c   : > { %v2603_v30 = vshll.u32 %v13742_v8, 30  ;;  %v2716_v41 = vshrl.u32 %v2711_v37, 16  ;;  %vm2717_vm11 = vc.u32 %v2709_v12, %v2713_v18  ;;  %v2719_v44 = vadd.s32 %v2713_v18, %v2709_v12 }
 0x25d   : > { %vm2337_vm1 = vweird.f32 %v17574_v25  ;;  %v2479_v16 = vmul.f32 %v2478_v58, %v2476_v45  ;;  %v2486_v63 = vmul.f32 %v2485_v19, %v2476_v45  ;;  %v2718_v42 = vsel %vm2717_vm11, 1, %v17311_v24 }
 0x25e   : > { %v2735_v53 = vshll.u32 %v13740_v56, 16  ;;  %v13753_v61 = vsub.s32 %v2600_v2, %v2603_v30  ;;  %v2714_v20 = vshrl.u32 %v2710_v31, 16  ;;  %v2720_v1 = vadd.s32 %v2718_v42, %v2712_v62 }
 0x25f   : > { %vm2721_vm0 = vc.u32 %v2719_v44, %v2715_v34  ;;  %v2480_v21 = vadd.f32 -0.4999988, %v2479_v16  ;;  %v2487_v36 = vadd.f32 -0.16666654, %v2486_v63  ;;  %vm4995_vm3 = vcmp.eq.s32.totalorder %v13681_v54, 2 }
 0x260   : > { %vm2497_vm14 = vcmp.eq.s32.totalorder %v13684_v32, 2  ;;  %v2722_v37 = vsel %vm2721_vm0, 1, %v17311_v24  ;;  %v2734_v9 = vmul.u32 %v2730_v60, %v17610_v13  ;;  %vm4992_vm6 = vcmp.eq.s32.totalorder %v13681_v54, 0 }
 0x261   : > { %vm2494_vm12 = vcmp.eq.s32.totalorder %v13684_v32, 0  ;;  %vm2605_vm15 = vcmp.lt.s32.totalorder %v13753_v61, 0  ;;  %v2606_v2 = vsub.s32 0, %v13753_v61  ;;  %v2724_v12 = vadd.s32 %v2722_v37, %v2720_v1  ;;  %v17617_v37 = vld [vmem:[#allocation85_spill] sm:$0xff] }
 0x262   : > { %v2737_v31 = vshll.u32 %v13747_v49, 16  ;;  %v2481_v6 = vmul.f32 %v2480_v21, %v2476_v45  ;;  %v2488_v48 = vmul.f32 %v2487_v36, %v2476_v45  ;;  %vm4991_vm2 = vcmp.lt.s32.totalorder %v13681_v54, 2 }
 0x263   : > { %vm2493_vm9 = vcmp.lt.s32.totalorder %v13684_v32, 2  ;;  %vm2739_vm10 = vc.u32 %v2731_v39, %v2735_v53  ;;  %v2741_v51 = vadd.s32 %v2735_v53, %v2731_v39  ;;  %vm2491_vm11 = vweird.f32 %v17576_v40 }
 0x264   : > { %v2607_v60 = vsel %vm2605_vm15, %v2606_v2, %v13753_v61  ;;  %v2695_v13 = vsel %vm2689_vm5, %v2692_v52, %v2694_v5  ;;  %v2725_v62 = vadd.s32 %v2724_v12, %v2714_v20  ;;  %v2740_v18 = vsel %vm2739_vm10, 1, %v17311_v24  ;;  %v17616_v20 = vld [vmem:[#allocation34_spill] sm:$0xff] }
 0x265   : > { %v2482_v34 = vadd.f32 1.0, %v2481_v6  ;;  %v2489_v58 = vadd.f32 1.0, %v2488_v48  ;;  %v2608_v19 = vclz %v2607_v60  ;;  %v2742_v45 = vadd.s32 %v2740_v18, %v2734_v9 }
 0x266   : > { %vm2999_vm0 = vcmp.lt.s32.totalorder %v12490_v59, 4  ;;  %v13772_v30 = vadd.s32 %v2725_v62, %v2716_v41  ;;  %v2736_v39 = vshrl.u32 %v13740_v56, 16  ;;  %vm2743_vm8 = vc.u32 %v2741_v51, %v2737_v31 }
 0x267   : > { %v13775_v44 = vadd.s32 %v2741_v51, %v2737_v31  ;;  %v2490_v16 = vmul.f32 %v2489_v58, %v13719_v0  ;;  %v2498_v57 = vxor.u32 2147483648, %v2482_v34  ;;  %v10161_v52 = vadd.s32 4294967294, %v2608_v19 }
 0x268   : > { %v2744_v5 = vsel %vm2743_vm8, 1, %v17311_v24  ;;  %v4844_v63 = vsel %vm2337_vm1, nan, %v13704_v11  ;;  %v2347_v41 = vsel %vm2337_vm1, nan, %v13728_v14  ;;  %v2738_v42 = vshrl.u32 %v13747_v49, 16 }
 0x269   : > { %v2746_v56 = vadd.s32 %v2744_v5, %v2742_v45  ;;  %v2495_v53 = vxor.u32 2147483648, %v2490_v16  ;;  %vm10162_vm5 = vcmp.lt.s32.totalorder %v10161_v52, 0  ;;  %v2749_v1 = vmul.u32 %v17616_v20, %v2695_v13 }
 0x26a   : > { %vm2751_vm15 = vc.u32 %v13772_v30, %v13775_v44  ;;  %v4997_v0 = vsel %vm4995_vm3, %v2498_v57, %v2490_v16  ;;  %v2499_v11 = vsel %vm2497_vm14, %v2498_v57, %v2490_v16  ;;  %v2611_v21 = vsel %vm10162_vm5, 0, %v10161_v52  ;;  %v17619_v16 = vld [vmem:[#allocation53_spill] sm:$0xff] }
 0x26b   : > { %v2747_v36 = vadd.s32 %v2746_v56, %v2736_v39  ;;  %vm2998_vm8 = vcmp.lt.s32.totalorder %v12490_v59, 3  ;;  %v4994_v25 = vsel %vm4992_vm6, %v2482_v34, %v2495_v53  ;;  %v2496_v14 = vsel %vm2494_vm12, %v2482_v34, %v2495_v53  ;;  %v17618_v34 = vld [vmem:[#allocation64_spill] sm:$0xff]  ;;  %v17621_v57 = vld [vmem:[#allocation57_spill] sm:$0xff] }
 0x26c   : > { %v2612_v49 = vsub.s32 32, %v2611_v21  ;;  %vm2843_vm1 = vcmp.lt.s32.totalorder %v13097_v29, 2  ;;  %vm2504_vm10 = vcmp.lt.s32.totalorder %v17617_v37, 0  ;;  %v4998_v9 = vsel %vm4991_vm2, %v4994_v25, %v4997_v0 }
 0x26d   : > { %v2500_v2 = vsel %vm2493_vm9, %v2496_v14, %v2499_v11  ;;  %v2616_v12 = vsub.s32 4294967266, %v2611_v21  ;;  %v2748_v31 = vadd.s32 %v2747_v36, %v2738_v42  ;;  %v4999_v6 = vsel %vm2491_vm11, nan, %v4998_v9 }
 0x26e   : > { %v2501_v48 = vsel %vm2491_vm11, nan, %v2500_v2  ;;  %v2613_v51 = vshll.u32 %v13753_v61, %v2611_v21  ;;  %v2614_v60 = vshrl.u32 %v13691_v17, %v2612_v49  ;;  %v5950_v13 = vpack.c.bf16 %v4999_v6, %v4844_v63  ;;  %v17623_v63 = vld [vmem:[#allocation55_spill] sm:$0xff] }
 0x26f   : > { %v3446_v62 = vpack.c.bf16 %v2501_v48, %v2347_v41  ;;  %v2617_v18 = vadd.s32 127, %v2616_v12  ;;  %v2752_v54 = vadd.s32 1, %v2748_v31  ;;  %v3005_v32 = vsel %vm2999_vm0, %v17618_v34, 920167782 }
 0x270   : > { %v2829_v58 = vor.u32 %v13322_v4, %v13298_v7  ;;  %v2851_v40 = vsel %vm2845_vm4, %v13562_v35, 920167782  ;;  %v2857_v17 = vsel %vm2843_vm1, %v13582_v10, %v13597_v27  ;;  %vm3283_vm3 = vcmp.gt.s32.totalorder %v13599_v47, 0  ;;  %6030 = vmatmul.bf16.gmra.mxu1 %v5950_v13  ;;  %v17620_v27 = vld [vmem:[#allocation58_spill] sm:$0xff] }
 0x271   : > { %6127 = vmatmul.bf16.gmra.mxu2 %v3446_v62  ;;  %v2615_v61 = vor.u32 %v2614_v60, %v2613_v51  ;;  %v2618_v19 = vshll.u32 %v2617_v18, 23  ;;  %v2753_v45 = vsel %vm2751_vm15, %v2752_v54, %v2748_v31  ;;  %v2626_v7 = vsub.s32 4, %v13742_v8 }
 0x272   : > { %v2754_v4 = vadd.s32 %v2753_v45, %v2749_v1  ;;  %v2861_v39 = vand.u32 65535, %v2857_v17  ;;  %v2862_v35 = vshrl.u32 %v2857_v17, 16  ;;  %v13831_v10 = vsel %vm2996_vm13, %v12854_v22, %v17619_v16  ;;  %v17625_v1 = vld [vmem:[#allocation66_spill] sm:$0xff] }
 0x273   : > { %v17622_v52 = vor.u32 %v17620_v27, %v17621_v57  ;;  %v3280_v41 = vor.u32 8388608, %v17623_v63  ;;  %v2619_v42 = vor.u32 4788187, %v2618_v19  ;;  %v2850_v56 = vsel %vm2842_vm7, %v2829_v58, %v13548_v55 }
 0x274   : > { %vm17624_vm14 = vcmp.lt.s32.totalorder %v13097_v29, 3  ;;  %v2755_v20 = vadd.s32 536870912, %v2754_v4  ;;  %v13846_v0 = vmul.u32 %v2862_v35, %v17625_v1  ;;  %v13851_v11 = vsel %vm2998_vm8, %v17619_v16, %v3005_v32 }
 0x275   : > { %v3009_v5 = vsel %vm2999_vm0, %v17622_v52, 1326507024  ;;  %v2852_v53 = vsel %vm17624_vm14, %v13552_v38, %v2851_v40  ;;  %v13856_v21 = vsel %vm3283_vm3, %v13599_v47, 0  ;;  %v2620_v36 = vand.u32 2147483647, %v2619_v42  ;;  %vm17630_vm9 = vmmov %vm17624_vm14 }
 0x276   : > { %v2622_v25 = vcvt.s32.f32 %v2615_v61  ;;  %v2627_v14 = vsel %vm2504_vm10, %v2626_v7, %v13742_v8  ;;  %v2756_v49 = vshrl.u32 %v2755_v20, 30  ;;  %v2863_v9 = vmul.u32 %v2861_v39, %v17625_v1  ;;  %v17629_v61 = vld [vmem:[#allocation7_spill] sm:$0xff] }
 0x277   : > { %v2867_v2 = vshll.u32 %v13846_v0, 16  ;;  %v13866_v12 = vsel %vm2998_vm8, %v17618_v34, %v3009_v5  ;;  %v2853_v47 = vsel %vm2843_vm1, %v2850_v56, %v2852_v53  ;;  %v13871_v6 = vmul.u32 %v2861_v39, %v13106_v33 }
 0x278   : > { %v2623_v31 = vmul.f32 %v2622_v25, %v2620_v36  ;;  %v13873_v48 = vshll.u32 %v3280_v41, 8  ;;  %v17626_v8 = vand.u32 2147483647, %v17617_v37  ;;  %v2757_v60 = vshll.u32 %v2756_v49, 30 }
 0x279   : > { %vm2871_vm12 = vc.u32 %v2863_v9, %v2867_v2  ;;  %v13882_v13 = vand.u32 31, %v13856_v21  ;;  %v2826_v54 = vshrl.u32 %v17301_v43, %v13115_v26  ;;  %v2847_v32 = vsel %vm2845_vm4, %v13552_v38, 2102212464 }
 0x27a   : > { %vm13877_vm6 = vcmp.le.f32.partialorder %v17626_v8, 0.7853982  ;;  %v2624_v62 = vxor.u32 2147483648, %v2623_v31  ;;  %v13888_v34 = vsub.s32 %v2754_v4, %v2757_v60  ;;  %v2873_v40 = vadd.s32 %v2867_v2, %v2863_v9 }
 0x27b   : > { %v2629_v18 = vsel %vm13877_vm6, 0, %v2627_v14  ;;  %v2884_v17 = vshrl.u32 %v2853_v47, 16  ;;  %vm2658_vm2 = vcmp.lt.s32.totalorder %v17629_v61, 0  ;;  %v2846_v45 = vsel %vm2842_vm7, %v2826_v54, %v2829_v58 }
 0x27c   : > { %v2625_v19 = vsel %vm2504_vm10, %v2624_v62, %v2623_v31  ;;  %v2869_v7 = vshll.u32 %v13871_v6, 16  ;;  %v2872_v26 = vsel %vm2871_vm12, 1, %v17311_v24  ;;  %vm2759_vm4 = vcmp.lt.s32.totalorder %v13888_v34, 0 }
 0x27d   : > { %v2628_v4 = vsel %vm13877_vm6, %v17617_v37, %v2625_v19  ;;  %v2760_v38 = vsub.s32 0, %v13888_v34  ;;  %v2866_v39 = vmul.u32 %v2862_v35, %v13106_v33  ;;  %v2848_v57 = vsel %vm17630_vm9, %v13548_v55, %v2847_v32 }
 0x27e   : > { %v2630_v27 = vmul.f32 %v2628_v4, %v2628_v4  ;;  %vm2875_vm7 = vc.u32 %v2873_v40, %v2869_v7  ;;  %v2883_v58 = vand.u32 65535, %v2853_v47  ;;  %v5144_v5 = vadd.s32 3, %v2629_v18 }
 0x27f   : > { %v2761_v52 = vsel %vm2759_vm4, %v2760_v38, %v13888_v34  ;;  %v2874_v63 = vadd.s32 %v2872_v26, %v2866_v39  ;;  %v2886_v41 = vmul.u32 %v2884_v17, %v17625_v1  ;;  %v17631_v53 = vand.u32 2147483647, %v17629_v61 }
 0x280   : > { %v2631_v42 = vmul.f32 -0.001358992, %v2630_v27  ;;  %v2638_v56 = vmul.f32 -0.00019511016, %v2630_v27  ;;  %v2762_v35 = vclz %v2761_v52  ;;  %v2876_v36 = vsel %vm2875_vm7, 1, %v17311_v24 }
 0x281   : > { %vm13913_vm11 = vcmp.le.f32.partialorder %v17631_v53, 0.7853982  ;;  %v2750_v55 = vadd.s32 %v13775_v44, %v13772_v30  ;;  %v2780_v25 = vsub.s32 4, %v2756_v49  ;;  %v13920_v14 = vand.u32 3, %v2629_v18 }
 0x282   : > { %v13924_v9 = vsel %vm2843_vm1, %v2846_v45, %v2848_v57  ;;  %v2632_v2 = vadd.f32 0.041655596, %v2631_v42  ;;  %v2639_v31 = vadd.f32 0.008332121, %v2638_v56  ;;  %v10164_v47 = vadd.s32 4294967294, %v2762_v35 }
 0x283   : > { %v2887_v8 = vmul.u32 %v2883_v58, %v13106_v33  ;;  %v2868_v51 = vshrl.u32 %v13846_v0, 16  ;;  %v2878_v60 = vadd.s32 %v2876_v36, %v2874_v63  ;;  %v2885_v62 = vmul.u32 %v2883_v58, %v17625_v1 }
 0x284   : > { %v2889_v54 = vshll.u32 %v2886_v41, 16  ;;  %v2633_v32 = vmul.f32 %v2632_v2, %v2630_v27  ;;  %v2640_v30 = vmul.f32 %v2639_v31, %v2630_v27  ;;  %vm10165_vm5 = vcmp.lt.s32.totalorder %v10164_v47, 0 }
 0x285   : > { %v13929_v44 = vand.u32 3, %v5144_v5  ;;  %v2765_v18 = vsel %vm10165_vm5, 0, %v10164_v47  ;;  %v2781_v29 = vsel %vm2658_vm2, %v2780_v25, %v2756_v49  ;;  %v2888_v40 = vmul.u32 %v2884_v17, %v13106_v33 }
 0x286   : > { %vm2893_vm15 = vc.u32 %v2885_v62, %v2889_v54  ;;  %v2634_v19 = vadd.f32 -0.4999988, %v2633_v32  ;;  %v2641_v45 = vadd.f32 -0.16666654, %v2640_v30  ;;  %v2766_v7 = vsub.s32 32, %v2765_v18 }
 0x287   : > { %v2891_v0 = vshll.u32 %v2887_v8, 16  ;;  %v2770_v26 = vsub.s32 4294967266, %v2765_v18  ;;  %v2879_v38 = vadd.s32 %v2878_v60, %v2868_v51  ;;  %v2894_v1 = vsel %vm2893_vm15, 1, %v17311_v24 }
 0x288   : > { %v2895_v39 = vadd.s32 %v2889_v54, %v2885_v62  ;;  %v2635_v57 = vmul.f32 %v2634_v19, %v2630_v27  ;;  %v2642_v58 = vmul.f32 %v2641_v45, %v2630_v27  ;;  %v2768_v52 = vshrl.u32 %v2750_v55, %v2766_v7 }
 0x289   : > { %v2896_v5 = vadd.s32 %v2894_v1, %v2888_v40  ;;  %v2767_v63 = vshll.u32 %v13888_v34, %v2765_v18  ;;  %v2771_v42 = vadd.s32 127, %v2770_v26  ;;  %v2783_v33 = vsel %vm13913_vm11, 0, %v2781_v29  ;;  %v17636_v26 = vld [vmem:[#allocation94_spill] sm:$0xff] }
 0x28a   : > { %vm2897_vm1 = vc.u32 %v2895_v39, %v2891_v0  ;;  %v2636_v49 = vadd.f32 1.0, %v2635_v57  ;;  %v2643_v17 = vadd.f32 1.0, %v2642_v58  ;;  %v2870_v56 = vshrl.u32 %v13871_v6, 16  ;;  %v17634_v6 = vld [vmem:[#allocation155_spill] sm:$0xff] }
 0x28b   : > { %v2898_v53 = vsel %vm2897_vm1, 1, %v17311_v24  ;;  %v2769_v35 = vor.u32 %v2768_v52, %v2767_v63  ;;  %v2772_v36 = vshll.u32 %v2771_v42, 23  ;;  %v2890_v25 = vshrl.u32 %v2886_v41, 16  ;;  %v17638_v42 = vld [vmem:[#allocation154_spill] sm:$0xff] }
 0x28c   : > { %v2900_v2 = vadd.s32 %v2898_v53, %v2896_v5  ;;  %v2644_v27 = vmul.f32 %v2643_v17, %v2628_v4  ;;  %v5299_v55 = vadd.s32 3, %v2783_v33  ;;  %vm2651_vm10 = vcmp.eq.s32.totalorder %v13920_v14, 2  ;;  %v17639_v53 = vld [vmem:[#allocation153_spill] sm:$0xff] }
 0x28d   : > { %v2880_v34 = vadd.s32 %v2879_v38, %v2870_v56  ;;  %v2773_v31 = vor.u32 4788187, %v2772_v36  ;;  %vm5147_vm3 = vcmp.eq.s32.totalorder %v13929_v44, 0  ;;  %vm2648_vm14 = vcmp.eq.s32.totalorder %v13920_v14, 0 }
 0x28e   : > { %v2892_v47 = vshrl.u32 %v2887_v8, 16  ;;  %v2901_v51 = vadd.s32 %v2900_v2, %v2890_v25  ;;  %v2652_v60 = vxor.u32 2147483648, %v2636_v49  ;;  %vm5146_vm6 = vcmp.lt.s32.totalorder %v13929_v44, 2 }
 0x28f   : > { %vm5150_vm12 = vcmp.eq.s32.totalorder %v13929_v44, 2  ;;  %vm17635_vm4 = vcmask 523264   ;;  %v2899_v4 = vadd.s32 %v2895_v39, %v2891_v0  ;;  %v2649_v62 = vxor.u32 2147483648, %v2644_v27 }
 0x290   : > { %v7349_v41 = vsel %vm17635_vm4, %v17634_v6, 0.0  ;;  %v2774_v54 = vand.u32 2147483647, %v2773_v31  ;;  %v2776_v32 = vcvt.s32.f32 %v2769_v35  ;;  %v2902_v30 = vadd.s32 %v2901_v51, %v2892_v47 }
 0x291   : > { %7350 = vadd.xlane.f32.xlu0 %v7349_v41  ;;  %v13947_v18 = vand.u32 3, %v5299_v55  ;;  %v13949_v29 = vand.u32 3, %v2783_v33  ;;  %vm2905_vm9 = vc.u32 %v2880_v34, %v2899_v4  ;;  %vm2997_vm7 = vcmp.lt.s32.totalorder %v12490_v59, 2 }
 0x292   : > { %v2777_v8 = vmul.f32 %v2776_v32, %v2774_v54  ;;  %v2903_v40 = vmul.u32 %v12504_v46, %v13924_v9  ;;  %v2906_v19 = vadd.s32 1, %v2902_v30  ;;  %v3007_v45 = vsel %vm2997_vm7, %v13112_v23, %v13851_v11 }
 0x293   : > { %v5152_v7 = vsel %vm5150_vm12, %v2652_v60, %v2644_v27  ;;  %v13960_v0 = vadd.s32 %v2899_v4, %v2880_v34  ;;  %v2980_v38 = vshrl.u32 %v17301_v43, %v17636_v26  ;;  %v3011_v1 = vsel %vm2997_vm7, %v13831_v10, %v13866_v12  ;;  %v17637_v10 = vld [vmem:[#allocation8_spill] sm:$0xff] }
 0x294   : > { %v2778_v46 = vxor.u32 2147483648, %v2777_v8  ;;  %v5149_v9 = vsel %vm5147_vm3, %v2636_v49, %v2649_v62  ;;  %v2907_v39 = vsel %vm2905_vm9, %v2906_v19, %v2902_v30  ;;  %v3015_v57 = vand.u32 65535, %v3011_v1 }
 0x295   : > { %v2908_v23 = vadd.s32 %v2907_v39, %v2903_v40  ;;  %v3001_v11 = vsel %vm2999_vm0, %v17619_v16, 2102212464  ;;  %v3016_v58 = vshrl.u32 %v3011_v1, 16  ;;  %v3038_v52 = vshrl.u32 %v3007_v45, 16 }
 0x296   : > { %v2779_v5 = vsel %vm2658_vm2, %v2778_v46, %v2777_v8  ;;  %v2653_v63 = vsel %vm2651_vm10, %v2652_v60, %v2644_v27  ;;  %v13980_v12 = vsel %vm2996_vm13, %v2980_v38, %v17637_v10  ;;  %v3019_v33 = vmul.u32 %v3015_v57, %v17638_v42 }
 0x297   : > { %v13986_v17 = vsel %vm13913_vm11, %v17629_v61, %v2779_v5  ;;  %v2650_v16 = vsel %vm2648_vm14, %v2636_v49, %v2649_v62  ;;  %v2909_v56 = vadd.s32 536870912, %v2908_v23  ;;  %v3018_v35 = vmul.u32 %v3016_v58, %v17639_v53 }
 0x298   : > { %v2784_v36 = vmul.f32 %v13986_v17, %v13986_v17  ;;  %v5153_v25 = vsel %vm5146_vm6, %v5149_v9, %v5152_v7  ;;  %v3002_v2 = vsel %vm2998_vm8, %v12854_v22, %v3001_v11  ;;  %v3037_v27 = vand.u32 65535, %v3007_v45 }
 0x299   : > { %v13998_v20 = vshrl.u32 %v2909_v56, 30  ;;  %v3017_v55 = vmul.u32 %v3015_v57, %v17639_v53  ;;  %v3021_v34 = vshll.u32 %v3018_v35, 16  ;;  %v14002_v49 = vmul.u32 %v3038_v52, %v17639_v53 }
 0x29a   : > { %v2785_v31 = vmul.f32 -0.001358992, %v2784_v36  ;;  %v2792_v47 = vmul.f32 -0.00019511016, %v2784_v36  ;;  %vm2647_vm13 = vcmp.lt.s32.totalorder %v13920_v14, 2  ;;  %v3020_v44 = vmul.u32 %v3016_v58, %v17638_v42 }
 0x29b   : > { %v3023_v51 = vshll.u32 %v3019_v33, 16  ;;  %v2911_v60 = vshll.u32 %v13998_v20, 30  ;;  %v3024_v41 = vshrl.u32 %v3019_v33, 16  ;;  %vm3025_vm0 = vc.u32 %v3017_v55, %v3021_v34 }
 0x29c   : > { %v3027_v22 = vadd.s32 %v3021_v34, %v3017_v55  ;;  %vm2645_vm8 = vweird.f32 %v17617_v37  ;;  %v2786_v4 = vadd.f32 0.041655596, %v2785_v31  ;;  %v2793_v62 = vadd.f32 0.008332121, %v2792_v47 }
 0x29d   : > { %v3026_v54 = vsel %vm3025_vm0, 1, %v17311_v24  ;;  %v3041_v32 = vmul.u32 %v3037_v27, %v17638_v42  ;;  %v14010_v30 = vsub.s32 %v2908_v23, %v2911_v60  ;;  %v3043_v40 = vshll.u32 %v14002_v49, 16 }
 0x29e   : > { %v3028_v8 = vadd.s32 %v3026_v54, %v3020_v44  ;;  %vm3029_vm2 = vc.u32 %v3027_v22, %v3023_v51  ;;  %v2787_v19 = vmul.f32 %v2786_v4, %v2784_v36  ;;  %v2794_v45 = vmul.f32 %v2793_v62, %v2784_v36  ;;  %v17640_v54 = vld [vmem:[#allocation149_spill] sm:$0xff] }
 0x29f   : > { %v3030_v7 = vsel %vm3029_vm2, 1, %v17311_v24  ;;  %v3039_v26 = vmul.u32 %v3037_v27, %v17639_v53  ;;  %vm2913_vm11 = vcmp.lt.s32.totalorder %v14010_v30, 0  ;;  %v2914_v38 = vsub.s32 0, %v14010_v30 }
 0x2a0   : > { %v3022_v1 = vshrl.u32 %v3018_v35, 16  ;;  %v3032_v46 = vadd.s32 %v3030_v7, %v3028_v8  ;;  %v2788_v9 = vadd.f32 -0.4999988, %v2787_v19  ;;  %v2795_v39 = vadd.f32 -0.16666654, %v2794_v45 }
 0x2a1   : > { %vm5305_vm5 = vcmp.eq.s32.totalorder %v13947_v18, 2  ;;  %vm2805_vm15 = vcmp.eq.s32.totalorder %v13949_v29, 2  ;;  %v3042_v57 = vmul.u32 %v3038_v52, %v17638_v42  ;;  %v3045_v23 = vshll.u32 %v3041_v32, 16 }
 0x2a2   : > { %vm5302_vm1 = vcmp.eq.s32.totalorder %v13947_v18, 0  ;;  %vm2802_vm10 = vcmp.eq.s32.totalorder %v13949_v29, 0  ;;  %v2915_v11 = vsel %vm2913_vm11, %v2914_v38, %v14010_v30  ;;  %v3033_v58 = vadd.s32 %v3032_v46, %v3022_v1 }
 0x2a3   : > { %vm3047_vm3 = vc.u32 %v3039_v26, %v3043_v40  ;;  %v3049_v5 = vadd.s32 %v3043_v40, %v3039_v26  ;;  %v2789_v10 = vmul.f32 %v2788_v9, %v2784_v36  ;;  %v2796_v33 = vmul.f32 %v2795_v39, %v2784_v36  ;;  %v17641_v9 = vld [vmem:[#allocation70_spill] sm:$0xff] }
 0x2a4   : > { %vm5301_vm14 = vcmp.lt.s32.totalorder %v13947_v18, 2  ;;  %vm2801_vm6 = vcmp.lt.s32.totalorder %v13949_v29, 2  ;;  %v2916_v56 = vclz %v2915_v11  ;;  %v3048_v53 = vsel %vm3047_vm3, 1, %v17311_v24  ;;  %v17642_v29 = vld [vmem:[#allocation74_spill] sm:$0xff] }
 0x2a5   : > { %vm2799_vm12 = vweird.f32 %v17629_v61  ;;  %v2654_v52 = vsel %vm2647_vm13, %v2650_v16, %v2653_v63  ;;  %v14029_v42 = vadd.s32 %v3033_v58, %v3024_v41  ;;  %v3050_v35 = vadd.s32 %v3048_v53, %v3042_v57  ;;  %v17643_v57 = vld [vmem:[#allocation77_spill] sm:$0xff]  ;;  %v17645_v11 = vld [vmem:[#allocation78_spill] sm:$0xff]  ;;  %v17646_v58 = vld [vmem:[#allocation75_spill] sm:$0xff] }
 0x2a6   : > { %vm3051_vm4 = vc.u32 %v3049_v5, %v3045_v23  ;;  %v2790_v27 = vadd.f32 1.0, %v2789_v10  ;;  %v2797_v55 = vadd.f32 1.0, %v2796_v33  ;;  %v10167_v34 = vadd.s32 4294967294, %v2916_v56  ;;  %v17648_v33 = vld [vmem:[#allocation129_spill] sm:$0xff] }
 0x2a7   : > { %v3052_v36 = vsel %vm3051_vm4, 1, %v17311_v24  ;;  %v5154_v31 = vsel %vm2645_vm8, nan, %v5153_v25  ;;  %v3003_v47 = vsel %vm2997_vm7, %v13980_v12, %v3002_v2  ;;  %v3044_v44 = vshrl.u32 %v14002_v49, 16 }
 0x2a8   : > { %v3054_v14 = vadd.s32 %v3052_v36, %v3050_v35  ;;  %v2798_v63 = vmul.f32 %v2797_v55, %v13986_v17  ;;  %v2806_v16 = vxor.u32 2147483648, %v2790_v27  ;;  %vm10168_vm9 = vcmp.lt.s32.totalorder %v10167_v34, 0  ;;  %v17650_v35 = vld [vmem:[#allocation79_spill] sm:$0xff] }
 0x2a9   : > { %v14039_v51 = vadd.s32 %v3049_v5, %v3045_v23  ;;  %v2655_v60 = vsel %vm2645_vm8, nan, %v2654_v52  ;;  %v2919_v41 = vsel %vm10168_vm9, 0, %v10167_v34  ;;  %v3046_v22 = vshrl.u32 %v3041_v32, 16  ;;  %v17649_v52 = vld [vmem:[#allocation82_spill] sm:$0xff] }
 0x2aa   : > { %v3055_v4 = vadd.s32 %v3054_v14, %v3044_v44  ;;  %v2803_v25 = vxor.u32 2147483648, %v2798_v63  ;;  %v2920_v62 = vsub.s32 32, %v2919_v41  ;;  %v3057_v59 = vmul.u32 %v17640_v54, %v3003_v47 }
 0x2ab   : > { %vm3059_vm7 = vc.u32 %v14029_v42, %v14039_v51  ;;  %v5307_v12 = vsel %vm5305_vm5, %v2806_v16, %v2798_v63  ;;  %v2807_v17 = vsel %vm2805_vm15, %v2806_v16, %v2798_v63  ;;  %v2924_v2 = vsub.s32 4294967266, %v2919_v41 }
 0x2ac   : > { %v3056_v49 = vadd.s32 %v3055_v4, %v3046_v22  ;;  %v5304_v37 = vsel %vm5302_vm1, %v2790_v27, %v2803_v25  ;;  %v2804_v32 = vsel %vm2802_vm10, %v2790_v27, %v2803_v25  ;;  %v2921_v8 = vshll.u32 %v14010_v30, %v2919_v41 }
 0x2ad   : > { %v2922_v40 = vshrl.u32 %v13960_v0, %v2920_v62  ;;  %v5308_v19 = vsel %vm5301_vm14, %v5304_v37, %v5307_v12  ;;  %v2808_v45 = vsel %vm2801_vm6, %v2804_v32, %v2807_v17  ;;  %v2925_v7 = vadd.s32 127, %v2924_v2  ;;  %v17655_v17 = vld [vmem:[#allocation72_spill] sm:$0xff] }
 0x2ae   : > { %v3060_v26 = vadd.s32 1, %v3056_v49  ;;  %v5309_v38 = vsel %vm2799_vm12, nan, %v5308_v19  ;;  %v2809_v1 = vsel %vm2799_vm12, nan, %v2808_v45  ;;  %vm3151_vm13 = vcmp.lt.s32.totalorder %v17641_v9, 2 }
 0x2af   : > { %v2923_v46 = vor.u32 %v2922_v40, %v2921_v8  ;;  %v5951_v30 = vpack.c.bf16 %v5309_v38, %v5154_v31  ;;  %v3447_v39 = vpack.c.bf16 %v2809_v1, %v2655_v60  ;;  %v2926_v0 = vshll.u32 %v2925_v7, 23 }
 0x2b0   : > { %v3061_v18 = vsel %vm3059_vm7, %v3060_v26, %v3056_v49  ;;  %vm17644_vm0 = vcmp.lt.s32.totalorder %v17641_v9, 1  ;;  %vm17647_vm8 = vcmp.lt.s32.totalorder %v17641_v9, 3  ;;  %v14077_v5 = vsub.s32 32, %v13882_v13 }
 0x2b1   : > { %v3158_v23 = vsel %vm17644_vm0, %v17643_v57, %v17642_v29  ;;  %v3160_v61 = vsel %vm17647_vm8, %v17646_v58, %v17645_v11  ;;  %v3062_v10 = vadd.s32 %v3061_v18, %v3057_v59  ;;  %vm2812_vm2 = vcmp.lt.s32.totalorder %v17648_v33, 0  ;;  %6035 = vmatmul.bf16.gmra.mxu1 %v5951_v30  ;;  %6132 = vmatmul.bf16.gmra.mxu2 %v3447_v39 }
 0x2b2   : > { %v14081_v56 = vand.u32 65535, %v13873_v48  ;;  %v2927_v53 = vor.u32 4788187, %v2926_v0  ;;  %v3165_v27 = vsel %vm3151_vm13, %v17650_v35, %v17649_v52  ;;  %v14088_v55 = vshrl.u32 %v13856_v21, 5 }
 0x2b3   : > { %v14091_v34 = vshrl.u32 %v13873_v48, 16  ;;  %v3063_v36 = vadd.s32 536870912, %v3062_v10  ;;  %v3170_v31 = vshrl.u32 %v3165_v27, 16  ;;  %v3289_v47 = vshll.u32 %v17301_v43, %v13882_v13 }
 0x2b4   : > { %v17651_v44 = vmov 2475754826   ;;  %v2928_v63 = vand.u32 2147483647, %v2927_v53  ;;  %v2930_v16 = vcvt.s32.f32 %v2923_v46  ;;  %v17652_v60 = vmov 2131351028  }
 0x2b5   : > { %v3292_v14 = vshll.u32 %v17651_v44, %v13882_v13  ;;  %v3295_v41 = vshll.u32 %v17652_v60, %v13882_v13  ;;  %v17653_v22 = vmov 2102212464   ;;  %v17654_v4 = vmov 1326507024  }
 0x2b6   : > { %v3298_v21 = vshll.u32 %v17653_v22, %v13882_v13  ;;  %v3302_v25 = vshrl.u32 %v17654_v4, %v14077_v5  ;;  %v14103_v62 = vshrl.u32 %v3063_v36, 30  ;;  %v2931_v54 = vmul.f32 %v2930_v16, %v2928_v63 }
 0x2b7   : > { %v3161_v59 = vsel %vm3151_vm13, %v3158_v23, %v3160_v61  ;;  %v3169_v12 = vand.u32 65535, %v3165_v27  ;;  %v14108_v2 = vmul.u32 %v3170_v31, %v17655_v17  ;;  %v3290_v49 = vshrl.u32 %v17651_v44, %v14077_v5  ;;  %v17660_v61 = vld [vmem:[#allocation73_spill] sm:$0xff] }
 0x2b8   : > { %v3293_v37 = vshrl.u32 %v17652_v60, %v14077_v5  ;;  %v17656_v32 = vmov 920167782   ;;  %v3065_v40 = vshll.u32 %v14103_v62, 30  ;;  %v3296_v19 = vshrl.u32 %v17653_v22, %v14077_v5 }
 0x2b9   : > { %v3301_v8 = vshll.u32 %v17656_v32, %v13882_v13  ;;  %v3299_v45 = vshrl.u32 %v17656_v32, %v14077_v5  ;;  %vm3307_vm11 = vcmp.lt.s32.totalorder %v14088_v55, 4  ;;  %v2932_v7 = vxor.u32 2147483648, %v2931_v54 }
 0x2ba   : > { %v17657_v38 = vand.u32 2147483647, %v17648_v33  ;;  %v14128_v46 = vsub.s32 %v3062_v10, %v3065_v40  ;;  %v3192_v13 = vshrl.u32 %v3161_v59, 16  ;;  %v3171_v39 = vmul.u32 %v3169_v12, %v17655_v17 }
 0x2bb   : > { %v3303_v26 = vor.u32 %v3302_v25, %v3301_v8  ;;  %v2933_v30 = vsel %vm2812_vm2, %v2932_v7, %v2931_v54  ;;  %v3175_v0 = vshll.u32 %v14108_v2, 16  ;;  %v3191_v18 = vand.u32 65535, %v3161_v59  ;;  %v17661_v8 = vld [vmem:[#allocation128_spill] sm:$0xff] }
 0x2bc   : > { %vm14124_vm5 = vcmp.le.f32.partialorder %v17657_v38, 0.7853982  ;;  %vm3067_vm15 = vcmp.lt.s32.totalorder %v14128_v46, 0  ;;  %v3068_v11 = vsub.s32 0, %v14128_v46  ;;  %v14142_v10 = vmul.u32 %v3169_v12, %v17660_v61 }
 0x2bd   : > { %v14137_v23 = vsel %vm14124_vm5, %v17648_v33, %v2933_v30  ;;  %v14144_v53 = vor.u32 %v3290_v49, %v3289_v47  ;;  %v14146_v52 = vor.u32 %v3293_v37, %v3292_v14  ;;  %v2934_v35 = vsub.s32 4, %v13998_v20 }
 0x2be   : > { %v14151_v27 = vmul.f32 %v14137_v23, %v14137_v23  ;;  %v14153_v36 = vor.u32 %v3296_v19, %v3295_v41  ;;  %v14155_v44 = vor.u32 %v3299_v45, %v3298_v21  ;;  %v3069_v63 = vsel %vm3067_vm15, %v3068_v11, %v14128_v46  ;;  %v17662_v19 = vld [vmem:[#allocation68_spill] sm:$0xff] }
 0x2bf   : > { %v14159_v16 = vmul.u32 %v3192_v13, %v17655_v17  ;;  %v3070_v60 = vclz %v3069_v63  ;;  %v3174_v14 = vmul.u32 %v3170_v31, %v17660_v61  ;;  %vm3179_vm1 = vc.u32 %v3171_v39, %v3175_v0 }
 0x2c0   : > { %v2946_v47 = vmul.f32 -0.00019511016, %v14151_v27  ;;  %v14165_v22 = vsel %vm3307_vm11, %v3303_v26, 1326507024  ;;  %v3177_v41 = vshll.u32 %v14142_v10, 16  ;;  %v3181_v4 = vadd.s32 %v3175_v0, %v3171_v39 }
 0x2c1   : > { %v14169_v21 = vmul.u32 %v3191_v18, %v17660_v61  ;;  %v2935_v25 = vsel %vm2812_vm2, %v2934_v35, %v13998_v20  ;;  %v2939_v54 = vmul.f32 -0.001358992, %v14151_v27  ;;  %v10170_v12 = vadd.s32 4294967294, %v3070_v60 }
 0x2c2   : > { %v2947_v59 = vadd.f32 0.008332121, %v2946_v47  ;;  %v3058_v31 = vadd.s32 %v14039_v51, %v14029_v42  ;;  %v3180_v49 = vsel %vm3179_vm1, 1, %v17311_v24  ;;  %v3193_v37 = vmul.u32 %v3191_v18, %v17655_v17 }
 0x2c3   : > { %v3197_v32 = vshll.u32 %v14159_v16, 16  ;;  %vm2966_vm10 = vcmp.lt.s32.totalorder %v17661_v8, 0  ;;  %vm10171_vm3 = vcmp.lt.s32.totalorder %v10170_v12, 0  ;;  %v3134_v20 = vshrl.u32 %v17301_v43, %v17662_v19 }
 0x2c4   : > { %v2948_v40 = vmul.f32 %v2947_v59, %v14151_v27  ;;  %v3182_v45 = vadd.s32 %v3180_v49, %v3174_v14  ;;  %v3073_v7 = vsel %vm10171_vm3, 0, %v10170_v12  ;;  %vm17663_vm14 = vcmp.lt.s32.totalorder %v17641_v9, 4 }
 0x2c5   : > { %v3155_v42 = vsel %vm17663_vm14, %v17646_v58, 2102212464  ;;  %vm3183_vm6 = vc.u32 %v3181_v4, %v3177_v41  ;;  %v3199_v51 = vshll.u32 %v14169_v21, 16  ;;  %v2940_v17 = vadd.f32 0.041655596, %v2939_v54 }
 0x2c6   : > { %v3074_v26 = vsub.s32 32, %v3073_v7  ;;  %v3176_v38 = vshrl.u32 %v14108_v2, 16  ;;  %v3196_v30 = vmul.u32 %v3192_v13, %v17660_v61  ;;  %vm3304_vm12 = vcmp.lt.s32.totalorder %v14088_v55, 1 }
 0x2c7   : > { %vm3306_vm4 = vcmp.lt.s32.totalorder %v14088_v55, 3  ;;  %v3078_v39 = vsub.s32 4294967266, %v3073_v7  ;;  %v3184_v0 = vsel %vm3183_vm6, 1, %v17311_v24  ;;  %vm3201_vm9 = vc.u32 %v3193_v37, %v3197_v32 }
 0x2c8   : > { %v3203_v18 = vadd.s32 %v3197_v32, %v3193_v37  ;;  %v2949_v11 = vadd.f32 -0.16666654, %v2948_v40  ;;  %v3076_v58 = vshrl.u32 %v3058_v31, %v3074_v26  ;;  %v3088_v35 = vsub.s32 4, %v14103_v62  ;;  %v14200_v31 = vpop.permute.xlu1 %814 }
 0x2c9   : > { %v3186_v63 = vadd.s32 %v3184_v0, %v3182_v45  ;;  %v3075_v47 = vshll.u32 %v14128_v46, %v3073_v7  ;;  %v3079_v60 = vadd.s32 127, %v3078_v39  ;;  %v3202_v2 = vsel %vm3201_vm9, 1, %v17311_v24 }
 0x2ca   : > { %vm3205_vm7 = vc.u32 %v3203_v18, %v3199_v51  ;;  %v2941_v13 = vmul.f32 %v2940_v17, %v14151_v27  ;;  %v3178_v61 = vshrl.u32 %v14142_v10, 16  ;;  %v3198_v41 = vshrl.u32 %v14159_v16, 16 }
 0x2cb   : > { %v3187_v14 = vadd.s32 %v3186_v63, %v3176_v38  ;;  %v3077_v4 = vor.u32 %v3076_v58, %v3075_v47  ;;  %v3080_v54 = vshll.u32 %v3079_v60, 23  ;;  %v3204_v59 = vadd.s32 %v3202_v2, %v3196_v30 }
 0x2cc   : > { %v3206_v12 = vsel %vm3205_vm7, 1, %v17311_v24  ;;  %v2937_v46 = vsel %vm14124_vm5, 0, %v2935_v25  ;;  %v2950_v49 = vmul.f32 %v2949_v11, %v14151_v27  ;;  %v17664_v37 = vand.u32 2147483647, %v17661_v8 }
 0x2cd   : > { %vm17667_vm8 = vcmp.lt.s32.totalorder %v17641_v9, 1  ;;  %v3081_v16 = vor.u32 4788187, %v3080_v54  ;;  %v3089_v40 = vsel %vm2966_vm10, %v3088_v35, %v14103_v62  ;;  %v3200_v1 = vshrl.u32 %v14169_v21, 16 }
 0x2ce   : > { %vm14207_vm0 = vcmp.le.f32.partialorder %v17664_v37, 0.7853982  ;;  %v3154_v10 = vsel %vm17667_vm8, %v3134_v20, %v17643_v57  ;;  %v3208_v25 = vadd.s32 %v3206_v12, %v3204_v59  ;;  %v2942_v19 = vadd.f32 -0.4999988, %v2941_v13  ;;  %v17669_v57 = vld [vmem:[#allocation137_spill] sm:$0xff] }
 0x2cf   : > { %vm17668_vm2 = vcmp.lt.s32.totalorder %v17641_v9, 3  ;;  %v14221_v7 = vadd.s32 %v3187_v14, %v3178_v61  ;;  %v14223_v17 = vadd.s32 %v3203_v18, %v3199_v51  ;;  %v3082_v26 = vand.u32 2147483647, %v3081_v16  ;;  %v14261_v61 = vpop.permute.xlu2 %816 }
 0x2d0   : > { %v3156_v45 = vsel %vm17668_vm2, %v17642_v29, %v3155_v42  ;;  %v3084_v38 = vcvt.s32.f32 %v3077_v4  ;;  %vm17670_vm5 = vcmask 523264   ;;  %v3209_v30 = vadd.s32 %v3208_v25, %v3198_v41  ;;  %v14265_v54 = vpop.permute.xlu1 %838 }
 0x2d1   : > { %v7352_v20 = vsel %vm17670_vm5, %v17669_v57, 0.0  ;;  %v3316_v62 = vsel %vm3304_vm12, %v14146_v52, %v14153_v36  ;;  %v3318_v29 = vsel %vm3306_vm4, %v14155_v44, %v14165_v22  ;;  %v2951_v21 = vadd.f32 1.0, %v2950_v49 }
 0x2d2   : > { %v3091_v42 = vsel %vm14207_vm0, 0, %v3089_v40  ;;  %7353 = vadd.xlane.f32.xlu1 %v7352_v20  ;;  %v3085_v51 = vmul.f32 %v3084_v38, %v3082_v26  ;;  %v5454_v39 = vadd.s32 3, %v2937_v46  ;;  %v3157_v0 = vsel %vm3151_vm13, %v3154_v10, %v3156_v45 }
 0x2d3   : > { %v3210_v18 = vadd.s32 %v3209_v30, %v3200_v1  ;;  %v3313_v11 = vsel %vm3307_vm11, %v14155_v44, 920167782  ;;  %v2943_v58 = vmul.f32 %v2942_v19, %v14151_v27  ;;  %v14243_v35 = vand.u32 3, %v2937_v46  ;;  %v17671_v44 = vld [vmem:[#allocation69_spill] sm:$0xff] }
 0x2d4   : > { %vm3213_vm15 = vc.u32 %v14221_v7, %v14223_v17  ;;  %v3086_v22 = vxor.u32 2147483648, %v3085_v51  ;;  %v5609_v63 = vadd.s32 3, %v3091_v42  ;;  %vm3305_vm1 = vcmp.lt.s32.totalorder %v14088_v55, 2  ;;  %v17672_v55 = vld [vmem:[#allocation49_spill] sm:$0xff] }
 0x2d5   : > { %v3214_v47 = vadd.s32 1, %v3210_v18  ;;  %v3312_v9 = vsel %vm3304_vm12, %v14144_v53, %v14146_v52  ;;  %v2952_v60 = vmul.f32 %v2951_v21, %v14137_v23  ;;  %v3211_v2 = vmul.u32 %v17671_v44, %v3157_v0 }
 0x2d6   : > { %v14256_v27 = vsel %vm3305_vm1, %v3316_v62, %v3318_v29  ;;  %v3314_v13 = vsel %vm3306_vm4, %v14153_v36, %v3313_v11  ;;  %v3087_v14 = vsel %vm2966_vm10, %v3086_v22, %v3085_v51  ;;  %v5455_v41 = vand.u32 3, %v5454_v39 }
 0x2d7   : > { %v3215_v4 = vsel %vm3213_vm15, %v3214_v47, %v3210_v18  ;;  %v2944_v23 = vadd.f32 1.0, %v2943_v58  ;;  %v14270_v59 = vsel %vm14207_vm0, %v17661_v8, %v3087_v14  ;;  %vm2956_vm13 = vcmp.eq.s32.totalorder %v14243_v35, 0  ;;  %v14308_v47 = vpop.permute.xlu2 %822 }
 0x2d8   : > { %v3216_v12 = vadd.s32 %v3215_v4, %v3211_v2  ;;  %v3092_v46 = vmul.f32 %v14270_v59, %v14270_v59  ;;  %v14275_v49 = vand.u32 3, %v5609_v63  ;;  %v3323_v37 = vand.u32 65535, %v14256_v27  ;;  %v14314_v44 = vpop.permute.xlu1 %832 }
 0x2d9   : > { %v3324_v10 = vshrl.u32 %v14256_v27, 16  ;;  %v2957_v16 = vxor.u32 2147483648, %v2952_v60  ;;  %vm2959_vm10 = vcmp.eq.s32.totalorder %v14243_v35, 2  ;;  %v14280_v40 = vand.u32 3, %v3091_v42 }
 0x2da   : > { %v3217_v32 = vadd.s32 536870912, %v3216_v12  ;;  %v3093_v1 = vmul.f32 -0.001358992, %v3092_v46  ;;  %v3100_v25 = vmul.f32 -0.00019511016, %v3092_v46  ;;  %v14284_v19 = vsel %vm3305_vm1, %v3312_v9, %v3314_v13 }
 0x2db   : > { %v14287_v45 = vmul.u32 %v3324_v10, %v14081_v56  ;;  %v2960_v26 = vxor.u32 2147483648, %v2944_v23  ;;  %vm5456_vm3 = vcmp.lt.s32.totalorder %v5455_v41, 2  ;;  %vm5457_vm14 = vcmp.eq.s32.totalorder %v5455_v41, 0 }
 0x2dc   : > { %vm2955_vm6 = vcmp.lt.s32.totalorder %v14243_v35, 2  ;;  %v14290_v38 = vshrl.u32 %v3217_v32, 30  ;;  %vm2953_vm9 = vweird.f32 %v17648_v33  ;;  %v3094_v20 = vadd.f32 0.041655596, %v3093_v1 }
 0x2dd   : > { %v3101_v30 = vadd.f32 0.008332121, %v3100_v25  ;;  %v3325_v62 = vmul.u32 %v3323_v37, %v14081_v56  ;;  %v3329_v29 = vshll.u32 %v14287_v45, 16  ;;  %vm5460_vm7 = vcmp.eq.s32.totalorder %v5455_v41, 2 }
 0x2de   : > { %v3219_v21 = vshll.u32 %v14290_v38, 30  ;;  %v14298_v42 = vshrl.u32 %v17301_v43, %v14077_v5  ;;  %v3346_v51 = vshrl.u32 %v14284_v19, 16  ;;  %v3095_v39 = vmul.f32 %v3094_v20, %v3092_v46 }
 0x2df   : > { %v3102_v0 = vmul.f32 %v3101_v30, %v3092_v46  ;;  %v5459_v18 = vsel %vm5457_vm14, %v2944_v23, %v2957_v16  ;;  %vm3333_vm0 = vc.u32 %v3325_v62, %v3329_v29  ;;  %v5462_v11 = vsel %vm5460_vm7, %v2960_v26, %v2952_v60 }
 0x2e0   : > { %v2961_v58 = vsel %vm2959_vm10, %v2960_v26, %v2952_v60  ;;  %v14303_v22 = vsub.s32 %v3216_v12, %v3219_v21  ;;  %v14306_v63 = vmul.u32 %v3323_v37, %v14091_v34  ;;  %v3096_v9 = vadd.f32 -0.4999988, %v3095_v39 }
 0x2e1   : > { %v3103_v43 = vadd.f32 -0.16666654, %v3102_v0  ;;  %vm5615_vm8 = vcmp.eq.s32.totalorder %v14275_v49, 2  ;;  %v2958_v5 = vsel %vm2956_vm13, %v2944_v23, %v2957_v16  ;;  %vm3113_vm2 = vcmp.eq.s32.totalorder %v14280_v40, 2 }
 0x2e2   : > { %v5463_v60 = vsel %vm5456_vm3, %v5459_v18, %v5462_v11  ;;  %vm5612_vm5 = vcmp.eq.s32.totalorder %v14275_v49, 0  ;;  %vm3110_vm15 = vcmp.eq.s32.totalorder %v14280_v40, 0  ;;  %v3334_v2 = vsel %vm3333_vm0, 1, %v17311_v24 }
 0x2e3   : > { %v3335_v27 = vadd.s32 %v3329_v29, %v3325_v62  ;;  %v14321_v13 = vmul.u32 %v3346_v51, %v14081_v56  ;;  %v3097_v14 = vmul.f32 %v3096_v9, %v3092_v46  ;;  %v3104_v4 = vmul.f32 %v3103_v43, %v3092_v46  ;;  %v14341_v62 = vpop.permute.xlu0 %830  ;;  %v14353_v43 = vpop.permute.xlu2 %834 }
 0x2e4   : > { %vm5611_vm13 = vcmp.lt.s32.totalorder %v14275_v49, 2  ;;  %vm3109_vm10 = vcmp.lt.s32.totalorder %v14280_v40, 2  ;;  %vm3221_vm14 = vcmp.lt.s32.totalorder %v14303_v22, 0  ;;  %v3328_v41 = vmul.u32 %v3324_v10, %v14091_v34 }
 0x2e5   : > { %vm3107_vm3 = vweird.f32 %v17661_v8  ;;  %v3212_v23 = vadd.s32 %v14223_v17, %v14221_v7  ;;  %v3222_v12 = vsub.s32 0, %v14303_v22  ;;  %v3331_v37 = vshll.u32 %v14306_v63, 16 }
 0x2e6   : > { %v3345_v16 = vand.u32 65535, %v14284_v19  ;;  %v3098_v46 = vadd.f32 1.0, %v3097_v14  ;;  %v3105_v32 = vadd.f32 1.0, %v3104_v4  ;;  %v2962_v1 = vsel %vm2955_vm6, %v2958_v5, %v2961_v58 }
 0x2e7   : > { %v3336_v25 = vadd.s32 %v3334_v2, %v3328_v41  ;;  %v5464_v10 = vsel %vm2953_vm9, nan, %v5463_v60  ;;  %v3223_v26 = vsel %vm3221_vm14, %v3222_v12, %v14303_v22  ;;  %vm3337_vm7 = vc.u32 %v3335_v27, %v3331_v37 }
 0x2e8   : > { %v3351_v7 = vshll.u32 %v14321_v13, 16  ;;  %v3106_v17 = vmul.f32 %v3105_v32, %v14270_v59  ;;  %v3114_v20 = vxor.u32 2147483648, %v3098_v46  ;;  %v3224_v30 = vclz %v3223_v26 }
 0x2e9   : > { %v3338_v19 = vsel %vm3337_vm7, 1, %v17311_v24  ;;  %v2963_v35 = vsel %vm2953_vm9, nan, %v2962_v1  ;;  %v3330_v29 = vshrl.u32 %v14287_v45, 16  ;;  %v3347_v21 = vmul.u32 %v3345_v16, %v14081_v56 }
 0x2ea   : > { %v3349_v39 = vmul.u32 %v3345_v16, %v14091_v34  ;;  %v3111_v0 = vxor.u32 2147483648, %v3106_v17  ;;  %v10173_v18 = vadd.s32 4294967294, %v3224_v30  ;;  %v3340_v11 = vadd.s32 %v3338_v19, %v3336_v25 }
 0x2eb   : > { %v3350_v59 = vmul.u32 %v3346_v51, %v14091_v34  ;;  %v5617_v58 = vsel %vm5615_vm8, %v3114_v20, %v3106_v17  ;;  %v3115_v9 = vsel %vm3113_vm2, %v3114_v20, %v3106_v17  ;;  %vm3355_vm6 = vc.u32 %v3347_v21, %v3351_v7  ;;  %v14360_v34 = vpop.permute.xlu1 %826  ;;  %v14381_v20 = vpop.permute.xlu0 %824 }
 0x2ec   : > { %v3357_v33 = vadd.s32 %v3351_v7, %v3347_v21  ;;  %v5614_v56 = vsel %vm5612_vm5, %v3098_v46, %v3111_v0  ;;  %v3112_v45 = vsel %vm3110_vm15, %v3098_v46, %v3111_v0  ;;  %vm10174_vm9 = vcmp.lt.s32.totalorder %v10173_v18, 0  ;;  %v14386_v0 = vpop.permute.xlu2 %828 }
 0x2ed   : > { %v3356_v5 = vsel %vm3355_vm6, 1, %v17311_v24  ;;  %v5618_v51 = vsel %vm5611_vm13, %v5614_v56, %v5617_v58  ;;  %v3116_v60 = vsel %vm3109_vm10, %v3112_v45, %v3115_v9  ;;  %v3227_v2 = vsel %vm10174_vm9, 0, %v10173_v18 }
 0x2ee   : > { %v3353_v27 = vshll.u32 %v3349_v39, 16  ;;  %v5619_v14 = vsel %vm3107_vm3, nan, %v5618_v51  ;;  %v3117_v4 = vsel %vm3107_vm3, nan, %v3116_v60  ;;  %v3228_v41 = vsub.s32 32, %v3227_v2 }
 0x2ef   : > { %v3341_v12 = vadd.s32 %v3340_v11, %v3330_v29  ;;  %v5952_v37 = vpack.c.bf16 %v5619_v14, %v5464_v10  ;;  %v3448_v16 = vpack.c.bf16 %v3117_v4, %v2963_v35  ;;  %v3232_v46 = vsub.s32 4294967266, %v3227_v2 }
 0x2f0   : > { %v3358_v32 = vadd.s32 %v3356_v5, %v3350_v59  ;;  %v11098_v1 = vmov 64.0   ;;  %v3230_v49 = vshrl.u32 %v3212_v23, %v3228_v41  ;;  %v3309_v40 = vsel %vm3307_vm11, %v14153_v36, 2102212464 }
 0x2f1   : > { %10724 = vrcp.f32 %v11098_v1  ;;  %vm3359_vm0 = vc.u32 %v3357_v33, %v3353_v27  ;;  %6040 = vmatmul.bf16.gmra.mxu1 %v5952_v37  ;;  %6137 = vmatmul.bf16.gmra.mxu2 %v3448_v16  ;;  %v3229_v25 = vshll.u32 %v14303_v22, %v3227_v2  ;;  %v3233_v8 = vadd.s32 127, %v3232_v46 }
 0x2f2   : > { %v3332_v26 = vshrl.u32 %v14306_v63, 16  ;;  %v3360_v10 = vsel %vm3359_vm0, 1, %v17311_v24  ;;  %v3308_v7 = vsel %vm3304_vm12, %v14298_v42, %v14144_v53  ;;  %v3352_v23 = vshrl.u32 %v14321_v13, 16 }
 0x2f3   : > { %v3362_v17 = vadd.s32 %v3360_v10, %v3358_v32  ;;  %v3231_v36 = vor.u32 %v3230_v49, %v3229_v25  ;;  %v3234_v30 = vshll.u32 %v3233_v8, 23  ;;  %v3310_v22 = vsel %vm3306_vm4, %v14146_v52, %v3309_v40  ;;  %v14390_v13 = vpop.permute.xlu1 %820  ;;  %v14393_v45 = vpop.permute.xlu0 %818 }
 0x2f4   : > { %v3342_v19 = vadd.s32 %v3341_v12, %v3332_v26  ;;  %v3354_v63 = vshrl.u32 %v3349_v39, 16  ;;  %v3361_v29 = vadd.s32 %v3357_v33, %v3353_v27  ;;  %v3311_v53 = vsel %vm3305_vm1, %v3308_v7, %v3310_v22  ;;  %v14398_v2 = vpop.permute.xlu2 %840 }
 0x2f5   : > { %v3363_v35 = vadd.s32 %v3362_v17, %v3352_v23  ;;  %v3235_v24 = vor.u32 4788187, %v3234_v30  ;;  %v3238_v11 = vcvt.s32.f32 %v3231_v36  ;;  %v3365_v52 = vmul.u32 %v13873_v48, %v3311_v53 }
 0x2f6   : > { %vm3367_vm11 = vc.u32 %v3342_v19, %v3361_v29  ;;  %vm3120_vm12 = vcmp.lt.s32.totalorder %v17672_v55, 0  ;;  %v17673_v41 = vand.u32 2147483647, %v17672_v55  ;;  %v3366_v22 = vadd.s32 %v3361_v29, %v3342_v19 }
 0x2f7   : > { %v10725_v21 = vpop.eup %10724  ;;  %v3364_v42 = vadd.s32 %v3363_v35, %v3354_v63  ;;  %v3236_v18 = vand.u32 2147483647, %v3235_v24  ;;  %vm17677_vm5 = vcmask 523264  }
 0x2f8   : > { %v7359_v39 = vmul.f32 64.0, %v10725_v21  ;;  %vm14407_vm4 = vcmp.le.f32.partialorder %v17673_v41, 0.7853982  ;;  %vm7363_vm8 = vweird.f32 %v10725_v21  ;;  %v7355_v29 = vsel %vm17677_vm5, %v13679_v3, 0.0  ;;  %vm17678_vm15 = vmmov %vm17677_vm5 }
 0x2f9   : > { %v3368_v59 = vadd.s32 1, %v3364_v42  ;;  %v3239_v58 = vmul.f32 %v3238_v11, %v3236_v18  ;;  %v17676_v11 = vld [vmem:[#allocation56_spill] sm:$0xff]  ;;  %7356 = vadd.xlane.f32.xlu2 %v7355_v29  ;;  %vm17682_vm14 = vmmov %vm17677_vm5 }
 0x2fa   : > { %v7360_v51 = vsub.f32 1.0, %v7359_v39 }
 0x2fb   : > { %v3369_v9 = vsel %vm3367_vm11, %v3368_v59, %v3364_v42  ;;  %v3240_v33 = vxor.u32 2147483648, %v3239_v58  ;;  %v14402_v14 = vpop.xlane.xlu1 %7317  ;;  %v14420_v49 = vpop.permute.xlu0 %842 }
 0x2fc   : > { %v3370_v56 = vadd.s32 %v3369_v9, %v3365_v52  ;;  %v7361_v4 = vmul.f32 %v10725_v21, %v7360_v51  ;;  %v7312_v26 = vpop.xlane.xlu2 %7311  ;;  %v3242_v9 = vsub.s32 4, %v14290_v38 }
 0x2fd   : > { %v3241_v27 = vsel %vm3120_vm12, %v3240_v33, %v3239_v58 }
 0x2fe   : > { %v3371_v5 = vadd.s32 536870912, %v3370_v56  ;;  %v14414_v37 = vsel %vm14407_vm4, %v17672_v55, %v3241_v27  ;;  %v7362_v32 = vadd.f32 %v10725_v21, %v7361_v4 }
 0x2ff   : > { %v14418_v1 = vmul.f32 %v14414_v37, %v14414_v37 }
 0x300   : > { %v14396_v60 = vshrl.u32 %v3371_v5, 30  ;;  %v14422_v8 = vsel %vm7363_vm8, %v10725_v21, %v7362_v32  ;;  %v6011_v32 = vpop.f32.mrf.mxu1 }
 0x301   : > { %v3254_v10 = vmul.f32 -0.00019511016, %v14418_v1  ;;  %v7365_v17 = vmul.f32 %v14422_v8, %v7312_v26  ;;  %v3247_v24 = vmul.f32 -0.001358992, %v14418_v1 }
 0x302   : > { %v3373_v48 = vshll.u32 %v14396_v60, 30  ;;  %v3396_v19 = vsub.s32 4, %v14396_v60 }
 0x303   : > { %v14425_v23 = vpop.xlane.xlu1 %7332  ;;  %v3255_v30 = vadd.f32 0.008332121, %v3254_v10  ;;  %v7315_v18 = vpop.xlane.xlu0 %7314  ;;  %v14430_v59 = vsub.f32 %v17676_v11, %v7365_v17 }
 0x304   : > { %v3374_v16 = vsub.s32 %v3370_v56, %v3373_v48  ;;  %v3248_v56 = vadd.f32 0.041655596, %v3247_v24  ;;  %v7324_v51 = vpop.xlane.xlu2 %7323  ;;  %v14442_v48 = vld [vmem:[%s16957_s7] ss:$0 sm:$0xff] }
 0x305   : > { %v3256_v58 = vmul.f32 %v3255_v30, %v14418_v1  ;;  %v7397_v5 = vmul.f32 %v14430_v59, %v14430_v59  ;;  %v17680_v30 = vld [vmem:[#allocation96_spill] sm:$0xff] }
 0x306   : > { %vm3375_vm1 = vcmp.lt.s32.totalorder %v3374_v16, 0  ;;  %v3376_v46 = vsub.s32 0, %v3374_v16  ;;  %v3249_v17 = vmul.f32 %v3248_v56, %v14418_v1 }
 0x307   : > { %v3257_v4 = vadd.f32 -0.16666654, %v3256_v58  ;;  %v7413_v26 = vsel %vm17678_vm15, %v7397_v5, 0.0  ;;  %v7366_v58 = vmul.f32 %v14422_v8, %v7315_v18  ;;  %v17683_v5 = vld [vmem:[#allocation87_spill] sm:$0xff] }
 0x308   : > { %v3377_v40 = vsel %vm3375_vm1, %v3376_v46, %v3374_v16  ;;  %v7369_v46 = vmul.f32 %v14422_v8, %v7324_v51  ;;  %7414 = vadd.xlane.f32.xlu1 %v7413_v26  ;;  %v3250_v56 = vadd.f32 -0.4999988, %v3249_v17  ;;  %v10645_v26 = vld [vmem:[%s16958_s8 + $0x18] sm:$0xff] }
 0x309   : > { %v3378_v25 = vclz %v3377_v40  ;;  %v6108_v40 = vpop.f32.mrf.mxu2  ;;  %6561 = vmatpush.bf16.msrb.mxu3 %v10645_v26 }
 0x30a   : > { %v6109_v10 = vadd.f32 %v6108_v40, %v6011_v32 }
 0x30b   : > { %v10176_v7 = vadd.s32 4294967294, %v3378_v25  ;;  %v7336_v27 = vpop.xlane.xlu1 %7335  ;;  %v3243_v25 = vsel %vm3120_vm12, %v3242_v9, %v14290_v38  ;;  %vm17687_vm12 = vmmov %vm17677_vm5  ;;  %vm3261_vm5 = vweird.f32 %v17672_v55 }
 0x30c   : > { %v14459_v38 = vadd.f32 %v14442_v48, %v6109_v10  ;;  %v3245_v24 = vsel %vm14407_vm4, 0, %v3243_v25  ;;  %v17684_v10 = vld [vmem:[#allocation88_spill] sm:$0xff] }
 0x30d   : > { %vm10177_vm2 = vcmp.lt.s32.totalorder %v10176_v7, 0  ;;  %v5764_v18 = vadd.s32 3, %v3245_v24  ;;  %v14484_v40 = vand.u32 3, %v3245_v24  ;;  %v14490_v17 = vsub.f32 %v17684_v10, %v7366_v58 }
 0x30e   : > { %v3381_v36 = vsel %vm10177_vm2, 0, %v10176_v7  ;;  %v17679_v7 = vld [vmem:[#allocation146_spill] sm:$0xff]  ;;  %v10290_v9 = vmul.f32 -1.442695, %v14459_v38 }
 0x30f   : > { %v3382_v63 = vsub.s32 32, %v3381_v36  ;;  %v3386_v35 = vsub.s32 4294967266, %v3381_v36  ;;  %v3383_v53 = vshll.u32 %v3374_v16, %v3381_v36  ;;  %vm3274_vm13 = vcmp.lt.s32.totalorder %v17679_v7, 0 }
 0x310   : > { %10726 = vpow2.f32 %v10290_v9  ;;  %vm3264_vm3 = vcmp.eq.s32.totalorder %v14484_v40, 0  ;;  %vm3267_vm7 = vcmp.eq.s32.totalorder %v14484_v40, 2  ;;  %vm3263_vm11 = vcmp.lt.s32.totalorder %v14484_v40, 2 }
 0x311   : > { %v3384_v42 = vshrl.u32 %v3366_v22, %v3382_v63  ;;  %v3387_v21 = vadd.s32 127, %v3386_v35  ;;  %v14452_v22 = vsub.f32 %v17680_v30, %v7369_v46  ;;  %v3397_v63 = vsel %vm3274_vm13, %v3396_v19, %v14396_v60  ;;  %v7327_v60 = vpop.xlane.xlu0 %7326  ;;  %v6110_v46 = vpop.f32.mrf.mxu2 }
 0x312   : > { %v7373_v35 = vmul.f32 %v14422_v8, %v7336_v27  ;;  %v7370_v27 = vmul.f32 %v14422_v8, %v7327_v60 }
 0x313   : > { %v3385_v52 = vor.u32 %v3384_v42, %v3383_v53  ;;  %v3388_v39 = vshll.u32 %v3387_v21, 23  ;;  %v3258_v53 = vmul.f32 %v3257_v4, %v14418_v1  ;;  %v7401_v21 = vmul.f32 %v14452_v22, %v14452_v22 }
 0x314   : > { %v14479_v51 = vsub.f32 %v17683_v5, %v7373_v35  ;;  %v17689_v5 = vld [vmem:[#allocation147_spill] sm:$0xff] }
 0x315   : > { %v3389_v33 = vor.u32 4788187, %v3388_v39  ;;  %v3392_v16 = vcvt.s32.f32 %v3385_v52  ;;  %v7367_v52 = vmul.f32 %v14422_v8, %v14402_v14  ;;  %v17681_v39 = vand.u32 2147483647, %v17679_v7  ;;  %v7321_v14 = vpop.xlane.xlu2 %7320 }
 0x316   : > { %v7425_v19 = vsel %vm17682_vm14, %v7401_v21, 0.0  ;;  %v3259_v4 = vadd.f32 1.0, %v3258_v53  ;;  %v17685_v53 = vld [vmem:[#allocation116_spill] sm:$0xff]  ;;  %v14496_v21 = vand.u32 3, %v5764_v18  ;;  %v7405_v24 = vmul.f32 %v14479_v51, %v14479_v51 }
 0x317   : > { %v3390_v41 = vand.u32 2147483647, %v3389_v33  ;;  %vm3273_vm10 = vcmp.le.f32.partialorder %v17681_v39, 0.7853982  ;;  %7426 = vadd.xlane.f32.xlu2 %v7425_v19  ;;  %v17686_v39 = vld [vmem:[#allocation104_spill] sm:$0xff] }
 0x318   : > { %v3399_v33 = vsel %vm3273_vm10, 0, %v3397_v63  ;;  %v14504_v9 = vsub.f32 %v17686_v39, %v7370_v27  ;;  %v3260_v58 = vmul.f32 %v3259_v4, %v14414_v37  ;;  %vm5766_vm6 = vcmp.lt.s32.totalorder %v14496_v21, 2 }
 0x319   : > { %v3393_v36 = vmul.f32 %v3392_v16, %v3390_v41  ;;  %v6013_v16 = vpop.f32.mrf.mxu1  ;;  %v5919_v32 = vadd.s32 3, %v3399_v33  ;;  %vm5767_vm9 = vcmp.eq.s32.totalorder %v14496_v21, 0  ;;  %vm5770_vm0 = vcmp.eq.s32.totalorder %v14496_v21, 2 }
 0x31a   : > { %v6111_v25 = vadd.f32 %v6110_v46, %v6013_v16  ;;  %v7437_v37 = vsel %vm17687_vm12, %v7405_v24, 0.0  ;;  %v3265_v4 = vxor.u32 2147483648, %v3260_v58  ;;  %v7398_v24 = vmul.f32 %v14490_v17, %v14490_v17 }
 0x31b   : > { %v3394_v42 = vxor.u32 2147483648, %v3393_v36  ;;  %v14507_v19 = vand.u32 3, %v5919_v32 }
 0x31c   : > { %v14501_v60 = vadd.f32 %v14442_v48, %v6111_v25 }
 0x31d   : > { %v3395_v12 = vsel %vm3274_vm13, %v3394_v42, %v3393_v36  ;;  %v3251_v36 = vmul.f32 %v3250_v56, %v14418_v1  ;;  %v14494_v42 = vsub.f32 %v17685_v53, %v7367_v52  ;;  %v14510_v52 = vand.u32 3, %v3399_v33  ;;  %v7339_v33 = vpop.xlane.xlu2 %7338 }
 0x31e   : > { %v14476_v29 = vsel %vm3273_vm10, %v17679_v7, %v3395_v12  ;;  %v10727_v12 = vpop.eup %10726  ;;  %v10291_v18 = vmul.f32 -1.442695, %v14501_v60  ;;  %vm5921_vm8 = vcmp.lt.s32.totalorder %v14507_v19, 2  ;;  %vm5922_vm15 = vcmp.eq.s32.totalorder %v14507_v19, 0  ;;  %vm17690_vm10 = vmmov %vm17687_vm12 }
 0x31f   : > { %v3400_v41 = vmul.f32 %v14476_v29, %v14476_v29  ;;  %v3252_v16 = vadd.f32 1.0, %v3251_v36  ;;  %v14514_v27 = vadd.f32 1.0, %v10727_v12  ;;  %7438 = vadd.xlane.f32.xlu2 %v7437_v37  ;;  %vm3418_vm4 = vcmp.eq.s32.totalorder %v14510_v52, 0  ;;  %v10644_v12 = vld [vmem:[%s16958_s8 + $0x10] sm:$0xff]  ;;  %vm17691_vm14 = vmmov %vm17690_vm10 }
 0x320   : > { %10728 = vpow2.f32 %v10291_v18  ;;  %vm3421_vm1 = vcmp.eq.s32.totalorder %v14510_v52, 2  ;;  %vm3417_vm2 = vcmp.lt.s32.totalorder %v14510_v52, 2  ;;  %vm5925_vm13 = vcmp.eq.s32.totalorder %v14507_v19, 2  ;;  %6562 = vmatpush.bf16.msrb.mxu3 %v10644_v12 }
 0x321   : > { %v3401_v63 = vmul.f32 -0.001358992, %v3400_v41  ;;  %v3408_v35 = vmul.f32 -0.00019511016, %v3400_v41  ;;  %10730 = vrcp.f32 %v14514_v27  ;;  %v6016_v36 = vpop.f32.mrf.mxu1  ;;  %v3268_v18 = vxor.u32 2147483648, %v3252_v16 }
 0x322   : > { %v7416_v30 = vsel %vm17690_vm10, %v7398_v24, 0.0 }
 0x323   : > { %v3402_v1 = vadd.f32 0.041655596, %v3401_v63  ;;  %v3409_v56 = vadd.f32 0.008332121, %v3408_v35  ;;  %v6113_v63 = vpop.f32.mrf.mxu2  ;;  %v7368_v35 = vmul.f32 %v14422_v8, %v7321_v14  ;;  %v17688_v14 = vld [vmem:[#allocation106_spill] sm:$0xff] }
 0x325   : > { %v3403_v46 = vmul.f32 %v3402_v1, %v3400_v41  ;;  %v3410_v25 = vmul.f32 %v3409_v56, %v3400_v41  ;;  %v7374_v1 = vmul.f32 %v14422_v8, %v7339_v33  ;;  %v6114_v56 = vadd.f32 %v6113_v63, %v6016_v36 }
 0x326   : > { %v10729_v63 = vpop.eup %10728  ;;  %v14547_v39 = vsub.f32 %v17689_v5, %v7368_v35 }
 0x327   : > { %v3404_v32 = vadd.f32 -0.4999988, %v3403_v46  ;;  %v3411_v26 = vadd.f32 -0.16666654, %v3410_v25  ;;  %v14537_v37 = vsub.f32 %v17688_v14, %v7374_v1  ;;  %v14540_v33 = vadd.f32 %v14442_v48, %v6114_v56  ;;  %v14553_v12 = vpop.eup %10730  ;;  %7417 = vadd.xlane.f32.xlu2 %v7416_v30 }
 0x328   : > { %v5772_v14 = vsel %vm5770_vm0, %v3268_v18, %v3260_v58  ;;  %v6233_v35 = vmul.f32 %v14553_v12, %v14514_v27  ;;  %v7400_v21 = vmul.f32 %v14547_v39, %v14547_v39  ;;  %vm6237_vm0 = vweird.f32 %v14514_v27 }
 0x329   : > { %v3405_v46 = vmul.f32 %v3404_v32, %v3400_v41  ;;  %v3412_v25 = vmul.f32 %v3411_v26, %v3400_v41  ;;  %v5769_v41 = vsel %vm5767_vm9, %v3252_v16, %v3265_v4  ;;  %v3266_v26 = vsel %vm3264_vm3, %v3252_v16, %v3265_v4 }
 0x32a   : > { %v7406_v1 = vmul.f32 %v14537_v37, %v14537_v37  ;;  %v10292_v56 = vmul.f32 -1.442695, %v14540_v33  ;;  %v14558_v16 = vadd.f32 1.0, %v10729_v63  ;;  %v3269_v4 = vsel %vm3267_vm7, %v3268_v18, %v3260_v58  ;;  %vm17692_vm7 = vmmov %vm17690_vm10 }
 0x32b   : > { %v3406_v36 = vadd.f32 1.0, %v3405_v46  ;;  %v3413_v32 = vadd.f32 1.0, %v3412_v25  ;;  %v5773_v53 = vsel %vm5766_vm6, %v5769_v41, %v5772_v14  ;;  %v6115_v63 = vpop.f32.mrf.mxu2  ;;  %v6234_v18 = vsub.f32 1.0, %v6233_v35  ;;  %v10643_v35 = vld [vmem:[%s16958_s8 + $0x8] sm:$0xff]  ;;  %vm17693_vm6 = vmmov %vm17692_vm7 }
 0x32c   : > { %v7440_v24 = vsel %vm17691_vm14, %v7406_v1, 0.0  ;;  %10732 = vpow2.f32 %v10292_v56  ;;  %v7402_v1 = vmul.f32 %v14504_v9, %v14504_v9  ;;  %vm3415_vm3 = vweird.f32 %v17679_v7  ;;  %6563 = vmatpush.bf16.msrb.mxu3 %v10643_v35 }
 0x32d   : > { %v3414_v46 = vmul.f32 %v3413_v32, %v14476_v29  ;;  %v3422_v25 = vxor.u32 2147483648, %v3406_v36  ;;  %v3270_v29 = vsel %vm3263_vm11, %v3266_v26, %v3269_v4  ;;  %10734 = vrcp.f32 %v14558_v16  ;;  %7441 = vadd.xlane.f32.xlu0 %v7440_v24  ;;  %v6018_v32 = vpop.f32.mrf.mxu1 }
 0x32e   : > { %v6116_v41 = vadd.f32 %v6115_v63, %v6018_v32  ;;  %v6235_v4 = vmul.f32 %v14553_v12, %v6234_v18  ;;  %v7422_v52 = vsel %vm17692_vm7, %v7400_v21, 0.0  ;;  %v7428_v18 = vsel %vm17693_vm6, %v7402_v1, 0.0 }
 0x32f   : > { %v3419_v5 = vxor.u32 2147483648, %v3414_v46  ;;  %v5927_v58 = vsel %vm5925_vm13, %v3422_v25, %v3414_v46  ;;  %v3423_v30 = vsel %vm3421_vm1, %v3422_v25, %v3414_v46  ;;  %v3271_v46 = vsel %vm3261_vm5, nan, %v3270_v29  ;;  %7429 = vadd.xlane.f32.xlu2 %v7428_v18  ;;  %vm17699_vm13 = vmmov %vm17693_vm6 }
 0x330   : > { %v14597_v32 = vadd.f32 %v14442_v48, %v6116_v41  ;;  %v6236_v55 = vadd.f32 %v14553_v12, %v6235_v4  ;;  %vm6238_vm9 = vweird.f32 %v14553_v12  ;;  %v6243_v21 = vand.u32 2147483648, %v14514_v27 }
 0x331   : > { %v5924_v40 = vsel %vm5922_vm15, %v3406_v36, %v3419_v5  ;;  %v3420_v14 = vsel %vm3418_vm4, %v3406_v36, %v3419_v5  ;;  %v5774_v5 = vsel %vm3261_vm5, nan, %v5773_v53  ;;  %v7399_v41 = vmul.f32 %v14494_v42, %v14494_v42  ;;  %vm14616_vm11 = vmor %vm6237_vm0, %vm6238_vm9 }
 0x332   : > { %v5928_v26 = vsel %vm5921_vm8, %v5924_v40, %v5927_v58  ;;  %v3424_v56 = vsel %vm3417_vm2, %v3420_v14, %v3423_v30  ;;  %v10733_v25 = vpop.eup %10732  ;;  %v10293_v29 = vmul.f32 -1.442695, %v14597_v32  ;;  %v6241_v14 = vand.u32 2147483647, %v14514_v27  ;;  %v10642_v27 = vld [vmem:[%s16958_s8] sm:$0xff]  ;;  %vm17696_vm8 = vmmov %vm17693_vm6 }
 0x333   : > { %v5929_v36 = vsel %vm3415_vm3, nan, %v5928_v26  ;;  %v3425_v7 = vsel %vm3415_vm3, nan, %v3424_v56  ;;  %v10735_v63 = vpop.eup %10734  ;;  %v14599_v58 = vadd.f32 1.0, %v10733_v25  ;;  %v6118_v1 = vpop.f32.mrf.mxu2  ;;  %v7372_v26 = vmul.f32 %v14422_v8, %v14425_v23  ;;  %6564 = vmatpush.bf16.msrb.mxu3 %v10642_v27  ;;  %vm17698_vm15 = vmmov %vm17693_vm6 }
 0x334   : > { %v5953_v19 = vpack.c.bf16 %v5929_v36, %v5774_v5  ;;  %v3449_v24 = vpack.c.bf16 %v3425_v7, %v3271_v46  ;;  %v6248_v53 = vmul.f32 %v10735_v63, %v14558_v16  ;;  %v6258_v4 = vand.u32 2147483648, %v14558_v16  ;;  %v14621_v5 = vpop.permute.xlu0 %836 }
 0x335   : > { %10736 = vrcp.f32 %v14599_v58  ;;  %7423 = vadd.xlane.f32.xlu0 %v7422_v52  ;;  %v6021_v40 = vpop.f32.mrf.mxu1  ;;  %v6240_v36 = vsel %vm14616_vm11, %v14553_v12, %v6236_v55  ;;  %vm6253_vm12 = vweird.f32 %v10735_v63  ;;  %v6256_v46 = vand.u32 2147483647, %v14558_v16 }
 0x336   : > { %6045 = vmatmul.bf16.gmra.mxu1 %v5953_v19  ;;  %6142 = vmatmul.bf16.gmra.mxu2 %v3449_v24  ;;  %v6249_v30 = vsub.f32 1.0, %v6248_v53  ;;  %10738 = vpow2.f32 %v10293_v29  ;;  %v6119_v35 = vadd.f32 %v6118_v1, %v6021_v40  ;;  %v6244_v7 = vor.u32 1.1754944e-38, %v6243_v21  ;;  %v17697_v29 = vld [vmem:[#allocation148_spill] sm:$0xff] }
 0x337   : > { %vm6242_vm4 = vcmp.eq.f32.partialorder %v6241_v14, 8.507059e+37  ;;  %vm6252_vm1 = vweird.f32 %v14558_v16  ;;  %v7419_v24 = vsel %vm17696_vm8, %v7399_v41, 0.0  ;;  %v6259_v12 = vor.u32 1.1754944e-38, %v6258_v4 }
 0x338   : > { %v6250_v23 = vmul.f32 %v10735_v63, %v6249_v30  ;;  %v14631_v25 = vadd.f32 %v14442_v48, %v6119_v35  ;;  %v6245_v18 = vsel %vm6242_vm4, %v6244_v7, %v6240_v36  ;;  %vm6254_vm2 = vmor %vm6252_vm1, %vm6253_vm12  ;;  %v14639_v21 = vsub.f32 %v17697_v29, %v7372_v26  ;;  %7420 = vadd.xlane.f32.xlu2 %v7419_v24 }
 0x339   : > { %vm6257_vm5 = vcmp.eq.f32.partialorder %v6256_v46, 8.507059e+37  ;;  %v6472_v56 = vmul.f32 %v6245_v18, %v14459_v38  ;;  %vm6267_vm14 = vweird.f32 %v14599_v58  ;;  %vm17702_vm1 = vmmov %vm17693_vm6 }
 0x33a   : > { %v6251_v19 = vadd.f32 %v10735_v63, %v6250_v23  ;;  %v10294_v55 = vmul.f32 -1.442695, %v14631_v25  ;;  %v7404_v26 = vmul.f32 %v14639_v21, %v14639_v21 }
 0x33b   : > { %v14635_v52 = vpop.eup %10736  ;;  %v6120_v41 = vpop.f32.mrf.mxu2 }
 0x33c   : > { %v10739_v53 = vpop.eup %10738  ;;  %v6255_v40 = vsel %vm6254_vm2, %v10735_v63, %v6251_v19  ;;  %v6263_v1 = vmul.f32 %v14635_v52, %v14599_v58  ;;  %10740 = vpow2.f32 %v10294_v55  ;;  %v7330_v63 = vpop.xlane.xlu0 %7329  ;;  %v7434_v24 = vsel %vm17699_vm13, %v7404_v26, 0.0 }
 0x33d   : > { %v6260_v14 = vsel %vm6257_vm5, %v6259_v12, %v6255_v40  ;;  %v14643_v16 = vadd.f32 1.0, %v10739_v53  ;;  %v6023_v30 = vpop.f32.mrf.mxu1  ;;  %v7371_v23 = vmul.f32 %v14422_v8, %v7330_v63  ;;  %vm6268_vm10 = vweird.f32 %v14635_v52 }
 0x33e   : > { %v6473_v4 = vmul.f32 %v6260_v14, %v14501_v60  ;;  %v6264_v35 = vsub.f32 1.0, %v6263_v1  ;;  %v6121_v27 = vadd.f32 %v6120_v41, %v6023_v30  ;;  %v6273_v14 = vand.u32 2147483648, %v14599_v58  ;;  %vm14672_vm3 = vmor %vm6267_vm14, %vm6268_vm10 }
 0x33f   : > { %10742 = vrcp.f32 %v14643_v16  ;;  %v14661_v18 = vsub.f32 %v12247_v28, %v7371_v23  ;;  %v6271_v41 = vand.u32 2147483647, %v14599_v58  ;;  %v6288_v63 = vand.u32 2147483648, %v14643_v16 }
 0x340   : > { %v14651_v36 = vadd.f32 %v14442_v48, %v6121_v27  ;;  %v6496_v46 = vpack.c.bf16 %v6473_v4, %v6472_v56  ;;  %v6265_v7 = vmul.f32 %v14635_v52, %v6264_v35  ;;  %7435 = vadd.xlane.f32.xlu2 %v7434_v24  ;;  %v6286_v27 = vand.u32 2147483647, %v14643_v16 }
 0x341   : > { %v7403_v4 = vmul.f32 %v14661_v18, %v14661_v18  ;;  %vm6272_vm9 = vcmp.eq.f32.partialorder %v6271_v41, 8.507059e+37  ;;  %vm6282_vm0 = vweird.f32 %v14643_v16 }
 0x342   : > { %v10295_v38 = vmul.f32 -1.442695, %v14651_v36  ;;  %10322 = vmatmul.msk.bf16.vlgmr.msrb.gmra.mxu3 %vm17698_vm15, %v6496_v46  ;;  %v10741_v60 = vpop.eup %10740  ;;  %v6266_v40 = vadd.f32 %v14635_v52, %v6265_v7  ;;  %vm6287_vm12 = vcmp.eq.f32.partialorder %v6286_v27, 8.507059e+37 }
 0x343   : > { %v14657_v19 = vadd.f32 1.0, %v10741_v60  ;;  %v6123_v53 = vpop.f32.mrf.mxu2  ;;  %v7431_v7 = vsel %vm17693_vm6, %v7403_v4, 0.0 }
 0x344   : > { %10744 = vpow2.f32 %v10295_v38  ;;  %v6270_v58 = vsel %vm14672_vm3, %v14635_v52, %v6266_v40  ;;  %v6274_v38 = vor.u32 1.1754944e-38, %v6273_v14  ;;  %7432 = vadd.xlane.f32.xlu1 %v7431_v7  ;;  %vm17703_vm3 = vmmov %vm17702_vm1 }
 0x345   : > { %v10743_v12 = vpop.eup %10742  ;;  %v6026_v55 = vpop.f32.mrf.mxu1  ;;  %10746 = vrcp.f32 %v14657_v19  ;;  %v6303_v27 = vand.u32 2147483648, %v14657_v19  ;;  %vm6297_vm8 = vweird.f32 %v14657_v19 }
 0x346   : > { %v6278_v1 = vmul.f32 %v10743_v12, %v14643_v16  ;;  %v6124_v30 = vadd.f32 %v6123_v53, %v6026_v55  ;;  %vm6283_vm7 = vweird.f32 %v10743_v12 }
 0x347   : > { %vm6284_vm11 = vmor %vm6282_vm0, %vm6283_vm7 }
 0x348   : > { %v6279_v56 = vsub.f32 1.0, %v6278_v1  ;;  %v14679_v26 = vadd.f32 %v14442_v48, %v6124_v30  ;;  %v6275_v1 = vsel %vm6272_vm9, %v6274_v38, %v6270_v58  ;;  %v6289_v30 = vor.u32 1.1754944e-38, %v6288_v63 }
 0x349   : > { %v6474_v7 = vmul.f32 %v6275_v1, %v14540_v33 }
 0x34a   : > { %v10745_v23 = vpop.eup %10744  ;;  %v6280_v46 = vmul.f32 %v10743_v12, %v6279_v56  ;;  %v10296_v24 = vmul.f32 -1.442695, %v14679_v26 }
 0x34b   : > { %v6221_v60 = vadd.f32 1.0, %v10745_v23  ;;  %v10747_v55 = vpop.eup %10746  ;;  %v6125_v40 = vpop.f32.mrf.mxu2 }
 0x34c   : > { %v6281_v53 = vadd.f32 %v10743_v12, %v6280_v46  ;;  %v6293_v35 = vmul.f32 %v10747_v55, %v14657_v19  ;;  %vm6298_vm4 = vweird.f32 %v10747_v55 }
 0x34d   : > { %10748 = vrcp.f32 %v6221_v60  ;;  %v6028_v52 = vpop.f32.mrf.mxu1  ;;  %vm6299_vm2 = vmor %vm6297_vm8, %vm6298_vm4  ;;  %vm6312_vm13 = vweird.f32 %v6221_v60 }
 0x34e   : > { %v6285_v56 = vsel %vm6284_vm11, %v10743_v12, %v6281_v53  ;;  %10750 = vpow2.f32 %v10296_v24  ;;  %v6294_v4 = vsub.f32 1.0, %v6293_v35  ;;  %v6126_v23 = vadd.f32 %v6125_v40, %v6028_v52  ;;  %vm17704_vm8 = vmmov %vm17703_vm3 }
 0x34f   : > { %v6290_v14 = vsel %vm6287_vm12, %v6289_v30, %v6285_v56  ;;  %v6301_v53 = vand.u32 2147483647, %v14657_v19  ;;  %v6316_v30 = vand.u32 2147483647, %v6221_v60  ;;  %v6318_v35 = vand.u32 2147483648, %v6221_v60 }
 0x350   : > { %v6475_v41 = vmul.f32 %v6290_v14, %v14597_v32  ;;  %v6295_v46 = vmul.f32 %v10747_v55, %v6294_v4  ;;  %v14691_v16 = vadd.f32 %v14442_v48, %v6126_v23  ;;  %v6304_v14 = vor.u32 1.1754944e-38, %v6303_v27 }
 0x351   : > { %vm6302_vm15 = vcmp.eq.f32.partialorder %v6301_v53, 8.507059e+37  ;;  %vm6317_vm14 = vcmp.eq.f32.partialorder %v6316_v30, 8.507059e+37 }
 0x352   : > { %v6497_v63 = vpack.c.bf16 %v6475_v41, %v6474_v7  ;;  %v10297_v38 = vmul.f32 -1.442695, %v14691_v16  ;;  %v6296_v28 = vadd.f32 %v10747_v55, %v6295_v46  ;;  %v6319_v7 = vor.u32 1.1754944e-38, %v6318_v35 }
 0x353   : > { %v10749_v58 = vpop.eup %10748  ;;  %v6128_v32 = vpop.f32.mrf.mxu2 }
 0x354   : > { %v10751_v29 = vpop.eup %10750  ;;  %v6308_v12 = vmul.f32 %v10749_v58, %v6221_v60  ;;  %10323 = vmatmul.msk.bf16.gmra.mxu3 %vm17702_vm1, %v6497_v63  ;;  %10752 = vpow2.f32 %v10297_v38  ;;  %v6300_v52 = vsel %vm6299_vm2, %v10747_v55, %v6296_v28  ;;  %vm6313_vm5 = vweird.f32 %v10749_v58 }
 0x355   : > { %v6222_v24 = vadd.f32 1.0, %v10751_v29  ;;  %v6031_v33 = vpop.f32.mrf.mxu1  ;;  %v6305_v23 = vsel %vm6302_vm15, %v6304_v14, %v6300_v52  ;;  %vm6314_vm10 = vmor %vm6312_vm13, %vm6313_vm5 }
 0x356   : > { %v6309_v1 = vsub.f32 1.0, %v6308_v12  ;;  %v6129_v56 = vadd.f32 %v6128_v32, %v6031_v33  ;;  %v6476_v55 = vmul.f32 %v6305_v23, %v14631_v25 }
 0x357   : > { %10754 = vrcp.f32 %v6222_v24  ;;  %vm6327_vm6 = vweird.f32 %v6222_v24 }
 0x358   : > { %v6310_v40 = vmul.f32 %v10749_v58, %v6309_v1  ;;  %v14699_v46 = vadd.f32 %v14442_v48, %v6129_v56  ;;  %v6331_v56 = vand.u32 2147483647, %v6222_v24 }
 0x35a   : > { %v6311_v4 = vadd.f32 %v10749_v58, %v6310_v40  ;;  %v10753_v29 = vpop.eup %10752  ;;  %v10298_v53 = vmul.f32 -1.442695, %v14699_v46  ;;  %v6333_v40 = vand.u32 2147483648, %v6222_v24  ;;  %vm6332_vm11 = vcmp.eq.f32.partialorder %v6331_v56, 8.507059e+37 }
 0x35b   : > { %v6223_v19 = vadd.f32 1.0, %v10753_v29  ;;  %v6130_v28 = vpop.f32.mrf.mxu2 }
 0x35c   : > { %v6315_v41 = vsel %vm6314_vm10, %v10749_v58, %v6311_v4 }
 0x35d   : > { %v10755_v63 = vpop.eup %10754  ;;  %v6320_v38 = vsel %vm6317_vm14, %v6319_v7, %v6315_v41  ;;  %10756 = vrcp.f32 %v6223_v19  ;;  %v6033_v60 = vpop.f32.mrf.mxu1  ;;  %v6348_v4 = vand.u32 2147483648, %v6223_v19  ;;  %v6346_v7 = vand.u32 2147483647, %v6223_v19 }
 0x35e   : > { %v6477_v12 = vmul.f32 %v6320_v38, %v14651_v36  ;;  %v6323_v27 = vmul.f32 %v10755_v63, %v6222_v24  ;;  %v6131_v33 = vadd.f32 %v6130_v28, %v6033_v60  ;;  %10758 = vpow2.f32 %v10298_v53 }
 0x35f   : > { %vm6328_vm7 = vweird.f32 %v10755_v63  ;;  %v6334_v38 = vor.u32 1.1754944e-38, %v6333_v40  ;;  %vm6342_vm12 = vweird.f32 %v6223_v19  ;;  %vm6347_vm1 = vcmp.eq.f32.partialorder %v6346_v7, 8.507059e+37 }
 0x360   : > { %v6324_v32 = vsub.f32 1.0, %v6323_v27  ;;  %v6498_v58 = vpack.c.bf16 %v6477_v12, %v6476_v55  ;;  %v14705_v1 = vadd.f32 %v14442_v48, %v6131_v33  ;;  %vm6329_vm9 = vmor %vm6327_vm6, %vm6328_vm7  ;;  %v6349_v27 = vor.u32 1.1754944e-38, %v6348_v4 }
 0x361   : > { %vm17705_vm6 = vmmov %vm17704_vm8 }
 0x362   : > { %v6325_v30 = vmul.f32 %v10755_v63, %v6324_v32  ;;  %v10299_v35 = vmul.f32 -1.442695, %v14705_v1 }
 0x363   : > { %v10757_v52 = vpop.eup %10756 }
 0x364   : > { %10324 = vmatmul.msk.bf16.gmra.mxu3 %vm17703_vm3, %v6498_v58  ;;  %v6326_v25 = vadd.f32 %v10755_v63, %v6325_v30  ;;  %v6338_v36 = vmul.f32 %v10757_v52, %v6223_v19  ;;  %10760 = vpow2.f32 %v10299_v35  ;;  %vm6343_vm0 = vweird.f32 %v10757_v52  ;;  %v10759_v41 = vpop.eup %10758  ;;  %v6133_v58 = vpop.f32.mrf.mxu2 }
 0x365   : > { %vm6344_vm4 = vmor %vm6342_vm12, %vm6343_vm0  ;;  %v6224_v33 = vadd.f32 1.0, %v10759_v41  ;;  %v6036_v35 = vpop.f32.mrf.mxu1 }
 0x366   : > { %v6339_v14 = vsub.f32 1.0, %v6338_v36  ;;  %v6330_v29 = vsel %vm6329_vm9, %v10755_v63, %v6326_v25  ;;  %v6134_v41 = vadd.f32 %v6133_v58, %v6036_v35 }
 0x367   : > { %v6335_v12 = vsel %vm6332_vm11, %v6334_v38, %v6330_v29  ;;  %vm6357_vm10 = vweird.f32 %v6224_v33 }
 0x368   : > { %v6340_v23 = vmul.f32 %v10757_v52, %v6339_v14  ;;  %v6478_v53 = vmul.f32 %v6335_v12, %v14679_v26  ;;  %v6363_v12 = vand.u32 2147483648, %v6224_v33  ;;  %v14716_v58 = vadd.f32 %v14442_v48, %v6134_v41 }
 0x36a   : > { %v6341_v28 = vadd.f32 %v10757_v52, %v6340_v23  ;;  %v10761_v55 = vpop.eup %10760  ;;  %v6364_v35 = vor.u32 1.1754944e-38, %v6363_v12 }
 0x36b   : > { %v6225_v24 = vadd.f32 1.0, %v10761_v55 }
 0x36c   : > { %v6345_v60 = vsel %vm6344_vm4, %v10757_v52, %v6341_v28  ;;  %v6135_v52 = vpop.f32.mrf.mxu2 }
 0x36d   : > { %v6350_v32 = vsel %vm6347_vm1, %v6349_v27, %v6345_v60  ;;  %10762 = vrcp.f32 %v6225_v24  ;;  %v6038_v14 = vpop.f32.mrf.mxu1  ;;  %v6378_v7 = vand.u32 2147483648, %v6225_v24  ;;  %vm6372_vm15 = vweird.f32 %v6225_v24 }
 0x36e   : > { %v6479_v63 = vmul.f32 %v6350_v32, %v14691_v16  ;;  %10764 = vrcp.f32 %v6224_v33  ;;  %v6136_v16 = vadd.f32 %v6135_v52, %v6038_v14  ;;  %v6376_v55 = vand.u32 2147483647, %v6225_v24 }
 0x36f   : > { %v6361_v60 = vand.u32 2147483647, %v6224_v33 }
 0x370   : > { %v6499_v30 = vpack.c.bf16 %v6479_v63, %v6478_v53  ;;  %v14713_v53 = vadd.f32 %v14442_v48, %v6136_v16  ;;  %v6379_v63 = vor.u32 1.1754944e-38, %v6378_v7  ;;  %vm6377_vm3 = vcmp.eq.f32.partialorder %v6376_v55, 8.507059e+37 }
 0x371   : > { %vm6362_vm7 = vcmp.eq.f32.partialorder %v6361_v60, 8.507059e+37 }
 0x373   : > { %v10763_v19 = vpop.eup %10762 }
 0x374   : > { %10325 = vmatmul.msk.bf16.gmra.mxu3 %vm17704_vm8, %v6499_v30  ;;  %v10765_v25 = vpop.eup %10764  ;;  %v6368_v36 = vmul.f32 %v10763_v19, %v6225_v24  ;;  %vm6373_vm2 = vweird.f32 %v10763_v19  ;;  %v6138_v38 = vpop.f32.mrf.mxu2  ;;  %v10301_v24 = vmul.f32 -1.442695, %v14713_v53 }
 0x375   : > { %v6353_v40 = vmul.f32 %v10765_v25, %v6224_v33  ;;  %vm6358_vm5 = vweird.f32 %v10765_v25  ;;  %vm6374_vm13 = vmor %vm6372_vm15, %vm6373_vm2  ;;  %v6041_v27 = vpop.f32.mrf.mxu1  ;;  %v10300_v33 = vmul.f32 -1.442695, %v14716_v58 }
 0x376   : > { %v6369_v56 = vsub.f32 1.0, %v6368_v36  ;;  %vm6359_vm14 = vmor %vm6357_vm10, %vm6358_vm5  ;;  %10766 = vpow2.f32 %v10301_v24 }
 0x377   : > { %v6354_v4 = vsub.f32 1.0, %v6353_v40  ;;  %10768 = vpow2.f32 %v10300_v33  ;;  %vm17706_vm10 = vmmov %vm17705_vm6 }
 0x378   : > { %v6370_v29 = vmul.f32 %v10763_v19, %v6369_v56 }
 0x379   : > { %v6355_v23 = vmul.f32 %v10765_v25, %v6354_v4 }
 0x37a   : > { %v6371_v26 = vadd.f32 %v10763_v19, %v6370_v29  ;;  %v6139_v29 = vadd.f32 %v6138_v38, %v6041_v27 }
 0x37b   : > { %v6356_v28 = vadd.f32 %v10765_v25, %v6355_v23 }
 0x37c   : > { %v6375_v32 = vsel %vm6374_vm13, %v10763_v19, %v6371_v26  ;;  %v6140_v19 = vpop.f32.mrf.mxu2  ;;  %v10767_v23 = vpop.eup %10766 }
 0x37d   : > { %v6360_v30 = vsel %vm6359_vm14, %v10765_v25, %v6356_v28  ;;  %v6380_v36 = vsel %vm6377_vm3, %v6379_v63, %v6375_v32  ;;  %v6043_v14 = vpop.f32.mrf.mxu1  ;;  %v10769_v16 = vpop.eup %10768  ;;  %v6227_v7 = vadd.f32 1.0, %v10767_v23 }
 0x37e   : > { %v6365_v40 = vsel %vm6362_vm7, %v6364_v35, %v6360_v30  ;;  %v6481_v52 = vmul.f32 %v6380_v36, %v14705_v1  ;;  %v6141_v25 = vadd.f32 %v6140_v19, %v6043_v14  ;;  %v14727_v1 = vadd.f32 %v14442_v48, %v6139_v29 }
 0x37f   : > { %v6480_v56 = vmul.f32 %v6365_v40, %v14699_v46  ;;  %v6226_v46 = vadd.f32 1.0, %v10769_v16  ;;  %10770 = vrcp.f32 %v6227_v7  ;;  %vm6402_vm11 = vweird.f32 %v6227_v7 }
 0x380   : > { %v14724_v26 = vadd.f32 %v14442_v48, %v6141_v25  ;;  %v10302_v28 = vmul.f32 -1.442695, %v14727_v1  ;;  %v6406_v25 = vand.u32 2147483647, %v6227_v7 }
 0x381   : > { %v6500_v4 = vpack.c.bf16 %v6481_v52, %v6480_v56  ;;  %v6408_v56 = vand.u32 2147483648, %v6227_v7  ;;  %v6393_v29 = vand.u32 2147483648, %v6226_v46  ;;  %vm6387_vm4 = vweird.f32 %v6226_v46 }
 0x382   : > { %v10303_v41 = vmul.f32 -1.442695, %v14724_v26  ;;  %v6391_v16 = vand.u32 2147483647, %v6226_v46  ;;  %vm6407_vm8 = vcmp.eq.f32.partialorder %v6406_v25, 8.507059e+37 }
 0x384   : > { %10326 = vmatmul.msk.bf16.gmra.mxu3 %vm17705_vm6, %v6500_v4  ;;  %10772 = vpow2.f32 %v10303_v41  ;;  %vm6392_vm2 = vcmp.eq.f32.partialorder %v6391_v16, 8.507059e+37 }
 0x385   : > { %10774 = vrcp.f32 %v6226_v46  ;;  %v10771_v38 = vpop.eup %10770 }
 0x386   : > { %10776 = vpow2.f32 %v10302_v28  ;;  %v6398_v60 = vmul.f32 %v10771_v38, %v6227_v7  ;;  %vm6403_vm9 = vweird.f32 %v10771_v38  ;;  %v6394_v7 = vor.u32 1.1754944e-38, %v6393_v29 }
 0x387   : > { %vm6404_vm12 = vmor %vm6402_vm11, %vm6403_vm9 }
 0x388   : > { %v6399_v35 = vsub.f32 1.0, %v6398_v60 }
 0x38a   : > { %v10773_v55 = vpop.eup %10772  ;;  %v6400_v24 = vmul.f32 %v10771_v38, %v6399_v35 }
 0x38b   : > { %v10775_v12 = vpop.eup %10774  ;;  %v14731_v32 = vadd.f32 1.0, %v10773_v55  ;;  %v6409_v55 = vor.u32 1.1754944e-38, %v6408_v56 }
 0x38c   : > { %v10777_v27 = vpop.eup %10776  ;;  %v6383_v63 = vmul.f32 %v10775_v12, %v6226_v46  ;;  %v6401_v33 = vadd.f32 %v10771_v38, %v6400_v24  ;;  %vm6388_vm0 = vweird.f32 %v10775_v12 }
 0x38d   : > { %v14733_v30 = vadd.f32 1.0, %v10777_v27  ;;  %10778 = vrcp.f32 %v14731_v32  ;;  %vm6389_vm1 = vmor %vm6387_vm4, %vm6388_vm0  ;;  %vm6432_vm13 = vweird.f32 %v14731_v32 }
 0x38e   : > { %v6384_v36 = vsub.f32 1.0, %v6383_v63  ;;  %v6405_v41 = vsel %vm6404_vm12, %v10771_v38, %v6401_v33  ;;  %vm17707_vm0 = vmmov %vm17706_vm10 }
 0x38f   : > { %10780 = vrcp.f32 %v14733_v30  ;;  %vm6417_vm3 = vweird.f32 %v14733_v30 }
 0x390   : > { %v6385_v40 = vmul.f32 %v10775_v12, %v6384_v36  ;;  %v6410_v36 = vsel %vm6407_vm8, %v6409_v55, %v6405_v41  ;;  %v6423_v41 = vand.u32 2147483648, %v14733_v30  ;;  %v6421_v55 = vand.u32 2147483647, %v14733_v30 }
 0x391   : > { %v6483_v46 = vmul.f32 %v6410_v36, %v14713_v53  ;;  %v6438_v53 = vand.u32 2147483648, %v14731_v32 }
 0x392   : > { %v6386_v14 = vadd.f32 %v10775_v12, %v6385_v40  ;;  %vm6422_vm9 = vcmp.eq.f32.partialorder %v6421_v55, 8.507059e+37 }
 0x393   : > { %v14737_v52 = vpop.eup %10778 }
 0x394   : > { %v6428_v4 = vmul.f32 %v14737_v52, %v14731_v32  ;;  %v6390_v60 = vsel %vm6389_vm1, %v10775_v12, %v6386_v14  ;;  %vm6433_vm5 = vweird.f32 %v14737_v52 }
 0x395   : > { %v14739_v19 = vpop.eup %10780  ;;  %v6395_v10 = vsel %vm6392_vm2, %v6394_v7, %v6390_v60  ;;  %vm6434_vm14 = vmor %vm6432_vm13, %vm6433_vm5 }
 0x396   : > { %v6413_v28 = vmul.f32 %v14739_v19, %v14733_v30  ;;  %v6429_v63 = vsub.f32 1.0, %v6428_v4  ;;  %v6482_v56 = vmul.f32 %v6395_v10, %v14716_v58  ;;  %vm6418_vm15 = vweird.f32 %v14739_v19  ;;  %vm17710_vm13 = vmmov %vm17707_vm0 }
 0x397   : > { %v6436_v10 = vand.u32 2147483647, %v14731_v32  ;;  %vm6419_vm7 = vmor %vm6417_vm3, %vm6418_vm15 }
 0x398   : > { %v6414_v24 = vsub.f32 1.0, %v6413_v28  ;;  %v6430_v38 = vmul.f32 %v14737_v52, %v6429_v63  ;;  %v6439_v63 = vor.u32 1.1754944e-38, %v6438_v53 }
 0x399   : > { %vm6437_vm6 = vcmp.eq.f32.partialorder %v6436_v10, 8.507059e+37 }
 0x39a   : > { %v6415_v12 = vmul.f32 %v14739_v19, %v6414_v24  ;;  %v6431_v4 = vadd.f32 %v14737_v52, %v6430_v38 }
 0x39c   : > { %v6416_v16 = vadd.f32 %v14739_v19, %v6415_v12 }
 0x3b3   : > { %v6046_v23 = vpop.f32.mrf.mxu1 }
 0x3b9   : > { %v6143_v27 = vpop.f32.mrf.mxu2 }
 0x3ba   : > { %v6144_v35 = vadd.f32 %v6143_v27, %v6046_v23  ;;  %v6501_v23 = vpack.c.bf16 %v6483_v46, %v6482_v56  ;;  %v6435_v27 = vsel %vm6434_vm14, %v14737_v52, %v6431_v4 }
 0x3bb   : > { %v6048_v14 = vpop.f32.mrf.mxu1  ;;  %v6440_v7 = vsel %vm6437_vm6, %v6439_v63, %v6435_v27 }
 0x3bc   : > { %v14746_v40 = vadd.f32 %v14442_v48, %v6144_v35  ;;  %10327 = vmatmul.msk.bf16.gmra.mxu3 %vm17706_vm10, %v6501_v23  ;;  %v6424_v35 = vor.u32 1.1754944e-38, %v6423_v41  ;;  %v6485_v24 = vmul.f32 %v6440_v7, %v14724_v26 }
 0x3be   : > { %v10304_v33 = vmul.f32 -1.442695, %v14746_v40 }
 0x3c0   : > { %10782 = vpow2.f32 %v10304_v33 }
 0x3c1   : > { %v6145_v25 = vpop.f32.mrf.mxu2 }
 0x3c2   : > { %v6146_v29 = vadd.f32 %v6145_v25, %v6048_v14  ;;  %v14776_v25 = vld [vmem:[%s16959_s9] ss:$0 sm:$0xff] }
 0x3c4   : > { %v14761_v58 = vadd.f32 %v14442_v48, %v6146_v29  ;;  %v6420_v48 = vsel %vm6419_vm7, %v14739_v19, %v6416_v16 }
 0x3c5   : > { %v6425_v36 = vsel %vm6422_vm9, %v6424_v35, %v6420_v48  ;;  %v6566_v12 = vpop.f32.mrf.mxu3 }
 0x3c6   : > { %v10783_v28 = vpop.eup %10782  ;;  %v10305_v60 = vmul.f32 -1.442695, %v14761_v58  ;;  %v6484_v30 = vmul.f32 %v6425_v36, %v14727_v1  ;;  %v6567_v1 = vadd.f32 %v14776_v25, %v6566_v12 }
 0x3c7   : > { %v6230_v32 = vadd.f32 1.0, %v10783_v28 }
 0x3c8   : > { %10784 = vpow2.f32 %v10305_v60  ;;  %v6502_v56 = vpack.c.bf16 %v6485_v24, %v6484_v30  ;;  %v14786_v63 = vadd.f32 %v6567_v1, %v14200_v31  ;;  %v10660_v31 = vld [vmem:[%s16966_s16 + $0x6c] sm:$0xf0] }
 0x3c9   : > { %10786 = vrcp.f32 %v6230_v32  ;;  %vm6447_vm12 = vweird.f32 %v6230_v32  ;;  %v6453_v23 = vand.u32 2147483648, %v6230_v32  ;;  %v6451_v16 = vand.u32 2147483647, %v6230_v32 }
 0x3cb   : > { %v6454_v35 = vor.u32 1.1754944e-38, %v6453_v23  ;;  %vm6452_vm8 = vcmp.eq.f32.partialorder %v6451_v16, 8.507059e+37 }
 0x3cc   : > { %10328 = vmatmul.msk.bf16.gmra.mxu3 %vm17707_vm0, %v6502_v56 }
 0x3cd   : > { %v6568_v41 = vpop.f32.mrf.mxu3 }
 0x3ce   : > { %v10785_v46 = vpop.eup %10784  ;;  %v6569_v48 = vadd.f32 %v14776_v25, %v6568_v41 }
 0x3cf   : > { %v10787_v52 = vpop.eup %10786  ;;  %v6231_v38 = vadd.f32 1.0, %v10785_v46  ;;  %v10396_v46 = vld [vmem:[%s16966_s16 + $0x60] sm:$0xf] }
 0x3d0   : > { %v6443_v33 = vmul.f32 %v10787_v52, %v6230_v32  ;;  %vm6448_vm11 = vweird.f32 %v10787_v52  ;;  %v10330_v32 = vmul.f32 -1.442695, %v14786_v63 }
 0x3d1   : > { %10788 = vrcp.f32 %v6231_v38  ;;  %vm14779_vm4 = vmor %vm6447_vm12, %vm6448_vm11  ;;  %v6466_v55 = vand.u32 2147483647, %v6231_v38  ;;  %v6468_v27 = vand.u32 2147483648, %v6231_v38  ;;  %vm6462_vm2 = vweird.f32 %v6231_v38 }
 0x3d2   : > { %v6444_v14 = vsub.f32 1.0, %v6443_v33  ;;  %10790 = vpow2.f32 %v10330_v32  ;;  %v10661_v32 = vld [vmem:[%s16966_s16 + $0x74] sm:$0xf0] }
 0x3d3   : > { %v6469_v24 = vor.u32 1.1754944e-38, %v6468_v27  ;;  %vm6467_vm15 = vcmp.eq.f32.partialorder %v6466_v55, 8.507059e+37  ;;  %v10652_v55 = vld [vmem:[%s16966_s16 + $0x2c] sm:$0xf0]  ;;  %v10658_v27 = vld [vmem:[%s16966_s16 + $0x64] sm:$0xf] }
 0x3d4   : > { %v6445_v19 = vmul.f32 %v10787_v52, %v6444_v14  ;;  %v10397_v14 = vor.u32 %v10660_v31, %v10396_v46  ;;  %v10406_v31 = vld [vmem:[%s16966_s16 + $0x78] sm:$0xf0] }
 0x3d6   : > { %v6446_v26 = vadd.f32 %v10787_v52, %v6445_v19  ;;  %7084 = vmatpush.bf16.msrb.mxu0 %v10397_v14 }
 0x3d7   : > { %v10789_v4 = vpop.eup %10788  ;;  %v6571_v19 = vpop.f32.mrf.mxu3 }
 0x3d8   : > { %v6458_v29 = vmul.f32 %v10789_v4, %v6231_v38  ;;  %v6450_v28 = vsel %vm14779_vm4, %v10787_v52, %v6446_v26  ;;  %vm6463_vm1 = vweird.f32 %v10789_v4  ;;  %v14797_v52 = vadd.f32 %v6569_v48, %v14261_v61  ;;  %v10656_v61 = vld [vmem:[%s16966_s16 + $0x4c] sm:$0xf0]  ;;  %v10791_v1 = vpop.eup %10790  ;;  %vm17719_vm4 = vmmov %vm17710_vm13 }
 0x3d9   : > { %v6455_v36 = vsel %vm6452_vm8, %v6454_v35, %v6450_v28  ;;  %vm6464_vm5 = vmor %vm6462_vm2, %vm6463_vm1  ;;  %v6572_v26 = vadd.f32 %v14776_v25, %v6571_v19  ;;  %v6670_v23 = vadd.f32 1.0, %v10791_v1  ;;  %v10398_v35 = vld [vmem:[%s16966_s16 + $0x70] sm:$0xf0] }
 0x3da   : > { %v6459_v10 = vsub.f32 1.0, %v6458_v29  ;;  %v6486_v33 = vmul.f32 %v6455_v36, %v14746_v40  ;;  %v10331_v12 = vmul.f32 -1.442695, %v14797_v52 }
 0x3db   : > { %v14810_v40 = vadd.f32 %v6572_v26, %v14393_v45  ;;  %v10364_v45 = vld [vmem:[%s16966_s16 + $0x20] sm:$0xf]  ;;  %v6697_v14 = vand.u32 2147483648, %v6670_v23  ;;  %vm6691_vm14 = vweird.f32 %v6670_v23 }
 0x3dc   : > { %v6460_v60 = vmul.f32 %v10789_v4, %v6459_v10  ;;  %10792 = vpow2.f32 %v10331_v12  ;;  %v10365_v48 = vor.u32 %v10652_v55, %v10364_v45  ;;  %v6695_v12 = vand.u32 2147483647, %v6670_v23  ;;  %v10653_v45 = vld [vmem:[%s16966_s16 + $0x34] sm:$0xf0] }
 0x3dd   : > { %v10332_v53 = vmul.f32 -1.442695, %v14810_v40  ;;  %10794 = vrcp.f32 %v6670_v23 }
 0x3de   : > { %v6461_v7 = vadd.f32 %v10789_v4, %v6460_v60  ;;  %vm14851_vm3 = vcmp.eq.f32.partialorder %v6695_v12, 8.507059e+37 }
 0x3df   : > { %10796 = vpow2.f32 %v10332_v53  ;;  %v6573_v10 = vpop.f32.mrf.mxu3  ;;  %v10366_v53 = vld [vmem:[%s16966_s16 + $0x30] sm:$0xf0] }
 0x3e0   : > { %v6465_v30 = vsel %vm6464_vm5, %v10789_v4, %v6461_v7  ;;  %v10380_v4 = vld [vmem:[%s16966_s16 + $0x40] sm:$0xf]  ;;  %v6574_v28 = vadd.f32 %v14776_v25, %v6573_v10  ;;  %v10404_v7 = vld [vmem:[%s16966_s16 + $0x68] sm:$0xf]  ;;  %vm17722_vm5 = vmmov %vm17719_vm4 }
 0x3e1   : > { %v6470_v38 = vsel %vm6467_vm15, %v6469_v24, %v6465_v30  ;;  %v10401_v24 = vor.u32 %v10658_v27, %v10398_v35  ;;  %v10405_v46 = vor.u32 %v10661_v32, %v10404_v7  ;;  %v10382_v35 = vld [vmem:[%s16966_s16 + $0x50] sm:$0xf0]  ;;  %v10388_v32 = vld [vmem:[%s16966_s16 + $0x48] sm:$0xf]  ;;  %vm17723_vm15 = vmmov %vm17719_vm4 }
 0x3e2   : > { %v6487_v56 = vmul.f32 %v6470_v38, %v14761_v58  ;;  %v10381_v58 = vor.u32 %v10656_v61, %v10380_v4  ;;  %v10793_v16 = vpop.eup %10792  ;;  %v14828_v60 = vadd.f32 %v6574_v28, %v14390_v13  ;;  %v10659_v13 = vld [vmem:[%s16966_s16 + $0x6c] sm:$0xf] }
 0x3e3   : > { %v14814_v41 = vadd.f32 1.0, %v10793_v16  ;;  %v10795_v36 = vpop.eup %10794  ;;  %7133 = vmatpush.bf16.msra.mxu3 %v10401_v24  ;;  %7182 = vmatpush.bf16.msra.mxu1 %v10405_v46  ;;  %v6698_v16 = vor.u32 1.1754944e-38, %v6697_v14  ;;  %v10657_v24 = vld [vmem:[%s16966_s16 + $0x54] sm:$0xf0] }
 0x3e4   : > { %v6503_v29 = vpack.c.bf16 %v6487_v56, %v6486_v33  ;;  %7085 = vmatpush.bf16.msrb.mxu0 %v10381_v58  ;;  %v6687_v38 = vmul.f32 %v10795_v36, %v6670_v23  ;;  %v10333_v33 = vmul.f32 -1.442695, %v14828_v60  ;;  %v10409_v56 = vor.u32 %v10659_v13, %v10406_v31  ;;  %v10654_v23 = vld [vmem:[%s16966_s16 + $0x44] sm:$0xf] }
 0x3e5   : > { %10798 = vrcp.f32 %v14814_v41  ;;  %v10797_v30 = vpop.eup %10796  ;;  %vm6692_vm10 = vweird.f32 %v10795_v36  ;;  %v6710_v10 = vand.u32 2147483647, %v14814_v41  ;;  %v6712_v27 = vand.u32 2147483648, %v14814_v41 }
 0x3e6   : > { %10329 = vmatmul.msk.bf16.gmra.mxu3 %vm17710_vm13, %v6503_v29  ;;  %v14846_v19 = vadd.f32 1.0, %v10797_v30  ;;  %v6688_v26 = vsub.f32 1.0, %v6687_v38  ;;  %10800 = vpow2.f32 %v10333_v33  ;;  %7231 = vmatpush.bf16.msra.mxu2 %v10409_v56  ;;  %vm14856_vm7 = vmor %vm6691_vm14, %vm6692_vm10  ;;  %v10385_v7 = vor.u32 %v10654_v23, %v10382_v35  ;;  %v10390_v33 = vld [vmem:[%s16966_s16 + $0x58] sm:$0xf0] }
 0x3e7   : > { %v6576_v29 = vpop.f32.mrf.mxu3  ;;  %v10389_v38 = vor.u32 %v10657_v24, %v10388_v32  ;;  %vm6706_vm9 = vweird.f32 %v14814_v41  ;;  %vm14888_vm0 = vcmp.eq.f32.partialorder %v6710_v10, 8.507059e+37  ;;  %v10374_v32 = vld [vmem:[%s16966_s16 + $0x38] sm:$0xf0]  ;;  %vm17724_vm14 = vmmov %vm17719_vm4 }
 0x3e8   : > { %7086 = vmatpush.bf16.msrb.mxu0 %v10365_v48  ;;  %10802 = vrcp.f32 %v14846_v19  ;;  %v6689_v61 = vmul.f32 %v10795_v36, %v6688_v26  ;;  %v6577_v1 = vadd.f32 %v14776_v25, %v6576_v29  ;;  %7134 = vmatpush.bf16.msra.mxu3 %v10385_v7  ;;  %v10348_v26 = vld [vmem:[%s16966_s16] sm:$0xf]  ;;  %v10648_v29 = vld [vmem:[%s16966_s16 + $0xc] sm:$0xf0]  ;;  %vm6721_vm1 = vweird.f32 %v14846_v19 }
 0x3e9   : > { %7183 = vmatpush.bf16.msra.mxu1 %v10389_v38  ;;  %v10349_v7 = vor.u32 %v10648_v29, %v10348_v26 }
 0x3ea   : > { %v6690_v28 = vadd.f32 %v10795_v36, %v6689_v61  ;;  %v14862_v48 = vadd.f32 %v6577_v1, %v14308_v47  ;;  %v10655_v47 = vld [vmem:[%s16966_s16 + $0x4c] sm:$0xf]  ;;  %v6713_v1 = vor.u32 1.1754944e-38, %v6712_v27 }
 0x3eb   : > { %v10799_v4 = vpop.eup %10798 }
 0x3ec   : > { %v6702_v58 = vmul.f32 %v10799_v4, %v14814_v41  ;;  %vm6707_vm6 = vweird.f32 %v10799_v4  ;;  %v10801_v46 = vpop.eup %10800  ;;  %v6694_v13 = vsel %vm14856_vm7, %v10795_v36, %v6690_v28  ;;  %v10334_v30 = vmul.f32 -1.442695, %v14862_v48  ;;  %v10650_v28 = vld [vmem:[%s16966_s16 + $0x24] sm:$0xf]  ;;  %7087 = vmatpush.bf16.msrb.mxu0 %v10349_v7 }
 0x3ed   : > { %v14892_v14 = vadd.f32 1.0, %v10801_v46  ;;  %v10393_v36 = vor.u32 %v10655_v47, %v10390_v33  ;;  %v6699_v61 = vsel %vm14851_vm3, %v6698_v16, %v6694_v13  ;;  %vm14903_vm11 = vmor %vm6706_vm9, %vm6707_vm6  ;;  %v10372_v16 = vld [vmem:[%s16966_s16 + $0x28] sm:$0xf]  ;;  %v10369_v46 = vor.u32 %v10650_v28, %v10366_v53  ;;  %v10350_v33 = vld [vmem:[%s16966_s16 + $0x10] sm:$0xf0] }
 0x3ee   : > { %v6703_v55 = vsub.f32 1.0, %v6702_v58  ;;  %v14885_v56 = vpop.eup %10802  ;;  %v6926_v24 = vmul.f32 %v6699_v61, %v14786_v63  ;;  %v10373_v38 = vor.u32 %v10653_v45, %v10372_v16  ;;  %v10646_v63 = vld [vmem:[%s16966_s16 + $0x4] sm:$0xf]  ;;  %v10649_v61 = vld [vmem:[%s16966_s16 + $0x14] sm:$0xf0]  ;;  %v6727_v53 = vand.u32 2147483648, %v14846_v19  ;;  %vm17725_vm6 = vmmov %vm17719_vm4 }
 0x3ef   : > { %v6717_v10 = vmul.f32 %v14885_v56, %v14846_v19  ;;  %10804 = vrcp.f32 %v14892_v14  ;;  %7232 = vmatpush.bf16.msra.mxu2 %v10393_v36  ;;  %v6578_v27 = vpop.f32.mrf.mxu3  ;;  %7135 = vmatpush.bf16.msra.mxu3 %v10369_v46  ;;  %v10353_v29 = vor.u32 %v10646_v63, %v10350_v33  ;;  %v10358_v58 = vld [vmem:[%s16966_s16 + $0x18] sm:$0xf0]  ;;  %vm6722_vm12 = vweird.f32 %v14885_v56  ;;  %vm17726_vm9 = vmmov %vm17719_vm4 }
 0x3f0   : > { %v6704_v31 = vmul.f32 %v10799_v4, %v6703_v55  ;;  %v10651_v55 = vld [vmem:[%s16966_s16 + $0x2c] sm:$0xf]  ;;  %10806 = vpow2.f32 %v10334_v30  ;;  %v6579_v30 = vadd.f32 %v14776_v25, %v6578_v27  ;;  %7184 = vmatpush.bf16.msra.mxu1 %v10373_v38  ;;  %v6725_v27 = vand.u32 2147483647, %v14846_v19  ;;  %vm14967_vm8 = vmor %vm6721_vm1, %vm6722_vm12 }
 0x3f1   : > { %v6718_v35 = vsub.f32 1.0, %v6717_v10  ;;  %v6740_v7 = vand.u32 2147483647, %v14892_v14  ;;  %v6728_v19 = vor.u32 1.1754944e-38, %v6727_v53  ;;  %vm6736_vm10 = vweird.f32 %v14892_v14  ;;  %vm17728_vm12 = vmmov %vm17719_vm4 }
 0x3f2   : > { %v6705_v41 = vadd.f32 %v10799_v4, %v6704_v31  ;;  %v14946_v26 = vadd.f32 %v6579_v30, %v14381_v20  ;;  %vm6726_vm13 = vcmp.eq.f32.partialorder %v6725_v27, 8.507059e+37 }
 0x3f3   : > { %v6719_v31 = vmul.f32 %v14885_v56, %v6718_v35  ;;  %7136 = vmatpush.bf16.msra.mxu3 %v10353_v29  ;;  %vm6741_vm7 = vcmp.eq.f32.partialorder %v6740_v7, 8.507059e+37 }
 0x3f4   : > { %v6709_v23 = vsel %vm14903_vm11, %v10799_v4, %v6705_v41  ;;  %v10377_v4 = vor.u32 %v10651_v55, %v10374_v32  ;;  %v10647_v41 = vld [vmem:[%s16966_s16 + $0xc] sm:$0xf]  ;;  %v10335_v45 = vmul.f32 -1.442695, %v14946_v26  ;;  %v6742_v32 = vand.u32 2147483648, %v14892_v14  ;;  %vm17727_vm11 = vmmov %vm17719_vm4 }
 0x3f5   : > { %v6714_v47 = vsel %vm14888_vm0, %v6713_v1, %v6709_v23  ;;  %v10805_v36 = vpop.eup %10804  ;;  %v6720_v10 = vadd.f32 %v14885_v56, %v6719_v31  ;;  %v10361_v55 = vor.u32 %v10647_v41, %v10358_v58 }
 0x3f6   : > { %v6927_v13 = vmul.f32 %v6714_v47, %v14797_v52  ;;  %7233 = vmatpush.bf16.msra.mxu2 %v10377_v4  ;;  %v10356_v52 = vld [vmem:[%s16966_s16 + $0x8] sm:$0xf]  ;;  %v10807_v1 = vpop.eup %10806  ;;  %v6732_v20 = vmul.f32 %v10805_v36, %v14892_v14  ;;  %vm6737_vm2 = vweird.f32 %v10805_v36  ;;  %v6743_v38 = vor.u32 1.1754944e-38, %v6742_v32 }
 0x3f7   : > { %v10357_v28 = vor.u32 %v10649_v61, %v10356_v52  ;;  %v14962_v16 = vadd.f32 1.0, %v10807_v1  ;;  %v6724_v47 = vsel %vm14967_vm8, %v14885_v56, %v6720_v10  ;;  %vm6738_vm3 = vmor %vm6736_vm10, %vm6737_vm2 }
 0x3f8   : > { %v6958_v12 = vpack.c.bf16 %v6927_v13, %v6926_v24  ;;  %v6733_v23 = vsub.f32 1.0, %v6732_v20  ;;  %v6581_v24 = vpop.f32.mrf.mxu3  ;;  %v6729_v31 = vsel %vm6726_vm13, %v6728_v19, %v6724_v47  ;;  %vm17729_vm10 = vmmov %vm17725_vm6 }
 0x3f9   : > { %7185 = vmatpush.bf16.msra.mxu1 %v10357_v28  ;;  %10808 = vrcp.f32 %v14962_v16  ;;  %v6928_v33 = vmul.f32 %v6729_v31, %v14810_v40  ;;  %v6582_v20 = vadd.f32 %v14776_v25, %v6581_v24 }
 0x3fa   : > { %10410 = vmatmul.msk.bf16.vlgmr.msrb.gmra.mxu0 %vm17719_vm4, %v6958_v12  ;;  %7234 = vmatpush.bf16.msra.mxu2 %v10361_v55  ;;  %v6734_v46 = vmul.f32 %v10805_v36, %v6733_v23  ;;  %10810 = vpow2.f32 %v10335_v45  ;;  %vm6751_vm4 = vweird.f32 %v14962_v16  ;;  %v6755_v45 = vand.u32 2147483647, %v14962_v16 }
 0x3fb   : > { %10418 = vmatmul.msk.bf16.vlgmr.msra.gmra.mxu3 %vm17722_vm5, %v6958_v12  ;;  %v14997_v7 = vadd.f32 %v6582_v20, %v14360_v34 }
 0x3fc   : > { %10426 = vmatmul.msk.bf16.vlgmr.msra.gmra.mxu1 %vm17723_vm15, %v6958_v12  ;;  %v6735_v13 = vadd.f32 %v10805_v36, %v6734_v46  ;;  %vm6756_vm5 = vcmp.eq.f32.partialorder %v6755_v45, 8.507059e+37 }
 0x3fd   : > { %10434 = vmatmul.msk.bf16.vlgmr.msra.gmra.mxu2 %vm17724_vm14, %v6958_v12  ;;  %vm17730_vm14 = vmmov %vm17725_vm6 }
 0x3fe   : > { %v6739_v4 = vsel %vm6738_vm3, %v10805_v36, %v6735_v13  ;;  %v10336_v13 = vmul.f32 -1.442695, %v14997_v7  ;;  %vm17731_vm3 = vmmov %vm17725_vm6 }
 0x3ff   : > { %v10809_v56 = vpop.eup %10808  ;;  %v6744_v30 = vsel %vm6741_vm7, %v6743_v38, %v6739_v4  ;;  %vm17732_vm7 = vmmov %vm17731_vm3 }
 0x400   : > { %v10811_v63 = vpop.eup %10810  ;;  %v6929_v52 = vmul.f32 %v6744_v30, %v14828_v60  ;;  %v6747_v29 = vmul.f32 %v10809_v56, %v14962_v16  ;;  %v6583_v14 = vpop.f32.mrf.mxu3  ;;  %vm6752_vm0 = vweird.f32 %v10809_v56  ;;  %v6757_v60 = vand.u32 2147483648, %v14962_v16 }
 0x401   : > { %v6675_v61 = vadd.f32 1.0, %v10811_v63  ;;  %v6584_v36 = vadd.f32 %v14776_v25, %v6583_v14  ;;  %vm6753_vm1 = vmor %vm6751_vm4, %vm6752_vm0 }
 0x402   : > { %v6959_v41 = vpack.c.bf16 %v6929_v52, %v6928_v33  ;;  %v6748_v58 = vsub.f32 1.0, %v6747_v29  ;;  %v6758_v24 = vor.u32 1.1754944e-38, %v6757_v60 }
 0x403   : > { %10812 = vrcp.f32 %v6675_v61  ;;  %v14991_v53 = vadd.f32 %v6584_v36, %v14386_v0  ;;  %v6772_v55 = vand.u32 2147483648, %v6675_v61  ;;  %v6770_v35 = vand.u32 2147483647, %v6675_v61 }
 0x404   : > { %v6749_v12 = vmul.f32 %v10809_v56, %v6748_v58  ;;  %vm6766_vm2 = vweird.f32 %v6675_v61 }
 0x405   : > { %v10337_v0 = vmul.f32 -1.442695, %v14991_v53  ;;  %v6773_v46 = vor.u32 1.1754944e-38, %v6772_v55  ;;  %vm6771_vm13 = vcmp.eq.f32.partialorder %v6770_v35, 8.507059e+37 }
 0x406   : > { %v6750_v40 = vadd.f32 %v10809_v56, %v6749_v12 }
 0x407   : > { %10814 = vpow2.f32 %v10337_v0 }
 0x408   : > { %v6586_v27 = vpop.f32.mrf.mxu3  ;;  %v6754_v32 = vsel %vm6753_vm1, %v10809_v56, %v6750_v40  ;;  %10816 = vpow2.f32 %v10336_v13 }
 0x409   : > { %v10813_v1 = vpop.eup %10812  ;;  %v6759_v19 = vsel %vm6756_vm5, %v6758_v24, %v6754_v32  ;;  %v6587_v33 = vadd.f32 %v14776_v25, %v6586_v27  ;;  %vm17733_vm5 = vmmov %vm17731_vm3 }
 0x40a   : > { %10411 = vmatmul.msk.bf16.gmra.mxu0 %vm17725_vm6, %v6959_v41  ;;  %v6762_v10 = vmul.f32 %v10813_v1, %v6675_v61  ;;  %vm6767_vm8 = vweird.f32 %v10813_v1  ;;  %v6930_v34 = vmul.f32 %v6759_v19, %v14862_v48 }
 0x40b   : > { %10419 = vmatmul.msk.bf16.gmra.mxu3 %vm17726_vm9, %v6959_v41  ;;  %vm6768_vm15 = vmor %vm6766_vm2, %vm6767_vm8  ;;  %v15013_v29 = vadd.f32 %v6587_v33, %v14341_v62 }
 0x40c   : > { %10427 = vmatmul.msk.bf16.gmra.mxu1 %vm17727_vm11, %v6959_v41  ;;  %v6763_v28 = vsub.f32 1.0, %v6762_v10 }
 0x40d   : > { %10435 = vmatmul.msk.bf16.gmra.mxu2 %vm17728_vm12, %v6959_v41  ;;  %v10815_v63 = vpop.eup %10814  ;;  %v10338_v58 = vmul.f32 -1.442695, %v15013_v29 }
 0x40e   : > { %v6764_v23 = vmul.f32 %v10813_v1, %v6763_v28  ;;  %v10817_v52 = vpop.eup %10816  ;;  %v6677_v48 = vadd.f32 1.0, %v10815_v63 }
 0x40f   : > { %v6676_v61 = vadd.f32 1.0, %v10817_v52 }
 0x410   : > { %v6765_v47 = vadd.f32 %v10813_v1, %v6764_v23  ;;  %v6588_v4 = vpop.f32.mrf.mxu3  ;;  %10818 = vrcp.f32 %v6677_v48  ;;  %v6802_v23 = vand.u32 2147483648, %v6677_v48  ;;  %vm6796_vm0 = vweird.f32 %v6677_v48 }
 0x411   : > { %v6589_v30 = vadd.f32 %v14776_v25, %v6588_v4  ;;  %10820 = vrcp.f32 %v6676_v61  ;;  %v6800_v32 = vand.u32 2147483647, %v6677_v48  ;;  %vm6781_vm12 = vweird.f32 %v6676_v61 }
 0x412   : > { %v6769_v16 = vsel %vm6768_vm15, %v10813_v1, %v6765_v47  ;;  %v6787_v47 = vand.u32 2147483648, %v6676_v61  ;;  %v6785_v0 = vand.u32 2147483647, %v6676_v61  ;;  %vm17734_vm15 = vmmov %vm17731_vm3 }
 0x413   : > { %v6774_v31 = vsel %vm6771_vm13, %v6773_v46, %v6769_v16  ;;  %v6803_v16 = vor.u32 1.1754944e-38, %v6802_v23  ;;  %vm6801_vm1 = vcmp.eq.f32.partialorder %v6800_v32, 8.507059e+37 }
 0x414   : > { %v6931_v38 = vmul.f32 %v6774_v31, %v14946_v26  ;;  %v15009_v26 = vadd.f32 %v6589_v30, %v14314_v44  ;;  %v6788_v4 = vor.u32 1.1754944e-38, %v6787_v47  ;;  %vm6786_vm8 = vcmp.eq.f32.partialorder %v6785_v0, 8.507059e+37 }
 0x416   : > { %v6960_v56 = vpack.c.bf16 %v6931_v38, %v6930_v34  ;;  %v10339_v41 = vmul.f32 -1.442695, %v15009_v26  ;;  %v10819_v14 = vpop.eup %10818 }
 0x417   : > { %v10821_v12 = vpop.eup %10820  ;;  %v6792_v44 = vmul.f32 %v10819_v14, %v6677_v48  ;;  %vm6797_vm6 = vweird.f32 %v10819_v14 }
 0x418   : > { %10822 = vpow2.f32 %v10339_v41  ;;  %v6777_v10 = vmul.f32 %v10821_v12, %v6676_v61  ;;  %vm6782_vm9 = vweird.f32 %v10821_v12  ;;  %vm6798_vm11 = vmor %vm6796_vm0, %vm6797_vm6 }
 0x419   : > { %10824 = vpow2.f32 %v10338_v58  ;;  %v6793_v40 = vsub.f32 1.0, %v6792_v44  ;;  %vm6783_vm4 = vmor %vm6781_vm12, %vm6782_vm9 }
 0x41a   : > { %10412 = vmatmul.msk.bf16.gmra.mxu0 %vm17729_vm10, %v6960_v56  ;;  %v6778_v60 = vsub.f32 1.0, %v6777_v10  ;;  %vm17735_vm10 = vmmov %vm17731_vm3 }
 0x41b   : > { %10420 = vmatmul.msk.bf16.gmra.mxu3 %vm17730_vm14, %v6960_v56  ;;  %v6794_v28 = vmul.f32 %v10819_v14, %v6793_v40  ;;  %vm17736_vm14 = vmmov %vm17731_vm3 }
 0x41c   : > { %10428 = vmatmul.msk.bf16.gmra.mxu1 %vm17731_vm3, %v6960_v56  ;;  %v6779_v45 = vmul.f32 %v10821_v12, %v6778_v60  ;;  %vm17737_vm12 = vmmov %vm17733_vm5 }
 0x41d   : > { %10436 = vmatmul.msk.bf16.gmra.mxu2 %vm17732_vm7, %v6960_v56  ;;  %v6795_v55 = vadd.f32 %v10819_v14, %v6794_v28 }
 0x41e   : > { %v10823_v36 = vpop.eup %10822  ;;  %v6780_v35 = vadd.f32 %v10821_v12, %v6779_v45 }
 0x41f   : > { %v10825_v1 = vpop.eup %10824  ;;  %v15017_v20 = vadd.f32 1.0, %v10823_v36  ;;  %v6799_v46 = vsel %vm6798_vm11, %v10819_v14, %v6795_v55 }
 0x420   : > { %v15019_v62 = vadd.f32 1.0, %v10825_v1  ;;  %v6784_v31 = vsel %vm6783_vm4, %v10821_v12, %v6780_v35  ;;  %v6804_v56 = vsel %vm6801_vm1, %v6803_v16, %v6799_v46  ;;  %vm17738_vm4 = vmmov %vm17733_vm5 }
 0x421   : > { %10826 = vrcp.f32 %v15017_v20  ;;  %v6789_v33 = vsel %vm6786_vm8, %v6788_v4, %v6784_v31  ;;  %v6933_v52 = vmul.f32 %v6804_v56, %v14991_v53  ;;  %vm6826_vm3 = vweird.f32 %v15017_v20  ;;  %vm17739_vm1 = vmmov %vm17738_vm4 }
 0x422   : > { %10828 = vrcp.f32 %v15019_v62  ;;  %v6932_v41 = vmul.f32 %v6789_v33, %v14997_v7  ;;  %v6832_v7 = vand.u32 2147483648, %v15017_v20  ;;  %v6817_v60 = vand.u32 2147483648, %v15019_v62  ;;  %vm17740_vm8 = vmmov %vm17739_vm1 }
 0x423   : > { %vm6811_vm6 = vweird.f32 %v15019_v62  ;;  %v6815_v45 = vand.u32 2147483647, %v15019_v62 }
 0x424   : > { %v6961_v44 = vpack.c.bf16 %v6933_v52, %v6932_v41  ;;  %v6833_v23 = vor.u32 1.1754944e-38, %v6832_v7  ;;  %v6818_v47 = vor.u32 1.1754944e-38, %v6817_v60 }
 0x425   : > { %vm6816_vm11 = vcmp.eq.f32.partialorder %v6815_v45, 8.507059e+37 }
 0x427   : > { %v15023_v27 = vpop.eup %10826 }
 0x428   : > { %v15025_v24 = vpop.eup %10828  ;;  %v6822_v19 = vmul.f32 %v15023_v27, %v15017_v20  ;;  %vm6827_vm2 = vweird.f32 %v15023_v27 }
 0x429   : > { %v6807_v38 = vmul.f32 %v15025_v24, %v15019_v62  ;;  %vm6812_vm13 = vweird.f32 %v15025_v24  ;;  %vm6828_vm7 = vmor %vm6826_vm3, %vm6827_vm2 }
 0x42a   : > { %v6823_v30 = vsub.f32 1.0, %v6822_v19  ;;  %10413 = vmatmul.msk.bf16.gmra.mxu0 %vm17733_vm5, %v6961_v44  ;;  %vm6813_vm9 = vmor %vm6811_vm6, %vm6812_vm13 }
 0x42b   : > { %v6808_v48 = vsub.f32 1.0, %v6807_v38  ;;  %10421 = vmatmul.msk.bf16.gmra.mxu3 %vm17734_vm15, %v6961_v44  ;;  %vm17743_vm6 = vmmov %vm17739_vm1 }
 0x42c   : > { %v6824_v58 = vmul.f32 %v15023_v27, %v6823_v30  ;;  %10429 = vmatmul.msk.bf16.gmra.mxu1 %vm17735_vm10, %v6961_v44 }
 0x42d   : > { %v6809_v12 = vmul.f32 %v15025_v24, %v6808_v48  ;;  %10437 = vmatmul.msk.bf16.gmra.mxu2 %vm17736_vm14, %v6961_v44 }
 0x42f   : > { %v6810_v10 = vadd.f32 %v15025_v24, %v6809_v12 }
 0x43f   : > { %v6591_v13 = vpop.f32.mrf.mxu3 }
 0x440   : > { %v6592_v34 = vadd.f32 %v14776_v25, %v6591_v13 }
 0x442   : > { %v15033_v63 = vadd.f32 %v6592_v34, %v14353_v43  ;;  %v6825_v43 = vadd.f32 %v15023_v27, %v6824_v58 }
 0x444   : > { %v10340_v61 = vmul.f32 -1.442695, %v15033_v63  ;;  %v6829_v55 = vsel %vm6828_vm7, %v15023_v27, %v6825_v43 }
 0x446   : > { %10830 = vpow2.f32 %v10340_v61 }
 0x447   : > { %v6593_v14 = vpop.f32.mrf.mxu3 }
 0x448   : > { %v6594_v36 = vadd.f32 %v14776_v25, %v6593_v14 }
 0x44a   : > { %v15044_v53 = vadd.f32 %v6594_v36, %v14621_v5  ;;  %v6830_v5 = vand.u32 2147483647, %v15017_v20  ;;  %v6814_v20 = vsel %vm6813_vm9, %v15025_v24, %v6810_v10  ;;  %vm17744_vm9 = vmmov %vm17739_vm1 }
 0x44b   : > { %v6819_v62 = vsel %vm6816_vm11, %v6818_v47, %v6814_v20 }
 0x44c   : > { %v10831_v1 = vpop.eup %10830  ;;  %v10341_v40 = vmul.f32 -1.442695, %v15044_v53  ;;  %vm6831_vm0 = vcmp.eq.f32.partialorder %v6830_v5, 8.507059e+37  ;;  %v6934_v38 = vmul.f32 %v6819_v62, %v15013_v29 }
 0x44d   : > { %v6680_v28 = vadd.f32 1.0, %v10831_v1  ;;  %v6834_v0 = vsel %vm6831_vm0, %v6833_v23, %v6829_v55  ;;  %vm17745_vm0 = vmmov %vm17739_vm1 }
 0x44e   : > { %10832 = vpow2.f32 %v10341_v40  ;;  %v6935_v19 = vmul.f32 %v6834_v0, %v15009_v26  ;;  %vm17746_vm11 = vmmov %vm17745_vm0 }
 0x44f   : > { %10834 = vrcp.f32 %v6680_v28  ;;  %v6596_v35 = vpop.f32.mrf.mxu3  ;;  %vm6841_vm5 = vweird.f32 %v6680_v28  ;;  %v6845_v58 = vand.u32 2147483647, %v6680_v28 }
 0x450   : > { %v6597_v32 = vadd.f32 %v14776_v25, %v6596_v35  ;;  %v6962_v30 = vpack.c.bf16 %v6935_v19, %v6934_v38  ;;  %v845_v38 = vpop.permute.xlu1 %844 }
 0x451   : > { %vm6846_vm10 = vcmp.eq.f32.partialorder %v6845_v58, 8.507059e+37 }
 0x452   : > { %v15065_v46 = vadd.f32 %v6597_v32, %v14265_v54  ;;  %10414 = vmatmul.msk.bf16.gmra.mxu0 %vm17737_vm12, %v6962_v30  ;;  %10422 = vmatmul.msk.bf16.gmra.mxu3 %vm17738_vm4, %v6962_v30 }
 0x453   : > { %10430 = vmatmul.msk.bf16.gmra.mxu1 %vm17739_vm1, %v6962_v30  ;;  %10438 = vmatmul.msk.bf16.gmra.mxu2 %vm17740_vm8, %v6962_v30 }
 0x454   : > { %v10833_v27 = vpop.eup %10832  ;;  %v10342_v16 = vmul.f32 -1.442695, %v15065_v46 }
 0x455   : > { %v10835_v13 = vpop.eup %10834  ;;  %v6681_v31 = vadd.f32 1.0, %v10833_v27 }
 0x456   : > { %v6837_v24 = vmul.f32 %v10835_v13, %v6680_v28  ;;  %10836 = vpow2.f32 %v10342_v16  ;;  %vm6842_vm2 = vweird.f32 %v10835_v13 }
 0x457   : > { %10838 = vrcp.f32 %v6681_v31  ;;  %v6598_v34 = vpop.f32.mrf.mxu3  ;;  %vm15082_vm15 = vmor %vm6841_vm5, %vm6842_vm2  ;;  %v6860_v36 = vand.u32 2147483647, %v6681_v31  ;;  %v6862_v44 = vand.u32 2147483648, %v6681_v31  ;;  %vm6856_vm14 = vweird.f32 %v6681_v31 }
 0x458   : > { %v6838_v4 = vsub.f32 1.0, %v6837_v24  ;;  %v6599_v56 = vadd.f32 %v14776_v25, %v6598_v34 }
 0x459   : > { %v6863_v23 = vor.u32 1.1754944e-38, %v6862_v44  ;;  %vm6861_vm7 = vcmp.eq.f32.partialorder %v6860_v36, 8.507059e+37 }
 0x45a   : > { %v6839_v54 = vmul.f32 %v10835_v13, %v6838_v4  ;;  %v15072_v33 = vadd.f32 %v6599_v56, %v14398_v2  ;;  %v6847_v2 = vand.u32 2147483648, %v6680_v28 }
 0x45c   : > { %v10837_v26 = vpop.eup %10836  ;;  %v10343_v29 = vmul.f32 -1.442695, %v15072_v33  ;;  %v6840_v61 = vadd.f32 %v10835_v13, %v6839_v54  ;;  %v6848_v5 = vor.u32 1.1754944e-38, %v6847_v2  ;;  %v10665_v54 = vld [vmem:[%s16962_s12 + $0x18] sm:$0xff] }
 0x45d   : > { %v10839_v52 = vpop.eup %10838  ;;  %v15079_v48 = vadd.f32 1.0, %v10837_v26  ;;  %7827 = vmatpush.bf16.msra.mxu0 %v10665_v54 }
 0x45e   : > { %v6852_v41 = vmul.f32 %v10839_v52, %v6681_v31  ;;  %10840 = vpow2.f32 %v10343_v29  ;;  %v6844_v7 = vsel %vm15082_vm15, %v10835_v13, %v6840_v61  ;;  %vm6857_vm13 = vweird.f32 %v10839_v52  ;;  %v15113_v61 = vld [vmem:[%s16967_s17] sm:$0xf] }
 0x45f   : > { %10842 = vrcp.f32 %v15079_v48  ;;  %v6849_v55 = vsel %vm6846_vm10, %v6848_v5, %v6844_v7  ;;  %vm6858_vm3 = vmor %vm6856_vm14, %vm6857_vm13  ;;  %vm6871_vm4 = vweird.f32 %v15079_v48  ;;  %v6875_v26 = vand.u32 2147483647, %v15079_v48 }
 0x460   : > { %v6853_v14 = vsub.f32 1.0, %v6852_v41  ;;  %v6936_v62 = vmul.f32 %v6849_v55, %v15033_v63  ;;  %vm17748_vm10 = vmmov %vm17745_vm0 }
 0x461   : > { %vm6876_vm2 = vcmp.eq.f32.partialorder %v6875_v26, 8.507059e+37  ;;  %vm17749_vm14 = vmmov %vm17745_vm0 }
 0x462   : > { %v6854_v1 = vmul.f32 %v10839_v52, %v6853_v14 }
 0x464   : > { %v10841_v40 = vpop.eup %10840  ;;  %v6855_v60 = vadd.f32 %v10839_v52, %v6854_v1 }
 0x465   : > { %v10843_v45 = vpop.eup %10842  ;;  %v6683_v35 = vadd.f32 1.0, %v10841_v40 }
 0x466   : > { %v6859_v20 = vsel %vm6858_vm3, %v10839_v52, %v6855_v60  ;;  %v6867_v32 = vmul.f32 %v10843_v45, %v15079_v48  ;;  %vm6872_vm12 = vweird.f32 %v10843_v45  ;;  %vm17750_vm3 = vmmov %vm17745_vm0 }
 0x467   : > { %v6864_v0 = vsel %vm6861_vm7, %v6863_v23, %v6859_v20  ;;  %10844 = vrcp.f32 %v6683_v35  ;;  %vm6873_vm1 = vmor %vm6871_vm4, %vm6872_vm12  ;;  %v6892_v52 = vand.u32 2147483648, %v6683_v35  ;;  %v6890_v58 = vand.u32 2147483647, %v6683_v35 }
 0x468   : > { %v6937_v27 = vmul.f32 %v6864_v0, %v15044_v53  ;;  %v6868_v19 = vsub.f32 1.0, %v6867_v32  ;;  %vm6886_vm5 = vweird.f32 %v6683_v35  ;;  %vm17751_vm7 = vmmov %vm17745_vm0 }
 0x469   : > { %v6601_v43 = vpop.f32.mrf.mxu3  ;;  %v6893_v44 = vor.u32 1.1754944e-38, %v6892_v52  ;;  %vm6891_vm13 = vcmp.eq.f32.partialorder %v6890_v58, 8.507059e+37 }
 0x46a   : > { %v6602_v10 = vadd.f32 %v14776_v25, %v6601_v43  ;;  %v6869_v16 = vmul.f32 %v10843_v45, %v6868_v19  ;;  %v6963_v31 = vpack.c.bf16 %v6937_v27, %v6936_v62 }
 0x46c   : > { %v15090_v28 = vadd.f32 %v6602_v10, %v14420_v49  ;;  %10415 = vmatmul.msk.bf16.gmra.mxu0 %vm17743_vm6, %v6963_v31  ;;  %10423 = vmatmul.msk.bf16.gmra.mxu3 %vm17744_vm9, %v6963_v31  ;;  %v6870_v53 = vadd.f32 %v10843_v45, %v6869_v16 }
 0x46d   : > { %v10845_v34 = vpop.eup %10844  ;;  %10431 = vmatmul.msk.bf16.gmra.mxu1 %vm17745_vm0, %v6963_v31  ;;  %10439 = vmatmul.msk.bf16.gmra.mxu2 %vm17746_vm11, %v6963_v31 }
 0x46e   : > { %v10344_v47 = vmul.f32 -1.442695, %v15090_v28  ;;  %v6882_v4 = vmul.f32 %v10845_v34, %v6683_v35  ;;  %v6874_v41 = vsel %vm6873_vm1, %v10843_v45, %v6870_v53  ;;  %vm6887_vm8 = vweird.f32 %v10845_v34 }
 0x46f   : > { %vm6888_vm15 = vmor %vm6886_vm5, %vm6887_vm8 }
 0x470   : > { %10846 = vpow2.f32 %v10344_v47  ;;  %v6883_v29 = vsub.f32 1.0, %v6882_v4 }
 0x471   : > { %v6603_v49 = vpop.f32.mrf.mxu3 }
 0x472   : > { %v6604_v13 = vadd.f32 %v14776_v25, %v6603_v49  ;;  %v6877_v25 = vand.u32 2147483648, %v15079_v48  ;;  %v6884_v2 = vmul.f32 %v10845_v34, %v6883_v29  ;;  %v15116_v48 = vperm.slane %v15113_v61, 0 }
 0x474   : > { %v15097_v24 = vadd.f32 %v6604_v13, %v845_v38  ;;  %v6878_v14 = vor.u32 1.1754944e-38, %v6877_v25  ;;  %v6885_v12 = vadd.f32 %v10845_v34, %v6884_v2  ;;  %v10664_v25 = vld [vmem:[%s16962_s12 + $0x10] sm:$0xff] }
 0x475   : > { %7828 = vmatpush.bf16.msra.mxu0 %v10664_v25 }
 0x476   : > { %v10847_v63 = vpop.eup %10846  ;;  %v10345_v56 = vmul.f32 -1.442695, %v15097_v24  ;;  %v6879_v36 = vsel %vm6876_vm2, %v6878_v14, %v6874_v41  ;;  %v6889_v7 = vsel %vm6888_vm15, %v10845_v34, %v6885_v12  ;;  %vm17752_vm2 = vmmov %vm17750_vm3  ;;  %v7345_v14 = vpop.xlane.xlu2 %7344 }
 0x477   : > { %v6684_v30 = vadd.f32 1.0, %v10847_v63  ;;  %v6894_v10 = vsel %vm6891_vm13, %v6893_v44, %v6889_v7  ;;  %v7089_v40 = vpop.f32.mrf.mxu0  ;;  %v6938_v60 = vmul.f32 %v6879_v36, %v15065_v46  ;;  %vm17753_vm5 = vmmov %vm17752_vm2  ;;  %v7342_v7 = vpop.xlane.xlu0 %7341 }
 0x478   : > { %10848 = vpow2.f32 %v10345_v56  ;;  %v6939_v45 = vmul.f32 %v6894_v10, %v15072_v33  ;;  %v15121_v23 = vadd.f32 %v7089_v40, %v15116_v48  ;;  %vm17754_vm15 = vmmov %vm17752_vm2  ;;  %v15169_v10 = vpop.xlane.xlu1 %7353 }
 0x479   : > { %10850 = vrcp.f32 %v6684_v30  ;;  %v6907_v27 = vand.u32 2147483648, %v6684_v30  ;;  %vm6901_vm9 = vweird.f32 %v6684_v30  ;;  %v6905_v19 = vand.u32 2147483647, %v6684_v30  ;;  %vm17755_vm13 = vmmov %vm17752_vm2 }
 0x47a   : > { %v6964_v20 = vpack.c.bf16 %v6939_v45, %v6938_v60  ;;  %7276 = vrot.lane.b32.xlu0 %v15121_v23, %s17747_s26  ;;  %v17756_v60 = vld [vmem:[#allocation86_spill] sm:$0xff] }
 0x47b   : > { %v6908_v34 = vor.u32 1.1754944e-38, %v6907_v27  ;;  %vm6906_vm12 = vcmp.eq.f32.partialorder %v6905_v19, 8.507059e+37 }
 0x47c   : > { %10416 = vmatmul.msk.bf16.gmra.mxu0 %vm17748_vm10, %v6964_v20  ;;  %10424 = vmatmul.msk.bf16.gmra.mxu3 %vm17749_vm14, %v6964_v20  ;;  %vm17757_vm10 = vmmov %vm17752_vm2 }
 0x47d   : > { %10432 = vmatmul.msk.bf16.gmra.mxu1 %vm17750_vm3, %v6964_v20  ;;  %10440 = vmatmul.msk.bf16.gmra.mxu2 %vm17751_vm7, %v6964_v20  ;;  %vm17758_vm14 = vmmov %vm17752_vm2 }
 0x47e   : > { %v10849_v43 = vpop.eup %10848  ;;  %v15163_v44 = vpop.xlane.xlu2 %7356  ;;  %vm17759_vm3 = vmmov %vm17752_vm2 }
 0x47f   : > { %v10851_v1 = vpop.eup %10850  ;;  %v6685_v5 = vadd.f32 1.0, %v10849_v43  ;;  %v7091_v33 = vpop.f32.mrf.mxu0 }
 0x480   : > { %v6897_v55 = vmul.f32 %v10851_v1, %v6684_v30  ;;  %vm6902_vm6 = vweird.f32 %v10851_v1  ;;  %v15130_v62 = vadd.f32 %v7091_v33, %v15116_v48  ;;  %v7348_v40 = vpop.xlane.xlu0 %7347  ;;  %v10663_v33 = vld [vmem:[%s16962_s12 + $0x8] sm:$0xff] }
 0x481   : > { %10852 = vrcp.f32 %v6685_v5  ;;  %vm6903_vm0 = vmor %vm6901_vm9, %vm6902_vm6  ;;  %v6922_v16 = vand.u32 2147483648, %v6685_v5  ;;  %v6920_v38 = vand.u32 2147483647, %v6685_v5  ;;  %vm6916_vm4 = vweird.f32 %v6685_v5  ;;  %7829 = vmatpush.bf16.msra.mxu0 %v10663_v33 }
 0x482   : > { %v6898_v35 = vsub.f32 1.0, %v6897_v55  ;;  %7278 = vrot.lane.b32.xlu1 %v15130_v62, %s17747_s26  ;;  %v7375_v55 = vmul.f32 %v14422_v8, %v7342_v7 }
 0x483   : > { %v6923_v4 = vor.u32 1.1754944e-38, %v6922_v16  ;;  %vm6921_vm8 = vcmp.eq.f32.partialorder %v6920_v38, 8.507059e+37 }
 0x484   : > { %v6899_v32 = vmul.f32 %v10851_v1, %v6898_v35  ;;  %v7377_v35 = vmul.f32 %v14422_v8, %v7348_v40 }
 0x486   : > { %v6900_v47 = vadd.f32 %v10851_v1, %v6899_v32  ;;  %v15165_v43 = vpop.xlane.xlu2 %7426  ;;  %v15188_v27 = vsub.f32 %v17601_v15, %v7377_v35 }
 0x487   : > { %v10853_v46 = vpop.eup %10852  ;;  %v7094_v56 = vpop.f32.mrf.mxu0 }
 0x488   : > { %v6912_v0 = vmul.f32 %v10853_v46, %v6685_v5  ;;  %v6904_v13 = vsel %vm6903_vm0, %v10851_v1, %v6900_v47  ;;  %vm6917_vm11 = vweird.f32 %v10853_v46  ;;  %v15138_v54 = vadd.f32 %v7094_v56, %v15116_v48  ;;  %v15182_v47 = vpop.xlane.xlu0 %7350 }
 0x489   : > { %v6909_v53 = vsel %vm6906_vm12, %v6908_v34, %v6904_v13  ;;  %vm6918_vm1 = vmor %vm6916_vm4, %vm6917_vm11  ;;  %v7376_v5 = vmul.f32 %v14422_v8, %v7345_v14 }
 0x48a   : > { %v6913_v49 = vsub.f32 1.0, %v6912_v0  ;;  %v6940_v29 = vmul.f32 %v6909_v53, %v15090_v28  ;;  %7280 = vrot.lane.b32.xlu1 %v15138_v54, %s17747_s26  ;;  %v15185_v0 = vsub.f32 %v17597_v50, %v7375_v55 }
 0x48b   : > { %v15173_v45 = vsub.f32 %v17756_v60, %v7376_v5 }
 0x48c   : > { %v6914_v31 = vmul.f32 %v10853_v46, %v6913_v49  ;;  %v7407_v34 = vmul.f32 %v15185_v0, %v15185_v0 }
 0x48d   : > { %v7408_v32 = vmul.f32 %v15173_v45, %v15173_v45 }
 0x48e   : > { %v6915_v63 = vadd.f32 %v10853_v46, %v6914_v31  ;;  %v15167_v1 = vpop.xlane.xlu2 %7438  ;;  %v7443_v25 = vsel %vm17758_vm14, %v7407_v34, 0.0 }
 0x48f   : > { %v7096_v2 = vpop.f32.mrf.mxu0  ;;  %v7446_v49 = vsel %vm17757_vm10, %v7408_v32, 0.0  ;;  %vm17767_vm10 = vmmov %vm17759_vm3 }
 0x490   : > { %v6919_v30 = vsel %vm6918_vm1, %v10853_v46, %v6915_v63  ;;  %v15149_v58 = vadd.f32 %v7096_v2, %v15116_v48  ;;  %v7415_v46 = vpop.xlane.xlu1 %7414  ;;  %v7409_v63 = vmul.f32 %v15188_v27, %v15188_v27  ;;  %v15202_v56 = vpop.xlane.xlu0 %7441 }
 0x491   : > { %v6924_v26 = vsel %vm6921_vm8, %v6923_v4, %v6919_v30  ;;  %v7461_v19 = vmul.f32 %v7415_v46, %v14422_v8 }
 0x492   : > { %v6941_v52 = vmul.f32 %v6924_v26, %v15097_v24  ;;  %7282 = vrot.lane.b32.xlu2 %v15149_v58, %s17747_s26  ;;  %v7449_v30 = vsel %vm17759_vm3, %v7409_v63, 0.0  ;;  %v10662_v63 = vld [vmem:[%s16962_s12] sm:$0xff] }
 0x493   : > { %v7477_v38 = vadd.f32 1e-06, %v7461_v19  ;;  %7830 = vmatpush.bf16.msra.mxu0 %v10662_v63 }
 0x494   : > { %v6965_v41 = vpack.c.bf16 %v6941_v52, %v6940_v29 }
 0x495   : > { %10854 = vrsqrt.f32 %v7477_v38  ;;  %vm7499_vm7 = vweird.f32 %v7477_v38 }
 0x496   : > { %10417 = vmatmul.msk.bf16.gmra.mxu0 %vm17752_vm2, %v6965_v41  ;;  %10425 = vmatmul.msk.bf16.gmra.mxu3 %vm17753_vm5, %v6965_v41  ;;  %v7418_v20 = vpop.xlane.xlu2 %7417 }
 0x497   : > { %10433 = vmatmul.msk.bf16.gmra.mxu1 %vm17754_vm15, %v6965_v41  ;;  %10441 = vmatmul.msk.bf16.gmra.mxu2 %vm17755_vm13, %v6965_v41  ;;  %v7099_v28 = vpop.f32.mrf.mxu0  ;;  %v7462_v13 = vmul.f32 %v7418_v20, %v14422_v8  ;;  %vm17766_vm13 = vmmov %vm17759_vm3 }
 0x498   : > { %v15154_v24 = vadd.f32 %v7099_v28, %v15116_v48  ;;  %v7424_v14 = vpop.xlane.xlu0 %7423 }
 0x499   : > { %v7478_v53 = vadd.f32 1e-06, %v7462_v13  ;;  %v7464_v55 = vmul.f32 %v7424_v14, %v14422_v8 }
 0x49a   : > { %7284 = vrot.lane.b32.xlu1 %v15154_v24, %s17747_s26 }
 0x49b   : > { %10856 = vrsqrt.f32 %v7478_v53  ;;  %v10855_v52 = vpop.eup %10854  ;;  %v15220_v46 = vadd.f32 1e-06, %v7464_v55  ;;  %vm7509_vm9 = vweird.f32 %v7478_v53 }
 0x49c   : > { %v7494_v28 = vmul.f32 %v10855_v52, %v7477_v38  ;;  %vm7500_vm6 = vweird.f32 %v10855_v52 }
 0x49d   : > { %vm7501_vm11 = vmor %vm7499_vm7, %vm7500_vm6  ;;  %vm7529_vm8 = vweird.f32 %v15220_v46 }
 0x49e   : > { %v7430_v4 = vpop.xlane.xlu2 %7429  ;;  %v7495_v35 = vmul.f32 %v10855_v52, %v7494_v28 }
 0x49f   : > { %v7101_v12 = vpop.f32.mrf.mxu0  ;;  %v7466_v38 = vmul.f32 %v7430_v4, %v14422_v8 }
 0x4a0   : > { %v15159_v36 = vadd.f32 %v7101_v12, %v15116_v48  ;;  %v7496_v33 = vmul.f32 0.5, %v7495_v35 }
 0x4a1   : > { %v10857_v41 = vpop.eup %10856  ;;  %v15252_v35 = vadd.f32 1e-06, %v7466_v38 }
 0x4a2   : > { %7286 = vrot.lane.b32.xlu0 %v15159_v36, %s17747_s26  ;;  %v7504_v5 = vmul.f32 %v10857_v41, %v7478_v53  ;;  %v7497_v13 = vsub.f32 1.5, %v7496_v33  ;;  %vm7510_vm0 = vweird.f32 %v10857_v41 }
 0x4a3   : > { %vm15239_vm12 = vmor %vm7509_vm9, %vm7510_vm0  ;;  %vm7549_vm7 = vweird.f32 %v15252_v35 }
 0x4a4   : > { %v7505_v20 = vmul.f32 %v10857_v41, %v7504_v5 }
 0x4a6   : > { %v7421_v2 = vpop.xlane.xlu2 %7420 }
 0x4a7   : > { %v7104_v16 = vpop.f32.mrf.mxu0  ;;  %v7463_v40 = vmul.f32 %v7421_v2, %v14422_v8 }
 0x4a8   : > { %v15194_v31 = vadd.f32 %v7104_v16, %v15116_v48 }
 0x4a9   : > { %v15218_v32 = vadd.f32 1e-06, %v7463_v40 }
 0x4aa   : > { %7288 = vrot.lane.b32.xlu2 %v15194_v31, %s17747_s26 }
 0x4ab   : > { %10858 = vrsqrt.f32 %v15218_v32  ;;  %vm7519_vm4 = vweird.f32 %v15218_v32 }
 0x4ac   : > { %10860 = vrsqrt.f32 %v15220_v46 }
 0x4af   : > { %v7106_v26 = vpop.f32.mrf.mxu0 }
 0x4b0   : > { %v15207_v29 = vadd.f32 %v7106_v26, %v15116_v48  ;;  %v7465_v26 = vmul.f32 %v15165_v43, %v14422_v8 }
 0x4b2   : > { %7290 = vrot.lane.b32.xlu2 %v15207_v29, %s17747_s26  ;;  %v15248_v53 = vadd.f32 1e-06, %v7465_v26  ;;  %v15276_v26 = vld [vmem:[%s16961_s11] ss:$0 sm:$0xff] }
 0x4b4   : > { %10862 = vrsqrt.f32 %v15248_v53  ;;  %vm7539_vm6 = vweird.f32 %v15248_v53 }
 0x4b5   : > { %10864 = vrsqrt.f32 %v15252_v35 }
 0x4c4   : > { %7447 = vadd.xlane.f32.xlu1 %v7446_v49  ;;  %v7506_v49 = vmul.f32 0.5, %v7505_v20 }
 0x4c6   : > { %v7507_v34 = vsub.f32 1.5, %v7506_v49  ;;  %v7433_v49 = vpop.xlane.xlu1 %7432 }
 0x4c8   : > { %v7508_v28 = vmul.f32 %v10857_v41, %v7507_v34 }
 0x4ca   : > { %v7512_v4 = vsel %vm15239_vm12, %v10857_v41, %v7508_v28  ;;  %vm17769_vm12 = vmmov %vm17767_vm10 }
 0x4cc   : > { %7444 = vadd.xlane.f32.xlu0 %v7443_v25  ;;  %7450 = vadd.xlane.f32.xlu1 %v7449_v30  ;;  %v15232_v25 = vpop.eup %10858  ;;  %v7498_v30 = vmul.f32 %v10855_v52, %v7497_v13  ;;  %v7654_v13 = vmul.f32 %v7512_v4, %v14490_v17 }
 0x4cd   : > { %v15236_v2 = vpop.eup %10860  ;;  %v7514_v5 = vmul.f32 %v15232_v25, %v15218_v32  ;;  %vm7520_vm1 = vweird.f32 %v15232_v25 }
 0x4ce   : > { %v7502_v43 = vsel %vm7501_vm11, %v10855_v52, %v7498_v30  ;;  %v7524_v55 = vmul.f32 %v15236_v2, %v15220_v46  ;;  %v15263_v52 = vld [vmem:[%s16960_s10] ss:$0 sm:$0xff]  ;;  %vm7530_vm2 = vweird.f32 %v15236_v2  ;;  %vm15301_vm5 = vmor %vm7519_vm4, %vm7520_vm1 }
 0x4cf   : > { %v7109_v12 = vpop.f32.mrf.mxu0  ;;  %v7515_v20 = vmul.f32 %v15232_v25, %v7514_v5  ;;  %v7653_v33 = vmul.f32 %v7502_v43, %v14430_v59  ;;  %v7673_v17 = vmul.f32 %v15263_v52, %v7654_v13  ;;  %vm15309_vm15 = vmor %vm7529_vm8, %vm7530_vm2 }
 0x4d0   : > { %v15212_v7 = vadd.f32 %v7109_v12, %v15116_v48  ;;  %v7378_v12 = vmul.f32 %v14422_v8, %v15182_v47  ;;  %vm17768_vm11 = vmmov %vm17767_vm10 }
 0x4d1   : > { %v7516_v63 = vmul.f32 0.5, %v7515_v20  ;;  %v7672_v59 = vmul.f32 %v15263_v52, %v7653_v33  ;;  %vm17770_vm1 = vmmov %vm17767_vm10 }
 0x4d2   : > { %7292 = vrot.lane.b32.xlu2 %v15212_v7, %s17747_s26 }
 0x4d3   : > { %v7517_v43 = vsub.f32 1.5, %v7516_v63  ;;  %v7436_v63 = vpop.xlane.xlu2 %7435 }
 0x4d5   : > { %v7518_v32 = vmul.f32 %v15232_v25, %v7517_v43 }
 0x4d7   : > { %v7111_v19 = vpop.f32.mrf.mxu0 }
 0x4d8   : > { %v15224_v16 = vadd.f32 %v7111_v19, %v15116_v48  ;;  %v7525_v19 = vmul.f32 %v15236_v2, %v7524_v55  ;;  %v7691_v55 = vadd.f32 %v15276_v26, %v7672_v59 }
 0x4da   : > { %v7526_v38 = vmul.f32 0.5, %v7525_v19  ;;  %v7692_v19 = vadd.f32 %v15276_v26, %v7673_v17 }
 0x4dc   : > { %v7527_v4 = vsub.f32 1.5, %v7526_v38 }
 0x4de   : > { %v7528_v17 = vmul.f32 %v15236_v2, %v7527_v4 }
 0x4e0   : > { %7294 = vrot.lane.b32.xlu0 %v15224_v16, %s17747_s26 }
 0x4e9   : > { %v7114_v14 = vpop.f32.mrf.mxu0 }
 0x4ea   : > { %v15246_v40 = vadd.f32 %v7114_v14, %v15116_v48  ;;  %v15281_v14 = vpop.eup %10862 }
 0x4eb   : > { %v15285_v5 = vpop.eup %10864  ;;  %v7534_v47 = vmul.f32 %v15281_v14, %v15248_v53  ;;  %vm7540_vm3 = vweird.f32 %v15281_v14 }
 0x4ec   : > { %7296 = vrot.lane.b32.xlu1 %v15246_v40, %s17747_s26  ;;  %v7277_v41 = vpop.permute.xlu0 %7276  ;;  %vm7550_vm14 = vweird.f32 %v15285_v5  ;;  %vm7541_vm0 = vmor %vm7539_vm6, %vm7540_vm3 }
 0x4ed   : > { %v7707_v28 = vadd.f32 1.0, %v7277_v41  ;;  %v7544_v41 = vmul.f32 %v15285_v5, %v15252_v35  ;;  %vm7551_vm9 = vmor %vm7549_vm7, %vm7550_vm14 }
 0x4ee   : > { %vm17772_vm14 = vmmov %vm17770_vm1 }
 0x4ef   : > { %v7723_v33 = vmul.f32 %v7707_v28, %v7691_v55  ;;  %v7467_v28 = vmul.f32 %v7433_v49, %v14422_v8  ;;  %v7545_v43 = vmul.f32 %v15285_v5, %v7544_v41 }
 0x4f1   : > { %v7116_v34 = vpop.f32.mrf.mxu0  ;;  %v15321_v4 = vadd.f32 1e-06, %v7467_v28 }
 0x4f2   : > { %v15270_v30 = vadd.f32 %v7116_v34, %v15116_v48  ;;  %v15292_v34 = vsub.f32 %v17634_v6, %v7378_v12  ;;  %v7739_v12 = vadd.f32 %v7723_v33, %v15121_v23  ;;  %v7522_v23 = vsel %vm15301_vm5, %v15232_v25, %v7518_v32 }
 0x4f3   : > { %v7546_v33 = vmul.f32 0.5, %v7545_v43  ;;  %10866 = vrsqrt.f32 %v15321_v4  ;;  %vm7559_vm2 = vweird.f32 %v15321_v4 }
 0x4f4   : > { %7298 = vrot.lane.b32.xlu0 %v15270_v30, %s17747_s26  ;;  %v7279_v20 = vpop.permute.xlu1 %7278 }
 0x4f5   : > { %v7708_v13 = vadd.f32 1.0, %v7279_v20  ;;  %v7468_v20 = vmul.f32 %v7436_v63, %v14422_v8  ;;  %v7547_v38 = vsub.f32 1.5, %v7546_v33 }
 0x4f7   : > { %v7724_v59 = vmul.f32 %v7708_v13, %v7692_v19  ;;  %v7535_v19 = vmul.f32 %v15281_v14, %v7534_v47  ;;  %v7410_v13 = vmul.f32 %v15292_v34, %v15292_v34  ;;  %v15327_v41 = vadd.f32 1e-06, %v7468_v20 }
 0x4f8   : > { %v7655_v47 = vmul.f32 %v7522_v23, %v14494_v42  ;;  %v7380_v42 = vmul.f32 %v14422_v8, %v15163_v44  ;;  %v7548_v43 = vmul.f32 %v15285_v5, %v7547_v38  ;;  %v7379_v38 = vmul.f32 %v14422_v8, %v15169_v10 }
 0x4f9   : > { %v7740_v55 = vadd.f32 %v7724_v59, %v15130_v62  ;;  %v7532_v62 = vsel %vm15309_vm15, %v15236_v2, %v7528_v17  ;;  %v7536_v63 = vmul.f32 0.5, %v7535_v19  ;;  %v7452_v59 = vsel %vm17767_vm10, %v7410_v13, 0.0  ;;  %v7283_v17 = vpop.permute.xlu2 %7282  ;;  %v15338_v46 = vpop.eup %10866  ;;  %vm17771_vm10 = vmmov %vm17770_vm1 }
 0x4fa   : > { %v7656_v25 = vmul.f32 %v7532_v62, %v14547_v39  ;;  %10868 = vrsqrt.f32 %v15327_v41  ;;  %v7674_v2 = vmul.f32 %v15263_v52, %v7655_v47  ;;  %v7710_v39 = vadd.f32 1.0, %v7283_v17  ;;  %v7119_v62 = vpop.f32.mrf.mxu0 }
 0x4fb   : > { %v7763_v49 = vpack.c.bf16 %v7740_v55, %v7739_v12  ;;  %7453 = vadd.xlane.f32.xlu2 %v7452_v59  ;;  %v7537_v28 = vsub.f32 1.5, %v7536_v63  ;;  %v7554_v23 = vmul.f32 %v15338_v46, %v15321_v4  ;;  %v15353_v33 = vsub.f32 %v13679_v3, %v7380_v42 }
 0x4fc   : > { %v7281_v32 = vpop.permute.xlu1 %7280  ;;  %v7675_v12 = vmul.f32 %v15263_v52, %v7656_v25  ;;  %v7693_v20 = vadd.f32 %v15276_v26, %v7674_v2  ;;  %v7552_v63 = vsel %vm7551_vm9, %v15285_v5, %v7548_v43  ;;  %v15371_v42 = vsub.f32 %v17669_v57, %v7379_v38  ;;  %v7138_v43 = vpop.f32.mrf.mxu3 }
 0x4fd   : > { %10458 = vmatmul.msk.bf16.vlgmr.msra.gmra.mxu0 %vm17766_vm13, %v7763_v49  ;;  %v7709_v55 = vadd.f32 1.0, %v7281_v32  ;;  %v7538_v19 = vmul.f32 %v15281_v14, %v7537_v28  ;;  %v7555_v53 = vmul.f32 %v15338_v46, %v7554_v23  ;;  %v7658_v32 = vmul.f32 %v7552_v63, %v14504_v9 }
 0x4fe   : > { %v7694_v49 = vadd.f32 %v15276_v26, %v7675_v12  ;;  %v7412_v5 = vmul.f32 %v15353_v33, %v15353_v33  ;;  %v15378_v23 = vadd.f32 %v7119_v62, %v15116_v48  ;;  %v7411_v63 = vmul.f32 %v15371_v42, %v15371_v42 }
 0x4ff   : > { %v7725_v44 = vmul.f32 %v7709_v55, %v7693_v20  ;;  %v7542_v59 = vsel %vm7541_vm0, %v15281_v14, %v7538_v19  ;;  %v7556_v14 = vmul.f32 0.5, %v7555_v53  ;;  %vm7560_vm4 = vweird.f32 %v15338_v46 }
 0x500   : > { %v15345_v13 = vpop.eup %10868  ;;  %v7726_v47 = vmul.f32 %v7710_v39, %v7694_v49  ;;  %v7657_v28 = vmul.f32 %v7542_v59, %v14452_v22  ;;  %v7455_v62 = vsel %vm17770_vm1, %v7411_v63, 0.0  ;;  %vm7561_vm5 = vmor %vm7559_vm2, %vm7560_vm4  ;;  %vm7569_vm15 = vweird.f32 %v15327_v41 }
 0x501   : > { %v7564_v35 = vmul.f32 %v15345_v13, %v15327_v41  ;;  %v7741_v25 = vadd.f32 %v7725_v44, %v15138_v54  ;;  %v7677_v54 = vmul.f32 %v15263_v52, %v7658_v32  ;;  %v7557_v19 = vsub.f32 1.5, %v7556_v14 }
 0x502   : > { %v7742_v2 = vadd.f32 %v7726_v47, %v15149_v58  ;;  %v7676_v9 = vmul.f32 %v15263_v52, %v7657_v28  ;;  %v7458_v58 = vsel %vm17769_vm12, %v7412_v5, 0.0  ;;  %v7121_v10 = vpop.f32.mrf.mxu0  ;;  %vm7570_vm8 = vweird.f32 %v15345_v13  ;;  %vm17773_vm12 = vmmov %vm17770_vm1 }
 0x503   : > { %v7565_v17 = vmul.f32 %v15345_v13, %v7564_v35  ;;  %v7696_v49 = vadd.f32 %v15276_v26, %v7677_v54  ;;  %v10669_v35 = vld [vmem:[%s16964_s14 + $0x18] sm:$0xff]  ;;  %v7558_v32 = vmul.f32 %v15338_v46, %v7557_v19  ;;  %vm7571_vm13 = vmor %vm7569_vm15, %vm7570_vm8  ;;  %v15399_v14 = vadd.f32 %v7121_v10, %v15116_v48 }
 0x504   : > { %v7764_v12 = vpack.c.bf16 %v7742_v2, %v7741_v25  ;;  %v7695_v47 = vadd.f32 %v15276_v26, %v7676_v9  ;;  %8264 = vmatpush.bf16.msrb.mxu3 %v10669_v35  ;;  %v7289_v41 = vpop.permute.xlu2 %7288  ;;  %v7470_v9 = vmul.f32 %v15202_v56, %v14422_v8 }
 0x505   : > { %v7566_v22 = vmul.f32 0.5, %v7565_v17  ;;  %v7562_v5 = vsel %vm7561_vm5, %v15338_v46, %v7558_v32  ;;  %v15408_v46 = vperm.slane %v15113_v61, 1 }
 0x506   : > { %v7659_v4 = vmul.f32 %v7562_v5, %v14661_v18  ;;  %v7713_v18 = vadd.f32 1.0, %v7289_v41  ;;  %v7486_v10 = vadd.f32 1e-06, %v7470_v9 }
 0x507   : > { %v7567_v59 = vsub.f32 1.5, %v7566_v22  ;;  %v15416_v22 = vadd.f32 %v7138_v43, %v15408_v46 }
 0x508   : > { %vm7589_vm0 = vweird.f32 %v7486_v10 }
 0x509   : > { %v7568_v2 = vmul.f32 %v15345_v13, %v7567_v59 }
 0x50c   : > { %v7285_v55 = vpop.permute.xlu1 %7284 }
 0x50d   : > { %10459 = vmatmul.msk.bf16.gmra.mxu0 %vm17768_vm11, %v7764_v12  ;;  %v7711_v39 = vadd.f32 1.0, %v7285_v55  ;;  %v7140_v12 = vpop.f32.mrf.mxu3  ;;  %v7572_v55 = vsel %vm7571_vm13, %v15345_v13, %v7568_v2  ;;  %v7678_v13 = vmul.f32 %v15263_v52, %v7659_v4  ;;  %vm17774_vm13 = vmmov %vm17771_vm10 }
 0x50e   : > { %v7660_v54 = vmul.f32 %v7572_v55, %v14639_v21  ;;  %v7291_v21 = vpop.permute.xlu2 %7290 }
 0x50f   : > { %v7727_v53 = vmul.f32 %v7711_v39, %v7695_v47 }
 0x511   : > { %v7743_v28 = vadd.f32 %v7727_v53, %v15154_v24  ;;  %v7469_v24 = vmul.f32 %v15167_v1, %v14422_v8  ;;  %v7679_v1 = vmul.f32 %v15263_v52, %v7660_v54 }
 0x513   : > { %7300 = vrot.lane.b32.xlu2 %v15378_v23, %s17747_s26  ;;  %v7124_v17 = vpop.f32.mrf.mxu0  ;;  %v7698_v43 = vadd.f32 %v15276_v26, %v7679_v1 }
 0x514   : > { %v7287_v20 = vpop.permute.xlu0 %7286  ;;  %v15429_v47 = vadd.f32 %v7124_v17, %v15116_v48 }
 0x515   : > { %v7712_v44 = vadd.f32 1.0, %v7287_v20  ;;  %v7143_v61 = vpop.f32.mrf.mxu3  ;;  %v7697_v20 = vadd.f32 %v15276_v26, %v7678_v13 }
 0x516   : > { %7459 = vadd.xlane.f32.xlu1 %v7458_v58  ;;  %v7485_v58 = vadd.f32 1e-06, %v7469_v24  ;;  %v15450_v17 = vadd.f32 %v7143_v61, %v15408_v46 }
 0x517   : > { %v7728_v25 = vmul.f32 %v7712_v44, %v7696_v49  ;;  %v7729_v19 = vmul.f32 %v7713_v18, %v7697_v20  ;;  %v7714_v49 = vadd.f32 1.0, %v7291_v21 }
 0x518   : > { %10870 = vrsqrt.f32 %v7485_v58  ;;  %vm7579_vm7 = vweird.f32 %v7485_v58 }
 0x519   : > { %v7744_v38 = vadd.f32 %v7728_v25, %v15159_v36  ;;  %10872 = vrsqrt.f32 %v7486_v10  ;;  %v7730_v44 = vmul.f32 %v7714_v49, %v7698_v43  ;;  %v7745_v63 = vadd.f32 %v7729_v19, %v15194_v31 }
 0x51b   : > { %v7765_v36 = vpack.c.bf16 %v7744_v38, %v7743_v28  ;;  %7302 = vrot.lane.b32.xlu2 %v15399_v14, %s17747_s26  ;;  %v7126_v39 = vpop.f32.mrf.mxu0  ;;  %v7746_v35 = vadd.f32 %v7730_v44, %v15207_v29  ;;  %v10668_v29 = vld [vmem:[%s16964_s14 + $0x10] sm:$0xff] }
 0x51c   : > { %v15423_v56 = vadd.f32 %v7126_v39, %v15116_v48  ;;  %8265 = vmatpush.bf16.msrb.mxu3 %v10668_v29 }
 0x51d   : > { %10460 = vmatmul.msk.bf16.gmra.mxu0 %vm17771_vm10, %v7765_v36  ;;  %v7766_v25 = vpack.c.bf16 %v7746_v35, %v7745_v63  ;;  %v7145_v38 = vpop.f32.mrf.mxu3 }
 0x51e   : > { %7456 = vadd.xlane.f32.xlu0 %v7455_v62  ;;  %v10871_v59 = vpop.eup %10870  ;;  %v15436_v62 = vadd.f32 %v7140_v12, %v15408_v46  ;;  %v15442_v48 = vadd.f32 %v7145_v38, %v15408_v46 }
 0x51f   : > { %v10873_v53 = vpop.eup %10872  ;;  %v7574_v32 = vmul.f32 %v10871_v59, %v7485_v58  ;;  %vm7580_vm3 = vweird.f32 %v10871_v59 }
 0x520   : > { %v7584_v2 = vmul.f32 %v10873_v53, %v7486_v10  ;;  %vm7590_vm6 = vweird.f32 %v10873_v53  ;;  %vm7581_vm9 = vmor %vm7579_vm7, %vm7580_vm3 }
 0x521   : > { %v7575_v31 = vmul.f32 %v10871_v59, %v7574_v32  ;;  %vm7591_vm11 = vmor %vm7589_vm0, %vm7590_vm6 }
 0x522   : > { %v7585_v28 = vmul.f32 %v10873_v53, %v7584_v2  ;;  %vm17775_vm0 = vmmov %vm17773_vm12 }
 0x523   : > { %8341 = vrot.lane.b32.xlu2 %v15416_v22, %s17747_s26  ;;  %v7576_v5 = vmul.f32 0.5, %v7575_v31 }
 0x524   : > { %v7586_v12 = vmul.f32 0.5, %v7585_v28 }
 0x525   : > { %v7577_v55 = vsub.f32 1.5, %v7576_v5 }
 0x526   : > { %v7587_v24 = vsub.f32 1.5, %v7586_v12 }
 0x527   : > { %v7578_v9 = vmul.f32 %v10871_v59, %v7577_v55 }
 0x528   : > { %v7588_v13 = vmul.f32 %v10873_v53, %v7587_v24 }
 0x529   : > { %v7582_v39 = vsel %vm7581_vm9, %v10871_v59, %v7578_v9 }
 0x52a   : > { %v7592_v61 = vsel %vm7591_vm11, %v10873_v53, %v7588_v13  ;;  %v7661_v20 = vmul.f32 %v7582_v39, %v14479_v51 }
 0x52b   : > { %v7662_v21 = vmul.f32 %v7592_v61, %v14537_v37 }
 0x52c   : > { %v7293_v19 = vpop.permute.xlu2 %7292  ;;  %v7680_v43 = vmul.f32 %v15263_v52, %v7661_v20 }
 0x52d   : > { %10461 = vmatmul.msk.bf16.gmra.mxu0 %vm17772_vm14, %v7766_v25  ;;  %v7715_v44 = vadd.f32 1.0, %v7293_v19  ;;  %v7681_v63 = vmul.f32 %v15263_v52, %v7662_v21 }
 0x52e   : > { %v7699_v35 = vadd.f32 %v15276_v26, %v7680_v43 }
 0x52f   : > { %7306 = vrot.lane.b32.xlu1 %v15423_v56, %s17747_s26  ;;  %v7700_v32 = vadd.f32 %v15276_v26, %v7681_v63 }
 0x530   : > { %v7731_v53 = vmul.f32 %v7715_v44, %v7699_v35 }
 0x532   : > { %7304 = vrot.lane.b32.xlu0 %v15429_v47, %s17747_s26  ;;  %v7747_v31 = vadd.f32 %v7731_v53, %v15212_v7 }
 0x537   : > { %8343 = vrot.lane.b32.xlu1 %v15436_v62, %s17747_s26  ;;  %v7448_v36 = vpop.xlane.xlu1 %7447 }
 0x538   : > { %v7472_v41 = vmul.f32 %v7448_v36, %v14422_v8 }
 0x53a   : > { %8347 = vrot.lane.b32.xlu0 %v15442_v48, %s17747_s26  ;;  %v7488_v18 = vadd.f32 1e-06, %v7472_v41 }
 0x53c   : > { %10874 = vrsqrt.f32 %v7488_v18  ;;  %vm7609_vm8 = vweird.f32 %v7488_v18 }
 0x53f   : > { %8345 = vrot.lane.b32.xlu1 %v15450_v17, %s17747_s26  ;;  %v7445_v4 = vpop.xlane.xlu0 %7444  ;;  %v7451_v28 = vpop.xlane.xlu1 %7450 }
 0x540   : > { %v7471_v54 = vmul.f32 %v7445_v4, %v14422_v8  ;;  %v7473_v55 = vmul.f32 %v7451_v28, %v14422_v8 }
 0x542   : > { %v7487_v1 = vadd.f32 1e-06, %v7471_v54  ;;  %v10875_v49 = vpop.eup %10874  ;;  %v7489_v41 = vadd.f32 1e-06, %v7473_v55 }
 0x543   : > { %v7604_v10 = vmul.f32 %v10875_v49, %v7488_v18  ;;  %vm7610_vm4 = vweird.f32 %v10875_v49 }
 0x544   : > { %10876 = vrsqrt.f32 %v7487_v1  ;;  %vm7611_vm2 = vmor %vm7609_vm8, %vm7610_vm4  ;;  %vm7599_vm5 = vweird.f32 %v7487_v1  ;;  %vm7619_vm14 = vweird.f32 %v7489_v41 }
 0x545   : > { %v7605_v2 = vmul.f32 %v10875_v49, %v7604_v10  ;;  %10878 = vrsqrt.f32 %v7489_v41 }
 0x547   : > { %v7606_v12 = vmul.f32 0.5, %v7605_v2  ;;  %v15482_v2 = vld [vmem:[%s16963_s13] ss:$0 sm:$0xff] }
 0x549   : > { %v7607_v4 = vsub.f32 1.5, %v7606_v12 }
 0x54a   : > { %v10877_v58 = vpop.eup %10876 }
 0x54b   : > { %v7594_v59 = vmul.f32 %v10877_v58, %v7487_v1  ;;  %v7608_v54 = vmul.f32 %v10875_v49, %v7607_v4  ;;  %vm7600_vm1 = vweird.f32 %v10877_v58  ;;  %v10879_v20 = vpop.eup %10878 }
 0x54c   : > { %vm7601_vm15 = vmor %vm7599_vm5, %vm7600_vm1  ;;  %v7614_v63 = vmul.f32 %v10879_v20, %v7489_v41  ;;  %vm7620_vm10 = vweird.f32 %v10879_v20 }
 0x54d   : > { %v7595_v37 = vmul.f32 %v10877_v58, %v7594_v59  ;;  %v7612_v7 = vsel %vm7611_vm2, %v10875_v49, %v7608_v54  ;;  %vm7621_vm3 = vmor %vm7619_vm14, %vm7620_vm10 }
 0x54e   : > { %v7664_v61 = vmul.f32 %v7612_v7, %v15173_v45  ;;  %v7615_v10 = vmul.f32 %v10879_v20, %v7614_v63  ;;  %v10666_v7 = vld [vmem:[%s16964_s14] sm:$0xff] }
 0x54f   : > { %v7596_v36 = vmul.f32 0.5, %v7595_v37 }
 0x550   : > { %v7683_v43 = vmul.f32 %v15263_v52, %v7664_v61 }
 0x551   : > { %v7597_v24 = vsub.f32 1.5, %v7596_v36 }
 0x552   : > { %v7295_v25 = vpop.permute.xlu0 %7294  ;;  %v7702_v35 = vadd.f32 %v15276_v26, %v7683_v43 }
 0x553   : > { %v7716_v51 = vadd.f32 1.0, %v7295_v25  ;;  %v7598_v9 = vmul.f32 %v10877_v58, %v7597_v24 }
 0x555   : > { %v7732_v38 = vmul.f32 %v7716_v51, %v7700_v32  ;;  %v10667_v32 = vld [vmem:[%s16964_s14 + $0x8] sm:$0xff]  ;;  %v7616_v51 = vmul.f32 0.5, %v7615_v10 }
 0x556   : > { %8266 = vmatpush.bf16.msrb.mxu3 %v10667_v32 }
 0x557   : > { %v7748_v29 = vadd.f32 %v7732_v38, %v15224_v16  ;;  %v7602_v16 = vsel %vm7601_vm15, %v10877_v58, %v7598_v9 }
 0x558   : > { %v7663_v13 = vmul.f32 %v7602_v16, %v15185_v0 }
 0x559   : > { %v7767_v5 = vpack.c.bf16 %v7748_v29, %v7747_v31 }
 0x55a   : > { %v7682_v19 = vmul.f32 %v15263_v52, %v7663_v13  ;;  %8267 = vmatpush.bf16.msrb.mxu3 %v10666_v7 }
 0x55b   : > { %10462 = vmatmul.msk.bf16.gmra.mxu0 %vm17773_vm12, %v7767_v5 }
 0x55c   : > { %v7701_v18 = vadd.f32 %v15276_v26, %v7682_v19 }
 0x55e   : > { %v7297_v21 = vpop.permute.xlu1 %7296 }
 0x55f   : > { %v7717_v1 = vadd.f32 1.0, %v7297_v21 }
 0x561   : > { %v7733_v49 = vmul.f32 %v7717_v1, %v7701_v18 }
 0x563   : > { %v7749_v0 = vadd.f32 %v7733_v49, %v15246_v40  ;;  %v7617_v40 = vsub.f32 1.5, %v7616_v51 }
 0x565   : > { %v7618_v31 = vmul.f32 %v10879_v20, %v7617_v40 }
 0x566   : > { %v7299_v39 = vpop.permute.xlu0 %7298 }
 0x567   : > { %v7718_v44 = vadd.f32 1.0, %v7299_v39  ;;  %v7622_v12 = vsel %vm7621_vm3, %v10879_v20, %v7618_v31 }
 0x568   : > { %v7665_v9 = vmul.f32 %v7622_v12, %v15188_v27 }
 0x569   : > { %v7734_v58 = vmul.f32 %v7718_v44, %v7702_v35 }
 0x56a   : > { %v7684_v27 = vmul.f32 %v15263_v52, %v7665_v9 }
 0x56b   : > { %v7750_v45 = vadd.f32 %v7734_v58, %v15270_v30 }
 0x56c   : > { %v7703_v1 = vadd.f32 %v15276_v26, %v7684_v27 }
 0x56d   : > { %v7768_v25 = vpack.c.bf16 %v7750_v45, %v7749_v0 }
 0x56e   : > { %v7454_v59 = vpop.xlane.xlu2 %7453 }
 0x56f   : > { %v7474_v53 = vmul.f32 %v7454_v59, %v14422_v8  ;;  %10463 = vmatmul.msk.bf16.gmra.mxu0 %vm17774_vm13, %v7768_v25 }
 0x571   : > { %v7490_v38 = vadd.f32 1e-06, %v7474_v53 }
 0x573   : > { %10880 = vrsqrt.f32 %v7490_v38  ;;  %vm7629_vm6 = vweird.f32 %v7490_v38 }
 0x576   : > { %v7301_v55 = vpop.permute.xlu2 %7300 }
 0x577   : > { %v7719_v44 = vadd.f32 1.0, %v7301_v55 }
 0x579   : > { %v10881_v28 = vpop.eup %10880  ;;  %v7735_v10 = vmul.f32 %v7719_v44, %v7703_v1 }
 0x57a   : > { %v7832_v30 = vpop.f32.mrf.mxu0  ;;  %v7624_v5 = vmul.f32 %v10881_v28, %v7490_v38  ;;  %vm7630_vm7 = vweird.f32 %v10881_v28 }
 0x57b   : > { %v15485_v37 = vadd.f32 %v15482_v2, %v7832_v30  ;;  %vm7631_vm9 = vmor %vm7629_vm6, %vm7630_vm7 }
 0x57c   : > { %v7625_v36 = vmul.f32 %v10881_v28, %v7624_v5 }
 0x57d   : > { %v10466_v29 = vmul.f32 -1.442695, %v15485_v37 }
 0x57e   : > { %v7626_v24 = vmul.f32 0.5, %v7625_v36  ;;  %v7303_v18 = vpop.permute.xlu2 %7302 }
 0x57f   : > { %10882 = vpow2.f32 %v10466_v29  ;;  %v7720_v45 = vadd.f32 1.0, %v7303_v18  ;;  %v7751_v29 = vadd.f32 %v7735_v10, %v15378_v23 }
 0x580   : > { %v7627_v13 = vsub.f32 1.5, %v7626_v24 }
 0x582   : > { %v7834_v4 = vpop.f32.mrf.mxu0  ;;  %v7628_v20 = vmul.f32 %v10881_v28, %v7627_v13 }
 0x583   : > { %v15489_v54 = vadd.f32 %v15482_v2, %v7834_v4 }
 0x584   : > { %v7632_v19 = vsel %vm7631_vm9, %v10881_v28, %v7628_v20  ;;  %vm17780_vm9 = vmmov %vm17775_vm0 }
 0x585   : > { %v10883_v16 = vpop.eup %10882  ;;  %v10467_v41 = vmul.f32 -1.442695, %v15489_v54  ;;  %v7666_v63 = vmul.f32 %v7632_v19, %v15292_v34 }
 0x586   : > { %v15496_v39 = vadd.f32 1.0, %v10883_v16 }
 0x587   : > { %10884 = vpow2.f32 %v10467_v41  ;;  %v7685_v35 = vmul.f32 %v15263_v52, %v7666_v63 }
 0x588   : > { %10886 = vrcp.f32 %v15496_v39  ;;  %v7947_v23 = vand.u32 2147483648, %v15496_v39  ;;  %vm7941_vm4 = vweird.f32 %v15496_v39  ;;  %v7945_v20 = vand.u32 2147483647, %v15496_v39 }
 0x589   : > { %v7460_v61 = vpop.xlane.xlu1 %7459  ;;  %v7704_v0 = vadd.f32 %v15276_v26, %v7685_v35 }
 0x58a   : > { %v7476_v21 = vmul.f32 %v7460_v61, %v14422_v8  ;;  %v7837_v51 = vpop.f32.mrf.mxu0  ;;  %v7948_v10 = vor.u32 1.1754944e-38, %v7947_v23  ;;  %vm7946_vm15 = vcmp.eq.f32.partialorder %v7945_v20, 8.507059e+37 }
 0x58b   : > { %v7736_v34 = vmul.f32 %v7720_v45, %v7704_v0  ;;  %v15510_v31 = vadd.f32 %v15482_v2, %v7837_v51 }
 0x58c   : > { %v7492_v43 = vadd.f32 1e-06, %v7476_v21 }
 0x58d   : > { %v10885_v49 = vpop.eup %10884  ;;  %v7752_v28 = vadd.f32 %v7736_v34, %v15399_v14  ;;  %v10468_v4 = vmul.f32 -1.442695, %v15510_v31 }
 0x58e   : > { %10888 = vrsqrt.f32 %v7492_v43  ;;  %v10887_v58 = vpop.eup %10886  ;;  %v7921_v59 = vadd.f32 1.0, %v10885_v49  ;;  %vm7649_vm1 = vweird.f32 %v7492_v43 }
 0x58f   : > { %v7937_v53 = vmul.f32 %v10887_v58, %v15496_v39  ;;  %v7769_v36 = vpack.c.bf16 %v7752_v28, %v7751_v29  ;;  %vm7942_vm11 = vweird.f32 %v10887_v58 }
 0x590   : > { %10890 = vrcp.f32 %v7921_v59  ;;  %vm15523_vm8 = vmor %vm7941_vm4, %vm7942_vm11  ;;  %v7962_v44 = vand.u32 2147483648, %v7921_v59  ;;  %vm7956_vm13 = vweird.f32 %v7921_v59 }
 0x591   : > { %v7457_v25 = vpop.xlane.xlu0 %7456  ;;  %v7938_v40 = vsub.f32 1.0, %v7937_v53  ;;  %10464 = vmatmul.msk.bf16.gmra.mxu0 %vm17775_vm0, %v7769_v36 }
 0x592   : > { %v7475_v32 = vmul.f32 %v7457_v25, %v14422_v8  ;;  %v7839_v13 = vpop.f32.mrf.mxu0 }
 0x593   : > { %v7939_v12 = vmul.f32 %v10887_v58, %v7938_v40  ;;  %v15519_v41 = vadd.f32 %v15482_v2, %v7839_v13 }
 0x594   : > { %v10889_v38 = vpop.eup %10888  ;;  %v15507_v30 = vadd.f32 1e-06, %v7475_v32  ;;  %v7963_v32 = vor.u32 1.1754944e-38, %v7962_v44 }
 0x595   : > { %v7644_v5 = vmul.f32 %v10889_v38, %v7492_v43  ;;  %v7940_v7 = vadd.f32 %v10887_v58, %v7939_v12  ;;  %vm7650_vm12 = vweird.f32 %v10889_v38  ;;  %v10469_v18 = vmul.f32 -1.442695, %v15519_v41 }
 0x596   : > { %10892 = vrsqrt.f32 %v15507_v30  ;;  %v10891_v24 = vpop.eup %10890  ;;  %vm15531_vm2 = vmor %vm7649_vm1, %vm7650_vm12  ;;  %v7960_v43 = vand.u32 2147483647, %v7921_v59  ;;  %vm7639_vm7 = vweird.f32 %v15507_v30 }
 0x597   : > { %v7645_v55 = vmul.f32 %v10889_v38, %v7644_v5  ;;  %10894 = vpow2.f32 %v10468_v4  ;;  %v7952_v16 = vmul.f32 %v10891_v24, %v7921_v59  ;;  %v7944_v1 = vsel %vm15523_vm8, %v10887_v58, %v7940_v7 }
 0x598   : > { %vm7957_vm5 = vweird.f32 %v10891_v24  ;;  %10896 = vpow2.f32 %v10469_v18  ;;  %v7949_v58 = vsel %vm7946_vm15, %v7948_v10, %v7944_v1  ;;  %vm7961_vm14 = vcmp.eq.f32.partialorder %v7960_v43, 8.507059e+37 }
 0x599   : > { %v7646_v9 = vmul.f32 0.5, %v7645_v55  ;;  %v7953_v21 = vsub.f32 1.0, %v7952_v16  ;;  %vm7958_vm10 = vmor %vm7956_vm13, %vm7957_vm5  ;;  %v8176_v5 = vmul.f32 %v7949_v58, %v15485_v37 }
 0x59a   : > { %v7842_v29 = vpop.f32.mrf.mxu0 }
 0x59b   : > { %v7647_v14 = vsub.f32 1.5, %v7646_v9  ;;  %v7954_v39 = vmul.f32 %v10891_v24, %v7953_v21  ;;  %v15544_v12 = vadd.f32 %v15482_v2, %v7842_v29 }
 0x59c   : > { %v10893_v61 = vpop.eup %10892 }
 0x59d   : > { %v7648_v19 = vmul.f32 %v10889_v38, %v7647_v14  ;;  %v7634_v63 = vmul.f32 %v10893_v61, %v15507_v30  ;;  %v10895_v49 = vpop.eup %10894  ;;  %v7955_v25 = vadd.f32 %v10891_v24, %v7954_v39  ;;  %vm7640_vm3 = vweird.f32 %v10893_v61 }
 0x59e   : > { %v15537_v53 = vadd.f32 1.0, %v10895_v49  ;;  %v10897_v36 = vpop.eup %10896  ;;  %vm7641_vm6 = vmor %vm7639_vm7, %vm7640_vm3  ;;  %v10470_v9 = vmul.f32 -1.442695, %v15544_v12 }
 0x59f   : > { %v7652_v0 = vsel %vm15531_vm2, %v10889_v38, %v7648_v19  ;;  %v7635_v45 = vmul.f32 %v10893_v61, %v7634_v63  ;;  %v7959_v40 = vsel %vm7958_vm10, %v10891_v24, %v7955_v25  ;;  %v7923_v24 = vadd.f32 1.0, %v10897_v36  ;;  %vm17783_vm2 = vmmov %vm17780_vm9 }
 0x5a0   : > { %v7668_v34 = vmul.f32 %v7652_v0, %v15353_v33  ;;  %10898 = vrcp.f32 %v15537_v53  ;;  %v7964_v28 = vsel %vm7961_vm14, %v7963_v32, %v7959_v40  ;;  %vm7971_vm11 = vweird.f32 %v15537_v53  ;;  %vm17784_vm13 = vmmov %vm17783_vm2 }
 0x5a1   : > { %v7636_v51 = vmul.f32 0.5, %v7635_v45  ;;  %v8177_v59 = vmul.f32 %v7964_v28, %v15489_v54  ;;  %10900 = vrcp.f32 %v7923_v24  ;;  %v7307_v37 = vpop.permute.xlu1 %7306  ;;  %v7977_v10 = vand.u32 2147483648, %v15537_v53 }
 0x5a2   : > { %v7687_v33 = vmul.f32 %v15263_v52, %v7668_v34  ;;  %10902 = vpow2.f32 %v10470_v9  ;;  %v7844_v14 = vpop.f32.mrf.mxu0  ;;  %v7722_v27 = vadd.f32 1.0, %v7307_v37  ;;  %v7990_v32 = vand.u32 2147483647, %v7923_v24 }
 0x5a3   : > { %v7637_v38 = vsub.f32 1.5, %v7636_v51  ;;  %v8200_v4 = vpack.c.bf16 %v8177_v59, %v8176_v5  ;;  %v7992_v51 = vand.u32 2147483648, %v7923_v24  ;;  %v7978_v28 = vor.u32 1.1754944e-38, %v7977_v10 }
 0x5a4   : > { %v7305_v23 = vpop.permute.xlu0 %7304  ;;  %v7706_v30 = vadd.f32 %v15276_v26, %v7687_v33  ;;  %vm7986_vm8 = vweird.f32 %v7923_v24  ;;  %vm7991_vm15 = vcmp.eq.f32.partialorder %v7990_v32, 8.507059e+37 }
 0x5a5   : > { %v7638_v55 = vmul.f32 %v10893_v61, %v7637_v38  ;;  %10498 = vmatmul.msk.bf16.vlgmr.msrb.gmra.mxu3 %vm17780_vm9, %v8200_v4  ;;  %v7721_v19 = vadd.f32 1.0, %v7305_v23  ;;  %v7993_v59 = vor.u32 1.1754944e-38, %v7992_v51 }
 0x5a6   : > { %v10899_v16 = vpop.eup %10898  ;;  %v7738_v18 = vmul.f32 %v7722_v27, %v7706_v30 }
 0x5a7   : > { %v7642_v7 = vsel %vm7641_vm6, %v10893_v61, %v7638_v55  ;;  %v7967_v54 = vmul.f32 %v10899_v16, %v15537_v53  ;;  %v15555_v61 = vadd.f32 %v15482_v2, %v7844_v14  ;;  %vm7972_vm0 = vweird.f32 %v10899_v16 }
 0x5a8   : > { %v7667_v13 = vmul.f32 %v7642_v7, %v15371_v42  ;;  %v10901_v42 = vpop.eup %10900  ;;  %vm15564_vm12 = vmor %vm7971_vm11, %vm7972_vm0 }
 0x5a9   : > { %v7968_v20 = vsub.f32 1.0, %v7967_v54  ;;  %v10471_v1 = vmul.f32 -1.442695, %v15555_v61  ;;  %v7982_v39 = vmul.f32 %v10901_v42, %v7923_v24  ;;  %v10903_v49 = vpop.eup %10902  ;;  %vm7987_vm4 = vweird.f32 %v10901_v42  ;;  %v15578_v54 = vpop.f32.mrf.mxu3 }
 0x5aa   : > { %v7686_v21 = vmul.f32 %v15263_v52, %v7667_v13  ;;  %v7975_v52 = vand.u32 2147483647, %v15537_v53  ;;  %v7924_v25 = vadd.f32 1.0, %v10903_v49  ;;  %v7847_v34 = vpop.f32.mrf.mxu0  ;;  %vm7988_vm5 = vmor %vm7986_vm8, %vm7987_vm4 }
 0x5ab   : > { %v7969_v44 = vmul.f32 %v10899_v16, %v7968_v20  ;;  %10904 = vpow2.f32 %v10471_v1  ;;  %v7983_v0 = vsub.f32 1.0, %v7982_v39 }
 0x5ac   : > { %v7705_v63 = vadd.f32 %v15276_v26, %v7686_v21  ;;  %v7754_v26 = vadd.f32 %v7738_v18, %v15423_v56  ;;  %10906 = vrcp.f32 %v7924_v25  ;;  %vm7976_vm1 = vcmp.eq.f32.partialorder %v7975_v52, 8.507059e+37 }
 0x5ad   : > { %v7970_v35 = vadd.f32 %v10899_v16, %v7969_v44  ;;  %v7984_v29 = vmul.f32 %v10901_v42, %v7983_v0  ;;  %v8007_v44 = vand.u32 2147483648, %v7924_v25  ;;  %vm8001_vm14 = vweird.f32 %v7924_v25 }
 0x5ae   : > { %v7737_v43 = vmul.f32 %v7721_v19, %v7705_v63  ;;  %v8005_v63 = vand.u32 2147483647, %v7924_v25 }
 0x5af   : > { %v7974_v40 = vsel %vm15564_vm12, %v10899_v16, %v7970_v35  ;;  %v7985_v56 = vadd.f32 %v10901_v42, %v7984_v29  ;;  %v8008_v52 = vor.u32 1.1754944e-38, %v8007_v44  ;;  %vm17785_vm12 = vmmov %vm17783_vm2 }
 0x5b0   : > { %v7753_v45 = vadd.f32 %v7737_v43, %v15429_v47  ;;  %v15571_v47 = vadd.f32 %v15482_v2, %v7847_v34  ;;  %v7979_v5 = vsel %vm7976_vm1, %v7978_v28, %v7974_v40  ;;  %vm8006_vm6 = vcmp.eq.f32.partialorder %v8005_v63, 8.507059e+37 }
 0x5b1   : > { %v10905_v38 = vpop.eup %10904  ;;  %v7989_v55 = vsel %vm7988_vm5, %v10901_v42, %v7985_v56  ;;  %v8178_v7 = vmul.f32 %v7979_v5, %v15510_v31  ;;  %v15585_v49 = vpop.f32.mrf.mxu3 }
 0x5b2   : > { %v7770_v53 = vpack.c.bf16 %v7754_v26, %v7753_v45  ;;  %v10472_v36 = vmul.f32 -1.442695, %v15571_v47  ;;  %v7925_v33 = vadd.f32 1.0, %v10905_v38  ;;  %v7994_v4 = vsel %vm7991_vm15, %v7993_v59, %v7989_v55  ;;  %v10907_v9 = vpop.eup %10906  ;;  %v7849_v37 = vpop.f32.mrf.mxu0 }
 0x5b3   : > { %v8179_v16 = vmul.f32 %v7994_v4, %v15519_v41  ;;  %v7997_v24 = vmul.f32 %v10907_v9, %v7924_v25  ;;  %v15581_v23 = vadd.f32 %v15482_v2, %v7849_v37  ;;  %vm8002_vm10 = vweird.f32 %v10907_v9 }
 0x5b4   : > { %10465 = vmatmul.msk.bf16.gmra.mxu0 %vm17783_vm2, %v7770_v53  ;;  %10908 = vpow2.f32 %v10472_v36  ;;  %vm8003_vm3 = vmor %vm8001_vm14, %vm8002_vm10  ;;  %v8022_v1 = vand.u32 2147483648, %v7925_v33  ;;  %v8020_v39 = vand.u32 2147483647, %v7925_v33  ;;  %vm8016_vm9 = vweird.f32 %v7925_v33 }
 0x5b5   : > { %10910 = vrcp.f32 %v7925_v33  ;;  %v8201_v13 = vpack.c.bf16 %v8179_v16, %v8178_v7  ;;  %v7998_v30 = vsub.f32 1.0, %v7997_v24  ;;  %v10473_v14 = vmul.f32 -1.442695, %v15581_v23  ;;  %vm17786_vm14 = vmmov %vm17785_vm12 }
 0x5b6   : > { %v8023_v58 = vor.u32 1.1754944e-38, %v8022_v1  ;;  %vm8021_vm11 = vcmp.eq.f32.partialorder %v8020_v39, 8.507059e+37 }
 0x5b7   : > { %10499 = vmatmul.msk.bf16.gmra.mxu3 %vm17784_vm13, %v8201_v13  ;;  %v7999_v21 = vmul.f32 %v10907_v9, %v7998_v30  ;;  %10912 = vpow2.f32 %v10473_v14 }
 0x5b9   : > { %v8000_v41 = vadd.f32 %v10907_v9, %v7999_v21  ;;  %v15590_v38 = vpop.f32.mrf.mxu3 }
 0x5ba   : > { %v10909_v20 = vpop.eup %10908 }
 0x5bb   : > { %v10911_v27 = vpop.eup %10910  ;;  %v7926_v31 = vadd.f32 1.0, %v10909_v20  ;;  %v8004_v42 = vsel %vm8003_vm3, %v10907_v9, %v8000_v41 }
 0x5bc   : > { %v8012_v19 = vmul.f32 %v10911_v27, %v7925_v33  ;;  %vm8017_vm7 = vweird.f32 %v10911_v27  ;;  %v8009_v26 = vsel %vm8006_vm6, %v8008_v52, %v8004_v42 }
 0x5bd   : > { %10914 = vrcp.f32 %v7926_v31  ;;  %v10913_v43 = vpop.eup %10912  ;;  %vm8018_vm0 = vmor %vm8016_vm9, %vm8017_vm7  ;;  %v8180_v34 = vmul.f32 %v8009_v26, %v15544_v12  ;;  %v8037_v36 = vand.u32 2147483648, %v7926_v31  ;;  %vm8031_vm1 = vweird.f32 %v7926_v31 }
 0x5be   : > { %v8013_v18 = vsub.f32 1.0, %v8012_v19  ;;  %v7927_v0 = vadd.f32 1.0, %v10913_v43  ;;  %v8035_v55 = vand.u32 2147483647, %v7926_v31 }
 0x5bf   : > { %v8038_v7 = vor.u32 1.1754944e-38, %v8037_v36 }
 0x5c0   : > { %v8014_v35 = vmul.f32 %v10911_v27, %v8013_v18  ;;  %10916 = vrcp.f32 %v7927_v0  ;;  %v8052_v4 = vand.u32 2147483648, %v7927_v0  ;;  %vm8036_vm5 = vcmp.eq.f32.partialorder %v8035_v55, 8.507059e+37 }
 0x5c1   : > { %vm8046_vm15 = vweird.f32 %v7927_v0  ;;  %v15592_v14 = vpop.f32.mrf.mxu3 }
 0x5c2   : > { %v8015_v10 = vadd.f32 %v10911_v27, %v8014_v35  ;;  %v8053_v37 = vor.u32 1.1754944e-38, %v8052_v4 }
 0x5c3   : > { %v10915_v45 = vpop.eup %10914 }
 0x5c4   : > { %v8019_v25 = vsel %vm8018_vm0, %v10911_v27, %v8015_v10  ;;  %v8027_v32 = vmul.f32 %v10915_v45, %v7926_v31  ;;  %vm8032_vm4 = vweird.f32 %v10915_v45 }
 0x5c5   : > { %v8024_v51 = vsel %vm8021_vm11, %v8023_v58, %v8019_v25  ;;  %vm8033_vm8 = vmor %vm8031_vm1, %vm8032_vm4 }
 0x5c6   : > { %v8181_v40 = vmul.f32 %v8024_v51, %v15555_v61  ;;  %v8028_v29 = vsub.f32 1.0, %v8027_v32  ;;  %v10917_v56 = vpop.eup %10916  ;;  %v8050_v61 = vand.u32 2147483647, %v7927_v0  ;;  %vm17787_vm1 = vmmov %vm17786_vm14 }
 0x5c7   : > { %v8042_v59 = vmul.f32 %v10917_v56, %v7927_v0  ;;  %vm8047_vm2 = vweird.f32 %v10917_v56 }
 0x5c8   : > { %v8202_v53 = vpack.c.bf16 %v8181_v40, %v8180_v34  ;;  %v8029_v28 = vmul.f32 %v10915_v45, %v8028_v29  ;;  %vm8048_vm13 = vmor %vm8046_vm15, %vm8047_vm2  ;;  %vm8051_vm10 = vcmp.eq.f32.partialorder %v8050_v61, 8.507059e+37 }
 0x5c9   : > { %v8043_v33 = vsub.f32 1.0, %v8042_v59  ;;  %v15598_v44 = vpop.f32.mrf.mxu3 }
 0x5ca   : > { %10500 = vmatmul.msk.bf16.gmra.mxu3 %vm17785_vm12, %v8202_v53  ;;  %v8030_v5 = vadd.f32 %v10915_v45, %v8029_v28 }
 0x5cb   : > { %v8044_v9 = vmul.f32 %v10917_v56, %v8043_v33 }
 0x5cc   : > { %v8034_v12 = vsel %vm8033_vm8, %v10915_v45, %v8030_v5 }
 0x5cd   : > { %v8045_v16 = vadd.f32 %v10917_v56, %v8044_v9  ;;  %v8039_v24 = vsel %vm8036_vm5, %v8038_v7, %v8034_v12 }
 0x5ce   : > { %v8182_v20 = vmul.f32 %v8039_v24, %v15571_v47 }
 0x5cf   : > { %v8049_v13 = vsel %vm8048_vm13, %v10917_v56, %v8045_v16 }
 0x5d0   : > { %v8054_v30 = vsel %vm8051_vm10, %v8053_v37, %v8049_v13 }
 0x5d1   : > { %v8183_v21 = vmul.f32 %v8054_v30, %v15581_v23  ;;  %v15601_v47 = vpop.f32.mrf.mxu3 }
 0x5d3   : > { %v8203_v27 = vpack.c.bf16 %v8183_v21, %v8182_v20 }
 0x5d8   : > { %v7852_v31 = vpop.f32.mrf.mxu0 }
 0x5d9   : > { %v7853_v41 = vadd.f32 %v15482_v2, %v7852_v31  ;;  %v15606_v25 = vpop.f32.mrf.mxu3 }
 0x5da   : > { %10501 = vmatmul.msk.bf16.gmra.mxu3 %vm17786_vm14, %v8203_v27 }
 0x5db   : > { %v10474_v19 = vmul.f32 -1.442695, %v7853_v41 }
 0x5dd   : > { %10918 = vpow2.f32 %v10474_v19 }
 0x5e0   : > { %v7854_v63 = vpop.f32.mrf.mxu0 }
 0x5e1   : > { %v7855_v18 = vadd.f32 %v15482_v2, %v7854_v63  ;;  %v15610_v24 = vpop.f32.mrf.mxu3 }
 0x5e3   : > { %v10919_v1 = vpop.eup %10918  ;;  %v10475_v42 = vmul.f32 -1.442695, %v7855_v18 }
 0x5e4   : > { %v7928_v35 = vadd.f32 1.0, %v10919_v1 }
 0x5e5   : > { %10920 = vpow2.f32 %v10475_v42 }
 0x5e6   : > { %10922 = vrcp.f32 %v7928_v35  ;;  %v8067_v40 = vand.u32 2147483648, %v7928_v35  ;;  %vm8061_vm7 = vweird.f32 %v7928_v35  ;;  %v8065_v29 = vand.u32 2147483647, %v7928_v35 }
 0x5e8   : > { %v8068_v36 = vor.u32 1.1754944e-38, %v8067_v40  ;;  %vm8066_vm0 = vcmp.eq.f32.partialorder %v8065_v29, 8.507059e+37 }
 0x5e9   : > { %v15613_v1 = vpop.f32.mrf.mxu3 }
 0x5eb   : > { %v10921_v23 = vpop.eup %10920 }
 0x5ec   : > { %v10923_v39 = vpop.eup %10922  ;;  %v7929_v43 = vadd.f32 1.0, %v10921_v23  ;;  %v7857_v45 = vpop.f32.mrf.mxu0 }
 0x5ed   : > { %v8057_v52 = vmul.f32 %v10923_v39, %v7928_v35  ;;  %v15604_v26 = vadd.f32 %v15482_v2, %v7857_v45  ;;  %vm8062_vm3 = vweird.f32 %v10923_v39 }
 0x5ee   : > { %10924 = vrcp.f32 %v7929_v43  ;;  %vm8063_vm6 = vmor %vm8061_vm7, %vm8062_vm3  ;;  %v8082_v28 = vand.u32 2147483648, %v7929_v43  ;;  %v8080_v59 = vand.u32 2147483647, %v7929_v43  ;;  %vm8076_vm11 = vweird.f32 %v7929_v43 }
 0x5ef   : > { %v8058_v10 = vsub.f32 1.0, %v8057_v52  ;;  %v10476_v34 = vmul.f32 -1.442695, %v15604_v26  ;;  %vm17788_vm7 = vmmov %vm17787_vm1 }
 0x5f0   : > { %v8083_v9 = vor.u32 1.1754944e-38, %v8082_v28  ;;  %vm8081_vm4 = vcmp.eq.f32.partialorder %v8080_v59, 8.507059e+37 }
 0x5f1   : > { %v8059_v0 = vmul.f32 %v10923_v39, %v8058_v10  ;;  %10926 = vpow2.f32 %v10476_v34  ;;  %v15615_v10 = vpop.f32.mrf.mxu3 }
 0x5f3   : > { %v8060_v32 = vadd.f32 %v10923_v39, %v8059_v0 }
 0x5f4   : > { %v10925_v58 = vpop.eup %10924  ;;  %v7859_v55 = vpop.f32.mrf.mxu0 }
 0x5f5   : > { %v8072_v51 = vmul.f32 %v10925_v58, %v7929_v43  ;;  %v8064_v56 = vsel %vm8063_vm6, %v10923_v39, %v8060_v32  ;;  %vm8077_vm9 = vweird.f32 %v10925_v58  ;;  %v7860_v4 = vadd.f32 %v15482_v2, %v7859_v55 }
 0x5f6   : > { %v8069_v12 = vsel %vm8066_vm0, %v8068_v36, %v8064_v56  ;;  %vm8078_vm12 = vmor %vm8076_vm11, %vm8077_vm9 }
 0x5f7   : > { %v8073_v53 = vsub.f32 1.0, %v8072_v51  ;;  %v10927_v61 = vpop.eup %10926  ;;  %v10477_v16 = vmul.f32 -1.442695, %v7860_v4  ;;  %v8184_v30 = vmul.f32 %v8069_v12, %v7853_v41 }
 0x5f8   : > { %v7930_v13 = vadd.f32 1.0, %v10927_v61 }
 0x5f9   : > { %v8074_v5 = vmul.f32 %v10925_v58, %v8073_v53  ;;  %10928 = vpow2.f32 %v10477_v16 }
 0x5fa   : > { %10930 = vrcp.f32 %v7930_v13  ;;  %v8097_v41 = vand.u32 2147483648, %v7930_v13  ;;  %vm8091_vm2 = vweird.f32 %v7930_v13 }
 0x5fb   : > { %v8075_v33 = vadd.f32 %v10925_v58, %v8074_v5 }
 0x5fc   : > { %v8098_v34 = vor.u32 1.1754944e-38, %v8097_v41 }
 0x5fd   : > { %v8079_v7 = vsel %vm8078_vm12, %v10925_v58, %v8075_v33 }
 0x5fe   : > { %v8084_v37 = vsel %vm8081_vm4, %v8083_v9, %v8079_v7  ;;  %v15622_v9 = vpop.f32.mrf.mxu3 }
 0x5ff   : > { %v8185_v20 = vmul.f32 %v8084_v37, %v7855_v18  ;;  %v10929_v27 = vpop.eup %10928  ;;  %v8095_v18 = vand.u32 2147483647, %v7930_v13 }
 0x600   : > { %v10931_v31 = vpop.eup %10930  ;;  %v7931_v19 = vadd.f32 1.0, %v10929_v27 }
 0x601   : > { %v8204_v21 = vpack.c.bf16 %v8185_v20, %v8184_v30  ;;  %v8087_v63 = vmul.f32 %v10931_v31, %v7930_v13  ;;  %vm8092_vm8 = vweird.f32 %v10931_v31  ;;  %vm8096_vm13 = vcmp.eq.f32.partialorder %v8095_v18, 8.507059e+37 }
 0x602   : > { %10932 = vrcp.f32 %v7931_v19  ;;  %vm8093_vm5 = vmor %vm8091_vm2, %vm8092_vm8  ;;  %v8112_v0 = vand.u32 2147483648, %v7931_v19  ;;  %v8110_v32 = vand.u32 2147483647, %v7931_v19  ;;  %vm8106_vm10 = vweird.f32 %v7931_v19 }
 0x603   : > { %10502 = vmatmul.msk.bf16.gmra.mxu3 %vm17787_vm1, %v8204_v21  ;;  %v8088_v42 = vsub.f32 1.0, %v8087_v63  ;;  %vm17790_vm2 = vmmov %vm17788_vm7 }
 0x604   : > { %v8113_v28 = vor.u32 1.1754944e-38, %v8112_v0  ;;  %vm8111_vm3 = vcmp.eq.f32.partialorder %v8110_v32, 8.507059e+37 }
 0x605   : > { %v8089_v35 = vmul.f32 %v10931_v31, %v8088_v42 }
 0x606   : > { %v15626_v30 = vpop.f32.mrf.mxu3 }
 0x607   : > { %v8090_v39 = vadd.f32 %v10931_v31, %v8089_v35 }
 0x608   : > { %v10933_v23 = vpop.eup %10932 }
 0x609   : > { %v8102_v43 = vmul.f32 %v10933_v23, %v7931_v19  ;;  %v8094_v45 = vsel %vm8093_vm5, %v10931_v31, %v8090_v39  ;;  %vm8107_vm15 = vweird.f32 %v10933_v23  ;;  %v15631_v31 = vld [vmem:[%s16965_s15] ss:$0 sm:$0xff]  ;;  %vm17791_vm5 = vmmov %vm17790_vm2 }
 0x60a   : > { %v8099_v53 = vsel %vm8096_vm13, %v8098_v34, %v8094_v45  ;;  %vm8108_vm14 = vmor %vm8106_vm10, %vm8107_vm15 }
 0x60b   : > { %v8103_v52 = vsub.f32 1.0, %v8102_v43  ;;  %v8186_v36 = vmul.f32 %v8099_v53, %v15604_v26  ;;  %vm17794_vm15 = vmmov %vm17790_vm2 }
 0x60c   : > { %vm17797_vm13 = vmmov %vm17790_vm2 }
 0x60d   : > { %v8104_v58 = vmul.f32 %v10933_v23, %v8103_v52 }
 0x60e   : > { %v7862_v51 = vpop.f32.mrf.mxu0 }
 0x60f   : > { %v15618_v40 = vadd.f32 %v15482_v2, %v7862_v51  ;;  %v8105_v29 = vadd.f32 %v10933_v23, %v8104_v58 }
 0x611   : > { %v10478_v56 = vmul.f32 -1.442695, %v15618_v40  ;;  %v8109_v5 = vsel %vm8108_vm14, %v10933_v23, %v8105_v29 }
 0x612   : > { %v8114_v59 = vsel %vm8111_vm3, %v8113_v28, %v8109_v5 }
 0x613   : > { %10934 = vpow2.f32 %v10478_v56  ;;  %v8187_v55 = vmul.f32 %v8114_v59, %v7860_v4 }
 0x615   : > { %v8205_v33 = vpack.c.bf16 %v8187_v55, %v8186_v36 }
 0x616   : > { %v7864_v12 = vpop.f32.mrf.mxu0 }
 0x617   : > { %v7865_v61 = vadd.f32 %v15482_v2, %v7864_v12  ;;  %10503 = vmatmul.msk.bf16.gmra.mxu3 %vm17788_vm7, %v8205_v33 }
 0x619   : > { %v10935_v7 = vpop.eup %10934  ;;  %v10479_v16 = vmul.f32 -1.442695, %v7865_v61 }
 0x61a   : > { %v7932_v37 = vadd.f32 1.0, %v10935_v7 }
 0x61b   : > { %10936 = vpow2.f32 %v10479_v16 }
 0x61c   : > { %10938 = vrcp.f32 %v7932_v37  ;;  %v8127_v43 = vand.u32 2147483648, %v7932_v37  ;;  %vm8121_vm9 = vweird.f32 %v7932_v37  ;;  %v8125_v18 = vand.u32 2147483647, %v7932_v37 }
 0x61e   : > { %v8128_v29 = vor.u32 1.1754944e-38, %v8127_v43  ;;  %vm8126_vm12 = vcmp.eq.f32.partialorder %v8125_v18, 8.507059e+37  ;;  %v17795_v43 = vld [vmem:[#allocation116_spill] sm:$0xff] }
 0x621   : > { %v10937_v13 = vpop.eup %10936 }
 0x622   : > { %v10939_v20 = vpop.eup %10938  ;;  %v7933_v21 = vadd.f32 1.0, %v10937_v13 }
 0x623   : > { %v8117_v26 = vmul.f32 %v10939_v20, %v7932_v37  ;;  %vm8122_vm6 = vweird.f32 %v10939_v20 }
 0x624   : > { %10940 = vrcp.f32 %v7933_v21  ;;  %vm8123_vm0 = vmor %vm8121_vm9, %vm8122_vm6  ;;  %v8140_v45 = vand.u32 2147483647, %v7933_v21  ;;  %v8142_v58 = vand.u32 2147483648, %v7933_v21  ;;  %vm8136_vm4 = vweird.f32 %v7933_v21 }
 0x625   : > { %v8118_v4 = vsub.f32 1.0, %v8117_v26 }
 0x626   : > { %v8143_v5 = vor.u32 1.1754944e-38, %v8142_v58  ;;  %vm8141_vm8 = vcmp.eq.f32.partialorder %v8140_v45, 8.507059e+37 }
 0x627   : > { %v8119_v27 = vmul.f32 %v10939_v20, %v8118_v4 }
 0x628   : > { %v8269_v19 = vpop.f32.mrf.mxu3 }
 0x629   : > { %v8120_v35 = vadd.f32 %v10939_v20, %v8119_v27  ;;  %v8270_v41 = vadd.f32 %v15631_v31, %v8269_v19 }
 0x62a   : > { %v10941_v63 = vpop.eup %10940 }
 0x62b   : > { %v8132_v23 = vmul.f32 %v10941_v63, %v7933_v21  ;;  %v8309_v32 = vmul.f32 %v8270_v41, %v15416_v22  ;;  %v8124_v51 = vsel %vm8123_vm0, %v10939_v20, %v8120_v35  ;;  %vm8137_vm11 = vweird.f32 %v10941_v63 }
 0x62c   : > { %v8129_v56 = vsel %vm8126_vm12, %v8128_v29, %v8124_v51  ;;  %vm8138_vm1 = vmor %vm8136_vm4, %vm8137_vm11 }
 0x62d   : > { %v8133_v52 = vsub.f32 1.0, %v8132_v23  ;;  %v15640_v53 = vadd.f32 %v8309_v32, %v17676_v11  ;;  %v8188_v16 = vmul.f32 %v8129_v56, %v15618_v40  ;;  %vm17798_vm12 = vmmov %vm17790_vm2 }
 0x62e   : > { %vm17801_vm4 = vmmov %vm17790_vm2 }
 0x62f   : > { %v8134_v34 = vmul.f32 %v10941_v63, %v8133_v52  ;;  %17789 = vst [vmem:[#allocation65_spill] sm:$0xff] %v15640_v53  ;;  %v8409_v33 = vsel %vm17790_vm2, %v15640_v53, 0.0 }
 0x630   : > { %v8271_v22 = vpop.f32.mrf.mxu3  ;;  %8410 = vadd.xlane.f32.xlu2 %v8409_v33 }
 0x631   : > { %v7867_v42 = vpop.f32.mrf.mxu0  ;;  %v8135_v28 = vadd.f32 %v10941_v63, %v8134_v34  ;;  %v8272_v7 = vadd.f32 %v15631_v31, %v8271_v22  ;;  %v7154_v22 = vadd.f32 %v15590_v38, %v15408_v46 }
 0x632   : > { %v15634_v39 = vadd.f32 %v15482_v2, %v7867_v42 }
 0x633   : > { %v8139_v36 = vsel %vm8138_vm1, %v10941_v63, %v8135_v28  ;;  %v8310_v21 = vmul.f32 %v8272_v7, %v15436_v62  ;;  %vm17804_vm1 = vmmov %vm17790_vm2 }
 0x634   : > { %v10480_v0 = vmul.f32 -1.442695, %v15634_v39  ;;  %v8144_v12 = vsel %vm8141_vm8, %v8143_v5, %v8139_v36  ;;  %vm17809_vm8 = vmmov %vm17804_vm1 }
 0x635   : > { %v8189_v37 = vmul.f32 %v8144_v12, %v7865_v61  ;;  %vm17812_vm2 = vmmov %vm17804_vm1 }
 0x636   : > { %10942 = vpow2.f32 %v10480_v0 }
 0x637   : > { %v8206_v26 = vpack.c.bf16 %v8189_v37, %v8188_v16 }
 0x639   : > { %v7869_v59 = vpop.f32.mrf.mxu0  ;;  %10504 = vmatmul.msk.bf16.gmra.mxu3 %vm17791_vm5, %v8206_v26  ;;  %vm17813_vm5 = vmmov %vm17804_vm1 }
 0x63a   : > { %v7870_v55 = vadd.f32 %v15482_v2, %v7869_v59  ;;  %v17792_v2 = vld [vmem:[#allocation88_spill] sm:$0xff]  ;;  %v8274_v19 = vpop.f32.mrf.mxu3 }
 0x63b   : > { %v15650_v4 = vadd.f32 %v8310_v21, %v17792_v2  ;;  %v8275_v40 = vadd.f32 %v15631_v31, %v8274_v19  ;;  %v7149_v21 = vadd.f32 %v15578_v54, %v15408_v46 }
 0x63c   : > { %v10943_v11 = vpop.eup %10942  ;;  %v10481_v13 = vmul.f32 -1.442695, %v7870_v55 }
 0x63d   : > { %v7934_v20 = vadd.f32 1.0, %v10943_v11  ;;  %17793 = vst [vmem:[#allocation83_spill] sm:$0xff] %v15650_v4  ;;  %v8412_v27 = vsel %vm17794_vm15, %v15650_v4, 0.0  ;;  %v8311_v62 = vmul.f32 %v8275_v40, %v15450_v17  ;;  %v7151_v17 = vadd.f32 %v15585_v49, %v15408_v46  ;;  %vm17816_vm15 = vmmov %vm17804_vm1 }
 0x63e   : > { %10944 = vpow2.f32 %v10481_v13  ;;  %8413 = vadd.xlane.f32.xlu0 %v8412_v27  ;;  %v17799_v27 = vld [vmem:[#allocation147_spill] sm:$0xff] }
 0x63f   : > { %10946 = vrcp.f32 %v7934_v20  ;;  %v15657_v41 = vadd.f32 %v8311_v62, %v17795_v43  ;;  %v8157_v32 = vand.u32 2147483648, %v7934_v20  ;;  %vm8151_vm14 = vweird.f32 %v7934_v20 }
 0x640   : > { %v8155_v51 = vand.u32 2147483647, %v7934_v20 }
 0x641   : > { %17796 = vst [vmem:[#allocation50_spill] sm:$0xff] %v15657_v41  ;;  %v8415_v52 = vsel %vm17797_vm13, %v15657_v41, 0.0  ;;  %v8158_v59 = vor.u32 1.1754944e-38, %v8157_v32  ;;  %vm17819_vm13 = vmmov %vm17804_vm1 }
 0x642   : > { %8416 = vadd.xlane.f32.xlu1 %v8415_v52  ;;  %vm8156_vm6 = vcmp.eq.f32.partialorder %v8155_v51, 8.507059e+37  ;;  %v8276_v49 = vpop.f32.mrf.mxu3  ;;  %v17805_v52 = vld [vmem:[#allocation104_spill] sm:$0xff] }
 0x643   : > { %v8277_v2 = vadd.f32 %v15631_v31, %v8276_v49 }
 0x644   : > { %v10945_v61 = vpop.eup %10944 }
 0x645   : > { %v10947_v63 = vpop.eup %10946  ;;  %v7935_v42 = vadd.f32 1.0, %v10945_v61 }
 0x646   : > { %v8147_v35 = vmul.f32 %v10947_v63, %v7934_v20  ;;  %vm8152_vm10 = vweird.f32 %v10947_v63  ;;  %v7156_v20 = vadd.f32 %v15592_v14, %v15408_v46 }
 0x647   : > { %10948 = vrcp.f32 %v7935_v42  ;;  %vm8153_vm3 = vmor %vm8151_vm14, %vm8152_vm10  ;;  %v8172_v29 = vand.u32 2147483648, %v7935_v42  ;;  %v8170_v5 = vand.u32 2147483647, %v7935_v42  ;;  %vm8166_vm9 = vweird.f32 %v7935_v42 }
 0x648   : > { %v8148_v23 = vsub.f32 1.0, %v8147_v35  ;;  %8351 = vrot.lane.b32.xlu2 %v7151_v17, %s17747_s26  ;;  %vm17821_vm10 = vmmov %vm17804_vm1 }
 0x649   : > { %v8173_v12 = vor.u32 1.1754944e-38, %v8172_v29  ;;  %vm8171_vm11 = vcmp.eq.f32.partialorder %v8170_v5, 8.507059e+37  ;;  %v17810_v29 = vld [vmem:[#allocation148_spill] sm:$0xff]  ;;  %vm17823_vm14 = vmmov %vm17804_vm1 }
 0x64a   : > { %v8149_v18 = vmul.f32 %v10947_v63, %v8148_v23 }
 0x64c   : > { %v8150_v45 = vadd.f32 %v10947_v63, %v8149_v18 }
 0x64d   : > { %v10949_v0 = vpop.eup %10948  ;;  %v8279_v38 = vpop.f32.mrf.mxu3 }
 0x64e   : > { %v8162_v58 = vmul.f32 %v10949_v0, %v7935_v42  ;;  %v8154_v28 = vsel %vm8153_vm3, %v10947_v63, %v8150_v45  ;;  %vm8167_vm7 = vweird.f32 %v10949_v0  ;;  %v8280_v40 = vadd.f32 %v15631_v31, %v8279_v38  ;;  %v17802_v42 = vld [vmem:[#allocation96_spill] sm:$0xff]  ;;  %vm17824_vm3 = vmmov %vm17804_vm1 }
 0x64f   : > { %v8159_v33 = vsel %vm8156_vm6, %v8158_v59, %v8154_v28  ;;  %vm8168_vm0 = vmor %vm8166_vm9, %vm8167_vm7 }
 0x650   : > { %v8163_v34 = vsub.f32 1.0, %v8162_v58  ;;  %v8190_v16 = vmul.f32 %v8159_v33, %v15634_v39  ;;  %v8312_v39 = vmul.f32 %v8277_v2, %v15442_v48  ;;  %v8313_v14 = vmul.f32 %v8280_v40, %v7149_v21  ;;  %v17807_v58 = vld [vmem:[#allocation135_spill] sm:$0xff]  ;;  %vm17825_vm7 = vmmov %vm17804_vm1 }
 0x651   : > { %vm17827_vm6 = vmmov %vm17804_vm1 }
 0x652   : > { %v8164_v56 = vmul.f32 %v10949_v0, %v8163_v34  ;;  %8353 = vrot.lane.b32.xlu0 %v7154_v22, %s17747_s26  ;;  %v15678_v19 = vadd.f32 %v8312_v39, %v17799_v27  ;;  %v15685_v62 = vadd.f32 %v8313_v14, %v17802_v42  ;;  %v15747_v14 = vpop.permute.xlu0 %8347  ;;  %vm17829_vm9 = vmmov %vm17804_vm1 }
 0x654   : > { %v8165_v36 = vadd.f32 %v10949_v0, %v8164_v56  ;;  %17800 = vst [vmem:[#allocation81_spill] sm:$0xff] %v15678_v19  ;;  %v8418_v61 = vsel %vm17801_vm4, %v15678_v19, 0.0  ;;  %v8421_v18 = vsel %vm17804_vm1, %v15685_v62, 0.0 }
 0x655   : > { %v8281_v26 = vpop.f32.mrf.mxu3  ;;  %17803 = vst [vmem:[#allocation98_spill] sm:$0xff] %v15685_v62 }
 0x656   : > { %v8169_v7 = vsel %vm8168_vm0, %v10949_v0, %v8165_v36  ;;  %v8282_v63 = vadd.f32 %v15631_v31, %v8281_v26  ;;  %vm17830_vm0 = vmmov %vm17804_vm1 }
 0x657   : > { %v8174_v11 = vsel %vm8171_vm11, %v8173_v12, %v8169_v7  ;;  %v15717_v12 = vadd.f32 %v15601_v47, %v15408_v46  ;;  %v15730_v47 = vadd.f32 %v15606_v25, %v15408_v46  ;;  %v15744_v25 = vpop.permute.xlu1 %8343  ;;  %vm17832_vm11 = vmmov %vm17830_vm0 }
 0x658   : > { %v8191_v37 = vmul.f32 %v8174_v11, %v7870_v55  ;;  %v8314_v48 = vmul.f32 %v8282_v63, %v7151_v17  ;;  %v15701_v17 = vadd.f32 %v15598_v44, %v15408_v46  ;;  %vm17834_vm4 = vmmov %vm17830_vm0 }
 0x659   : > { %vm17835_vm1 = vmmov %vm17830_vm0 }
 0x65a   : > { %v8207_v13 = vpack.c.bf16 %v8191_v37, %v8190_v16  ;;  %8355 = vrot.lane.b32.xlu0 %v7156_v20, %s17747_s26  ;;  %v15692_v0 = vadd.f32 %v8314_v48, %v17805_v52  ;;  %v17817_v16 = vld [vmem:[#allocation106_spill] sm:$0xff] }
 0x65b   : > { %8349 = vrot.lane.b32.xlu1 %v7149_v21, %s17747_s26 }
 0x65c   : > { %10505 = vmatmul.msk.bf16.gmra.mxu3 %vm17798_vm12, %v8207_v13  ;;  %17806 = vst [vmem:[#allocation97_spill] sm:$0xff] %v15692_v0  ;;  %v8424_v51 = vsel %vm17809_vm8, %v15692_v0, 0.0  ;;  %vm17833_vm12 = vmmov %vm17830_vm0 }
 0x65d   : > { %v8284_v55 = vpop.f32.mrf.mxu3  ;;  %vm17836_vm8 = vmmov %vm17830_vm0 }
 0x65e   : > { %v8285_v35 = vadd.f32 %v15631_v31, %v8284_v55  ;;  %v15741_v55 = vadd.f32 %v15610_v24, %v15408_v46 }
 0x65f   : > { %v15754_v63 = vpop.permute.xlu1 %8345 }
 0x660   : > { %v8315_v43 = vmul.f32 %v8285_v35, %v7154_v22  ;;  %v17814_v22 = vld [vmem:[#allocation87_spill] sm:$0xff] }
 0x662   : > { %v15695_v32 = vadd.f32 %v8315_v43, %v17807_v58 }
 0x664   : > { %17808 = vst [vmem:[#allocation100_spill] sm:$0xff] %v15695_v32  ;;  %v8427_v5 = vsel %vm17812_vm2, %v15695_v32, 0.0  ;;  %vm17837_vm2 = vmmov %vm17830_vm0 }
 0x665   : > { %v8286_v54 = vpop.f32.mrf.mxu3 }
 0x666   : > { %v8287_v23 = vadd.f32 %v15631_v31, %v8286_v54 }
 0x668   : > { %v8316_v45 = vmul.f32 %v8287_v23, %v7156_v20 }
 0x66a   : > { %v15704_v28 = vadd.f32 %v8316_v45, %v17810_v29  ;;  %v15771_v45 = vadd.f32 %v15613_v1, %v15408_v46 }
 0x66c   : > { %17811 = vst [vmem:[#allocation99_spill] sm:$0xff] %v15704_v28  ;;  %v8430_v36 = vsel %vm17813_vm5, %v15704_v28, 0.0  ;;  %vm17839_vm5 = vmmov %vm17830_vm0 }
 0x671   : > { %8419 = vadd.xlane.f32.xlu2 %v8418_v61 }
 0x679   : > { %8422 = vadd.xlane.f32.xlu2 %v8421_v18 }
 0x681   : > { %8428 = vadd.xlane.f32.xlu2 %v8427_v5 }
 0x684   : > { %8425 = vadd.xlane.f32.xlu0 %v8424_v51 }
 0x685   : > { %8431 = vadd.xlane.f32.xlu1 %v8430_v36 }
 0x686   : > { %v8289_v34 = vpop.f32.mrf.mxu3 }
 0x687   : > { %v8290_v56 = vadd.f32 %v15631_v31, %v8289_v34 }
 0x689   : > { %v8317_v59 = vmul.f32 %v8290_v56, %v15701_v17 }
 0x68b   : > { %v15713_v33 = vadd.f32 %v8317_v59, %v17814_v22  ;;  %v15783_v59 = vadd.f32 %v15615_v10, %v15408_v46 }
 0x68d   : > { %17815 = vst [vmem:[#allocation92_spill] sm:$0xff] %v15713_v33  ;;  %v8433_v11 = vsel %vm17816_vm15, %v15713_v33, 0.0  ;;  %vm17840_vm15 = vmmov %vm17830_vm0 }
 0x68e   : > { %v8291_v44 = vpop.f32.mrf.mxu3  ;;  %8434 = vadd.xlane.f32.xlu1 %v8433_v11  ;;  %v15796_v11 = vadd.f32 %v15622_v9, %v15408_v46  ;;  %v15812_v9 = vadd.f32 %v15626_v30, %v15408_v46 }
 0x68f   : > { %v8292_v7 = vadd.f32 %v15631_v31, %v8291_v44  ;;  %v15792_v44 = vpop.permute.xlu2 %8341 }
 0x691   : > { %v8318_v49 = vmul.f32 %v8292_v7, %v15717_v12 }
 0x693   : > { %v15724_v37 = vadd.f32 %v8318_v49, %v17817_v16 }
 0x695   : > { %17818 = vst [vmem:[#allocation80_spill] sm:$0xff] %v15724_v37  ;;  %v8436_v13 = vsel %vm17819_vm13, %v15724_v37, 0.0  ;;  %vm17842_vm13 = vmmov %vm17830_vm0 }
 0x696   : > { %8437 = vadd.xlane.f32.xlu0 %v8436_v13 }
 0x69a   : > { %v8294_v20 = vpop.f32.mrf.mxu3 }
 0x69b   : > { %v8295_v38 = vadd.f32 %v15631_v31, %v8294_v20 }
 0x69d   : > { %v8319_v21 = vmul.f32 %v8295_v38, %v15730_v47 }
 0x69f   : > { %v15735_v26 = vadd.f32 %v8319_v21, %v17597_v50  ;;  %v10673_v21 = vld [vmem:[%s16962_s12 + $0x38] sm:$0xff] }
 0x6a0   : > { %8921 = vmatpush.bf16.msrb.mxu1 %v10673_v21 }
 0x6a1   : > { %17820 = vst [vmem:[#allocation93_spill] sm:$0xff] %v15735_v26  ;;  %v8439_v2 = vsel %vm17821_vm10, %v15735_v26, 0.0  ;;  %vm17843_vm10 = vmmov %vm17830_vm0 }
 0x6a2   : > { %v8296_v39 = vpop.f32.mrf.mxu3  ;;  %8440 = vadd.xlane.f32.xlu0 %v8439_v2 }
 0x6a3   : > { %v8297_v27 = vadd.f32 %v15631_v31, %v8296_v39  ;;  %v8411_v7 = vpop.xlane.xlu2 %8410 }
 0x6a5   : > { %v8320_v40 = vmul.f32 %v8297_v27, %v15741_v55 }
 0x6a7   : > { %v15750_v50 = vadd.f32 %v8320_v40, %v17756_v60 }
 0x6a9   : > { %17822 = vst [vmem:[#allocation22_spill] sm:$0xff] %v15750_v50  ;;  %v8442_v61 = vsel %vm17823_vm14, %v15750_v50, 0.0  ;;  %vm17844_vm14 = vmmov %vm17830_vm0 }
 0x6aa   : > { %8443 = vadd.xlane.f32.xlu2 %v8442_v61 }
 0x6ab   : > { %v15805_v20 = vpop.permute.xlu2 %8351 }
 0x6b1   : > { %v8414_v54 = vpop.xlane.xlu0 %8413 }
 0x6b2   : > { %v8458_v24 = vmul.f32 %v8414_v54, %v14422_v8 }
 0x6b4   : > { %v15758_v42 = vsub.f32 %v15650_v4, %v8458_v24 }
 0x6b5   : > { %v8417_v23 = vpop.xlane.xlu1 %8416 }
 0x6b6   : > { %v8490_v35 = vmul.f32 %v15758_v42, %v15758_v42  ;;  %v8459_v60 = vmul.f32 %v8417_v23, %v14422_v8 }
 0x6b8   : > { %v8508_v48 = vsel %vm17824_vm3, %v8490_v35, 0.0  ;;  %v15765_v43 = vsub.f32 %v15657_v41, %v8459_v60  ;;  %vm17845_vm3 = vmmov %vm17830_vm0 }
 0x6b9   : > { %8509 = vadd.xlane.f32.xlu0 %v8508_v48 }
 0x6ba   : > { %v8491_v52 = vmul.f32 %v15765_v43, %v15765_v43 }
 0x6bc   : > { %v8299_v18 = vpop.f32.mrf.mxu3  ;;  %v8511_v51 = vsel %vm17825_vm7, %v8491_v52, 0.0  ;;  %vm17846_vm7 = vmmov %vm17830_vm0 }
 0x6bd   : > { %v8300_v58 = vadd.f32 %v15631_v31, %v8299_v18 }
 0x6bf   : > { %v8321_v34 = vmul.f32 %v8300_v58, %v15771_v45 }
 0x6c1   : > { %8512 = vadd.xlane.f32.xlu0 %v8511_v51  ;;  %v15777_v29 = vadd.f32 %v8321_v34, %v17601_v15 }
 0x6c3   : > { %17826 = vst [vmem:[#allocation90_spill] sm:$0xff] %v15777_v29  ;;  %v8445_v56 = vsel %vm17827_vm6, %v15777_v29, 0.0 }
 0x6c4   : > { %v8301_v5 = vpop.f32.mrf.mxu3  ;;  %8446 = vadd.xlane.f32.xlu2 %v8445_v56  ;;  %v15816_v39 = vpop.permute.xlu0 %8353 }
 0x6c5   : > { %v8302_v1 = vadd.f32 %v15631_v31, %v8301_v5 }
 0x6c7   : > { %v8322_v36 = vmul.f32 %v8302_v1, %v15783_v59 }
 0x6c9   : > { %v15788_v22 = vadd.f32 %v8322_v36, %v17634_v6 }
 0x6cb   : > { %17828 = vst [vmem:[#allocation91_spill] sm:$0xff] %v15788_v22  ;;  %v8448_v15 = vsel %vm17829_vm9, %v15788_v22, 0.0 }
 0x6cc   : > { %8449 = vadd.xlane.f32.xlu2 %v8448_v15  ;;  %v15830_v24 = vpop.permute.xlu0 %8355 }
 0x6df   : > { %v8304_v49 = vpop.f32.mrf.mxu3 }
 0x6e0   : > { %v8305_v10 = vadd.f32 %v15631_v31, %v8304_v49 }
 0x6e2   : > { %v8323_v16 = vmul.f32 %v8305_v10, %v15796_v11 }
 0x6e4   : > { %v15801_v13 = vadd.f32 %v8323_v16, %v17669_v57  ;;  %v8457_v57 = vmul.f32 %v8411_v7, %v14422_v8  ;;  %v8420_v46 = vpop.xlane.xlu2 %8419 }
 0x6e5   : > { %v8460_v30 = vmul.f32 %v8420_v46, %v14422_v8 }
 0x6e6   : > { %v8451_v6 = vsel %vm17830_vm0, %v15801_v13, 0.0  ;;  %v15823_v61 = vsub.f32 %v15640_v53, %v8457_v57 }
 0x6e7   : > { %v8306_v38 = vpop.f32.mrf.mxu3  ;;  %8452 = vadd.xlane.f32.xlu1 %v8451_v6  ;;  %v15833_v35 = vsub.f32 %v15678_v19, %v8460_v30  ;;  %v10672_v6 = vld [vmem:[%s16962_s12 + $0x30] sm:$0xff] }
 0x6e8   : > { %v8307_v2 = vadd.f32 %v15631_v31, %v8306_v38  ;;  %v8489_v31 = vmul.f32 %v15823_v61, %v15823_v61  ;;  %8922 = vmatpush.bf16.msrb.mxu1 %v10672_v6  ;;  %v15863_v38 = vpop.f32.mrf.mxu1 }
 0x6e9   : > { %v8492_v18 = vmul.f32 %v15833_v35, %v15833_v35 }
 0x6ea   : > { %v8324_v27 = vmul.f32 %v8307_v2, %v15812_v9 }
 0x6eb   : > { %v8514_v34 = vsel %vm17834_vm4, %v8492_v18, 0.0 }
 0x6ec   : > { %v15820_v40 = vadd.f32 %v8324_v27, %v13679_v3  ;;  %v8505_v3 = vsel %vm17833_vm12, %v8489_v31, 0.0  ;;  %v8423_v48 = vpop.xlane.xlu2 %8422  ;;  %v15877_v27 = vpop.permute.xlu1 %8349 }
 0x6ed   : > { %v8461_v23 = vmul.f32 %v8423_v48, %v14422_v8 }
 0x6ee   : > { %17831 = vst [vmem:[#allocation6_spill] sm:$0xff] %v15820_v40  ;;  %v8454_v54 = vsel %vm17832_vm11, %v15820_v40, 0.0 }
 0x6ef   : > { %8455 = vadd.xlane.f32.xlu2 %v8454_v54  ;;  %v15838_v60 = vsub.f32 %v15685_v62, %v8461_v23  ;;  %v10671_v54 = vld [vmem:[%s16962_s12 + $0x28] sm:$0xff] }
 0x6f0   : > { %v15865_v21 = vpop.f32.mrf.mxu1  ;;  %8923 = vmatpush.bf16.msrb.mxu1 %v10671_v54 }
 0x6f1   : > { %v8493_v58 = vmul.f32 %v15838_v60, %v15838_v60 }
 0x6f3   : > { %v8517_v56 = vsel %vm17835_vm1, %v8493_v58, 0.0 }
 0x6f4   : > { %8518 = vadd.xlane.f32.xlu0 %v8517_v56  ;;  %v8429_v1 = vpop.xlane.xlu2 %8428 }
 0x6f5   : > { %v8463_v36 = vmul.f32 %v8429_v1, %v14422_v8 }
 0x6f7   : > { %8506 = vadd.xlane.f32.xlu2 %v8505_v3  ;;  %v8426_v52 = vpop.xlane.xlu0 %8425  ;;  %v15852_v15 = vsub.f32 %v15695_v32, %v8463_v36 }
 0x6f8   : > { %v8462_v51 = vmul.f32 %v8426_v52, %v14422_v8  ;;  %v15871_v2 = vpop.f32.mrf.mxu1 }
 0x6f9   : > { %v8495_v49 = vmul.f32 %v15852_v15, %v15852_v15 }
 0x6fa   : > { %v15848_v5 = vsub.f32 %v15692_v0, %v8462_v51 }
 0x6fb   : > { %v8523_v16 = vsel %vm17837_vm2, %v8495_v49, 0.0 }
 0x6fc   : > { %v8494_v7 = vmul.f32 %v15848_v5, %v15848_v5  ;;  %8524 = vadd.xlane.f32.xlu1 %v8523_v16 }
 0x6fe   : > { %v8520_v10 = vsel %vm17836_vm8, %v8494_v7, 0.0 }
 0x6ff   : > { %8515 = vadd.xlane.f32.xlu2 %v8514_v34  ;;  %8521 = vadd.xlane.f32.xlu0 %v8520_v10 }
 0x700   : > { %v15875_v57 = vpop.f32.mrf.mxu1 }
 0x708   : > { %v15882_v46 = vpop.f32.mrf.mxu1 }
 0x709   : > { %v8438_v3 = vpop.xlane.xlu0 %8437 }
 0x710   : > { %v15889_v23 = vpop.f32.mrf.mxu1 }
 0x713   : > { %8361 = vrot.lane.b32.xlu0 %v15730_v47, %s17747_s26 }
 0x715   : > { %8359 = vrot.lane.b32.xlu1 %v15717_v12, %s17747_s26  ;;  %v8441_v16 = vpop.xlane.xlu0 %8440 }
 0x717   : > { %8357 = vrot.lane.b32.xlu2 %v15701_v17, %s17747_s26  ;;  %v8432_v17 = vpop.xlane.xlu1 %8431 }
 0x718   : > { %v8464_v47 = vmul.f32 %v8432_v17, %v14422_v8  ;;  %v8466_v17 = vmul.f32 %v8438_v3, %v14422_v8  ;;  %v8467_v3 = vmul.f32 %v8441_v16, %v14422_v8 }
 0x71a   : > { %v15886_v31 = vsub.f32 %v15704_v28, %v8464_v47 }
 0x71c   : > { %v8496_v51 = vmul.f32 %v15886_v31, %v15886_v31 }
 0x71d   : > { %v8444_v30 = vpop.xlane.xlu2 %8443 }
 0x71e   : > { %v8468_v48 = vmul.f32 %v8444_v30, %v14422_v8  ;;  %v8526_v7 = vsel %vm17839_vm5, %v8496_v51, 0.0  ;;  %v15911_v30 = vpop.f32.mrf.mxu1 }
 0x71f   : > { %v8435_v12 = vpop.xlane.xlu1 %8434 }
 0x720   : > { %v8465_v58 = vmul.f32 %v8435_v12, %v14422_v8  ;;  %v15896_v34 = vsub.f32 %v15750_v50, %v8468_v48 }
 0x722   : > { %v15904_v36 = vsub.f32 %v15713_v33, %v8465_v58  ;;  %v8500_v10 = vmul.f32 %v15896_v34, %v15896_v34 }
 0x724   : > { %v8497_v47 = vmul.f32 %v15904_v36, %v15904_v36  ;;  %v8538_v48 = vsel %vm17842_vm13, %v8500_v10, 0.0 }
 0x726   : > { %v15931_v10 = vpop.f32.mrf.mxu1 }
 0x72c   : > { %v8510_v51 = vpop.xlane.xlu0 %8509 }
 0x737   : > { %v8447_v18 = vpop.xlane.xlu2 %8446 }
 0x738   : > { %v8469_v52 = vmul.f32 %v8447_v18, %v14422_v8  ;;  %v15921_v18 = vsub.f32 %v15724_v37, %v8466_v17 }
 0x73a   : > { %v15899_v56 = vsub.f32 %v15777_v29, %v8469_v52  ;;  %v8529_v52 = vsel %vm17843_vm10, %v8497_v47, 0.0  ;;  %v15939_v47 = vpop.f32.mrf.mxu1 }
 0x73c   : > { %17838 = vst [vmem:[#allocation26_spill] sm:$0xff] %v15899_v56  ;;  %v8501_v1 = vmul.f32 %v15899_v56, %v15899_v56 }
 0x73d   : > { %8527 = vadd.xlane.f32.xlu0 %v8526_v7  ;;  %v8554_v7 = vmul.f32 %v8510_v51, %v14422_v8 }
 0x73e   : > { %v8541_v49 = vsel %vm17840_vm15, %v8501_v1, 0.0  ;;  %v8498_v1 = vmul.f32 %v15921_v18, %v15921_v18  ;;  %vm17850_vm15 = vmmov %vm17845_vm3 }
 0x73f   : > { %v8450_v6 = vpop.xlane.xlu2 %8449  ;;  %8539 = vadd.xlane.f32.xlu1 %v8538_v48  ;;  %v8570_v17 = vadd.f32 1e-06, %v8554_v7 }
 0x740   : > { %8542 = vadd.xlane.f32.xlu2 %v8541_v49  ;;  %v8470_v54 = vmul.f32 %v8450_v6, %v14422_v8  ;;  %v15934_v6 = vsub.f32 %v15735_v26, %v8467_v3 }
 0x741   : > { %10950 = vrsqrt.f32 %v8570_v17  ;;  %vm8601_vm9 = vweird.f32 %v8570_v17 }
 0x742   : > { %v15917_v12 = vsub.f32 %v15788_v22, %v8470_v54  ;;  %v8532_v54 = vsel %vm17845_vm3, %v8498_v1, 0.0  ;;  %v8499_v16 = vmul.f32 %v15934_v6, %v15934_v6 }
 0x744   : > { %17841 = vst [vmem:[#allocation19_spill] sm:$0xff] %v15917_v12  ;;  %v8502_v58 = vmul.f32 %v15917_v12, %v15917_v12  ;;  %v8535_v48 = vsel %vm17846_vm7, %v8499_v16, 0.0  ;;  %v10670_v16 = vld [vmem:[%s16962_s12 + $0x20] sm:$0xff] }
 0x745   : > { %8530 = vadd.xlane.f32.xlu0 %v8529_v52  ;;  %v8513_v52 = vpop.xlane.xlu0 %8512  ;;  %8924 = vmatpush.bf16.msrb.mxu1 %v10670_v16 }
 0x746   : > { %v8544_v49 = vsel %vm17844_vm14, %v8502_v58, 0.0  ;;  %v8555_v51 = vmul.f32 %v8513_v52, %v14422_v8  ;;  %vm17851_vm14 = vmmov %vm17845_vm3 }
 0x747   : > { %8545 = vadd.xlane.f32.xlu1 %v8544_v49  ;;  %v10951_v58 = vpop.eup %10950  ;;  %v15947_v49 = vpop.f32.mrf.mxu1 }
 0x748   : > { %v8596_v3 = vmul.f32 %v10951_v58, %v8570_v17  ;;  %v15945_v7 = vadd.f32 1e-06, %v8555_v51  ;;  %vm8602_vm6 = vweird.f32 %v10951_v58  ;;  %v15989_v17 = vld [vmem:[%s16960_s10 + $0x1] ss:$0 sm:$0xff] }
 0x749   : > { %vm8603_vm0 = vmor %vm8601_vm9, %vm8602_vm6 }
 0x74a   : > { %10952 = vrsqrt.f32 %v15945_v7  ;;  %vm8611_vm8 = vweird.f32 %v15945_v7 }
 0x74d   : > { %8533 = vadd.xlane.f32.xlu0 %v8532_v54  ;;  %v8597_v54 = vmul.f32 %v10951_v58, %v8596_v3 }
 0x74f   : > { %v15958_v3 = vpop.f32.mrf.mxu1 }
 0x750   : > { %v15956_v51 = vpop.eup %10952 }
 0x751   : > { %v8606_v50 = vmul.f32 %v15956_v51, %v15945_v7  ;;  %vm8612_vm1 = vweird.f32 %v15956_v51 }
 0x752   : > { %vm16046_vm2 = vmor %vm8611_vm8, %vm8612_vm1 }
 0x755   : > { %8536 = vadd.xlane.f32.xlu0 %v8535_v48  ;;  %v8598_v48 = vmul.f32 0.5, %v8597_v54 }
 0x757   : > { %v8599_v29 = vsub.f32 1.5, %v8598_v48 }
 0x758   : > { %8367 = vrot.lane.b32.xlu2 %v15783_v59, %s17747_s26 }
 0x759   : > { %v8600_v54 = vmul.f32 %v10951_v58, %v8599_v29 }
 0x760   : > { %8365 = vrot.lane.b32.xlu1 %v15771_v45, %s17747_s26 }
 0x762   : > { %v8456_v1 = vpop.xlane.xlu2 %8455 }
 0x763   : > { %v8472_v33 = vmul.f32 %v8456_v1, %v14422_v8 }
 0x767   : > { %v8519_v26 = vpop.xlane.xlu0 %8518 }
 0x768   : > { %v8557_v16 = vmul.f32 %v8519_v26, %v14422_v8  ;;  %8371 = vrot.lane.b32.xlu1 %v15812_v9, %s17747_s26  ;;  %v8604_v26 = vsel %vm8603_vm0, %v10951_v58, %v8600_v54  ;;  %v15994_v58 = vpop.f32.mrf.mxu1 }
 0x769   : > { %8363 = vrot.lane.b32.xlu0 %v15741_v55, %s17747_s26  ;;  %v15976_v55 = vld [vmem:[%s16967_s17] sm:$0xf] }
 0x76a   : > { %v8507_v22 = vpop.xlane.xlu2 %8506  ;;  %v15971_v28 = vadd.f32 1e-06, %v8557_v16  ;;  %v15979_v29 = vperm.slane %v15976_v55, 2 }
 0x76b   : > { %v8553_v59 = vmul.f32 %v8507_v22, %v14422_v8 }
 0x76c   : > { %v15984_v9 = vadd.f32 %v15871_v2, %v15979_v29  ;;  %v16015_v19 = vadd.f32 %v15863_v38, %v15979_v29  ;;  %v16019_v41 = vadd.f32 %v15865_v21, %v15979_v29  ;;  %vm8631_vm0 = vweird.f32 %v15971_v28 }
 0x76d   : > { %v8569_v52 = vadd.f32 1e-06, %v8553_v59  ;;  %v8607_v59 = vmul.f32 %v15956_v51, %v8606_v50 }
 0x76f   : > { %10954 = vrsqrt.f32 %v8569_v52  ;;  %v8608_v16 = vmul.f32 0.5, %v8607_v59  ;;  %vm8591_vm12 = vweird.f32 %v8569_v52 }
 0x770   : > { %8377 = vrot.lane.b32.xlu1 %v15984_v9, %s17747_s26 }
 0x771   : > { %v8609_v59 = vsub.f32 1.5, %v8608_v16 }
 0x772   : > { %v8516_v22 = vpop.xlane.xlu2 %8515  ;;  %v8522_v32 = vpop.xlane.xlu0 %8521 }
 0x773   : > { %v8556_v45 = vmul.f32 %v8516_v22, %v14422_v8  ;;  %v8558_v2 = vmul.f32 %v8522_v32, %v14422_v8 }
 0x775   : > { %v10955_v48 = vpop.eup %10954  ;;  %v15969_v37 = vadd.f32 1e-06, %v8556_v45  ;;  %v8746_v45 = vmul.f32 %v8604_v26, %v15758_v42  ;;  %v16002_v42 = vld [vmem:[%s16961_s11 + $0x1] ss:$0 sm:$0xff]  ;;  %v16006_v26 = vsub.f32 %v15820_v40, %v8472_v33  ;;  %v16022_v33 = vpop.f32.mrf.mxu2 }
 0x776   : > { %v8586_v22 = vmul.f32 %v10955_v48, %v8569_v52  ;;  %vm8592_vm11 = vweird.f32 %v10955_v48  ;;  %v16026_v52 = vadd.f32 %v15882_v46, %v15979_v29  ;;  %v8800_v46 = vadd.f32 1.0, %v16019_v41 }
 0x777   : > { %10956 = vrsqrt.f32 %v15969_v37  ;;  %v8765_v1 = vmul.f32 %v15989_v17, %v8746_v45  ;;  %17847 = vst [vmem:[#allocation76_spill] sm:$0xff] %v16006_v26  ;;  %vm8593_vm4 = vmor %vm8591_vm12, %vm8592_vm11  ;;  %vm8621_vm13 = vweird.f32 %v15969_v37 }
 0x778   : > { %v8587_v50 = vmul.f32 %v10955_v48, %v8586_v22  ;;  %10958 = vrsqrt.f32 %v15971_v28  ;;  %8381 = vrot.lane.b32.xlu1 %v16026_v52, %s17747_s26  ;;  %vm17852_vm12 = vmmov %vm17851_vm14 }
 0x779   : > { %v8784_v38 = vadd.f32 %v16002_v42, %v8765_v1  ;;  %v16042_v1 = vpop.f32.mrf.mxu1 }
 0x77a   : > { %v8588_v54 = vmul.f32 0.5, %v8587_v50  ;;  %v16008_v50 = vadd.f32 1e-06, %v8558_v2  ;;  %v8610_v2 = vmul.f32 %v15956_v51, %v8609_v59 }
 0x77c   : > { %v8589_v22 = vsub.f32 1.5, %v8588_v54  ;;  %10960 = vrsqrt.f32 %v16008_v50  ;;  %v8614_v7 = vsel %vm16046_vm2, %v15956_v51, %v8610_v2  ;;  %vm8641_vm6 = vweird.f32 %v16008_v50 }
 0x77d   : > { %v10957_v0 = vpop.eup %10956 }
 0x77e   : > { %v8590_v32 = vmul.f32 %v10955_v48, %v8589_v22  ;;  %v8616_v62 = vmul.f32 %v10957_v0, %v15969_v37  ;;  %v16011_v54 = vpop.eup %10958  ;;  %v8504_v22 = vmul.f32 %v16006_v26, %v16006_v26  ;;  %vm8622_vm5 = vweird.f32 %v10957_v0 }
 0x77f   : > { %v8626_v4 = vmul.f32 %v16011_v54, %v15971_v28  ;;  %vm8623_vm10 = vmor %vm8621_vm13, %vm8622_vm5  ;;  %vm8632_vm7 = vweird.f32 %v16011_v54 }
 0x780   : > { %v8594_v45 = vsel %vm8593_vm4, %v10955_v48, %v8590_v32  ;;  %v8617_v16 = vmul.f32 %v10957_v0, %v8616_v62  ;;  %v8799_v62 = vadd.f32 1.0, %v16015_v19  ;;  %vm8633_vm11 = vmor %vm8631_vm0, %vm8632_vm7 }
 0x781   : > { %v8745_v21 = vmul.f32 %v8594_v45, %v15823_v61  ;;  %v8816_v45 = vmul.f32 %v8800_v46, %v8784_v38  ;;  %v8627_v26 = vmul.f32 %v16011_v54, %v8626_v4  ;;  %v16066_v4 = vpop.f32.mrf.mxu2  ;;  %v8453_v61 = vpop.xlane.xlu1 %8452  ;;  %vm17853_vm4 = vmmov %vm17852_vm12 }
 0x782   : > { %v8618_v40 = vmul.f32 0.5, %v8617_v16  ;;  %v10961_v32 = vpop.eup %10960  ;;  %vm17854_vm1 = vmmov %vm17853_vm4 }
 0x783   : > { %v8764_v48 = vmul.f32 %v15989_v17, %v8745_v21  ;;  %v8550_v21 = vsel %vm17850_vm15, %v8504_v22, 0.0  ;;  %v8636_v56 = vmul.f32 %v10961_v32, %v16008_v50  ;;  %v8832_v2 = vadd.f32 %v8816_v45, %v15744_v25  ;;  %vm17855_vm0 = vmmov %vm17854_vm1 }
 0x784   : > { %v8619_v59 = vsub.f32 1.5, %v8618_v40  ;;  %8551 = vadd.xlane.f32.xlu2 %v8550_v21  ;;  %v16060_v40 = vadd.f32 %v15939_v47, %v15979_v29  ;;  %v8747_v22 = vmul.f32 %v8614_v7, %v15765_v43  ;;  %v7195_v25 = vadd.f32 %v15875_v57, %v15979_v29 }
 0x785   : > { %v8783_v16 = vadd.f32 %v16002_v42, %v8764_v48  ;;  %v8637_v51 = vmul.f32 %v10961_v32, %v8636_v56  ;;  %v8628_v48 = vmul.f32 0.5, %v8627_v26  ;;  %vm8642_vm3 = vweird.f32 %v10961_v32 }
 0x786   : > { %v8620_v53 = vmul.f32 %v10957_v0, %v8619_v59  ;;  %8389 = vrot.lane.b32.xlu1 %v16060_v40, %s17747_s26  ;;  %v8766_v43 = vmul.f32 %v15989_v17, %v8747_v22  ;;  %v8802_v26 = vadd.f32 1.0, %v7195_v25  ;;  %v8801_v21 = vadd.f32 1.0, %v15984_v9  ;;  %vm8643_vm9 = vmor %vm8641_vm6, %vm8642_vm3 }
 0x787   : > { %v8815_v12 = vmul.f32 %v8799_v62, %v8783_v16  ;;  %v8638_v62 = vmul.f32 0.5, %v8637_v51  ;;  %v8629_v56 = vsub.f32 1.5, %v8628_v48  ;;  %v16095_v50 = vperm.slane %v15976_v55, 3 }
 0x788   : > { %v8624_v38 = vsel %vm8623_vm10, %v10957_v0, %v8620_v53  ;;  %v8785_v7 = vadd.f32 %v16002_v42, %v8766_v43 }
 0x789   : > { %v8831_v46 = vadd.f32 %v8815_v12, %v15792_v44  ;;  %v8748_v37 = vmul.f32 %v8624_v38, %v15833_v35  ;;  %v8639_v0 = vsub.f32 1.5, %v8638_v62  ;;  %v7219_v44 = vpop.f32.mrf.mxu1  ;;  %v8471_v35 = vmul.f32 %v8453_v61, %v14422_v8  ;;  %v7241_v51 = vpop.f32.mrf.mxu2 }
 0x78a   : > { %v16078_v45 = vadd.f32 %v7219_v44, %v15979_v29  ;;  %v8630_v16 = vmul.f32 %v16011_v54, %v8629_v56  ;;  %v8817_v22 = vmul.f32 %v8801_v21, %v8785_v7  ;;  %v16100_v62 = vadd.f32 %v7241_v51, %v16095_v50  ;;  %v16134_v21 = vpop.permute.xlu0 %8361 }
 0x78b   : > { %v8767_v59 = vmul.f32 %v15989_v17, %v8748_v37  ;;  %v8856_v53 = vpack.c.bf16 %v8832_v2, %v8831_v46  ;;  %v8640_v47 = vmul.f32 %v10961_v32, %v8639_v0  ;;  %v16082_v57 = vsub.f32 %v15801_v13, %v8471_v35 }
 0x78c   : > { %v8634_v46 = vsel %vm8633_vm11, %v16011_v54, %v8630_v16 }
 0x78d   : > { %10533 = vmatmul.msk.bf16.vlgmr.msrb.gmra.mxu1 %vm17851_vm14, %v8856_v53  ;;  %v8786_v12 = vadd.f32 %v16002_v42, %v8767_v59  ;;  %v8644_v2 = vsel %vm8643_vm9, %v10961_v32, %v8640_v47  ;;  %v8503_v37 = vmul.f32 %v16082_v57, %v16082_v57  ;;  %v8749_v28 = vmul.f32 %v8634_v46, %v15838_v60  ;;  %v8525_v59 = vpop.xlane.xlu1 %8524 }
 0x78e   : > { %8399 = vrot.lane.b32.xlu1 %v16078_v45, %s17747_s26  ;;  %v8750_v9 = vmul.f32 %v8644_v2, %v15848_v5  ;;  %v8833_v32 = vadd.f32 %v8817_v22, %v15754_v63  ;;  %v8559_v63 = vmul.f32 %v8525_v59, %v14422_v8  ;;  %v7203_v22 = vadd.f32 %v15911_v30, %v15979_v29 }
 0x78f   : > { %v8818_v38 = vmul.f32 %v8802_v26, %v8786_v12  ;;  %v8547_v61 = vsel %vm17852_vm12, %v8503_v37, 0.0  ;;  %v8768_v5 = vmul.f32 %v15989_v17, %v8749_v28  ;;  %v7205_v59 = vadd.f32 %v15931_v10, %v15979_v29  ;;  %v10676_v10 = vld [vmem:[%s16964_s14 + $0x30] sm:$0xff] }
 0x790   : > { %v8769_v54 = vmul.f32 %v15989_v17, %v8750_v9  ;;  %v8575_v35 = vadd.f32 1e-06, %v8559_v63 }
 0x791   : > { %v8834_v48 = vadd.f32 %v8818_v38, %v15747_v14  ;;  %v7200_v14 = vadd.f32 %v15889_v23, %v15979_v29  ;;  %v7243_v60 = vpop.f32.mrf.mxu2  ;;  %v8787_v44 = vadd.f32 %v16002_v42, %v8768_v5  ;;  %v8803_v23 = vadd.f32 1.0, %v16026_v52  ;;  %v10677_v52 = vld [vmem:[%s16964_s14 + $0x38] sm:$0xff] }
 0x792   : > { %v8788_v53 = vadd.f32 %v16002_v42, %v8769_v54  ;;  %v16117_v0 = vadd.f32 %v7243_v60, %v16095_v50  ;;  %10962 = vrsqrt.f32 %v8575_v35  ;;  %9360 = vmatpush.bf16.msrb.mxu2 %v10677_v52  ;;  %vm8651_vm2 = vweird.f32 %v8575_v35 }
 0x793   : > { %8548 = vadd.xlane.f32.xlu0 %v8547_v61  ;;  %v8857_v55 = vpack.c.bf16 %v8834_v48, %v8833_v32  ;;  %v8804_v43 = vadd.f32 1.0, %v7200_v14  ;;  %v8819_v12 = vmul.f32 %v8803_v23, %v8787_v44  ;;  %v16160_v32 = vpop.permute.xlu2 %8357  ;;  %v16189_v52 = vadd.f32 %v15994_v58, %v15979_v29 }
 0x795   : > { %v8820_v56 = vmul.f32 %v8804_v43, %v8788_v53  ;;  %v8835_v47 = vadd.f32 %v8819_v12, %v15877_v27  ;;  %v16140_v27 = vpop.permute.xlu1 %8359 }
 0x796   : > { %9441 = vrot.lane.b32.xlu1 %v16100_v62, %s17747_s26  ;;  %9361 = vmatpush.bf16.msrb.mxu2 %v10676_v10 }
 0x798   : > { %v10963_v7 = vpop.eup %10962 }
 0x799   : > { %v8646_v16 = vmul.f32 %v10963_v7, %v8575_v35  ;;  %vm8652_vm8 = vweird.f32 %v10963_v7 }
 0x79a   : > { %vm8653_vm5 = vmor %vm8651_vm2, %vm8652_vm8 }
 0x79c   : > { %8369 = vrot.lane.b32.xlu2 %v15796_v11, %s17747_s26  ;;  %v8836_v11 = vadd.f32 %v8820_v56, %v15805_v20  ;;  %v16138_v20 = vadd.f32 %v15947_v49, %v15979_v29  ;;  %v16150_v49 = vadd.f32 %v15958_v3, %v15979_v29 }
 0x79d   : > { %10534 = vmatmul.msk.bf16.gmra.mxu1 %vm17853_vm4, %v8857_v55 }
 0x79e   : > { %9443 = vrot.lane.b32.xlu1 %v16117_v0, %s17747_s26  ;;  %v8858_v26 = vpack.c.bf16 %v8836_v11, %v8835_v47 }
 0x7a4   : > { %8375 = vrot.lane.b32.xlu2 %v16019_v41, %s17747_s26  ;;  %v8647_v41 = vmul.f32 %v10963_v7, %v8646_v16 }
 0x7a7   : > { %8373 = vrot.lane.b32.xlu0 %v16015_v19, %s17747_s26  ;;  %v8648_v19 = vmul.f32 0.5, %v8647_v41 }
 0x7a9   : > { %v8649_v2 = vsub.f32 1.5, %v8648_v19 }
 0x7ab   : > { %v8650_v9 = vmul.f32 %v10963_v7, %v8649_v2 }
 0x7ac   : > { %8379 = vrot.lane.b32.xlu2 %v7195_v25, %s17747_s26 }
 0x7ad   : > { %10535 = vmatmul.msk.bf16.gmra.mxu1 %vm17854_vm1, %v8858_v26  ;;  %v8654_v54 = vsel %vm8653_vm5, %v10963_v7, %v8650_v9  ;;  %v16185_v7 = vadd.f32 %v16022_v33, %v16095_v50  ;;  %v7222_v33 = vpop.f32.mrf.mxu1 }
 0x7ae   : > { %v8751_v60 = vmul.f32 %v8654_v54, %v15852_v15 }
 0x7af   : > { %8391 = vrot.lane.b32.xlu0 %v16138_v20, %s17747_s26 }
 0x7b0   : > { %v8528_v25 = vpop.xlane.xlu0 %8527  ;;  %v8770_v35 = vmul.f32 %v15989_v17, %v8751_v60 }
 0x7b1   : > { %v8560_v38 = vmul.f32 %v8528_v25, %v14422_v8 }
 0x7b2   : > { %v8540_v46 = vpop.xlane.xlu1 %8539  ;;  %v8789_v58 = vadd.f32 %v16002_v42, %v8770_v35 }
 0x7b3   : > { %v8576_v51 = vadd.f32 1e-06, %v8560_v38  ;;  %v8564_v37 = vmul.f32 %v8540_v46, %v14422_v8  ;;  %v8543_v56 = vpop.xlane.xlu2 %8542 }
 0x7b4   : > { %8383 = vrot.lane.b32.xlu2 %v7200_v14, %s17747_s26  ;;  %v16166_v14 = vadd.f32 %v16042_v1, %v15979_v29  ;;  %v8565_v41 = vmul.f32 %v8543_v56, %v14422_v8 }
 0x7b5   : > { %10964 = vrsqrt.f32 %v8576_v51  ;;  %v16156_v48 = vadd.f32 1e-06, %v8564_v37  ;;  %vm8661_vm13 = vweird.f32 %v8576_v51  ;;  %v8805_v37 = vadd.f32 1.0, %v7203_v22 }
 0x7b7   : > { %8393 = vrot.lane.b32.xlu0 %v16150_v49, %s17747_s26  ;;  %10966 = vrsqrt.f32 %v16156_v48  ;;  %vm8701_vm12 = vweird.f32 %v16156_v48 }
 0x7b8   : > { %v8531_v28 = vpop.xlane.xlu0 %8530 }
 0x7b9   : > { %v8561_v30 = vmul.f32 %v8531_v28, %v14422_v8 }
 0x7ba   : > { %v8546_v23 = vpop.xlane.xlu1 %8545 }
 0x7bb   : > { %v10965_v3 = vpop.eup %10964  ;;  %v8577_v61 = vadd.f32 1e-06, %v8561_v30  ;;  %v8566_v16 = vmul.f32 %v8546_v23, %v14422_v8  ;;  %v8806_v30 = vadd.f32 1.0, %v7205_v59 }
 0x7bc   : > { %8385 = vrot.lane.b32.xlu2 %v7203_v22, %s17747_s26  ;;  %v8656_v55 = vmul.f32 %v10965_v3, %v8576_v51  ;;  %vm8662_vm15 = vweird.f32 %v10965_v3 }
 0x7bd   : > { %10968 = vrsqrt.f32 %v8577_v61  ;;  %v16172_v63 = vpop.eup %10966  ;;  %vm8663_vm10 = vmor %vm8661_vm13, %vm8662_vm15  ;;  %v16202_v28 = vadd.f32 1e-06, %v8566_v16  ;;  %vm8671_vm3 = vweird.f32 %v8577_v61  ;;  %v7224_v16 = vpop.f32.mrf.mxu1 }
 0x7be   : > { %v8657_v5 = vmul.f32 %v10965_v3, %v8656_v55  ;;  %v8696_v12 = vmul.f32 %v16172_v63, %v16156_v48  ;;  %v16205_v55 = vadd.f32 1e-06, %v8565_v41  ;;  %vm8702_vm9 = vweird.f32 %v16172_v63  ;;  %vm17856_vm15 = vmmov %vm17855_vm0 }
 0x7bf   : > { %8397 = vrot.lane.b32.xlu0 %v16166_v14, %s17747_s26  ;;  %vm8703_vm1 = vmor %vm8701_vm12, %vm8702_vm9  ;;  %v8807_v48 = vadd.f32 1.0, %v16060_v40  ;;  %v16249_v40 = vadd.f32 %v16066_v4, %v16095_v50 }
 0x7c0   : > { %v8658_v53 = vmul.f32 0.5, %v8657_v5  ;;  %v8534_v43 = vpop.xlane.xlu0 %8533  ;;  %v8697_v51 = vmul.f32 %v16172_v63, %v8696_v12  ;;  %vm17859_vm9 = vmmov %vm17855_vm0 }
 0x7c1   : > { %v8562_v1 = vmul.f32 %v8534_v43, %v14422_v8 }
 0x7c2   : > { %v8659_v44 = vsub.f32 1.5, %v8658_v53  ;;  %v8698_v5 = vmul.f32 0.5, %v8697_v51  ;;  %v8821_v53 = vmul.f32 %v8805_v37, %v8789_v58 }
 0x7c3   : > { %v10969_v15 = vpop.eup %10968  ;;  %v16181_v11 = vadd.f32 1e-06, %v8562_v1  ;;  %v16210_v1 = vadd.f32 %v7222_v33, %v15979_v29 }
 0x7c4   : > { %8387 = vrot.lane.b32.xlu2 %v7205_v59, %s17747_s26  ;;  %v8660_v47 = vmul.f32 %v10965_v3, %v8659_v44  ;;  %v8666_v26 = vmul.f32 %v10969_v15, %v8577_v61  ;;  %vm8672_vm14 = vweird.f32 %v10969_v15  ;;  %v8699_v35 = vsub.f32 1.5, %v8698_v5 }
 0x7c5   : > { %10970 = vrsqrt.f32 %v16181_v11  ;;  %vm8673_vm7 = vmor %vm8671_vm3, %vm8672_vm14  ;;  %v8837_v61 = vadd.f32 %v8821_v53, %v15816_v39  ;;  %vm8681_vm11 = vweird.f32 %v16181_v11 }
 0x7c6   : > { %v8664_v19 = vsel %vm8663_vm10, %v10965_v3, %v8660_v47  ;;  %v8667_v25 = vmul.f32 %v10969_v15, %v8666_v26  ;;  %10972 = vrsqrt.f32 %v16202_v28  ;;  %vm8721_vm10 = vweird.f32 %v16202_v28 }
 0x7c7   : > { %v8752_v38 = vmul.f32 %v8664_v19, %v15886_v31  ;;  %9437 = vrot.lane.b32.xlu0 %v16185_v7, %s17747_s26  ;;  %v8700_v19 = vmul.f32 %v16172_v63, %v8699_v35 }
 0x7c8   : > { %v8668_v2 = vmul.f32 0.5, %v8667_v25  ;;  %v8537_v46 = vpop.xlane.xlu0 %8536 }
 0x7c9   : > { %v8771_v9 = vmul.f32 %v15989_v17, %v8752_v38  ;;  %v8563_v3 = vmul.f32 %v8537_v46, %v14422_v8 }
 0x7ca   : > { %v8669_v31 = vsub.f32 1.5, %v8668_v2  ;;  %v8704_v2 = vsel %vm8703_vm1, %v16172_v63, %v8700_v19 }
 0x7cb   : > { %v10971_v54 = vpop.eup %10970  ;;  %v8790_v60 = vadd.f32 %v16002_v42, %v8771_v9  ;;  %v8579_v10 = vadd.f32 1e-06, %v8563_v3 }
 0x7cc   : > { %8395 = vrot.lane.b32.xlu2 %v16189_v52, %s17747_s26  ;;  %v8670_v43 = vmul.f32 %v10969_v15, %v8669_v31  ;;  %v8676_v22 = vmul.f32 %v10971_v54, %v16181_v11  ;;  %vm8682_vm6 = vweird.f32 %v10971_v54  ;;  %v8808_v31 = vadd.f32 1.0, %v16138_v20 }
 0x7cd   : > { %v8822_v59 = vmul.f32 %v8806_v30, %v8790_v60  ;;  %10974 = vrsqrt.f32 %v8579_v10  ;;  %vm8683_vm4 = vmor %vm8681_vm11, %vm8682_vm6  ;;  %vm8691_vm2 = vweird.f32 %v8579_v10 }
 0x7ce   : > { %v8674_v44 = vsel %vm8673_vm7, %v10969_v15, %v8670_v43  ;;  %v8677_v23 = vmul.f32 %v10971_v54, %v8676_v22  ;;  %10976 = vrsqrt.f32 %v16205_v55  ;;  %v16219_v15 = vpop.eup %10972  ;;  %vm8711_vm7 = vweird.f32 %v16205_v55 }
 0x7cf   : > { %v8753_v56 = vmul.f32 %v8674_v44, %v15904_v36  ;;  %v8838_v12 = vadd.f32 %v8822_v59, %v15830_v24  ;;  %v16227_v24 = vadd.f32 %v7224_v16, %v15979_v29  ;;  %v8716_v58 = vmul.f32 %v16219_v15, %v16202_v28 }
 0x7d0   : > { %v8678_v47 = vmul.f32 0.5, %v8677_v23  ;;  %vm8722_vm13 = vweird.f32 %v16219_v15 }
 0x7d1   : > { %v8859_v26 = vpack.c.bf16 %v8838_v12, %v8837_v61  ;;  %v8772_v36 = vmul.f32 %v15989_v17, %v8753_v56  ;;  %v8717_v63 = vmul.f32 %v16219_v15, %v8716_v58  ;;  %v7246_v56 = vpop.f32.mrf.mxu2  ;;  %vm8723_vm14 = vmor %vm8721_vm10, %vm8722_vm13  ;;  %v10675_v58 = vld [vmem:[%s16964_s14 + $0x28] sm:$0xff] }
 0x7d2   : > { %v8679_v41 = vsub.f32 1.5, %v8678_v47  ;;  %v8809_v47 = vadd.f32 1.0, %v16150_v49  ;;  %9362 = vmatpush.bf16.msrb.mxu2 %v10675_v58 }
 0x7d3   : > { %10536 = vmatmul.msk.bf16.gmra.mxu1 %vm17855_vm0, %v8859_v26  ;;  %v10975_v39 = vpop.eup %10974  ;;  %v8791_v29 = vadd.f32 %v16002_v42, %v8772_v36  ;;  %v8718_v22 = vmul.f32 0.5, %v8717_v63  ;;  %v8810_v26 = vadd.f32 1.0, %v16189_v52  ;;  %v8366_v63 = vpop.permute.xlu1 %8365 }
 0x7d4   : > { %8401 = vrot.lane.b32.xlu2 %v16210_v1, %s17747_s26  ;;  %v8680_v25 = vmul.f32 %v10971_v54, %v8679_v41  ;;  %v8686_v38 = vmul.f32 %v10975_v39, %v8579_v10  ;;  %v16230_v51 = vpop.eup %10976  ;;  %vm8692_vm8 = vweird.f32 %v10975_v39 }
 0x7d5   : > { %v8706_v11 = vmul.f32 %v16230_v51, %v16205_v55  ;;  %v8823_v5 = vmul.f32 %v8807_v48, %v8791_v29  ;;  %vm8693_vm5 = vmor %vm8691_vm2, %vm8692_vm8  ;;  %v8719_v61 = vsub.f32 1.5, %v8718_v22  ;;  %vm8712_vm3 = vweird.f32 %v16230_v51 }
 0x7d6   : > { %v8684_v33 = vsel %vm8683_vm4, %v10971_v54, %v8680_v25  ;;  %v8687_v37 = vmul.f32 %v10975_v39, %v8686_v38  ;;  %vm8713_vm6 = vmor %vm8711_vm7, %vm8712_vm3 }
 0x7d7   : > { %v8754_v46 = vmul.f32 %v8684_v33, %v15921_v18  ;;  %v8756_v18 = vmul.f32 %v8704_v2, %v15896_v34  ;;  %v8707_v60 = vmul.f32 %v16230_v51, %v8706_v11  ;;  %v8839_v34 = vadd.f32 %v8823_v5, %v16160_v32  ;;  %v17857_v33 = vld [vmem:[#allocation19_spill] sm:$0xff]  ;;  %v8368_v2 = vpop.permute.xlu2 %8367 }
 0x7d8   : > { %v8688_v30 = vmul.f32 0.5, %v8687_v37  ;;  %v8720_v41 = vmul.f32 %v16219_v15, %v8719_v61  ;;  %v17858_v37 = vld [vmem:[#allocation26_spill] sm:$0xff]  ;;  %v8812_v11 = vadd.f32 1.0, %v16078_v45 }
 0x7d9   : > { %v8773_v9 = vmul.f32 %v15989_v17, %v8754_v46  ;;  %v8775_v20 = vmul.f32 %v15989_v17, %v8756_v18  ;;  %v8708_v23 = vmul.f32 0.5, %v8707_v60  ;;  %v16294_v60 = vld [vmem:[%s16963_s13 + $0x1] ss:$0 sm:$0xff] }
 0x7da   : > { %v8689_v3 = vsub.f32 1.5, %v8688_v30  ;;  %v8724_v25 = vsel %vm8723_vm14, %v16219_v15, %v8720_v41 }
 0x7db   : > { %v8792_v54 = vadd.f32 %v16002_v42, %v8773_v9  ;;  %v8794_v12 = vadd.f32 %v16002_v42, %v8775_v20  ;;  %v8364_v16 = vpop.permute.xlu0 %8363  ;;  %v8758_v28 = vmul.f32 %v8724_v25, %v17857_v33 }
 0x7dc   : > { %8403 = vrot.lane.b32.xlu2 %v16227_v24, %s17747_s26  ;;  %v8690_v53 = vmul.f32 %v10975_v39, %v8689_v3 }
 0x7dd   : > { %v8824_v43 = vmul.f32 %v8808_v31, %v8792_v54  ;;  %v8826_v36 = vmul.f32 %v8810_v26, %v8794_v12  ;;  %v8777_v46 = vmul.f32 %v15989_v17, %v8758_v28  ;;  %v8811_v31 = vadd.f32 1.0, %v16166_v14 }
 0x7de   : > { %v8694_v59 = vsel %vm8693_vm5, %v10975_v39, %v8690_v53 }
 0x7df   : > { %v8840_v44 = vadd.f32 %v8824_v43, %v16140_v27  ;;  %v8755_v4 = vmul.f32 %v8694_v59, %v15934_v6  ;;  %v16265_v27 = vadd.f32 %v7246_v56, %v16095_v50  ;;  %v8709_v6 = vsub.f32 1.5, %v8708_v23  ;;  %v10674_v23 = vld [vmem:[%s16964_s14 + $0x20] sm:$0xff] }
 0x7e0   : > { %v8842_v52 = vadd.f32 %v8826_v36, %v8364_v16  ;;  %v8796_v15 = vadd.f32 %v16002_v42, %v8777_v46  ;;  %9363 = vmatpush.bf16.msrb.mxu2 %v10674_v23 }
 0x7e1   : > { %v8860_v35 = vpack.c.bf16 %v8840_v44, %v8839_v34  ;;  %v8774_v10 = vmul.f32 %v15989_v17, %v8755_v4  ;;  %v8710_v39 = vmul.f32 %v16230_v51, %v8709_v6 }
 0x7e2   : > { %v8828_v9 = vmul.f32 %v8812_v11, %v8796_v15 }
 0x7e3   : > { %10537 = vmatmul.msk.bf16.gmra.mxu1 %vm17856_vm15, %v8860_v35  ;;  %v8793_v32 = vadd.f32 %v16002_v42, %v8774_v10 }
 0x7e4   : > { %9439 = vrot.lane.b32.xlu2 %v16249_v40, %s17747_s26  ;;  %v8844_v3 = vadd.f32 %v8828_v9, %v8368_v2  ;;  %v8372_v9 = vpop.permute.xlu1 %8371 }
 0x7e5   : > { %v8825_v19 = vmul.f32 %v8809_v47, %v8793_v32 }
 0x7e7   : > { %v8841_v49 = vadd.f32 %v8825_v19, %v16134_v21  ;;  %v8714_v21 = vsel %vm8713_vm6, %v16230_v51, %v8710_v39 }
 0x7e8   : > { %v8757_v29 = vmul.f32 %v8714_v21, %v17858_v37 }
 0x7e9   : > { %v8861_v38 = vpack.c.bf16 %v8842_v52, %v8841_v49 }
 0x7ea   : > { %v8776_v48 = vmul.f32 %v15989_v17, %v8757_v29 }
 0x7ec   : > { %9445 = vrot.lane.b32.xlu2 %v16265_v27, %s17747_s26  ;;  %v8795_v30 = vadd.f32 %v16002_v42, %v8776_v48 }
 0x7ee   : > { %v8827_v18 = vmul.f32 %v8811_v31, %v8795_v30 }
 0x7f0   : > { %v8843_v54 = vadd.f32 %v8827_v18, %v8366_v63 }
 0x7f2   : > { %v8862_v53 = vpack.c.bf16 %v8844_v3, %v8843_v54 }
 0x7f3   : > { %10538 = vmatmul.msk.bf16.gmra.mxu1 %vm17859_vm9, %v8861_v38  ;;  %vm17867_vm9 = vmmov %vm17855_vm0 }
 0x7f7   : > { %v8552_v55 = vpop.xlane.xlu2 %8551 }
 0x7f8   : > { %v8568_v51 = vmul.f32 %v8552_v55, %v14422_v8 }
 0x7fa   : > { %v8584_v5 = vadd.f32 1e-06, %v8568_v51 }
 0x7fc   : > { %10978 = vrsqrt.f32 %v8584_v5  ;;  %vm8741_vm1 = vweird.f32 %v8584_v5 }
 0x802   : > { %v16302_v59 = vpop.eup %10978 }
 0x803   : > { %10539 = vmatmul.msk.bf16.gmra.mxu1 %vm17855_vm0, %v8862_v53  ;;  %v8736_v35 = vmul.f32 %v16302_v59, %v8584_v5  ;;  %vm8742_vm12 = vweird.f32 %v16302_v59 }
 0x804   : > { %vm16329_vm2 = vmor %vm8741_vm1, %vm8742_vm12 }
 0x805   : > { %v8737_v12 = vmul.f32 %v16302_v59, %v8736_v35  ;;  %vm17870_vm1 = vmmov %vm17867_vm9 }
 0x806   : > { %v8549_v22 = vpop.xlane.xlu0 %8548 }
 0x807   : > { %v8567_v20 = vmul.f32 %v8549_v22, %v14422_v8  ;;  %v8738_v16 = vmul.f32 0.5, %v8737_v12 }
 0x809   : > { %v8583_v34 = vadd.f32 1e-06, %v8567_v20  ;;  %v8739_v38 = vsub.f32 1.5, %v8738_v16 }
 0x80a   : > { %v8926_v45 = vpop.f32.mrf.mxu1 }
 0x80b   : > { %v16297_v43 = vadd.f32 %v16294_v60, %v8926_v45  ;;  %v8740_v37 = vmul.f32 %v16302_v59, %v8739_v38  ;;  %vm8731_vm4 = vweird.f32 %v8583_v34  ;;  %v8813_v38 = vadd.f32 1.0, %v16210_v1 }
 0x80d   : > { %v10541_v14 = vmul.f32 -1.442695, %v16297_v43  ;;  %v8744_v63 = vsel %vm16329_vm2, %v16302_v59, %v8740_v37 }
 0x80f   : > { %10980 = vpow2.f32 %v10541_v14 }
 0x810   : > { %10982 = vrsqrt.f32 %v8583_v34 }
 0x812   : > { %v8928_v44 = vpop.f32.mrf.mxu1 }
 0x813   : > { %v16305_v4 = vadd.f32 %v16294_v60, %v8928_v44  ;;  %v17866_v44 = vld [vmem:[#allocation76_spill] sm:$0xff] }
 0x814   : > { %v8760_v23 = vmul.f32 %v8744_v63, %v17866_v44 }
 0x815   : > { %v10981_v56 = vpop.eup %10980  ;;  %v10542_v61 = vmul.f32 -1.442695, %v16305_v4 }
 0x816   : > { %v9014_v10 = vadd.f32 1.0, %v10981_v56  ;;  %v10983_v47 = vpop.eup %10982 }
 0x817   : > { %10984 = vpow2.f32 %v10542_v61  ;;  %v8726_v26 = vmul.f32 %v10983_v47, %v8583_v34  ;;  %vm8732_vm11 = vweird.f32 %v10983_v47 }
 0x818   : > { %10986 = vrcp.f32 %v9014_v10  ;;  %vm16323_vm8 = vmor %vm8731_vm4, %vm8732_vm11  ;;  %v9041_v18 = vand.u32 2147483648, %v9014_v10  ;;  %vm9035_vm15 = vweird.f32 %v9014_v10  ;;  %v9039_v3 = vand.u32 2147483647, %v9014_v10 }
 0x819   : > { %v8727_v41 = vmul.f32 %v10983_v47, %v8726_v26 }
 0x81a   : > { %v8931_v32 = vpop.f32.mrf.mxu1  ;;  %v9042_v35 = vor.u32 1.1754944e-38, %v9041_v18  ;;  %vm9040_vm14 = vcmp.eq.f32.partialorder %v9039_v3, 8.507059e+37 }
 0x81b   : > { %v16314_v6 = vadd.f32 %v16294_v60, %v8931_v32  ;;  %v8728_v52 = vmul.f32 0.5, %v8727_v41  ;;  %v8779_v41 = vmul.f32 %v15989_v17, %v8760_v23 }
 0x81d   : > { %v10985_v19 = vpop.eup %10984  ;;  %v10543_v36 = vmul.f32 -1.442695, %v16314_v6  ;;  %v8729_v58 = vsub.f32 1.5, %v8728_v52 }
 0x81e   : > { %v10987_v49 = vpop.eup %10986  ;;  %v9015_v39 = vadd.f32 1.0, %v10985_v19 }
 0x81f   : > { %v9031_v25 = vmul.f32 %v10987_v49, %v9014_v10  ;;  %10988 = vpow2.f32 %v10543_v36  ;;  %v8730_v2 = vmul.f32 %v10983_v47, %v8729_v58  ;;  %vm9036_vm5 = vweird.f32 %v10987_v49 }
 0x820   : > { %10990 = vrcp.f32 %v9015_v39  ;;  %vm16339_vm13 = vmor %vm9035_vm15, %vm9036_vm5  ;;  %v9054_v45 = vand.u32 2147483647, %v9015_v39  ;;  %v9056_v14 = vand.u32 2147483648, %v9015_v39  ;;  %vm9050_vm3 = vweird.f32 %v9015_v39 }
 0x821   : > { %v9032_v33 = vsub.f32 1.0, %v9031_v25  ;;  %v8734_v31 = vsel %vm16323_vm8, %v10983_v47, %v8730_v2 }
 0x822   : > { %v8933_v28 = vpop.f32.mrf.mxu1  ;;  %v8759_v53 = vmul.f32 %v8734_v31, %v16082_v57  ;;  %vm9055_vm6 = vcmp.eq.f32.partialorder %v9054_v45, 8.507059e+37  ;;  %v9057_v12 = vor.u32 1.1754944e-38, %v9056_v14 }
 0x823   : > { %v9033_v21 = vmul.f32 %v10987_v49, %v9032_v33  ;;  %v16318_v46 = vadd.f32 %v16294_v60, %v8933_v28 }
 0x824   : > { %v8778_v26 = vmul.f32 %v15989_v17, %v8759_v53  ;;  %v8798_v17 = vadd.f32 %v16002_v42, %v8779_v41 }
 0x825   : > { %v10989_v29 = vpop.eup %10988  ;;  %v10544_v15 = vmul.f32 -1.442695, %v16318_v46  ;;  %v9034_v30 = vadd.f32 %v10987_v49, %v9033_v21  ;;  %v8814_v21 = vadd.f32 1.0, %v16227_v24 }
 0x826   : > { %v10991_v48 = vpop.eup %10990  ;;  %v16327_v55 = vadd.f32 1.0, %v10989_v29  ;;  %v8797_v28 = vadd.f32 %v16002_v42, %v8778_v26 }
 0x827   : > { %v9046_v51 = vmul.f32 %v10991_v48, %v9015_v39  ;;  %v9038_v20 = vsel %vm16339_vm13, %v10987_v49, %v9034_v30  ;;  %vm9051_vm10 = vweird.f32 %v10991_v48  ;;  %v8830_v1 = vmul.f32 %v8814_v21, %v8798_v17 }
 0x828   : > { %10992 = vrcp.f32 %v16327_v55  ;;  %v9043_v10 = vsel %vm9040_vm14, %v9042_v35, %v9038_v20  ;;  %vm9052_vm7 = vmor %vm9050_vm3, %vm9051_vm10  ;;  %v8829_v37 = vmul.f32 %v8813_v38, %v8797_v28  ;;  %v9071_v30 = vand.u32 2147483648, %v16327_v55 }
 0x829   : > { %v9047_v54 = vsub.f32 1.0, %v9046_v51  ;;  %10994 = vpow2.f32 %v10544_v15  ;;  %v9270_v49 = vmul.f32 %v9043_v10, %v16297_v43  ;;  %v8370_v15 = vpop.permute.xlu2 %8369  ;;  %v8846_v31 = vadd.f32 %v8830_v1, %v8372_v9  ;;  %vm17871_vm10 = vmmov %vm17870_vm1 }
 0x82a   : > { %v8936_v22 = vpop.f32.mrf.mxu1  ;;  %v8845_v11 = vadd.f32 %v8829_v37, %v8370_v15  ;;  %vm9065_vm11 = vweird.f32 %v16327_v55  ;;  %v9069_v51 = vand.u32 2147483647, %v16327_v55  ;;  %v9072_v20 = vor.u32 1.1754944e-38, %v9071_v30  ;;  %v16388_v37 = vpop.f32.mrf.mxu2 }
 0x82b   : > { %v9048_v59 = vmul.f32 %v10991_v48, %v9047_v54  ;;  %v16347_v34 = vadd.f32 %v16294_v60, %v8936_v22 }
 0x82c   : > { %v8863_v54 = vpack.c.bf16 %v8846_v31, %v8845_v11  ;;  %vm9070_vm8 = vcmp.eq.f32.partialorder %v9069_v51, 8.507059e+37 }
 0x82d   : > { %v9049_v56 = vadd.f32 %v10991_v48, %v9048_v59  ;;  %v10545_v61 = vmul.f32 -1.442695, %v16347_v34 }
 0x82e   : > { %v16351_v57 = vpop.eup %10992  ;;  %10540 = vmatmul.msk.bf16.gmra.mxu1 %vm17870_vm1, %v8863_v54 }
 0x82f   : > { %v10995_v47 = vpop.eup %10994  ;;  %v9053_v32 = vsel %vm9052_vm7, %v10991_v48, %v9049_v56  ;;  %v9061_v16 = vmul.f32 %v16351_v57, %v16327_v55  ;;  %10996 = vpow2.f32 %v10545_v61  ;;  %vm9066_vm0 = vweird.f32 %v16351_v57 }
 0x830   : > { %v9058_v19 = vsel %vm9055_vm6, %v9057_v12, %v9053_v32  ;;  %v9017_v36 = vadd.f32 1.0, %v10995_v47  ;;  %vm16374_vm12 = vmor %vm9065_vm11, %vm9066_vm0 }
 0x831   : > { %v9271_v52 = vmul.f32 %v9058_v19, %v16305_v4  ;;  %v9062_v39 = vsub.f32 1.0, %v9061_v16 }
 0x832   : > { %10998 = vrcp.f32 %v9017_v36  ;;  %v8938_v25 = vpop.f32.mrf.mxu1  ;;  %v9086_v3 = vand.u32 2147483648, %v9017_v36  ;;  %v9084_v14 = vand.u32 2147483647, %v9017_v36  ;;  %vm9080_vm2 = vweird.f32 %v9017_v36  ;;  %v16395_v9 = vpop.f32.mrf.mxu2 }
 0x833   : > { %v9295_v58 = vpack.c.bf16 %v9271_v52, %v9270_v49  ;;  %v16361_v33 = vadd.f32 %v16294_v60, %v8938_v25  ;;  %v9063_v43 = vmul.f32 %v16351_v57, %v9062_v39 }
 0x834   : > { %v9087_v35 = vor.u32 1.1754944e-38, %v9086_v3  ;;  %vm9085_vm15 = vcmp.eq.f32.partialorder %v9084_v14, 8.507059e+37 }
 0x835   : > { %v10997_v2 = vpop.eup %10996  ;;  %v10546_v4 = vmul.f32 -1.442695, %v16361_v33  ;;  %10582 = vmatmul.msk.bf16.vlgmr.msrb.gmra.mxu2 %vm17867_vm9, %v9295_v58  ;;  %v9064_v24 = vadd.f32 %v16351_v57, %v9063_v43 }
 0x836   : > { %v9018_v29 = vadd.f32 1.0, %v10997_v2 }
 0x837   : > { %11000 = vpow2.f32 %v10546_v4  ;;  %v9068_v53 = vsel %vm16374_vm12, %v16351_v57, %v9064_v24  ;;  %vm17872_vm12 = vmmov %vm17870_vm1 }
 0x838   : > { %v10999_v48 = vpop.eup %10998  ;;  %11002 = vrcp.f32 %v9018_v29  ;;  %v9073_v23 = vsel %vm9070_vm8, %v9072_v20, %v9068_v53  ;;  %v9101_v19 = vand.u32 2147483648, %v9018_v29  ;;  %vm9095_vm14 = vweird.f32 %v9018_v29 }
 0x839   : > { %v9076_v42 = vmul.f32 %v10999_v48, %v9017_v36  ;;  %vm9081_vm4 = vweird.f32 %v10999_v48  ;;  %v9272_v10 = vmul.f32 %v9073_v23, %v16314_v6  ;;  %v9099_v36 = vand.u32 2147483647, %v9018_v29 }
 0x83a   : > { %vm9082_vm5 = vmor %vm9080_vm2, %vm9081_vm4  ;;  %v9102_v38 = vor.u32 1.1754944e-38, %v9101_v19  ;;  %v16401_v18 = vpop.f32.mrf.mxu2 }
 0x83b   : > { %v9077_v63 = vsub.f32 1.0, %v9076_v42  ;;  %vm9100_vm6 = vcmp.eq.f32.partialorder %v9099_v36, 8.507059e+37 }
 0x83d   : > { %v11001_v5 = vpop.eup %11000  ;;  %v9078_v45 = vmul.f32 %v10999_v48, %v9077_v63 }
 0x83e   : > { %v11003_v22 = vpop.eup %11002  ;;  %v9019_v59 = vadd.f32 1.0, %v11001_v5 }
 0x83f   : > { %v9079_v55 = vadd.f32 %v10999_v48, %v9078_v45  ;;  %v9091_v44 = vmul.f32 %v11003_v22, %v9018_v29  ;;  %vm9096_vm13 = vweird.f32 %v11003_v22 }
 0x840   : > { %11004 = vrcp.f32 %v9019_v59  ;;  %vm9097_vm3 = vmor %vm9095_vm14, %vm9096_vm13  ;;  %v9116_v52 = vand.u32 2147483648, %v9019_v59  ;;  %v9114_v6 = vand.u32 2147483647, %v9019_v59  ;;  %vm9110_vm9 = vweird.f32 %v9019_v59 }
 0x841   : > { %v9083_v56 = vsel %vm9082_vm5, %v10999_v48, %v9079_v55  ;;  %v9092_v61 = vsub.f32 1.0, %v9091_v44  ;;  %vm17875_vm14 = vmmov %vm17872_vm12 }
 0x842   : > { %v9088_v57 = vsel %vm9085_vm15, %v9087_v35, %v9083_v56  ;;  %v9117_v28 = vor.u32 1.1754944e-38, %v9116_v52  ;;  %vm9115_vm11 = vcmp.eq.f32.partialorder %v9114_v6, 8.507059e+37  ;;  %v16409_v35 = vpop.f32.mrf.mxu2 }
 0x843   : > { %v9273_v12 = vmul.f32 %v9088_v57, %v16318_v46  ;;  %v9093_v47 = vmul.f32 %v11003_v22, %v9092_v61 }
 0x845   : > { %v9296_v26 = vpack.c.bf16 %v9273_v12, %v9272_v10  ;;  %v9094_v16 = vadd.f32 %v11003_v22, %v9093_v47 }
 0x846   : > { %v11005_v32 = vpop.eup %11004 }
 0x847   : > { %v9106_v41 = vmul.f32 %v11005_v32, %v9019_v59  ;;  %10583 = vmatmul.msk.bf16.gmra.mxu2 %vm17871_vm10, %v9296_v26  ;;  %v9098_v39 = vsel %vm9097_vm3, %v11003_v22, %v9094_v16  ;;  %vm9111_vm7 = vweird.f32 %v11005_v32 }
 0x848   : > { %v9103_v58 = vsel %vm9100_vm6, %v9102_v38, %v9098_v39  ;;  %vm9112_vm0 = vmor %vm9110_vm9, %vm9111_vm7 }
 0x849   : > { %v9107_v49 = vsub.f32 1.0, %v9106_v41  ;;  %v9274_v2 = vmul.f32 %v9103_v58, %v16347_v34 }
 0x84b   : > { %v9108_v25 = vmul.f32 %v11005_v32, %v9107_v49 }
 0x84d   : > { %v9109_v46 = vadd.f32 %v11005_v32, %v9108_v25 }
 0x84f   : > { %v9113_v21 = vsel %vm9112_vm0, %v11005_v32, %v9109_v46 }
 0x850   : > { %v9118_v17 = vsel %vm9115_vm11, %v9117_v28, %v9113_v21  ;;  %v8941_v29 = vpop.f32.mrf.mxu1 }
 0x851   : > { %v9275_v43 = vmul.f32 %v9118_v17, %v16361_v33  ;;  %v16391_v1 = vadd.f32 %v16294_v60, %v8941_v29 }
 0x853   : > { %v9297_v4 = vpack.c.bf16 %v9275_v43, %v9274_v2  ;;  %v10547_v15 = vmul.f32 -1.442695, %v16391_v1  ;;  %v16424_v43 = vpop.f32.mrf.mxu2 }
 0x855   : > { %11006 = vpow2.f32 %v10547_v15 }
 0x857   : > { %10584 = vmatmul.msk.bf16.gmra.mxu2 %vm17872_vm12, %v9297_v4 }
 0x858   : > { %v8943_v48 = vpop.f32.mrf.mxu1 }
 0x859   : > { %v8944_v11 = vadd.f32 %v16294_v60, %v8943_v48 }
 0x85b   : > { %v11007_v34 = vpop.eup %11006  ;;  %v10548_v24 = vmul.f32 -1.442695, %v8944_v11 }
 0x85c   : > { %v9020_v33 = vadd.f32 1.0, %v11007_v34 }
 0x85d   : > { %11008 = vpow2.f32 %v10548_v24 }
 0x85e   : > { %11010 = vrcp.f32 %v9020_v33  ;;  %v9131_v56 = vand.u32 2147483648, %v9020_v33  ;;  %vm9125_vm1 = vweird.f32 %v9020_v33  ;;  %v9129_v61 = vand.u32 2147483647, %v9020_v33 }
 0x860   : > { %v8946_v42 = vpop.f32.mrf.mxu1  ;;  %v9132_v19 = vor.u32 1.1754944e-38, %v9131_v56  ;;  %vm9130_vm5 = vcmp.eq.f32.partialorder %v9129_v61, 8.507059e+37 }
 0x861   : > { %v16398_v30 = vadd.f32 %v16294_v60, %v8946_v42 }
 0x863   : > { %v11009_v31 = vpop.eup %11008  ;;  %v10549_v51 = vmul.f32 -1.442695, %v16398_v30 }
 0x864   : > { %v11011_v63 = vpop.eup %11010  ;;  %v9021_v3 = vadd.f32 1.0, %v11009_v31 }
 0x865   : > { %v9121_v54 = vmul.f32 %v11011_v63, %v9020_v33  ;;  %11012 = vpow2.f32 %v10549_v51  ;;  %vm9126_vm4 = vweird.f32 %v11011_v63 }
 0x866   : > { %11014 = vrcp.f32 %v9021_v3  ;;  %vm16412_vm8 = vmor %vm9125_vm1, %vm9126_vm4  ;;  %v9144_v12 = vand.u32 2147483647, %v9021_v3  ;;  %v9146_v47 = vand.u32 2147483648, %v9021_v3  ;;  %vm9140_vm15 = vweird.f32 %v9021_v3 }
 0x867   : > { %v9122_v5 = vsub.f32 1.0, %v9121_v54  ;;  %vm17878_vm1 = vmmov %vm17875_vm14 }
 0x868   : > { %v8948_v53 = vpop.f32.mrf.mxu1  ;;  %v9147_v6 = vor.u32 1.1754944e-38, %v9146_v47  ;;  %vm9145_vm10 = vcmp.eq.f32.partialorder %v9144_v12, 8.507059e+37 }
 0x869   : > { %v9123_v45 = vmul.f32 %v11011_v63, %v9122_v5  ;;  %v16404_v14 = vadd.f32 %v16294_v60, %v8948_v53 }
 0x86b   : > { %v11013_v22 = vpop.eup %11012  ;;  %v10550_v20 = vmul.f32 -1.442695, %v16404_v14  ;;  %v9124_v44 = vadd.f32 %v11011_v63, %v9123_v45 }
 0x86c   : > { %v11015_v59 = vpop.eup %11014  ;;  %v16407_v55 = vadd.f32 1.0, %v11013_v22 }
 0x86d   : > { %v9136_v23 = vmul.f32 %v11015_v59, %v9021_v3  ;;  %11016 = vpow2.f32 %v10550_v20  ;;  %v9128_v32 = vsel %vm16412_vm8, %v11011_v63, %v9124_v44  ;;  %vm9141_vm2 = vweird.f32 %v11015_v59 }
 0x86e   : > { %11018 = vrcp.f32 %v16407_v55  ;;  %v9133_v25 = vsel %vm9130_vm5, %v9132_v19, %v9128_v32  ;;  %vm9142_vm13 = vmor %vm9140_vm15, %vm9141_vm2  ;;  %vm9155_vm7 = vweird.f32 %v16407_v55  ;;  %v9159_v51 = vand.u32 2147483647, %v16407_v55 }
 0x86f   : > { %v9137_v57 = vsub.f32 1.0, %v9136_v23  ;;  %v9276_v21 = vmul.f32 %v9133_v25, %v16391_v1 }
 0x870   : > { %v8951_v26 = vpop.f32.mrf.mxu1  ;;  %vm9160_vm0 = vcmp.eq.f32.partialorder %v9159_v51, 8.507059e+37 }
 0x871   : > { %v9138_v16 = vmul.f32 %v11015_v59, %v9137_v57  ;;  %v16419_v41 = vadd.f32 %v16294_v60, %v8951_v26 }
 0x873   : > { %v11017_v36 = vpop.eup %11016  ;;  %v9139_v49 = vadd.f32 %v11015_v59, %v9138_v16  ;;  %v10551_v52 = vmul.f32 -1.442695, %v16419_v41 }
 0x874   : > { %v11019_v39 = vpop.eup %11018  ;;  %v9023_v38 = vadd.f32 1.0, %v11017_v36 }
 0x875   : > { %v9143_v46 = vsel %vm9142_vm13, %v11015_v59, %v9139_v49  ;;  %v9151_v58 = vmul.f32 %v11019_v39, %v16407_v55  ;;  %11020 = vpow2.f32 %v10551_v52  ;;  %vm9156_vm3 = vweird.f32 %v11019_v39  ;;  %v16446_v59 = vpop.f32.mrf.mxu2 }
 0x876   : > { %v9148_v28 = vsel %vm9145_vm10, %v9147_v6, %v9143_v46  ;;  %11022 = vrcp.f32 %v9023_v38  ;;  %vm16437_vm6 = vmor %vm9155_vm7, %vm9156_vm3  ;;  %v9174_v54 = vand.u32 2147483647, %v9023_v38  ;;  %v9176_v5 = vand.u32 2147483648, %v9023_v38 }
 0x877   : > { %v9277_v17 = vmul.f32 %v9148_v28, %v8944_v11  ;;  %v9152_v2 = vsub.f32 1.0, %v9151_v58  ;;  %v9161_v11 = vand.u32 2147483648, %v16407_v55  ;;  %vm9170_vm11 = vweird.f32 %v9023_v38  ;;  %vm17879_vm7 = vmmov %vm17878_vm1 }
 0x878   : > { %v8953_v4 = vpop.f32.mrf.mxu1  ;;  %v9177_v10 = vor.u32 1.1754944e-38, %v9176_v5  ;;  %vm9175_vm4 = vcmp.eq.f32.partialorder %v9174_v54, 8.507059e+37 }
 0x879   : > { %v9298_v29 = vpack.c.bf16 %v9277_v17, %v9276_v21  ;;  %v9153_v15 = vmul.f32 %v11019_v39, %v9152_v2  ;;  %v16427_v48 = vadd.f32 %v16294_v60, %v8953_v4  ;;  %v9162_v44 = vor.u32 1.1754944e-38, %v9161_v11 }
 0x87b   : > { %v11021_v34 = vpop.eup %11020  ;;  %v10552_v24 = vmul.f32 -1.442695, %v16427_v48  ;;  %10585 = vmatmul.msk.bf16.gmra.mxu2 %vm17875_vm14, %v9298_v29  ;;  %v9154_v31 = vadd.f32 %v11019_v39, %v9153_v15 }
 0x87c   : > { %v11023_v33 = vpop.eup %11022  ;;  %v16431_v42 = vadd.f32 1.0, %v11021_v34 }
 0x87d   : > { %v9166_v1 = vmul.f32 %v11023_v33, %v9023_v38  ;;  %11024 = vpow2.f32 %v10552_v24  ;;  %v9158_v45 = vsel %vm16437_vm6, %v11019_v39, %v9154_v31  ;;  %vm9171_vm9 = vweird.f32 %v11023_v33  ;;  %v16457_v58 = vpop.f32.mrf.mxu2 }
 0x87e   : > { %11026 = vrcp.f32 %v16431_v42  ;;  %v9163_v57 = vsel %vm9160_vm0, %v9162_v44, %v9158_v45  ;;  %vm9172_vm12 = vmor %vm9170_vm11, %vm9171_vm9  ;;  %vm9185_vm2 = vweird.f32 %v16431_v42  ;;  %v9189_v17 = vand.u32 2147483647, %v16431_v42 }
 0x87f   : > { %v9167_v63 = vsub.f32 1.0, %v9166_v1  ;;  %v9278_v16 = vmul.f32 %v9163_v57, %v16398_v30 }
 0x880   : > { %v8956_v53 = vpop.f32.mrf.mxu1  ;;  %vm9190_vm13 = vcmp.eq.f32.partialorder %v9189_v17, 8.507059e+37 }
 0x881   : > { %v9168_v22 = vmul.f32 %v11023_v33, %v9167_v63  ;;  %v16444_v20 = vadd.f32 %v16294_v60, %v8956_v53 }
 0x883   : > { %v11025_v55 = vpop.eup %11024  ;;  %v9169_v23 = vadd.f32 %v11023_v33, %v9168_v22  ;;  %v10553_v56 = vmul.f32 -1.442695, %v16444_v20 }
 0x884   : > { %v11027_v61 = vpop.eup %11026  ;;  %v9025_v12 = vadd.f32 1.0, %v11025_v55 }
 0x885   : > { %v9173_v47 = vsel %vm9172_vm12, %v11023_v33, %v9169_v23  ;;  %v9181_v26 = vmul.f32 %v11027_v61, %v16431_v42  ;;  %11028 = vpow2.f32 %v10553_v56  ;;  %vm9186_vm8 = vweird.f32 %v11027_v61  ;;  %v16462_v54 = vpop.f32.mrf.mxu2 }
 0x886   : > { %v9178_v32 = vsel %vm9175_vm4, %v9177_v10, %v9173_v47  ;;  %11030 = vrcp.f32 %v9025_v12  ;;  %vm9187_vm5 = vmor %vm9185_vm2, %vm9186_vm8  ;;  %v9206_v4 = vand.u32 2147483648, %v9025_v12  ;;  %v9204_v34 = vand.u32 2147483647, %v9025_v12 }
 0x887   : > { %v9279_v19 = vmul.f32 %v9178_v32, %v16404_v14  ;;  %v9182_v36 = vsub.f32 1.0, %v9181_v26  ;;  %v9191_v14 = vand.u32 2147483648, %v16431_v42  ;;  %vm9200_vm10 = vweird.f32 %v9025_v12  ;;  %vm17880_vm2 = vmmov %vm17879_vm7 }
 0x888   : > { %v8958_v49 = vpop.f32.mrf.mxu1  ;;  %v9207_v51 = vor.u32 1.1754944e-38, %v9206_v4  ;;  %vm9205_vm3 = vcmp.eq.f32.partialorder %v9204_v34, 8.507059e+37 }
 0x889   : > { %v9299_v52 = vpack.c.bf16 %v9279_v19, %v9278_v16  ;;  %v9183_v39 = vmul.f32 %v11027_v61, %v9182_v36  ;;  %v16453_v25 = vadd.f32 %v16294_v60, %v8958_v49  ;;  %v9192_v24 = vor.u32 1.1754944e-38, %v9191_v14 }
 0x88b   : > { %v11029_v6 = vpop.eup %11028  ;;  %v10554_v38 = vmul.f32 -1.442695, %v16453_v25  ;;  %10586 = vmatmul.msk.bf16.gmra.mxu2 %vm17878_vm1, %v9299_v52  ;;  %v9184_v21 = vadd.f32 %v11027_v61, %v9183_v39 }
 0x88c   : > { %v11031_v46 = vpop.eup %11030  ;;  %v9026_v28 = vadd.f32 1.0, %v11029_v6 }
 0x88d   : > { %v9196_v30 = vmul.f32 %v11031_v46, %v9025_v12  ;;  %11032 = vpow2.f32 %v10554_v38  ;;  %v9188_v29 = vsel %vm9187_vm5, %v11027_v61, %v9184_v21  ;;  %vm9201_vm15 = vweird.f32 %v11031_v46  ;;  %v16467_v47 = vpop.f32.mrf.mxu2  ;;  %vm17882_vm5 = vmmov %vm17880_vm2 }
 0x88e   : > { %11034 = vrcp.f32 %v9026_v28  ;;  %v9193_v11 = vsel %vm9190_vm13, %v9192_v24, %v9188_v29  ;;  %vm9202_vm14 = vmor %vm9200_vm10, %vm9201_vm15  ;;  %v9221_v57 = vand.u32 2147483648, %v9026_v28  ;;  %vm9215_vm9 = vweird.f32 %v9026_v28  ;;  %v8374_v24 = vpop.permute.xlu0 %8373 }
 0x88f   : > { %v9197_v2 = vsub.f32 1.0, %v9196_v30  ;;  %v9280_v53 = vmul.f32 %v9193_v11, %v16419_v41  ;;  %v9219_v10 = vand.u32 2147483647, %v9026_v28  ;;  %vm17884_vm15 = vmmov %vm17880_vm2 }
 0x890   : > { %v9222_v16 = vor.u32 1.1754944e-38, %v9221_v57 }
 0x891   : > { %v9198_v15 = vmul.f32 %v11031_v46, %v9197_v2  ;;  %vm9220_vm12 = vcmp.eq.f32.partialorder %v9219_v10, 8.507059e+37 }
 0x893   : > { %v11033_v33 = vpop.eup %11032  ;;  %v9199_v31 = vadd.f32 %v11031_v46, %v9198_v15 }
 0x894   : > { %v11035_v1 = vpop.eup %11034  ;;  %v9027_v63 = vadd.f32 1.0, %v11033_v33 }
 0x895   : > { %v9203_v3 = vsel %vm9202_vm14, %v11031_v46, %v9199_v31  ;;  %v9211_v42 = vmul.f32 %v11035_v1, %v9026_v28  ;;  %vm9216_vm6 = vweird.f32 %v11035_v1  ;;  %v16471_v28 = vpop.f32.mrf.mxu2 }
 0x896   : > { %v9208_v5 = vsel %vm9205_vm3, %v9207_v51, %v9203_v3  ;;  %11036 = vrcp.f32 %v9027_v63  ;;  %vm9217_vm0 = vmor %vm9215_vm9, %vm9216_vm6  ;;  %v9236_v26 = vand.u32 2147483648, %v9027_v63  ;;  %vm9230_vm4 = vweird.f32 %v9027_v63 }
 0x897   : > { %v9281_v45 = vmul.f32 %v9208_v5, %v16427_v48  ;;  %v9212_v22 = vsub.f32 1.0, %v9211_v42  ;;  %v9234_v48 = vand.u32 2147483647, %v9027_v63  ;;  %v8376_v42 = vpop.permute.xlu2 %8375  ;;  %vm17888_vm3 = vmmov %vm17880_vm2 }
 0x898   : > { %v9237_v49 = vor.u32 1.1754944e-38, %v9236_v26 }
 0x899   : > { %v9300_v44 = vpack.c.bf16 %v9281_v45, %v9280_v53  ;;  %v9213_v55 = vmul.f32 %v11035_v1, %v9212_v22  ;;  %vm9235_vm8 = vcmp.eq.f32.partialorder %v9234_v48, 8.507059e+37 }
 0x89b   : > { %10587 = vmatmul.msk.bf16.gmra.mxu2 %vm17879_vm7, %v9300_v44  ;;  %v9214_v56 = vadd.f32 %v11035_v1, %v9213_v55  ;;  %v17883_v55 = vld [vmem:[#allocation83_spill] sm:$0xff] }
 0x89c   : > { %v11037_v23 = vpop.eup %11036 }
 0x89d   : > { %v9226_v61 = vmul.f32 %v11037_v23, %v9027_v63  ;;  %v9218_v41 = vsel %vm9217_vm0, %v11035_v1, %v9214_v56  ;;  %vm9231_vm11 = vweird.f32 %v11037_v23  ;;  %v16474_v30 = vpop.f32.mrf.mxu2  ;;  %v17881_v1 = vld [vmem:[#allocation65_spill] sm:$0xff] }
 0x89e   : > { %v9223_v36 = vsel %vm9220_vm12, %v9222_v16, %v9218_v41  ;;  %vm9232_vm1 = vmor %vm9230_vm4, %vm9231_vm11 }
 0x89f   : > { %v9227_v12 = vsub.f32 1.0, %v9226_v61  ;;  %v9282_v6 = vmul.f32 %v9223_v36, %v16444_v20  ;;  %v16486_v20 = vld [vmem:[%s16965_s15 + $0x1] ss:$0 sm:$0xff]  ;;  %vm17890_vm12 = vmmov %vm17880_vm2 }
 0x8a0   : > { %vm17891_vm4 = vmmov %vm17880_vm2 }
 0x8a1   : > { %v9228_v32 = vmul.f32 %v11037_v23, %v9227_v12  ;;  %v8378_v12 = vpop.permute.xlu1 %8377 }
 0x8a3   : > { %v9229_v19 = vadd.f32 %v11037_v23, %v9228_v32 }
 0x8a5   : > { %v9233_v52 = vsel %vm9232_vm1, %v11037_v23, %v9229_v19  ;;  %v17885_v19 = vld [vmem:[#allocation50_spill] sm:$0xff]  ;;  %vm17893_vm1 = vmmov %vm17880_vm2 }
 0x8a6   : > { %v9238_v39 = vsel %vm9235_vm8, %v9237_v49, %v9233_v52  ;;  %vm17895_vm8 = vmmov %vm17893_vm1 }
 0x8a7   : > { %v9283_v38 = vmul.f32 %v9238_v39, %v16453_v25 }
 0x8a9   : > { %v9301_v46 = vpack.c.bf16 %v9283_v38, %v9282_v6 }
 0x8ab   : > { %10588 = vmatmul.msk.bf16.gmra.mxu2 %vm17880_vm2, %v9301_v46  ;;  %v8961_v21 = vpop.f32.mrf.mxu1  ;;  %vm17898_vm2 = vmmov %vm17893_vm1 }
 0x8ac   : > { %v16477_v14 = vadd.f32 %v16294_v60, %v8961_v21 }
 0x8ae   : > { %v10555_v17 = vmul.f32 -1.442695, %v16477_v14 }
 0x8b0   : > { %11038 = vpow2.f32 %v10555_v17 }
 0x8b3   : > { %v8963_v2 = vpop.f32.mrf.mxu1 }
 0x8b4   : > { %v16481_v4 = vadd.f32 %v16294_v60, %v8963_v2 }
 0x8b6   : > { %v11039_v29 = vpop.eup %11038  ;;  %v10556_v15 = vmul.f32 -1.442695, %v16481_v4 }
 0x8b7   : > { %v9028_v33 = vadd.f32 1.0, %v11039_v29 }
 0x8b8   : > { %v9365_v25 = vpop.f32.mrf.mxu2  ;;  %11040 = vpow2.f32 %v10556_v15  ;;  %v8380_v15 = vpop.permute.xlu2 %8379 }
 0x8b9   : > { %v9366_v34 = vadd.f32 %v16486_v20, %v9365_v25  ;;  %11042 = vrcp.f32 %v9028_v33  ;;  %v9251_v16 = vand.u32 2147483648, %v9028_v33  ;;  %vm9245_vm10 = vweird.f32 %v9028_v33 }
 0x8ba   : > { %v9249_v49 = vand.u32 2147483647, %v9028_v33 }
 0x8bb   : > { %v9405_v31 = vmul.f32 %v9366_v34, %v8374_v24  ;;  %v9252_v25 = vor.u32 1.1754944e-38, %v9251_v16 }
 0x8bc   : > { %vm9250_vm6 = vcmp.eq.f32.partialorder %v9249_v49, 8.507059e+37 }
 0x8bd   : > { %v16491_v11 = vadd.f32 %v9405_v31, %v17881_v1 }
 0x8be   : > { %v11041_v3 = vpop.eup %11040 }
 0x8bf   : > { %v9469_v51 = vsel %vm17882_vm5, %v16491_v11, 0.0  ;;  %v11043_v5 = vpop.eup %11042  ;;  %v9029_v53 = vadd.f32 1.0, %v11041_v3  ;;  %vm17899_vm5 = vmmov %vm17893_vm1 }
 0x8c0   : > { %v9367_v60 = vpop.f32.mrf.mxu2  ;;  %9470 = vadd.xlane.f32.xlu0 %v9469_v51  ;;  %v9241_v22 = vmul.f32 %v11043_v5, %v9028_v33  ;;  %vm9246_vm13 = vweird.f32 %v11043_v5  ;;  %v17889_v51 = vld [vmem:[#allocation81_spill] sm:$0xff] }
 0x8c1   : > { %v9368_v63 = vadd.f32 %v16486_v20, %v9367_v60  ;;  %11044 = vrcp.f32 %v9029_v53  ;;  %vm16505_vm14 = vmor %vm9245_vm10, %vm9246_vm13  ;;  %v9266_v6 = vand.u32 2147483648, %v9029_v53  ;;  %v9264_v17 = vand.u32 2147483647, %v9029_v53 }
 0x8c2   : > { %v9242_v44 = vsub.f32 1.0, %v9241_v22  ;;  %vm9260_vm9 = vweird.f32 %v9029_v53  ;;  %vm17903_vm13 = vmmov %vm17893_vm1 }
 0x8c3   : > { %v9406_v45 = vmul.f32 %v9368_v63, %v8376_v42  ;;  %v9267_v33 = vor.u32 1.1754944e-38, %v9266_v6  ;;  %vm9265_vm11 = vcmp.eq.f32.partialorder %v9264_v17, 8.507059e+37  ;;  %v8392_v17 = vpop.permute.xlu0 %8391  ;;  %vm17906_vm10 = vmmov %vm17893_vm1 }
 0x8c4   : > { %v9243_v56 = vmul.f32 %v11043_v5, %v9242_v44  ;;  %v8382_v44 = vpop.permute.xlu1 %8381 }
 0x8c5   : > { %v16497_v23 = vadd.f32 %v9406_v45, %v17883_v55 }
 0x8c6   : > { %v9244_v32 = vadd.f32 %v11043_v5, %v9243_v56  ;;  %v17892_v56 = vld [vmem:[#allocation98_spill] sm:$0xff] }
 0x8c7   : > { %v9472_v57 = vsel %vm17884_vm15, %v16497_v23, 0.0  ;;  %v11045_v26 = vpop.eup %11044  ;;  %vm17901_vm15 = vmmov %vm17893_vm1 }
 0x8c8   : > { %9473 = vadd.xlane.f32.xlu1 %v9472_v57  ;;  %v9256_v48 = vmul.f32 %v11045_v26, %v9029_v53  ;;  %v9248_v46 = vsel %vm16505_vm14, %v11043_v5, %v9244_v32  ;;  %vm9261_vm7 = vweird.f32 %v11045_v26  ;;  %v16536_v57 = vadd.f32 %v16388_v37, %v16095_v50  ;;  %vm17907_vm14 = vmmov %vm17893_vm1 }
 0x8c9   : > { %v9253_v24 = vsel %vm9250_vm6, %v9252_v25, %v9248_v46  ;;  %vm9262_vm0 = vmor %vm9260_vm9, %vm9261_vm7  ;;  %v17896_v25 = vld [vmem:[#allocation100_spill] sm:$0xff] }
 0x8ca   : > { %v9370_v61 = vpop.f32.mrf.mxu2  ;;  %v9257_v52 = vsub.f32 1.0, %v9256_v48  ;;  %v9284_v3 = vmul.f32 %v9253_v24, %v16477_v14  ;;  %vm17911_vm7 = vmmov %vm17893_vm1 }
 0x8cb   : > { %v9371_v10 = vadd.f32 %v16486_v20, %v9370_v61  ;;  %vm17912_vm6 = vmmov %vm17893_vm1 }
 0x8cc   : > { %v9258_v21 = vmul.f32 %v11045_v26, %v9257_v52  ;;  %v8390_v46 = vpop.permute.xlu1 %8389  ;;  %vm17913_vm9 = vmmov %vm17893_vm1 }
 0x8cd   : > { %v9407_v41 = vmul.f32 %v9371_v10, %v8378_v12  ;;  %v8384_v12 = vpop.permute.xlu2 %8383 }
 0x8ce   : > { %v9259_v34 = vadd.f32 %v11045_v26, %v9258_v21 }
 0x8cf   : > { %v16503_v36 = vadd.f32 %v9407_v41, %v17885_v19  ;;  %v17894_v19 = vld [vmem:[#allocation97_spill] sm:$0xff] }
 0x8d0   : > { %v9263_v1 = vsel %vm9262_vm0, %v11045_v26, %v9259_v34  ;;  %vm17914_vm0 = vmmov %vm17893_vm1 }
 0x8d1   : > { %v9475_v38 = vsel %vm17888_vm3, %v16503_v36, 0.0  ;;  %v9268_v60 = vsel %vm9265_vm11, %v9267_v33, %v9263_v1  ;;  %vm17909_vm3 = vmmov %vm17893_vm1 }
 0x8d2   : > { %v9372_v2 = vpop.f32.mrf.mxu2  ;;  %9476 = vadd.xlane.f32.xlu2 %v9475_v38  ;;  %v9285_v42 = vmul.f32 %v9268_v60, %v16481_v4  ;;  %v16530_v4 = vadd.f32 %v16395_v9, %v16095_v50  ;;  %vm17915_vm11 = vmmov %vm17914_vm0 }
 0x8d3   : > { %v9373_v29 = vadd.f32 %v16486_v20, %v9372_v2 }
 0x8d4   : > { %v9302_v45 = vpack.c.bf16 %v9285_v42, %v9284_v3  ;;  %v17900_v3 = vld [vmem:[#allocation99_spill] sm:$0xff] }
 0x8d5   : > { %v9408_v31 = vmul.f32 %v9373_v29, %v8380_v15  ;;  %v8386_v41 = vpop.permute.xlu2 %8385  ;;  %v17897_v15 = vld [vmem:[#allocation92_spill] sm:$0xff] }
 0x8d6   : > { %10589 = vmatmul.msk.bf16.gmra.mxu2 %vm17891_vm4, %v9302_v45  ;;  %vm17918_vm4 = vmmov %vm17914_vm0 }
 0x8d7   : > { %v16515_v63 = vadd.f32 %v9408_v31, %v17889_v51 }
 0x8d9   : > { %v9478_v5 = vsel %vm17890_vm12, %v16515_v63, 0.0  ;;  %vm17916_vm12 = vmmov %vm17914_vm0 }
 0x8da   : > { %v9375_v22 = vpop.f32.mrf.mxu2  ;;  %9479 = vadd.xlane.f32.xlu0 %v9478_v5  ;;  %v8394_v5 = vpop.permute.xlu0 %8393 }
 0x8db   : > { %v9376_v53 = vadd.f32 %v16486_v20, %v9375_v22 }
 0x8dd   : > { %v9409_v55 = vmul.f32 %v9376_v53, %v8382_v44  ;;  %v8388_v52 = vpop.permute.xlu2 %8387 }
 0x8df   : > { %v16524_v61 = vadd.f32 %v9409_v55, %v17892_v56  ;;  %v17902_v56 = vld [vmem:[#allocation80_spill] sm:$0xff] }
 0x8e1   : > { %v9481_v14 = vsel %vm17893_vm1, %v16524_v61, 0.0  ;;  %9449 = vrot.lane.b32.xlu1 %v16530_v4, %s17747_s26  ;;  %vm17919_vm1 = vmmov %vm17914_vm0 }
 0x8e2   : > { %9482 = vadd.xlane.f32.xlu2 %v9481_v14  ;;  %v9377_v10 = vpop.f32.mrf.mxu2 }
 0x8e3   : > { %v9378_v32 = vadd.f32 %v16486_v20, %v9377_v10  ;;  %v8400_v10 = vpop.permute.xlu1 %8399 }
 0x8e5   : > { %v9410_v9 = vmul.f32 %v9378_v32, %v8384_v12  ;;  %v8396_v31 = vpop.permute.xlu2 %8395 }
 0x8e7   : > { %v16543_v49 = vadd.f32 %v9410_v9, %v17894_v19 }
 0x8e9   : > { %v9484_v6 = vsel %vm17895_vm8, %v16543_v49, 0.0  ;;  %vm17920_vm8 = vmmov %vm17914_vm0 }
 0x8ed   : > { %v8402_v44 = vpop.permute.xlu2 %8401 }
 0x8ee   : > { %9447 = vrot.lane.b32.xlu0 %v16536_v57, %s17747_s26 }
 0x8fe   : > { %v9380_v26 = vpop.f32.mrf.mxu2 }
 0x8ff   : > { %v9381_v16 = vadd.f32 %v16486_v20, %v9380_v26 }
 0x901   : > { %v9411_v37 = vmul.f32 %v9381_v16, %v8386_v41  ;;  %v8398_v41 = vpop.permute.xlu0 %8397  ;;  %v17904_v16 = vld [vmem:[#allocation93_spill] sm:$0xff] }
 0x903   : > { %v16550_v29 = vadd.f32 %v9411_v37, %v17896_v25 }
 0x905   : > { %v9487_v60 = vsel %vm17899_vm5, %v16550_v29, 0.0  ;;  %vm17922_vm5 = vmmov %vm17914_vm0 }
 0x906   : > { %v9382_v48 = vpop.f32.mrf.mxu2 }
 0x907   : > { %v9383_v2 = vadd.f32 %v16486_v20, %v9382_v48 }
 0x909   : > { %v9412_v1 = vmul.f32 %v9383_v2, %v8388_v52  ;;  %v8404_v52 = vpop.permute.xlu2 %8403  ;;  %v16585_v2 = vpop.permute.xlu0 %9437 }
 0x90b   : > { %9485 = vadd.xlane.f32.xlu1 %v9484_v6  ;;  %v16561_v42 = vadd.f32 %v9412_v1, %v17900_v3 }
 0x90d   : > { %v9490_v53 = vsel %vm17901_vm15, %v16561_v42, 0.0  ;;  %vm17923_vm15 = vmmov %vm17914_vm0 }
 0x90e   : > { %v9385_v39 = vpop.f32.mrf.mxu2 }
 0x90f   : > { %v9386_v38 = vadd.f32 %v16486_v20, %v9385_v39  ;;  %v17905_v39 = vld [vmem:[#allocation22_spill] sm:$0xff] }
 0x911   : > { %v9413_v21 = vmul.f32 %v9386_v38, %v8390_v46  ;;  %v16582_v46 = vpop.permute.xlu1 %9441 }
 0x913   : > { %v16553_v34 = vadd.f32 %v9413_v21, %v17897_v15  ;;  %9488 = vadd.xlane.f32.xlu1 %v9487_v60  ;;  %v17908_v15 = vld [vmem:[#allocation90_spill] sm:$0xff] }
 0x915   : > { %v9493_v24 = vsel %vm17898_vm2, %v16553_v34, 0.0  ;;  %vm17921_vm2 = vmmov %vm17914_vm0 }
 0x916   : > { %v9387_v33 = vpop.f32.mrf.mxu2  ;;  %9494 = vadd.xlane.f32.xlu2 %v9493_v24 }
 0x917   : > { %v9388_v51 = vadd.f32 %v16486_v20, %v9387_v33  ;;  %v16590_v33 = vpop.permute.xlu2 %9439 }
 0x919   : > { %v9414_v45 = vmul.f32 %v9388_v51, %v8392_v17  ;;  %v16595_v51 = vpop.permute.xlu1 %9443 }
 0x91b   : > { %9491 = vadd.xlane.f32.xlu1 %v9490_v53  ;;  %v16567_v14 = vadd.f32 %v9414_v45, %v17902_v56 }
 0x91d   : > { %v9496_v26 = vsel %vm17903_vm13, %v16567_v14, 0.0 }
 0x91e   : > { %v9390_v22 = vpop.f32.mrf.mxu2 }
 0x91f   : > { %v9391_v55 = vadd.f32 %v16486_v20, %v9390_v22  ;;  %v17910_v22 = vld [vmem:[#allocation91_spill] sm:$0xff] }
 0x921   : > { %v9415_v12 = vmul.f32 %v9391_v55, %v8394_v5 }
 0x923   : > { %9497 = vadd.xlane.f32.xlu1 %v9496_v26  ;;  %v16573_v19 = vadd.f32 %v9415_v12, %v17904_v16  ;;  %v16606_v12 = vpop.permute.xlu2 %9445 }
 0x925   : > { %v9499_v6 = vsel %vm17906_vm10, %v16573_v19, 0.0 }
 0x926   : > { %v9392_v32 = vpop.f32.mrf.mxu2 }
 0x927   : > { %v9393_v48 = vadd.f32 %v16486_v20, %v9392_v32 }
 0x929   : > { %v9416_v9 = vmul.f32 %v9393_v48, %v8396_v31 }
 0x92b   : > { %v16576_v37 = vadd.f32 %v9416_v9, %v17905_v39  ;;  %9500 = vadd.xlane.f32.xlu1 %v9499_v6 }
 0x92d   : > { %v9502_v38 = vsel %vm17907_vm14, %v16576_v37, 0.0 }
 0x92e   : > { %v9395_v21 = vpop.f32.mrf.mxu2  ;;  %9503 = vadd.xlane.f32.xlu0 %v9502_v38 }
 0x92f   : > { %v9396_v17 = vadd.f32 %v16486_v20, %v9395_v21 }
 0x931   : > { %v9417_v25 = vmul.f32 %v9396_v17, %v8398_v41 }
 0x933   : > { %v16588_v24 = vadd.f32 %v9417_v25, %v17908_v15  ;;  %v9471_v3 = vpop.xlane.xlu0 %9470 }
 0x934   : > { %v9517_v5 = vmul.f32 %v9471_v3, %v14422_v8 }
 0x935   : > { %v9505_v31 = vsel %vm17909_vm3, %v16588_v24, 0.0 }
 0x936   : > { %v9397_v1 = vpop.f32.mrf.mxu2  ;;  %9506 = vadd.xlane.f32.xlu2 %v9505_v31  ;;  %v16602_v55 = vsub.f32 %v16491_v11, %v9517_v5 }
 0x937   : > { %v9398_v60 = vadd.f32 %v16486_v20, %v9397_v1 }
 0x938   : > { %v9549_v32 = vmul.f32 %v16602_v55, %v16602_v55 }
 0x939   : > { %v9418_v45 = vmul.f32 %v9398_v60, %v8400_v10 }
 0x93a   : > { %v9565_v11 = vsel %vm17912_vm6, %v9549_v32, 0.0 }
 0x93b   : > { %v16599_v53 = vadd.f32 %v9418_v45, %v17910_v22  ;;  %v9474_v26 = vpop.xlane.xlu1 %9473 }
 0x93c   : > { %v9518_v41 = vmul.f32 %v9474_v26, %v14422_v8 }
 0x93d   : > { %v9508_v56 = vsel %vm17911_vm7, %v16599_v53, 0.0  ;;  %vm17925_vm7 = vmmov %vm17914_vm0 }
 0x93e   : > { %9509 = vadd.xlane.f32.xlu0 %v9508_v56  ;;  %v16612_v10 = vsub.f32 %v16497_v23, %v9518_v41  ;;  %v17917_v41 = vld [vmem:[#allocation6_spill] sm:$0xff] }
 0x940   : > { %v9550_v48 = vmul.f32 %v16612_v10, %v16612_v10 }
 0x942   : > { %v9568_v16 = vsel %vm17913_vm9, %v9550_v48, 0.0 }
 0x943   : > { %9569 = vadd.xlane.f32.xlu2 %v9568_v16 }
 0x945   : > { %v9477_v9 = vpop.xlane.xlu2 %9476 }
 0x946   : > { %9566 = vadd.xlane.f32.xlu0 %v9565_v11  ;;  %v9519_v39 = vmul.f32 %v9477_v9, %v14422_v8 }
 0x948   : > { %v16620_v6 = vsub.f32 %v16503_v36, %v9519_v39 }
 0x94a   : > { %v9551_v38 = vmul.f32 %v16620_v6, %v16620_v6 }
 0x94c   : > { %v9571_v21 = vsel %vm17914_vm0, %v9551_v38, 0.0 }
 0x94d   : > { %v9480_v23 = vpop.xlane.xlu0 %9479  ;;  %9572 = vadd.xlane.f32.xlu2 %v9571_v21 }
 0x94e   : > { %v9520_v17 = vmul.f32 %v9480_v23, %v14422_v8 }
 0x950   : > { %v16627_v25 = vsub.f32 %v16515_v63, %v9520_v17 }
 0x952   : > { %v9552_v15 = vmul.f32 %v16627_v25, %v16627_v25 }
 0x954   : > { %v9574_v31 = vsel %vm17915_vm11, %v9552_v15, 0.0 }
 0x955   : > { %9575 = vadd.xlane.f32.xlu0 %v9574_v31  ;;  %v9483_v45 = vpop.xlane.xlu2 %9482 }
 0x956   : > { %v9521_v56 = vmul.f32 %v9483_v45, %v14422_v8 }
 0x958   : > { %v16644_v48 = vsub.f32 %v16524_v61, %v9521_v56  ;;  %v16685_v56 = vadd.f32 %v16401_v18, %v16095_v50  ;;  %v16703_v18 = vadd.f32 %v16409_v35, %v16095_v50 }
 0x959   : > { %v9400_v36 = vpop.f32.mrf.mxu2 }
 0x95a   : > { %v9401_v1 = vadd.f32 %v16486_v20, %v9400_v36 }
 0x95c   : > { %v9419_v60 = vmul.f32 %v9401_v1, %v8402_v44  ;;  %v9553_v44 = vmul.f32 %v16644_v48, %v16644_v48 }
 0x95e   : > { %v16634_v3 = vadd.f32 %v9419_v60, %v15801_v13  ;;  %v9577_v11 = vsel %vm17919_vm1, %v9553_v44, 0.0 }
 0x960   : > { %v9511_v5 = vsel %vm17916_vm12, %v16634_v3, 0.0  ;;  %vm17926_vm12 = vmmov %vm17919_vm1 }
 0x961   : > { %v9402_v22 = vpop.f32.mrf.mxu2  ;;  %9512 = vadd.xlane.f32.xlu1 %v9511_v5 }
 0x962   : > { %v9403_v63 = vadd.f32 %v16486_v20, %v9402_v22  ;;  %v16651_v20 = vpop.permute.xlu1 %9449 }
 0x964   : > { %v9420_v26 = vmul.f32 %v9403_v63, %v8404_v52  ;;  %v16681_v63 = vpop.permute.xlu0 %9447 }
 0x966   : > { %v16641_v32 = vadd.f32 %v9420_v26, %v17917_v41  ;;  %v16691_v26 = vadd.f32 %v16424_v43, %v16095_v50  ;;  %v16699_v41 = vadd.f32 %v16446_v59, %v16095_v50  ;;  %v10681_v59 = vld [vmem:[%s16968_s18 + $0x18] sm:$0xff] }
 0x967   : > { %9941 = vmatpush.bf16.msrb.mxu0 %v10681_v59 }
 0x968   : > { %v9514_v13 = vsel %vm17918_vm4, %v16641_v32, 0.0 }
 0x969   : > { %9515 = vadd.xlane.f32.xlu1 %v9514_v13 }
 0x971   : > { %9578 = vadd.xlane.f32.xlu1 %v9577_v11 }
 0x97e   : > { %v9486_v9 = vpop.xlane.xlu1 %9485 }
 0x97f   : > { %v9522_v52 = vmul.f32 %v9486_v9, %v14422_v8 }
 0x981   : > { %v16655_v16 = vsub.f32 %v16543_v49, %v9522_v52 }
 0x983   : > { %v9554_v61 = vmul.f32 %v16655_v16, %v16655_v16 }
 0x985   : > { %v9580_v38 = vsel %vm17920_vm8, %v9554_v61, 0.0 }
 0x986   : > { %v9489_v21 = vpop.xlane.xlu1 %9488  ;;  %9581 = vadd.xlane.f32.xlu2 %v9580_v38  ;;  %v10680_v38 = vld [vmem:[%s16968_s18 + $0x10] sm:$0xff] }
 0x987   : > { %v9523_v17 = vmul.f32 %v9489_v21, %v14422_v8  ;;  %9942 = vmatpush.bf16.msrb.mxu0 %v10680_v38 }
 0x989   : > { %v9495_v39 = vpop.xlane.xlu2 %9494  ;;  %v16666_v31 = vsub.f32 %v16550_v29, %v9523_v17 }
 0x98a   : > { %v9525_v23 = vmul.f32 %v9495_v39, %v14422_v8 }
 0x98b   : > { %v9555_v36 = vmul.f32 %v16666_v31, %v16666_v31 }
 0x98c   : > { %v16663_v15 = vsub.f32 %v16553_v34, %v9525_v23 }
 0x98d   : > { %v9583_v60 = vsel %vm17922_vm5, %v9555_v36, 0.0 }
 0x98e   : > { %v9557_v49 = vmul.f32 %v16663_v15, %v16663_v15  ;;  %v9492_v5 = vpop.xlane.xlu1 %9491  ;;  %9584 = vadd.xlane.f32.xlu2 %v9583_v60 }
 0x98f   : > { %v9524_v45 = vmul.f32 %v9492_v5, %v14422_v8 }
 0x990   : > { %v9589_v1 = vsel %vm17921_vm2, %v9557_v49, 0.0  ;;  %v10679_v49 = vld [vmem:[%s16968_s18 + $0x8] sm:$0xff]  ;;  %vm17927_vm2 = vmmov %vm17919_vm1 }
 0x991   : > { %9590 = vadd.xlane.f32.xlu0 %v9589_v1  ;;  %v16676_v34 = vsub.f32 %v16561_v42, %v9524_v45  ;;  %9943 = vmatpush.bf16.msrb.mxu0 %v10679_v49 }
 0x993   : > { %v9556_v29 = vmul.f32 %v16676_v34, %v16676_v34 }
 0x995   : > { %v9586_v22 = vsel %vm17923_vm15, %v9556_v29, 0.0 }
 0x996   : > { %9587 = vadd.xlane.f32.xlu1 %v9586_v22  ;;  %v10678_v22 = vld [vmem:[%s16968_s18] sm:$0xff] }
 0x997   : > { %9944 = vmatpush.bf16.msrb.mxu0 %v10678_v22 }
 0x9a1   : > { %v16693_v42 = vpop.xlane.xlu0 %9503 }
 0x9a5   : > { %9451 = vrot.lane.b32.xlu0 %v16685_v56, %s17747_s26 }
 0x9a6   : > { %9455 = vrot.lane.b32.xlu2 %v16691_v26, %s17747_s26 }
 0x9a9   : > { %v9507_v13 = vpop.xlane.xlu2 %9506 }
 0x9aa   : > { %v9529_v22 = vmul.f32 %v9507_v13, %v14422_v8 }
 0x9ae   : > { %9457 = vrot.lane.b32.xlu2 %v16699_v41, %s17747_s26 }
 0x9af   : > { %9453 = vrot.lane.b32.xlu1 %v16703_v18, %s17747_s26 }
 0x9b1   : > { %v9510_v44 = vpop.xlane.xlu0 %9509 }
 0x9b2   : > { %v9530_v39 = vmul.f32 %v9510_v44, %v14422_v8 }
 0x9b4   : > { %v16723_v60 = vsub.f32 %v16599_v53, %v9530_v39 }
 0x9b6   : > { %v9570_v9 = vpop.xlane.xlu2 %9569  ;;  %17924 = vst [vmem:[#allocation14_spill] sm:$0xff] %v16723_v60 }
 0x9b7   : > { %v9614_v52 = vmul.f32 %v9570_v9, %v14422_v8  ;;  %v9562_v9 = vmul.f32 %v16723_v60, %v16723_v60 }
 0x9b9   : > { %v9567_v43 = vpop.xlane.xlu0 %9566  ;;  %v9630_v35 = vadd.f32 1e-06, %v9614_v52 }
 0x9ba   : > { %v9613_v11 = vmul.f32 %v9567_v43, %v14422_v8 }
 0x9bb   : > { %vm9661_vm6 = vweird.f32 %v9630_v35 }
 0x9bc   : > { %v9629_v61 = vadd.f32 1e-06, %v9613_v11  ;;  %v9498_v11 = vpop.xlane.xlu1 %9497 }
 0x9be   : > { %11046 = vrsqrt.f32 %v9629_v61  ;;  %vm9651_vm10 = vweird.f32 %v9629_v61 }
 0x9bf   : > { %11048 = vrsqrt.f32 %v9630_v35 }
 0x9c0   : > { %v9573_v23 = vpop.xlane.xlu2 %9572 }
 0x9c1   : > { %v9615_v17 = vmul.f32 %v9573_v23, %v14422_v8 }
 0x9c3   : > { %v9631_v5 = vadd.f32 1e-06, %v9615_v17 }
 0x9c4   : > { %v11047_v21 = vpop.eup %11046 }
 0x9c5   : > { %v9646_v36 = vmul.f32 %v11047_v21, %v9629_v61  ;;  %v11049_v1 = vpop.eup %11048  ;;  %11050 = vrsqrt.f32 %v9631_v5  ;;  %vm9652_vm13 = vweird.f32 %v11047_v21  ;;  %vm9671_vm11 = vweird.f32 %v9631_v5 }
 0x9c6   : > { %v9656_v45 = vmul.f32 %v11049_v1, %v9630_v35  ;;  %vm9662_vm14 = vweird.f32 %v11049_v1  ;;  %vm9653_vm3 = vmor %vm9651_vm10, %vm9652_vm13 }
 0x9c7   : > { %v9647_v29 = vmul.f32 %v11047_v21, %v9646_v36  ;;  %v9526_v36 = vmul.f32 %v9498_v11, %v14422_v8  ;;  %vm9663_vm9 = vmor %vm9661_vm6, %vm9662_vm14  ;;  %v9822_v11 = vadd.f32 1.0, %v16590_v33 }
 0x9c8   : > { %v9657_v44 = vmul.f32 %v11049_v1, %v9656_v45  ;;  %v9576_v59 = vpop.xlane.xlu0 %9575  ;;  %v9604_v45 = vsel %vm17925_vm7, %v9562_v9, 0.0  ;;  %vm17928_vm13 = vmmov %vm17919_vm1 }
 0x9c9   : > { %v9648_v43 = vmul.f32 0.5, %v9647_v29  ;;  %v9616_v53 = vmul.f32 %v9576_v59, %v14422_v8  ;;  %v16739_v35 = vsub.f32 %v16567_v14, %v9526_v36  ;;  %vm17929_vm10 = vmmov %vm17919_vm1 }
 0x9ca   : > { %v9658_v52 = vmul.f32 0.5, %v9657_v44  ;;  %vm17930_vm14 = vmmov %vm17919_vm1 }
 0x9cb   : > { %v9649_v38 = vsub.f32 1.5, %v9648_v43  ;;  %v9632_v17 = vadd.f32 1e-06, %v9616_v53  ;;  %v11051_v49 = vpop.eup %11050  ;;  %v9821_v43 = vadd.f32 1.0, %v16585_v2  ;;  %v9501_v53 = vpop.xlane.xlu1 %9500 }
 0x9cc   : > { %v9659_v39 = vsub.f32 1.5, %v9658_v52  ;;  %v9666_v44 = vmul.f32 %v11051_v49, %v9631_v5  ;;  %v9527_v33 = vmul.f32 %v9501_v53, %v14422_v8  ;;  %vm9672_vm0 = vweird.f32 %v11051_v49 }
 0x9cd   : > { %v9650_v23 = vmul.f32 %v11047_v21, %v9649_v38  ;;  %11052 = vrsqrt.f32 %v9632_v17  ;;  %vm9673_vm4 = vmor %vm9671_vm11, %vm9672_vm0  ;;  %v9528_v5 = vmul.f32 %v16693_v42, %v14422_v8  ;;  %vm9681_vm5 = vweird.f32 %v9632_v17 }
 0x9ce   : > { %v9660_v29 = vmul.f32 %v11049_v1, %v9659_v39  ;;  %v9667_v52 = vmul.f32 %v11051_v49, %v9666_v44 }
 0x9cf   : > { %v9654_v60 = vsel %vm9653_vm3, %v11047_v21, %v9650_v23  ;;  %9605 = vadd.xlane.f32.xlu0 %v9604_v45  ;;  %vm17931_vm3 = vmmov %vm17919_vm1 }
 0x9d0   : > { %v9805_v61 = vmul.f32 %v9654_v60, %v16602_v55  ;;  %v9664_v59 = vsel %vm9663_vm9, %v11049_v1, %v9660_v29  ;;  %v9668_v21 = vmul.f32 0.5, %v9667_v52  ;;  %v16743_v55 = vsub.f32 %v16588_v24, %v9529_v22 }
 0x9d1   : > { %v9806_v38 = vmul.f32 %v9664_v59, %v16612_v10  ;;  %v9558_v10 = vmul.f32 %v16739_v35, %v16739_v35  ;;  %v16753_v24 = vsub.f32 %v16573_v19, %v9527_v33 }
 0x9d2   : > { %v9837_v9 = vmul.f32 %v9821_v43, %v9805_v61  ;;  %v9669_v60 = vsub.f32 1.5, %v9668_v21  ;;  %v16772_v21 = vsub.f32 %v16576_v37, %v9528_v5 }
 0x9d3   : > { %v9838_v39 = vmul.f32 %v9822_v11, %v9806_v38  ;;  %v11053_v13 = vpop.eup %11052  ;;  %v9592_v29 = vsel %vm17919_vm1, %v9558_v10, 0.0  ;;  %v9559_v52 = vmul.f32 %v16753_v24, %v16753_v24  ;;  %v9823_v11 = vadd.f32 1.0, %v16582_v46 }
 0x9d4   : > { %v9853_v2 = vadd.f32 %v9837_v9, %v16185_v7  ;;  %v9676_v23 = vmul.f32 %v11053_v13, %v9632_v17  ;;  %v9670_v36 = vmul.f32 %v11051_v49, %v9669_v60  ;;  %v9561_v7 = vmul.f32 %v16743_v55, %v16743_v55  ;;  %v16756_v43 = vpop.xlane.xlu1 %9512 }
 0x9d5   : > { %v9854_v1 = vadd.f32 %v9838_v39, %v16249_v40  ;;  %vm9682_vm8 = vweird.f32 %v11053_v13  ;;  %v9824_v9 = vadd.f32 1.0, %v16595_v51  ;;  %v9560_v37 = vmul.f32 %v16772_v21, %v16772_v21 }
 0x9d6   : > { %v9677_v45 = vmul.f32 %v11053_v13, %v9676_v23  ;;  %v9674_v44 = vsel %vm9673_vm4, %v11051_v49, %v9670_v36  ;;  %v9601_v22 = vsel %vm17927_vm2, %v9561_v7, 0.0  ;;  %vm9683_vm15 = vmor %vm9681_vm5, %vm9682_vm8  ;;  %v16766_v49 = vadd.f32 %v16462_v54, %v16095_v50 }
 0x9d7   : > { %v9877_v14 = vpack.c.bf16 %v9854_v1, %v9853_v2  ;;  %9593 = vadd.xlane.f32.xlu2 %v9592_v29  ;;  %v9807_v59 = vmul.f32 %v9674_v44, %v16620_v6  ;;  %v9595_v6 = vsel %vm17928_vm13, %v9559_v52, 0.0  ;;  %v16787_v60 = vadd.f32 %v16471_v28, %v16095_v50 }
 0x9d8   : > { %v9678_v40 = vmul.f32 0.5, %v9677_v45  ;;  %v16799_v28 = vadd.f32 %v16474_v30, %v16095_v50  ;;  %v16810_v30 = vadd.f32 %v16467_v47, %v16095_v50 }
 0x9d9   : > { %10606 = vmatmul.msk.bf16.vlgmr.msrb.gmra.mxu0 %vm17926_vm12, %v9877_v14  ;;  %9602 = vadd.xlane.f32.xlu1 %v9601_v22  ;;  %v9839_v17 = vmul.f32 %v9823_v11, %v9807_v59 }
 0x9da   : > { %v9679_v61 = vsub.f32 1.5, %v9678_v40  ;;  %v16806_v40 = vadd.f32 %v16457_v58, %v16095_v50 }
 0x9db   : > { %v9855_v46 = vadd.f32 %v9839_v17, %v16100_v62  ;;  %v9598_v62 = vsel %vm17930_vm14, %v9560_v37, 0.0  ;;  %v9826_v37 = vadd.f32 1.0, %v16681_v63  ;;  %vm17933_vm14 = vmmov %vm17927_vm2 }
 0x9dc   : > { %v9680_v19 = vmul.f32 %v11053_v13, %v9679_v61  ;;  %v9516_v53 = vpop.xlane.xlu1 %9515 }
 0x9dd   : > { %v9532_v39 = vmul.f32 %v9516_v53, %v14422_v8 }
 0x9de   : > { %v9684_v38 = vsel %vm9683_vm15, %v11053_v13, %v9680_v19 }
 0x9df   : > { %v9808_v42 = vmul.f32 %v9684_v38, %v16627_v25  ;;  %9596 = vadd.xlane.f32.xlu2 %v9595_v6  ;;  %v16781_v25 = vsub.f32 %v16641_v32, %v9532_v39  ;;  %v9825_v39 = vadd.f32 1.0, %v16606_v12 }
 0x9e1   : > { %v9840_v54 = vmul.f32 %v9824_v9, %v9808_v42  ;;  %v9564_v13 = vmul.f32 %v16781_v25, %v16781_v25 }
 0x9e3   : > { %9461 = vrot.lane.b32.xlu0 %v16766_v49, %s17747_s26  ;;  %v9856_v51 = vadd.f32 %v9840_v54, %v16117_v0  ;;  %v9610_v0 = vsel %vm17931_vm3, %v9564_v13, 0.0  ;;  %vm9986_vm3 = vcmask 261120  }
 0x9e4   : > { %v9579_v32 = vpop.xlane.xlu1 %9578  ;;  %9611 = vadd.xlane.f32.xlu1 %v9610_v0 }
 0x9e5   : > { %v9878_v2 = vpack.c.bf16 %v9856_v51, %v9855_v46  ;;  %v9617_v1 = vmul.f32 %v9579_v32, %v14422_v8 }
 0x9e7   : > { %9599 = vadd.xlane.f32.xlu2 %v9598_v62  ;;  %v9633_v33 = vadd.f32 1e-06, %v9617_v1 }
 0x9e9   : > { %10607 = vmatmul.msk.bf16.gmra.mxu0 %vm17929_vm10, %v9878_v2  ;;  %11054 = vrsqrt.f32 %v9633_v33  ;;  %vm9691_vm6 = vweird.f32 %v9633_v33  ;;  %vm17932_vm10 = vmmov %vm17927_vm2 }
 0x9eb   : > { %9465 = vrot.lane.b32.xlu0 %v16787_v60, %s17747_s26 }
 0x9ef   : > { %v11055_v23 = vpop.eup %11054 }
 0x9f0   : > { %v9686_v10 = vmul.f32 %v11055_v23, %v9633_v33  ;;  %vm9692_vm7 = vweird.f32 %v11055_v23 }
 0x9f1   : > { %vm9693_vm9 = vmor %vm9691_vm6, %vm9692_vm7 }
 0x9f2   : > { %v9687_v14 = vmul.f32 %v11055_v23, %v9686_v10 }
 0x9f3   : > { %9467 = vrot.lane.b32.xlu0 %v16799_v28, %s17747_s26 }
 0x9f4   : > { %v9688_v29 = vmul.f32 0.5, %v9687_v14 }
 0x9f6   : > { %v9689_v44 = vsub.f32 1.5, %v9688_v29 }
 0x9f8   : > { %v9690_v58 = vmul.f32 %v11055_v23, %v9689_v44  ;;  %v9827_v44 = vadd.f32 1.0, %v16651_v20 }
 0x9f9   : > { %v9582_v36 = vpop.xlane.xlu2 %9581 }
 0x9fa   : > { %v9618_v45 = vmul.f32 %v9582_v36, %v14422_v8  ;;  %v9694_v47 = vsel %vm9693_vm9, %v11055_v23, %v9690_v58 }
 0x9fb   : > { %v9809_v6 = vmul.f32 %v9694_v47, %v16644_v48 }
 0x9fc   : > { %v9634_v7 = vadd.f32 1e-06, %v9618_v45  ;;  %v9531_v45 = vmul.f32 %v16756_v43, %v14422_v8 }
 0x9fd   : > { %9463 = vrot.lane.b32.xlu1 %v16810_v30, %s17747_s26  ;;  %v9841_v13 = vmul.f32 %v9825_v39, %v9809_v6 }
 0x9fe   : > { %11056 = vrsqrt.f32 %v9634_v7  ;;  %vm9701_vm11 = vweird.f32 %v9634_v7 }
 0x9ff   : > { %9459 = vrot.lane.b32.xlu2 %v16806_v40, %s17747_s26  ;;  %v9857_v33 = vadd.f32 %v9841_v13, %v16265_v27 }
 0xa01   : > { %v9585_v61 = vpop.xlane.xlu2 %9584 }
 0xa02   : > { %v9619_v22 = vmul.f32 %v9585_v61, %v14422_v8 }
 0xa04   : > { %v11057_v5 = vpop.eup %11056  ;;  %v9635_v59 = vadd.f32 1e-06, %v9619_v22  ;;  %v9591_v1 = vpop.xlane.xlu0 %9590  ;;  %v16830_v22 = vsub.f32 %v16634_v3, %v9531_v45 }
 0xa05   : > { %v9696_v19 = vmul.f32 %v11057_v5, %v9634_v7  ;;  %vm9702_vm0 = vweird.f32 %v11057_v5  ;;  %v9621_v3 = vmul.f32 %v9591_v1, %v14422_v8 }
 0xa06   : > { %11058 = vrsqrt.f32 %v9635_v59  ;;  %vm9703_vm12 = vmor %vm9701_vm11, %vm9702_vm0  ;;  %vm9711_vm1 = vweird.f32 %v9635_v59  ;;  %v9563_v43 = vmul.f32 %v16830_v22, %v16830_v22 }
 0xa07   : > { %v9697_v50 = vmul.f32 %v11057_v5, %v9696_v19 }
 0xa08   : > { %v9607_v20 = vsel %vm17932_vm10, %v9563_v43, 0.0 }
 0xa09   : > { %v9698_v52 = vmul.f32 0.5, %v9697_v50  ;;  %v9588_v11 = vpop.xlane.xlu1 %9587 }
 0xa0a   : > { %v9620_v38 = vmul.f32 %v9588_v11, %v14422_v8 }
 0xa0b   : > { %v9699_v9 = vsub.f32 1.5, %v9698_v52  ;;  %v9456_v52 = vpop.permute.xlu2 %9455 }
 0xa0c   : > { %v11059_v42 = vpop.eup %11058  ;;  %v9636_v17 = vadd.f32 1e-06, %v9620_v38 }
 0xa0d   : > { %v9700_v53 = vmul.f32 %v11057_v5, %v9699_v9  ;;  %v9706_v54 = vmul.f32 %v11059_v42, %v9635_v59  ;;  %vm9712_vm4 = vweird.f32 %v11059_v42 }
 0xa0e   : > { %11060 = vrsqrt.f32 %v9636_v17  ;;  %vm9713_vm8 = vmor %vm9711_vm1, %vm9712_vm4  ;;  %vm9721_vm15 = vweird.f32 %v9636_v17 }
 0xa0f   : > { %v9704_v46 = vsel %vm9703_vm12, %v11057_v5, %v9700_v53  ;;  %v9707_v51 = vmul.f32 %v11059_v42, %v9706_v54  ;;  %v16846_v54 = vld [vmem:[%s16969_s19] ss:$0 sm:$0xff] }
 0xa10   : > { %v9810_v2 = vmul.f32 %v9704_v46, %v16655_v16 }
 0xa11   : > { %v9708_v62 = vmul.f32 0.5, %v9707_v51 }
 0xa12   : > { %v9842_v0 = vmul.f32 %v9826_v37, %v9810_v2 }
 0xa13   : > { %v9709_v32 = vsub.f32 1.5, %v9708_v62  ;;  %v16840_v11 = vpop.permute.xlu2 %9457 }
 0xa14   : > { %v11061_v48 = vpop.eup %11060  ;;  %v9858_v23 = vadd.f32 %v9842_v0, %v16536_v57 }
 0xa15   : > { %v9710_v10 = vmul.f32 %v11059_v42, %v9709_v32  ;;  %v9716_v12 = vmul.f32 %v11061_v48, %v9636_v17  ;;  %vm9722_vm5 = vweird.f32 %v11061_v48 }
 0xa16   : > { %v9879_v14 = vpack.c.bf16 %v9858_v23, %v9857_v33  ;;  %vm9723_vm13 = vmor %vm9721_vm15, %vm9722_vm5 }
 0xa17   : > { %v9717_v36 = vmul.f32 %v11061_v48, %v9716_v12  ;;  %v9714_v16 = vsel %vm9713_vm8, %v11059_v42, %v9710_v10  ;;  %v9452_v29 = vpop.permute.xlu0 %9451 }
 0xa18   : > { %10608 = vmatmul.msk.bf16.gmra.mxu0 %vm17927_vm2, %v9879_v14  ;;  %v9811_v27 = vmul.f32 %v9714_v16, %v16666_v31  ;;  %v9828_v61 = vadd.f32 1.0, %v9452_v29 }
 0xa19   : > { %v9718_v63 = vmul.f32 0.5, %v9717_v36 }
 0xa1a   : > { %v9843_v58 = vmul.f32 %v9827_v44, %v9811_v27 }
 0xa1b   : > { %v9719_v7 = vsub.f32 1.5, %v9718_v63 }
 0xa1c   : > { %v9859_v50 = vadd.f32 %v9843_v58, %v16530_v4 }
 0xa1d   : > { %v9720_v57 = vmul.f32 %v11061_v48, %v9719_v7 }
 0xa1f   : > { %v9724_v5 = vsel %vm9723_vm13, %v11061_v48, %v9720_v57 }
 0xa20   : > { %v9812_v59 = vmul.f32 %v9724_v5, %v16676_v34  ;;  %v9637_v34 = vadd.f32 1e-06, %v9621_v3 }
 0xa21   : > { %v9454_v42 = vpop.permute.xlu1 %9453 }
 0xa22   : > { %v9844_v19 = vmul.f32 %v9828_v61, %v9812_v59  ;;  %11062 = vrsqrt.f32 %v9637_v34  ;;  %vm9731_vm6 = vweird.f32 %v9637_v34  ;;  %v9829_v58 = vadd.f32 1.0, %v9454_v42 }
 0xa24   : > { %v9860_v31 = vadd.f32 %v9844_v19, %v16685_v56 }
 0xa26   : > { %v9880_v47 = vpack.c.bf16 %v9860_v31, %v9859_v50  ;;  %v9830_v50 = vadd.f32 1.0, %v9456_v52 }
 0xa28   : > { %9608 = vadd.xlane.f32.xlu2 %v9607_v20  ;;  %10609 = vmatmul.msk.bf16.gmra.mxu0 %vm17933_vm14, %v9880_v47  ;;  %v11063_v38 = vpop.eup %11062 }
 0xa29   : > { %v9726_v9 = vmul.f32 %v11063_v38, %v9637_v34  ;;  %vm9732_vm7 = vweird.f32 %v11063_v38 }
 0xa2a   : > { %vm9733_vm9 = vmor %vm9731_vm6, %vm9732_vm7 }
 0xa2b   : > { %v9727_v4 = vmul.f32 %v11063_v38, %v9726_v9 }
 0xa2d   : > { %v9728_v53 = vmul.f32 0.5, %v9727_v4 }
 0xa2f   : > { %v9729_v51 = vsub.f32 1.5, %v9728_v53 }
 0xa31   : > { %v9730_v33 = vmul.f32 %v11063_v38, %v9729_v51 }
 0xa33   : > { %v9734_v36 = vsel %vm9733_vm9, %v11063_v38, %v9730_v33 }
 0xa34   : > { %v9813_v44 = vmul.f32 %v9734_v36, %v16663_v15 }
 0xa36   : > { %v9845_v31 = vmul.f32 %v9829_v58, %v9813_v44 }
 0xa38   : > { %v9861_v42 = vadd.f32 %v9845_v31, %v16703_v18 }
 0xa42   : > { %v9606_v39 = vpop.xlane.xlu0 %9605 }
 0xa43   : > { %v9626_v0 = vmul.f32 %v9606_v39, %v14422_v8 }
 0xa45   : > { %v16861_v12 = vadd.f32 1e-06, %v9626_v0 }
 0xa47   : > { %vm9781_vm7 = vweird.f32 %v16861_v12 }
 0xa4a   : > { %v9594_v6 = vpop.xlane.xlu2 %9593 }
 0xa4b   : > { %v9622_v56 = vmul.f32 %v9594_v6, %v14422_v8 }
 0xa4c   : > { %v9603_v46 = vpop.xlane.xlu1 %9602 }
 0xa4d   : > { %v9638_v17 = vadd.f32 1e-06, %v9622_v56  ;;  %v9625_v1 = vmul.f32 %v9603_v46, %v14422_v8 }
 0xa4f   : > { %11064 = vrsqrt.f32 %v9638_v17  ;;  %v16863_v14 = vadd.f32 1e-06, %v9625_v1  ;;  %vm9741_vm11 = vweird.f32 %v9638_v17 }
 0xa51   : > { %vm9771_vm9 = vweird.f32 %v16863_v14 }
 0xa52   : > { %v9597_v37 = vpop.xlane.xlu2 %9596 }
 0xa53   : > { %v9623_v13 = vmul.f32 %v9597_v37, %v14422_v8 }
 0xa55   : > { %v11065_v32 = vpop.eup %11064  ;;  %v9639_v48 = vadd.f32 1e-06, %v9623_v13  ;;  %v9462_v58 = vpop.permute.xlu0 %9461 }
 0xa56   : > { %v9946_v2 = vpop.f32.mrf.mxu0  ;;  %v9736_v23 = vmul.f32 %v11065_v32, %v9638_v17  ;;  %vm9742_vm0 = vweird.f32 %v11065_v32 }
 0xa57   : > { %v9947_v62 = vadd.f32 %v16846_v54, %v9946_v2  ;;  %11066 = vrsqrt.f32 %v9639_v48  ;;  %vm9743_vm12 = vmor %vm9741_vm11, %vm9742_vm0  ;;  %vm9751_vm1 = vweird.f32 %v9639_v48 }
 0xa58   : > { %v9737_v10 = vmul.f32 %v11065_v32, %v9736_v23  ;;  %11068 = vrsqrt.f32 %v16861_v12  ;;  %v9831_v23 = vadd.f32 1.0, %v16840_v11  ;;  %vm17935_vm11 = vmmov %vm17927_vm2 }
 0xa59   : > { %9987 = vst.msk [vmem:[%s16853_s22] sm:$0xff] %vm9986_vm3, %v9947_v62  ;;  %11070 = vrsqrt.f32 %v16863_v14 }
 0xa5a   : > { %v9738_v16 = vmul.f32 0.5, %v9737_v10  ;;  %v9600_v63 = vpop.xlane.xlu2 %9599  ;;  %v9612_v10 = vpop.xlane.xlu1 %9611 }
 0xa5b   : > { %v9624_v45 = vmul.f32 %v9600_v63, %v14422_v8 }
 0xa5c   : > { %v9739_v29 = vsub.f32 1.5, %v9738_v16 }
 0xa5d   : > { %v11067_v57 = vpop.eup %11066  ;;  %v9640_v61 = vadd.f32 1e-06, %v9624_v45 }
 0xa5e   : > { %v9948_v7 = vpop.f32.mrf.mxu0  ;;  %v9740_v5 = vmul.f32 %v11065_v32, %v9739_v29  ;;  %v9746_v59 = vmul.f32 %v11067_v57, %v9639_v48  ;;  %v16873_v20 = vpop.eup %11068  ;;  %vm9752_vm4 = vweird.f32 %v11067_v57 }
 0xa5f   : > { %v9949_v27 = vadd.f32 %v16846_v54, %v9948_v7  ;;  %11072 = vrsqrt.f32 %v9640_v61  ;;  %v11071_v3 = vpop.eup %11070  ;;  %v9776_v56 = vmul.f32 %v16873_v20, %v16861_v12  ;;  %vm9753_vm8 = vmor %vm9751_vm1, %vm9752_vm4  ;;  %vm9761_vm15 = vweird.f32 %v9640_v61 }
 0xa60   : > { %v9744_v19 = vsel %vm9743_vm12, %v11065_v32, %v9740_v5  ;;  %v9747_v43 = vmul.f32 %v11067_v57, %v9746_v59  ;;  %vm9782_vm10 = vweird.f32 %v16873_v20  ;;  %vm9772_vm14 = vweird.f32 %v11071_v3  ;;  %vm17937_vm12 = vmmov %vm17927_vm2 }
 0xa61   : > { %9988 = vst.msk [vmem:[%s16853_s22 + $0x8] sm:$0xff] %vm9986_vm3, %v9949_v27  ;;  %v9814_v47 = vmul.f32 %v9744_v19, %v16739_v35  ;;  %v9766_v35 = vmul.f32 %v11071_v3, %v16863_v14  ;;  %v9777_v18 = vmul.f32 %v16873_v20, %v9776_v56  ;;  %vm9783_vm6 = vmor %vm9781_vm7, %vm9782_vm10  ;;  %v17936_v19 = vld [vmem:[#allocation14_spill] sm:$0xff] }
 0xa62   : > { %v9748_v15 = vmul.f32 0.5, %v9747_v43  ;;  %v9460_v33 = vpop.permute.xlu2 %9459  ;;  %vm9773_vm0 = vmor %vm9771_vm9, %vm9772_vm14 }
 0xa63   : > { %v9846_v34 = vmul.f32 %v9830_v50, %v9814_v47  ;;  %v9767_v51 = vmul.f32 %v11071_v3, %v9766_v35  ;;  %v9778_v32 = vmul.f32 0.5, %v9777_v18  ;;  %v9832_v45 = vadd.f32 1.0, %v9460_v33 }
 0xa64   : > { %v9749_v9 = vsub.f32 1.5, %v9748_v15  ;;  %v9833_v50 = vadd.f32 1.0, %v9462_v58  ;;  %v9628_v15 = vmul.f32 %v9612_v10, %v14422_v8 }
 0xa65   : > { %v11073_v6 = vpop.eup %11072  ;;  %v9862_v52 = vadd.f32 %v9846_v34, %v16691_v26  ;;  %v9768_v1 = vmul.f32 0.5, %v9767_v51  ;;  %v9779_v7 = vsub.f32 1.5, %v9778_v32 }
 0xa66   : > { %v9951_v38 = vpop.f32.mrf.mxu0  ;;  %v9750_v17 = vmul.f32 %v11067_v57, %v9749_v9  ;;  %v9756_v53 = vmul.f32 %v11073_v6, %v9640_v61  ;;  %vm9762_vm5 = vweird.f32 %v11073_v6 }
 0xa67   : > { %v9952_v4 = vadd.f32 %v16846_v54, %v9951_v38  ;;  %v9881_v39 = vpack.c.bf16 %v9862_v52, %v9861_v42  ;;  %vm9763_vm13 = vmor %vm9761_vm15, %vm9762_vm5  ;;  %v9769_v29 = vsub.f32 1.5, %v9768_v1  ;;  %v9780_v11 = vmul.f32 %v16873_v20, %v9779_v7 }
 0xa68   : > { %v9757_v46 = vmul.f32 %v11073_v6, %v9756_v53  ;;  %v9754_v37 = vsel %vm9753_vm8, %v11067_v57, %v9750_v17  ;;  %v9466_v17 = vpop.permute.xlu0 %9465 }
 0xa69   : > { %9989 = vst.msk [vmem:[%s16853_s22 + $0x10] sm:$0xff] %vm9986_vm3, %v9952_v4  ;;  %10610 = vmatmul.msk.bf16.gmra.mxu0 %vm17927_vm2, %v9881_v39  ;;  %v9815_v0 = vmul.f32 %v9754_v37, %v16753_v24  ;;  %v9770_v44 = vmul.f32 %v11071_v3, %v9769_v29  ;;  %v9784_v59 = vsel %vm9783_vm6, %v16873_v20, %v9780_v11  ;;  %v9644_v20 = vadd.f32 1e-06, %v9628_v15 }
 0xa6a   : > { %v9758_v2 = vmul.f32 0.5, %v9757_v46  ;;  %v9818_v43 = vmul.f32 %v9784_v59, %v17936_v19 }
 0xa6b   : > { %v9847_v63 = vmul.f32 %v9831_v23, %v9815_v0  ;;  %v9774_v5 = vsel %vm9773_vm0, %v11071_v3, %v9770_v44  ;;  %11074 = vrsqrt.f32 %v9644_v20  ;;  %vm9801_vm1 = vweird.f32 %v9644_v20 }
 0xa6c   : > { %v9759_v13 = vsub.f32 1.5, %v9758_v2  ;;  %v9835_v23 = vadd.f32 1.0, %v9466_v17 }
 0xa6d   : > { %v9863_v24 = vadd.f32 %v9847_v63, %v16699_v41 }
 0xa6e   : > { %v9953_v26 = vpop.f32.mrf.mxu0  ;;  %v9760_v48 = vmul.f32 %v11073_v6, %v9759_v13 }
 0xa6f   : > { %v9954_v62 = vadd.f32 %v16846_v54, %v9953_v26 }
 0xa70   : > { %v9764_v36 = vsel %vm9763_vm13, %v11073_v6, %v9760_v48  ;;  %v9468_v26 = vpop.permute.xlu0 %9467  ;;  %vm17938_vm13 = vmmov %vm17935_vm11 }
 0xa71   : > { %9990 = vst.msk [vmem:[%s16853_s22 + $0x18] sm:$0xff] %vm9986_vm3, %v9954_v62  ;;  %v9816_v16 = vmul.f32 %v9764_v36, %v16772_v21  ;;  %v9464_v21 = vpop.permute.xlu1 %9463  ;;  %v11075_v3 = vpop.eup %11074  ;;  %v9836_v48 = vadd.f32 1.0, %v9468_v26 }
 0xa72   : > { %v9834_v41 = vadd.f32 1.0, %v9464_v21  ;;  %v9796_v9 = vmul.f32 %v11075_v3, %v9644_v20  ;;  %vm9802_vm4 = vweird.f32 %v11075_v3 }
 0xa73   : > { %v9848_v27 = vmul.f32 %v9832_v45, %v9816_v16  ;;  %vm9803_vm8 = vmor %vm9801_vm1, %vm9802_vm4 }
 0xa74   : > { %v9850_v12 = vmul.f32 %v9834_v41, %v9818_v43  ;;  %v9797_v4 = vmul.f32 %v11075_v3, %v9796_v9 }
 0xa75   : > { %v9864_v57 = vadd.f32 %v9848_v27, %v16806_v40  ;;  %v9817_v40 = vmul.f32 %v9774_v5, %v16743_v55 }
 0xa76   : > { %v9866_v47 = vadd.f32 %v9850_v12, %v16810_v30  ;;  %v9798_v52 = vmul.f32 0.5, %v9797_v4 }
 0xa77   : > { %v9882_v61 = vpack.c.bf16 %v9864_v57, %v9863_v24  ;;  %v9849_v31 = vmul.f32 %v9833_v50, %v9817_v40 }
 0xa78   : > { %v9799_v35 = vsub.f32 1.5, %v9798_v52 }
 0xa79   : > { %10611 = vmatmul.msk.bf16.gmra.mxu0 %vm17935_vm11, %v9882_v61  ;;  %v9865_v14 = vadd.f32 %v9849_v31, %v16766_v49 }
 0xa7a   : > { %v9800_v18 = vmul.f32 %v11075_v3, %v9799_v35 }
 0xa7b   : > { %v9883_v34 = vpack.c.bf16 %v9866_v47, %v9865_v14 }
 0xa7c   : > { %v9804_v37 = vsel %vm9803_vm8, %v11075_v3, %v9800_v18 }
 0xa7d   : > { %v9820_v0 = vmul.f32 %v9804_v37, %v16781_v25 }
 0xa7f   : > { %v9852_v10 = vmul.f32 %v9836_v48, %v9820_v0 }
 0xa81   : > { %v9868_v25 = vadd.f32 %v9852_v10, %v16799_v28 }
 0xa89   : > { %10612 = vmatmul.msk.bf16.gmra.mxu0 %vm17937_vm12, %v9883_v34 }
 0xa95   : > { %v9956_v55 = vpop.f32.mrf.mxu0 }
 0xa96   : > { %v9957_v38 = vadd.f32 %v16846_v54, %v9956_v55 }
 0xa98   : > { %9991 = vst.msk [vmem:[%s16853_s22 + $0x20] sm:$0xff] %vm9986_vm3, %v9957_v38 }
 0xa9b   : > { %v9609_v6 = vpop.xlane.xlu2 %9608 }
 0xa9c   : > { %v9627_v49 = vmul.f32 %v9609_v6, %v14422_v8 }
 0xa9d   : > { %v9958_v30 = vpop.f32.mrf.mxu0 }
 0xa9e   : > { %v9643_v42 = vadd.f32 1e-06, %v9627_v49  ;;  %v9959_v56 = vadd.f32 %v16846_v54, %v9958_v30 }
 0xaa0   : > { %11076 = vrsqrt.f32 %v9643_v42  ;;  %9992 = vst.msk [vmem:[%s16853_s22 + $0x28] sm:$0xff] %vm9986_vm3, %v9959_v56  ;;  %vm9791_vm5 = vweird.f32 %v9643_v42 }
 0xaa5   : > { %v9961_v53 = vpop.f32.mrf.mxu0 }
 0xaa6   : > { %v11077_v39 = vpop.eup %11076  ;;  %v9962_v46 = vadd.f32 %v16846_v54, %v9961_v53 }
 0xaa7   : > { %v9786_v51 = vmul.f32 %v11077_v39, %v9643_v42  ;;  %vm9792_vm2 = vweird.f32 %v11077_v39 }
 0xaa8   : > { %9993 = vst.msk [vmem:[%s16853_s22 + $0x30] sm:$0xff] %vm9986_vm3, %v9962_v46  ;;  %vm9793_vm15 = vmor %vm9791_vm5, %vm9792_vm2 }
 0xaa9   : > { %v9787_v8 = vmul.f32 %v11077_v39, %v9786_v51 }
 0xaab   : > { %v9788_v2 = vmul.f32 0.5, %v9787_v8 }
 0xaad   : > { %v9789_v13 = vsub.f32 1.5, %v9788_v2  ;;  %v9963_v62 = vpop.f32.mrf.mxu0 }
 0xaae   : > { %v9964_v32 = vadd.f32 %v16846_v54, %v9963_v62 }
 0xaaf   : > { %v9790_v1 = vmul.f32 %v11077_v39, %v9789_v13 }
 0xab0   : > { %9994 = vst.msk [vmem:[%s16853_s22 + $0x38] sm:$0xff] %vm9986_vm3, %v9964_v32 }
 0xab1   : > { %v9794_v33 = vsel %vm9793_vm15, %v11077_v39, %v9790_v1 }
 0xab2   : > { %v9819_v36 = vmul.f32 %v9794_v33, %v16830_v22 }
 0xab4   : > { %v9851_v16 = vmul.f32 %v9835_v23, %v9819_v36 }
 0xab6   : > { %v9867_v63 = vadd.f32 %v9851_v16, %v16787_v60 }
 0xab8   : > { %v9884_v45 = vpack.c.bf16 %v9868_v25, %v9867_v63 }
 0xaba   : > { %10613 = vmatmul.msk.bf16.gmra.mxu0 %vm17938_vm13, %v9884_v45 }
 0xae6   : > { %v9966_v7 = vpop.f32.mrf.mxu0 }
 0xae7   : > { %v9967_v29 = vadd.f32 %v16846_v54, %v9966_v7 }
 0xae9   : > { %9995 = vst.msk [vmem:[%s16853_s22 + $0x40] sm:$0xff] %vm9986_vm3, %v9967_v29 }
 0xaee   : > { %v9968_v27 = vpop.f32.mrf.mxu0 }
 0xaef   : > { %v9969_v24 = vadd.f32 %v16846_v54, %v9968_v27 }
 0xaf1   : > { %9996 = vst.msk [vmem:[%s16853_s22 + $0x48] sm:$0xff] %vm9986_vm3, %v9969_v24 }
 0xaf6   : > { %v9971_v22 = vpop.f32.mrf.mxu0 }
 0xaf7   : > { %v9972_v28 = vadd.f32 %v16846_v54, %v9971_v22 }
 0xaf9   : > { %9997 = vst.msk [vmem:[%s16853_s22 + $0x50] sm:$0xff] %vm9986_vm3, %v9972_v28 }
 0xafe   : > { %v9973_v60 = vpop.f32.mrf.mxu0 }
 0xaff   : > { %v9974_v57 = vadd.f32 %v16846_v54, %v9973_v60 }
 0xb01   : > { %9998 = vst.msk [vmem:[%s16853_s22 + $0x58] sm:$0xff] %vm9986_vm3, %v9974_v57 }
 0xb06   : > { %v9976_v44 = vpop.f32.mrf.mxu0 }
 0xb07   : > { %v9977_v11 = vadd.f32 %v16846_v54, %v9976_v44 }
 0xb09   : > { %9999 = vst.msk [vmem:[%s16853_s22 + $0x60] sm:$0xff] %vm9986_vm3, %v9977_v11 }
 0xb0e   : > { %v9978_v61 = vpop.f32.mrf.mxu0 }
 0xb0f   : > { %v9979_v21 = vadd.f32 %v16846_v54, %v9978_v61 }
 0xb11   : > { %10000 = vst.msk [vmem:[%s16853_s22 + $0x68] sm:$0xff] %vm9986_vm3, %v9979_v21 }
 0xb37   : > { %v9981_v5 = vpop.f32.mrf.mxu0 }
 0xb38   : > { %v9982_v59 = vadd.f32 %v16846_v54, %v9981_v5 }
 0xb3a   : > { %10001 = vst.msk [vmem:[%s16853_s22 + $0x70] sm:$0xff] %vm9986_vm3, %v9982_v59 }
 0xb3f   : > { %v9983_v41 = vpop.f32.mrf.mxu0 }
 0xb40   : > { %v9984_v58 = vadd.f32 %v16846_v54, %v9983_v41 }
 0xb42   : > { %10002 = vst.msk [vmem:[%s16853_s22 + $0x78] sm:$0xff] %vm9986_vm3, %v9984_v58 }
 0xb43 PF: > { %s30_s1 = sadd.s32 1, %s11088_s1  }
 0xb44   : > { %p27_p4 = scmp.ge.s32.totalorder %s30_s1, 6  }
 0xb46   :  { %29 = sbr.rel (!%p27_p4) target bundleno = 6 (0x6), region = 139 }

</bundles_post_ra>
